<compile_context>
chip_gen: v5e
topology: v5e:2x2
jax: 0.10.0
libtpu: 0.0.40
codegen_flags: <defaults>
</compile_context>

<pallas_src>
import math
import functools

import jax
import jax.numpy as jnp
from jax.experimental import pallas as pl
from jax.experimental.pallas import tpu as pltpu  # noqa: F401  (TPU backend assumed)

# ------------------------- configuration (small shapes) -------------------------
IMAGE_SIZE = 16
PATCH_SIZE = 4
NUM_LAYERS = 2
NUM_HEADS = 4
EMBED_DIM = 32
FORWARD_DIM = 64
NUM_CLASSES = 10
REPR_SIZE = 24          # representation_size (pre_logits + tanh branch of the head)
LN_EPS = 1e-5

NUM_PATCHES = (IMAGE_SIZE // PATCH_SIZE) ** 2    # 16
SEQ_LEN = NUM_PATCHES + 1                        # 17 (+1 class token)
SEQ_PAD = 24                                     # next multiple of 8 -> exact sublane tiles
HEAD_DIM = EMBED_DIM // NUM_HEADS                # 8
PATCH_K = 3 * PATCH_SIZE * PATCH_SIZE            # 48
NEG_INF = -1e9


# ------------------------------ fused Pallas kernel ----------------------------------
def _vit_fused_kernel(patches_ref, add_ref, kbias_ref, convw_ref,
                      ln1w_ref, ln1b_ref, wq_ref, bq_ref, wk_ref, bk_ref,
                      wv_ref, bv_ref, wo_ref, bo_ref, ln2w_ref, ln2b_ref,
                      w1_ref, b1_ref, w2_ref, b2_ref,
                      lnf_w_ref, lnf_b_ref, pre_w_ref, pre_b_ref,
                      head_w_ref, head_b_ref,
                      feats_ref, logits_ref, *, batch):
    def layernorm(a, w, b):
        mu = jnp.mean(a, axis=-1, keepdims=True)
        var = jnp.mean(jnp.square(a - mu), axis=-1, keepdims=True)
        return (a - mu) * jax.lax.rsqrt(var + LN_EPS) * w + b

    # Patch embedding (conv_proj rewritten as im2row matmul).  Cls token, positional embedding
    # and the conv bias were pre-folded into add_ref on the host; pad rows stay exactly zero.
    x = jnp.dot(patches_ref[...], convw_ref[...],
                preferred_element_type=jnp.float32) + add_ref[...]      # (batch*SEQ_PAD, D)
    kbias = kbias_ref[...]                                              # (1, SEQ_PAD) key mask

    for l in range(NUM_LAYERS):                                         # static unroll
        # ---- pre-LN + multi-head self-attention (per-head weights; no lane slicing/concat) ----
        xn = layernorm(x, ln1w_ref[l], ln1b_ref[l])
        acc = [None] * batch
        for h in range(NUM_HEADS):                                      # static unroll
            q = jnp.dot(xn, wq_ref[l, h], preferred_element_type=jnp.float32) + bq_ref[l, h]
            k = jnp.dot(xn, wk_ref[l, h], preferred_element_type=jnp.float32) + bk_ref[l, h]
            v = jnp.dot(xn, wv_ref[l, h], preferred_element_type=jnp.float32) + bv_ref[l, h]
            for b in range(batch):                                      # static unroll (tiny N)
                sl = slice(b * SEQ_PAD, (b + 1) * SEQ_PAD)              # sublane-aligned slice
                s = jax.lax.dot_general(q[sl], k[sl], (((1,), (1,)), ((), ())),
                                        preferred_element_type=jnp.float32) + kbias
                s = s - jnp.max(s, axis=-1, keepdims=True)
                p = jnp.exp(s)
                p = p * pl.reciprocal(jnp.sum(p, axis=-1, keepdims=True), approx=True)
                o = jnp.dot(p, v[sl], preferred_element_type=jnp.float32)      # (SEQ_PAD, dh)
                c = jnp.dot(o, wo_ref[l, h], preferred_element_type=jnp.float32)  # (SEQ_PAD, D)
                acc[b] = c if acc[b] is None else acc[b] + c
        x = x + jnp.concatenate(acc, axis=0) + bo_ref[l]                # residual 1

        # ---- pre-LN + GELU MLP ----
        yn = layernorm(x, ln2w_ref[l], ln2b_ref[l])
        h1 = jnp.dot(yn, w1_ref[l], preferred_element_type=jnp.float32) + b1_ref[l]
        h1 = 0.5 * h1 * (1.0 + jax.lax.erf(h1 * (1.0 / math.sqrt(2.0))))  # exact GELU
        x = x + jnp.dot(h1, w2_ref[l], preferred_element_type=jnp.float32) + b2_ref[l]

    feats_ref[...] = x                                                  # (batch*SEQ_PAD, D)

    # ---- heads: final LayerNorm on the class tokens only, pre_logits + Tanh, head ----
    cls = jnp.concatenate([x[b * SEQ_PAD:b * SEQ_PAD + 1] for b in range(batch)], axis=0)
    cn = layernorm(cls, lnf_w_ref[...], lnf_b_ref[...])
    pre = jnp.tanh(jnp.dot(cn, pre_w_ref[...], preferred_element_type=jnp.float32) + pre_b_ref[...])
    logits_ref[...] = (jnp.dot(pre, head_w_ref[...], preferred_element_type=jnp.float32)
                       + head_b_ref[...])


# ------------------------------- model wrapper -----------------------------------
def _patchify(x_nchw):
    n = x_nchw.shape[0]
    p = PATCH_SIZE
    nh = IMAGE_SIZE // p
    # (N, C, nh, P, nw, P) -> (N, nh, nw, C, P, P) -> (N, num_patches, C*P*P)
    return (x_nchw.reshape(n, 3, nh, p, nh, p)
                  .transpose(0, 2, 4, 1, 3, 5)
                  .reshape(n, nh * nh, 3 * p * p))


def prepare_kernel_params(params):
    """One-time host-side repack of torch-style params into the fused-kernel layout."""
    d, hd, nh = EMBED_DIM, HEAD_DIM, NUM_HEADS
    scale = 1.0 / math.sqrt(hd)

    def per_head_in_out(w_rows):           # (D_out, D_in) -> (H, D_in, dh)
        return w_rows.reshape(nh, hd, d).transpose(0, 2, 1)

    keys = ["ln1w", "ln1b", "wq", "bq", "wk", "bk", "wv", "bv",
            "wo", "bo", "ln2w", "ln2b", "w1", "b1", "w2", "b2"]
    stacks = {k: [] for k in keys}
    for (ln1w, ln1b, wqkv, bqkv, wo, bo, ln2w, ln2b, w1, b1, w2, b2) in params["layers"]:
        stacks["ln1w"].append(ln1w)
        stacks["ln1b"].append(ln1b)
        stacks["wq"].append(per_head_in_out(wqkv[:d]) * scale)          # 1/sqrt(dh) folded in
        stacks["bq"].append(bqkv[0, :d].reshape(nh, 1, hd) * scale)
        stacks["wk"].append(per_head_in_out(wqkv[d:2 * d]))
        stacks["bk"].append(bqkv[0, d:2 * d].reshape(nh, 1, hd))
        stacks["wv"].append(per_head_in_out(wqkv[2 * d:]))
        stacks["bv"].append(bqkv[0, 2 * d:].reshape(nh, 1, hd))
        stacks["wo"].append(wo.T.reshape(nh, hd, d))                    # per-head out projection
        stacks["bo"].append(bo)
        stacks["ln2w"].append(ln2w)
        stacks["ln2b"].append(ln2b)
        stacks["w1"].append(w1.T)                                       # [in, out] for x @ W
        stacks["b1"].append(b1)
        stacks["w2"].append(w2.T)
        stacks["b2"].append(b2)
    kp = {k: jnp.stack(v, axis=0) for k, v in stacks.items()}

    # Additive slab per sample: row 0 = cls_token + pos[0]; rows 1..16 = pos[1:] + conv bias;
    # pad rows (17..23) = 0.
    pos = params["pos_embedding"][0]                                    # (SEQ_LEN, D)
    add_row = jnp.concatenate(
        [params["class_token"][0] + pos[:1],
         pos[1:] + params["conv_b"],
         jnp.zeros((SEQ_PAD - SEQ_LEN, EMBED_DIM), jnp.float32)], axis=0)   # (SEQ_PAD, D)
    kbias = jnp.where(jnp.arange(SEQ_PAD) < SEQ_LEN, 0.0, NEG_INF).astype(jnp.float32)

    kp.update(
        conv_w=params["conv_w_flat"],                                   # (K, D)
        add_row=add_row,
        kbias=kbias.reshape(1, SEQ_PAD),
        lnf_w=params["ln_w"], lnf_b=params["ln_b"],
        pre_w=params["pre_w"].T, pre_b=params["pre_b"],
        head_w=params["head_w"].T, head_b=params["head_b"],
    )
    return kp


def vit_forward_fused(x_nchw, kp):
    """Full ViT forward: returns (features (N, SEQ_LEN, D), logits (N, NUM_CLASSES))."""
    n = x_nchw.shape[0]
    patches = _patchify(x_nchw)                                          # (N, NP, K)
    patches = jnp.pad(patches, ((0, 0), (1, SEQ_PAD - SEQ_LEN), (0, 0)))  # cls + pad rows = 0
    patches = patches.reshape(n * SEQ_PAD, PATCH_K)
    add_slab = jnp.tile(kp["add_row"], (n, 1))                           # (N*SEQ_PAD, D)

    feats_flat, logits = pl.pallas_call(
        functools.partial(_vit_fused_kernel, batch=n),
        out_shape=(jax.ShapeDtypeStruct((n * SEQ_PAD, EMBED_DIM), jnp.float32),
                   jax.ShapeDtypeStruct((n, NUM_CLASSES), jnp.float32)),
    )(patches, add_slab, kp["kbias"], kp["conv_w"],
      kp["ln1w"], kp["ln1b"], kp["wq"], kp["bq"], kp["wk"], kp["bk"],
      kp["wv"], kp["bv"], kp["wo"], kp["bo"], kp["ln2w"], kp["ln2b"],
      kp["w1"], kp["b1"], kp["w2"], kp["b2"],
      kp["lnf_w"], kp["lnf_b"], kp["pre_w"], kp["pre_b"],
      kp["head_w"], kp["head_b"])

    feats = feats_flat.reshape(n, SEQ_PAD, EMBED_DIM)[:, :SEQ_LEN, :]
    return feats, logits


# ------------------------------ parameter init ------------------------------------
def init_params(key):
    p = PATCH_SIZE
    fan_in = 3 * p * p
    ks = jax.random.split(key, 4 + NUM_LAYERS)

    conv_w = jax.random.normal(ks[0], (EMBED_DIM, 3, p, p), jnp.float32) * math.sqrt(1.0 / fan_in)
    conv_w_flat = conv_w.reshape(EMBED_DIM, fan_in).T                   # [K, D] for the matmul
    conv_b = jnp.zeros((1, EMBED_DIM), jnp.float32)

    class_token = jnp.zeros((1, 1, EMBED_DIM), jnp.float32)
    pos_embedding = jax.random.normal(ks[1], (1, SEQ_LEN, EMBED_DIM), jnp.float32) * 0.02

    layers = []
    for i in range(NUM_LAYERS):
        lk = jax.random.split(ks[2 + i], 4)
        ln1w = jnp.ones((1, EMBED_DIM), jnp.float32)
        ln1b = jnp.zeros((1, EMBED_DIM), jnp.float32)
        wqkv = jax.random.normal(lk[0], (3 * EMBED_DIM, EMBED_DIM), jnp.float32) * 0.05
        bqkv = jnp.zeros((1, 3 * EMBED_DIM), jnp.float32)
        wo = jax.random.normal(lk[1], (EMBED_DIM, EMBED_DIM), jnp.float32) * 0.05
        bo = jnp.zeros((1, EMBED_DIM), jnp.float32)
        ln2w = jnp.ones((1, EMBED_DIM), jnp.float32)
        ln2b = jnp.zeros((1, EMBED_DIM), jnp.float32)
        w1 = jax.random.normal(lk[2], (FORWARD_DIM, EMBED_DIM), jnp.float32) * 0.05
        b1 = jnp.zeros((1, FORWARD_DIM), jnp.float32)
        w2 = jax.random.normal(lk[3], (EMBED_DIM, FORWARD_DIM), jnp.float32) * 0.05
        b2 = jnp.zeros((1, EMBED_DIM), jnp.float32)
        layers.append((ln1w, ln1b, wqkv, bqkv, wo, bo, ln2w, ln2b, w1, b1, w2, b2))

    ln_w = jnp.ones((1, EMBED_DIM), jnp.float32)
    ln_b = jnp.zeros((1, EMBED_DIM), jnp.float32)
    pre_w = jax.random.normal(ks[2 + NUM_LAYERS], (REPR_SIZE, EMBED_DIM), jnp.float32) \
        * math.sqrt(1.0 / EMBED_DIM)
    pre_b = jnp.zeros((1, REPR_SIZE), jnp.float32)
    # NOTE: the module zero-inits the head; we use small random values so the numerical
    # check actually exercises the head matmul (forward semantics are unchanged).
    head_w = jax.random.normal(ks[3 + NUM_LAYERS], (NUM_CLASSES, REPR_SIZE), jnp.float32) * 0.1
    head_b = jnp.zeros((1, NUM_CLASSES), jnp.float32)

    return dict(conv_w_flat=conv_w_flat, conv_b=conv_b, class_token=class_token,
                pos_embedding=pos_embedding, layers=layers,
                ln_w=ln_w, ln_b=ln_b, pre_w=pre_w, pre_b=pre_b,
                head_w=head_w, head_b=head_b)


# ------------------------------ pure-JAX reference ---------------------------------
def _ln_ref(a, w, b):
    mu = a.mean(-1, keepdims=True)
    var = ((a - mu) ** 2).mean(-1, keepdims=True)
    return (a - mu) / jnp.sqrt(var + LN_EPS) * w + b


def ref_encode(x_nchw, params):
    n = x_nchw.shape[0]
    hp = jax.lax.Precision.HIGHEST
    emb = _patchify(x_nchw) @ params["conv_w_flat"] + params["conv_b"]      # (N, NP, D)
    x = jnp.concatenate(
        [jnp.broadcast_to(params["class_token"], (n, 1, EMBED_DIM)), emb],
        axis=1) + params["pos_embedding"]
    dh = HEAD_DIM
    for (ln1w, ln1b, wqkv, bqkv, wo, bo, ln2w, ln2b, w1, b1, w2, b2) in params["layers"]:
        xn = _ln_ref(x, ln1w, ln1b)
        qkv = jnp.einsum('nsd,ed->nse', xn, wqkv, precision=hp) + bqkv
        q, k, v = jnp.split(qkv, 3, axis=-1)
        sp = lambda t: t.reshape(n, SEQ_LEN, NUM_HEADS, dh).transpose(0, 2, 1, 3)
        s = jnp.einsum('nhqd,nhkd->nhqk', sp(q), sp(k), precision=hp) / math.sqrt(dh)
        p = jax.nn.softmax(s, axis=-1)
        a = jnp.einsum('nhqk,nhkd->nhqd', p, sp(v), precision=hp)
        a = a.transpose(0, 2, 1, 3).reshape(n, SEQ_LEN, EMBED_DIM)
        x = x + jnp.einsum('nsd,ed->nse', a, wo, precision=hp) + bo
        yn = _ln_ref(x, ln2w, ln2b)
        h1 = jnp.einsum('nsd,fd->nsf', yn, w1, precision=hp) + b1
        h1 = 0.5 * h1 * (1.0 + jax.lax.erf(h1 / math.sqrt(2.0)))
        x = x + jnp.einsum('nsf,df->nsd', h1, w2, precision=hp) + b2
    return x


def ref_head(feats, params):
    hp = jax.lax.Precision.HIGHEST
    x = _ln_ref(feats, params["ln_w"], params["ln_b"])[:, 0]
    pre = jnp.tanh(jnp.einsum('nd,rd->nr', x, params["pre_w"], precision=hp) + params["pre_b"])
    return jnp.einsum('nr,cr->nc', pre, params["head_w"], precision=hp) + params["head_b"]


# --------------------------------------- main --------------------------------------
if __name__ == "__main__":
    key = jax.random.PRNGKey(0)
    pkey, xkey = jax.random.split(key)
    params = init_params(pkey)
    kernel_params = prepare_kernel_params(params)
    x = jax.random.normal(xkey, (2, 3, IMAGE_SIZE, IMAGE_SIZE), jnp.float32)

    fwd = jax.jit(vit_forward_fused)
    feats, logits = jax.block_until_ready(fwd(x, kernel_params))

    ref_feats = jax.block_until_ready(ref_encode(x, params))
    ref_logits = jax.block_until_ready(ref_head(ref_feats, params))

    assert logits.shape == (2, NUM_CLASSES)
    assert jnp.allclose(feats, ref_feats, atol=1e-2, rtol=1e-2), "encoder features mismatch"
    assert jnp.allclose(logits, ref_logits, atol=1e-2, rtol=1e-2), "logits mismatch"
    print("KERNEL_OK")
</pallas_src>

<mosaic_0001>
module attributes {stable_mosaic.version = 11 : i64} {
  func.func @_vit_fused_kernel(%arg0: memref<48x48xf32, #tpu.memory_space<vmem>>, %arg1: memref<48x32xf32, #tpu.memory_space<vmem>>, %arg2: memref<1x24xf32, #tpu.memory_space<vmem>>, %arg3: memref<48x32xf32, #tpu.memory_space<vmem>>, %arg4: memref<2x1x32xf32, #tpu.memory_space<vmem>>, %arg5: memref<2x1x32xf32, #tpu.memory_space<vmem>>, %arg6: memref<2x4x32x8xf32, #tpu.memory_space<vmem>>, %arg7: memref<2x4x1x8xf32, #tpu.memory_space<vmem>>, %arg8: memref<2x4x32x8xf32, #tpu.memory_space<vmem>>, %arg9: memref<2x4x1x8xf32, #tpu.memory_space<vmem>>, %arg10: memref<2x4x32x8xf32, #tpu.memory_space<vmem>>, %arg11: memref<2x4x1x8xf32, #tpu.memory_space<vmem>>, %arg12: memref<2x4x8x32xf32, #tpu.memory_space<vmem>>, %arg13: memref<2x1x32xf32, #tpu.memory_space<vmem>>, %arg14: memref<2x1x32xf32, #tpu.memory_space<vmem>>, %arg15: memref<2x1x32xf32, #tpu.memory_space<vmem>>, %arg16: memref<2x32x64xf32, #tpu.memory_space<vmem>>, %arg17: memref<2x1x64xf32, #tpu.memory_space<vmem>>, %arg18: memref<2x64x32xf32, #tpu.memory_space<vmem>>, %arg19: memref<2x1x32xf32, #tpu.memory_space<vmem>>, %arg20: memref<1x32xf32, #tpu.memory_space<vmem>>, %arg21: memref<1x32xf32, #tpu.memory_space<vmem>>, %arg22: memref<32x24xf32, #tpu.memory_space<vmem>>, %arg23: memref<1x24xf32, #tpu.memory_space<vmem>>, %arg24: memref<24x10xf32, #tpu.memory_space<vmem>>, %arg25: memref<1x10xf32, #tpu.memory_space<vmem>>, %arg26: memref<48x32xf32, #tpu.memory_space<vmem>>, %arg27: memref<2x10xf32, #tpu.memory_space<vmem>>) attributes {dimension_semantics = [], scalar_prefetch = 0 : i64, scratch_operands = 0 : i64, tpu.core_type = #tpu.core_type<tc>} {
    %c0 = arith.constant 0 : index
    %c0_0 = arith.constant 0 : index
    %0 = vector.load %arg0[%c0, %c0_0] : memref<48x48xf32, #tpu.memory_space<vmem>>, vector<48x48xf32>
    %c0_1 = arith.constant 0 : index
    %c0_2 = arith.constant 0 : index
    %1 = vector.load %arg3[%c0_1, %c0_2] : memref<48x32xf32, #tpu.memory_space<vmem>>, vector<48x32xf32>
    %cst = arith.constant dense<0.000000e+00> : vector<48x32xf32>
    %2 = tpu.matmul %0, %1, %cst {dimension_numbers = #tpu.dot_dimension_numbers<[1], [0], [0], [1], [0, 0, 1, 1], [], []>} : vector<48x48xf32>, vector<48x32xf32>, vector<48x32xf32> -> vector<48x32xf32>
    %c0_3 = arith.constant 0 : index
    %c0_4 = arith.constant 0 : index
    %3 = vector.load %arg1[%c0_3, %c0_4] : memref<48x32xf32, #tpu.memory_space<vmem>>, vector<48x32xf32>
    %4 = arith.addf %2, %3 : vector<48x32xf32>
    %c0_5 = arith.constant 0 : index
    %c0_6 = arith.constant 0 : index
    %5 = vector.load %arg2[%c0_5, %c0_6] : memref<1x24xf32, #tpu.memory_space<vmem>>, vector<1x24xf32>
    %c0_7 = arith.constant 0 : index
    %c0_8 = arith.constant 0 : index
    %c0_9 = arith.constant 0 : index
    %6 = vector.load %arg4[%c0_7, %c0_8, %c0_9] : memref<2x1x32xf32, #tpu.memory_space<vmem>>, vector<1x1x32xf32>
    %7 = vector.shape_cast %6 : vector<1x1x32xf32> to vector<1x32xf32>
    %c0_10 = arith.constant 0 : index
    %c0_11 = arith.constant 0 : index
    %c0_12 = arith.constant 0 : index
    %8 = vector.load %arg5[%c0_10, %c0_11, %c0_12] : memref<2x1x32xf32, #tpu.memory_space<vmem>>, vector<1x1x32xf32>
    %9 = vector.shape_cast %8 : vector<1x1x32xf32> to vector<1x32xf32>
    %cst_13 = arith.constant dense<0.000000e+00> : vector<48xf32>
    %10 = vector.multi_reduction <add>, %4, %cst_13 [1] : vector<48x32xf32> to vector<48xf32>
    %11 = vector.shape_cast %10 : vector<48xf32> to vector<48x1xf32>
    %cst_14 = arith.constant 3.200000e+01 : f32
    %12 = vector.broadcast %cst_14 : f32 to vector<48x1xf32>
    %13 = arith.divf %11, %12 : vector<48x1xf32>
    %14 = vector.broadcast %13 : vector<48x1xf32> to vector<48x32xf32>
    %15 = arith.subf %4, %14 : vector<48x32xf32>
    %16 = arith.mulf %15, %15 : vector<48x32xf32>
    %cst_15 = arith.constant dense<0.000000e+00> : vector<48xf32>
    %17 = vector.multi_reduction <add>, %16, %cst_15 [1] : vector<48x32xf32> to vector<48xf32>
    %18 = vector.shape_cast %17 : vector<48xf32> to vector<48x1xf32>
    %cst_16 = arith.constant 3.200000e+01 : f32
    %19 = vector.broadcast %cst_16 : f32 to vector<48x1xf32>
    %20 = arith.divf %18, %19 : vector<48x1xf32>
    %21 = vector.broadcast %13 : vector<48x1xf32> to vector<48x32xf32>
    %22 = arith.subf %4, %21 : vector<48x32xf32>
    %cst_17 = arith.constant 9.99999974E-6 : f32
    %23 = vector.broadcast %cst_17 : f32 to vector<48x1xf32>
    %24 = arith.addf %20, %23 : vector<48x1xf32>
    %25 = math.rsqrt %24 : vector<48x1xf32>
    %26 = vector.broadcast %25 : vector<48x1xf32> to vector<48x32xf32>
    %27 = arith.mulf %22, %26 : vector<48x32xf32>
    %28 = vector.broadcast %7 : vector<1x32xf32> to vector<48x32xf32>
    %29 = arith.mulf %27, %28 : vector<48x32xf32>
    %30 = vector.broadcast %9 : vector<1x32xf32> to vector<48x32xf32>
    %31 = arith.addf %29, %30 : vector<48x32xf32>
    %c0_18 = arith.constant 0 : index
    %c0_19 = arith.constant 0 : index
    %c0_20 = arith.constant 0 : index
    %c0_21 = arith.constant 0 : index
    %32 = vector.load %arg6[%c0_18, %c0_19, %c0_20, %c0_21] : memref<2x4x32x8xf32, #tpu.memory_space<vmem>>, vector<1x1x32x8xf32>
    %33 = vector.shape_cast %32 : vector<1x1x32x8xf32> to vector<32x8xf32>
    %cst_22 = arith.constant dense<0.000000e+00> : vector<48x8xf32>
    %34 = tpu.matmul %31, %33, %cst_22 {dimension_numbers = #tpu.dot_dimension_numbers<[1], [0], [0], [1], [0, 0, 1, 1], [], []>} : vector<48x32xf32>, vector<32x8xf32>, vector<48x8xf32> -> vector<48x8xf32>
    %c0_23 = arith.constant 0 : index
    %c0_24 = arith.constant 0 : index
    %c0_25 = arith.constant 0 : index
    %c0_26 = arith.constant 0 : index
    %35 = vector.load %arg7[%c0_23, %c0_24, %c0_25, %c0_26] : memref<2x4x1x8xf32, #tpu.memory_space<vmem>>, vector<1x1x1x8xf32>
    %36 = vector.shape_cast %35 : vector<1x1x1x8xf32> to vector<1x8xf32>
    %37 = vector.broadcast %36 : vector<1x8xf32> to vector<48x8xf32>
    %38 = arith.addf %34, %37 : vector<48x8xf32>
    %c0_27 = arith.constant 0 : index
    %c0_28 = arith.constant 0 : index
    %c0_29 = arith.constant 0 : index
    %c0_30 = arith.constant 0 : index
    %39 = vector.load %arg8[%c0_27, %c0_28, %c0_29, %c0_30] : memref<2x4x32x8xf32, #tpu.memory_space<vmem>>, vector<1x1x32x8xf32>
    %40 = vector.shape_cast %39 : vector<1x1x32x8xf32> to vector<32x8xf32>
    %cst_31 = arith.constant dense<0.000000e+00> : vector<48x8xf32>
    %41 = tpu.matmul %31, %40, %cst_31 {dimension_numbers = #tpu.dot_dimension_numbers<[1], [0], [0], [1], [0, 0, 1, 1], [], []>} : vector<48x32xf32>, vector<32x8xf32>, vector<48x8xf32> -> vector<48x8xf32>
    %c0_32 = arith.constant 0 : index
    %c0_33 = arith.constant 0 : index
    %c0_34 = arith.constant 0 : index
    %c0_35 = arith.constant 0 : index
    %42 = vector.load %arg9[%c0_32, %c0_33, %c0_34, %c0_35] : memref<2x4x1x8xf32, #tpu.memory_space<vmem>>, vector<1x1x1x8xf32>
    %43 = vector.shape_cast %42 : vector<1x1x1x8xf32> to vector<1x8xf32>
    %44 = vector.broadcast %43 : vector<1x8xf32> to vector<48x8xf32>
    %45 = arith.addf %41, %44 : vector<48x8xf32>
    %c0_36 = arith.constant 0 : index
    %c0_37 = arith.constant 0 : index
    %c0_38 = arith.constant 0 : index
    %c0_39 = arith.constant 0 : index
    %46 = vector.load %arg10[%c0_36, %c0_37, %c0_38, %c0_39] : memref<2x4x32x8xf32, #tpu.memory_space<vmem>>, vector<1x1x32x8xf32>
    %47 = vector.shape_cast %46 : vector<1x1x32x8xf32> to vector<32x8xf32>
    %cst_40 = arith.constant dense<0.000000e+00> : vector<48x8xf32>
    %48 = tpu.matmul %31, %47, %cst_40 {dimension_numbers = #tpu.dot_dimension_numbers<[1], [0], [0], [1], [0, 0, 1, 1], [], []>} : vector<48x32xf32>, vector<32x8xf32>, vector<48x8xf32> -> vector<48x8xf32>
    %c0_41 = arith.constant 0 : index
    %c0_42 = arith.constant 0 : index
    %c0_43 = arith.constant 0 : index
    %c0_44 = arith.constant 0 : index
    %49 = vector.load %arg11[%c0_41, %c0_42, %c0_43, %c0_44] : memref<2x4x1x8xf32, #tpu.memory_space<vmem>>, vector<1x1x1x8xf32>
    %50 = vector.shape_cast %49 : vector<1x1x1x8xf32> to vector<1x8xf32>
    %51 = vector.broadcast %50 : vector<1x8xf32> to vector<48x8xf32>
    %52 = arith.addf %48, %51 : vector<48x8xf32>
    %53 = vector.extract_strided_slice %38 {offsets = [0, 0], sizes = [24, 8], strides = [1, 1]} : vector<48x8xf32> to vector<24x8xf32>
    %54 = vector.extract_strided_slice %45 {offsets = [0, 0], sizes = [24, 8], strides = [1, 1]} : vector<48x8xf32> to vector<24x8xf32>
    %cst_45 = arith.constant dense<0.000000e+00> : vector<24x24xf32>
    %55 = tpu.matmul %53, %54, %cst_45 {dimension_numbers = #tpu.dot_dimension_numbers<[1], [1], [0], [0], [0, 0, 1, 0], [], []>} : vector<24x8xf32>, vector<24x8xf32>, vector<24x24xf32> -> vector<24x24xf32>
    %56 = vector.broadcast %5 : vector<1x24xf32> to vector<24x24xf32>
    %57 = arith.addf %55, %56 : vector<24x24xf32>
    %cst_46 = arith.constant dense<0xFF800000> : vector<24xf32>
    %58 = vector.multi_reduction <maximumf>, %57, %cst_46 [1] : vector<24x24xf32> to vector<24xf32>
    %59 = vector.shape_cast %58 : vector<24xf32> to vector<24x1xf32>
    %60 = vector.broadcast %59 : vector<24x1xf32> to vector<24x24xf32>
    %61 = arith.subf %57, %60 : vector<24x24xf32>
    %62 = math.exp %61 : vector<24x24xf32>
    %cst_47 = arith.constant dense<0.000000e+00> : vector<24xf32>
    %63 = vector.multi_reduction <add>, %62, %cst_47 [1] : vector<24x24xf32> to vector<24xf32>
    %64 = vector.shape_cast %63 : vector<24xf32> to vector<24x1xf32>
    %65 = tpu.reciprocal %64 {approx = true} : vector<24x1xf32> -> vector<24x1xf32>
    %66 = vector.broadcast %65 : vector<24x1xf32> to vector<24x24xf32>
    %67 = arith.mulf %62, %66 : vector<24x24xf32>
    %68 = vector.extract_strided_slice %52 {offsets = [0, 0], sizes = [24, 8], strides = [1, 1]} : vector<48x8xf32> to vector<24x8xf32>
    %cst_48 = arith.constant dense<0.000000e+00> : vector<24x8xf32>
    %69 = tpu.matmul %67, %68, %cst_48 {dimension_numbers = #tpu.dot_dimension_numbers<[1], [0], [0], [1], [0, 0, 1, 1], [], []>} : vector<24x24xf32>, vector<24x8xf32>, vector<24x8xf32> -> vector<24x8xf32>
    %c0_49 = arith.constant 0 : index
    %c0_50 = arith.constant 0 : index
    %c0_51 = arith.constant 0 : index
    %c0_52 = arith.constant 0 : index
    %70 = vector.load %arg12[%c0_49, %c0_50, %c0_51, %c0_52] : memref<2x4x8x32xf32, #tpu.memory_space<vmem>>, vector<1x1x8x32xf32>
    %71 = vector.shape_cast %70 : vector<1x1x8x32xf32> to vector<8x32xf32>
    %cst_53 = arith.constant dense<0.000000e+00> : vector<24x32xf32>
    %72 = tpu.matmul %69, %71, %cst_53 {dimension_numbers = #tpu.dot_dimension_numbers<[1], [0], [0], [1], [0, 0, 1, 1], [], []>} : vector<24x8xf32>, vector<8x32xf32>, vector<24x32xf32> -> vector<24x32xf32>
    %73 = vector.extract_strided_slice %38 {offsets = [24, 0], sizes = [24, 8], strides = [1, 1]} : vector<48x8xf32> to vector<24x8xf32>
    %74 = vector.extract_strided_slice %45 {offsets = [24, 0], sizes = [24, 8], strides = [1, 1]} : vector<48x8xf32> to vector<24x8xf32>
    %cst_54 = arith.constant dense<0.000000e+00> : vector<24x24xf32>
    %75 = tpu.matmul %73, %74, %cst_54 {dimension_numbers = #tpu.dot_dimension_numbers<[1], [1], [0], [0], [0, 0, 1, 0], [], []>} : vector<24x8xf32>, vector<24x8xf32>, vector<24x24xf32> -> vector<24x24xf32>
    %76 = vector.broadcast %5 : vector<1x24xf32> to vector<24x24xf32>
    %77 = arith.addf %75, %76 : vector<24x24xf32>
    %cst_55 = arith.constant dense<0xFF800000> : vector<24xf32>
    %78 = vector.multi_reduction <maximumf>, %77, %cst_55 [1] : vector<24x24xf32> to vector<24xf32>
    %79 = vector.shape_cast %78 : vector<24xf32> to vector<24x1xf32>
    %80 = vector.broadcast %79 : vector<24x1xf32> to vector<24x24xf32>
    %81 = arith.subf %77, %80 : vector<24x24xf32>
    %82 = math.exp %81 : vector<24x24xf32>
    %cst_56 = arith.constant dense<0.000000e+00> : vector<24xf32>
    %83 = vector.multi_reduction <add>, %82, %cst_56 [1] : vector<24x24xf32> to vector<24xf32>
    %84 = vector.shape_cast %83 : vector<24xf32> to vector<24x1xf32>
    %85 = tpu.reciprocal %84 {approx = true} : vector<24x1xf32> -> vector<24x1xf32>
    %86 = vector.broadcast %85 : vector<24x1xf32> to vector<24x24xf32>
    %87 = arith.mulf %82, %86 : vector<24x24xf32>
    %88 = vector.extract_strided_slice %52 {offsets = [24, 0], sizes = [24, 8], strides = [1, 1]} : vector<48x8xf32> to vector<24x8xf32>
    %cst_57 = arith.constant dense<0.000000e+00> : vector<24x8xf32>
    %89 = tpu.matmul %87, %88, %cst_57 {dimension_numbers = #tpu.dot_dimension_numbers<[1], [0], [0], [1], [0, 0, 1, 1], [], []>} : vector<24x24xf32>, vector<24x8xf32>, vector<24x8xf32> -> vector<24x8xf32>
    %c0_58 = arith.constant 0 : index
    %c0_59 = arith.constant 0 : index
    %c0_60 = arith.constant 0 : index
    %c0_61 = arith.constant 0 : index
    %90 = vector.load %arg12[%c0_58, %c0_59, %c0_60, %c0_61] : memref<2x4x8x32xf32, #tpu.memory_space<vmem>>, vector<1x1x8x32xf32>
    %91 = vector.shape_cast %90 : vector<1x1x8x32xf32> to vector<8x32xf32>
    %cst_62 = arith.constant dense<0.000000e+00> : vector<24x32xf32>
    %92 = tpu.matmul %89, %91, %cst_62 {dimension_numbers = #tpu.dot_dimension_numbers<[1], [0], [0], [1], [0, 0, 1, 1], [], []>} : vector<24x8xf32>, vector<8x32xf32>, vector<24x32xf32> -> vector<24x32xf32>
    %c0_63 = arith.constant 0 : index
    %c1 = arith.constant 1 : index
    %c0_64 = arith.constant 0 : index
    %c0_65 = arith.constant 0 : index
    %93 = vector.load %arg6[%c0_63, %c1, %c0_64, %c0_65] : memref<2x4x32x8xf32, #tpu.memory_space<vmem>>, vector<1x1x32x8xf32>
    %94 = vector.shape_cast %93 : vector<1x1x32x8xf32> to vector<32x8xf32>
    %cst_66 = arith.constant dense<0.000000e+00> : vector<48x8xf32>
    %95 = tpu.matmul %31, %94, %cst_66 {dimension_numbers = #tpu.dot_dimension_numbers<[1], [0], [0], [1], [0, 0, 1, 1], [], []>} : vector<48x32xf32>, vector<32x8xf32>, vector<48x8xf32> -> vector<48x8xf32>
    %c0_67 = arith.constant 0 : index
    %c1_68 = arith.constant 1 : index
    %c0_69 = arith.constant 0 : index
    %c0_70 = arith.constant 0 : index
    %96 = vector.load %arg7[%c0_67, %c1_68, %c0_69, %c0_70] : memref<2x4x1x8xf32, #tpu.memory_space<vmem>>, vector<1x1x1x8xf32>
    %97 = vector.shape_cast %96 : vector<1x1x1x8xf32> to vector<1x8xf32>
    %98 = vector.broadcast %97 : vector<1x8xf32> to vector<48x8xf32>
    %99 = arith.addf %95, %98 : vector<48x8xf32>
    %c0_71 = arith.constant 0 : index
    %c1_72 = arith.constant 1 : index
    %c0_73 = arith.constant 0 : index
    %c0_74 = arith.constant 0 : index
    %100 = vector.load %arg8[%c0_71, %c1_72, %c0_73, %c0_74] : memref<2x4x32x8xf32, #tpu.memory_space<vmem>>, vector<1x1x32x8xf32>
    %101 = vector.shape_cast %100 : vector<1x1x32x8xf32> to vector<32x8xf32>
    %cst_75 = arith.constant dense<0.000000e+00> : vector<48x8xf32>
    %102 = tpu.matmul %31, %101, %cst_75 {dimension_numbers = #tpu.dot_dimension_numbers<[1], [0], [0], [1], [0, 0, 1, 1], [], []>} : vector<48x32xf32>, vector<32x8xf32>, vector<48x8xf32> -> vector<48x8xf32>
    %c0_76 = arith.constant 0 : index
    %c1_77 = arith.constant 1 : index
    %c0_78 = arith.constant 0 : index
    %c0_79 = arith.constant 0 : index
    %103 = vector.load %arg9[%c0_76, %c1_77, %c0_78, %c0_79] : memref<2x4x1x8xf32, #tpu.memory_space<vmem>>, vector<1x1x1x8xf32>
    %104 = vector.shape_cast %103 : vector<1x1x1x8xf32> to vector<1x8xf32>
    %105 = vector.broadcast %104 : vector<1x8xf32> to vector<48x8xf32>
    %106 = arith.addf %102, %105 : vector<48x8xf32>
    %c0_80 = arith.constant 0 : index
    %c1_81 = arith.constant 1 : index
    %c0_82 = arith.constant 0 : index
    %c0_83 = arith.constant 0 : index
    %107 = vector.load %arg10[%c0_80, %c1_81, %c0_82, %c0_83] : memref<2x4x32x8xf32, #tpu.memory_space<vmem>>, vector<1x1x32x8xf32>
    %108 = vector.shape_cast %107 : vector<1x1x32x8xf32> to vector<32x8xf32>
    %cst_84 = arith.constant dense<0.000000e+00> : vector<48x8xf32>
    %109 = tpu.matmul %31, %108, %cst_84 {dimension_numbers = #tpu.dot_dimension_numbers<[1], [0], [0], [1], [0, 0, 1, 1], [], []>} : vector<48x32xf32>, vector<32x8xf32>, vector<48x8xf32> -> vector<48x8xf32>
    %c0_85 = arith.constant 0 : index
    %c1_86 = arith.constant 1 : index
    %c0_87 = arith.constant 0 : index
    %c0_88 = arith.constant 0 : index
    %110 = vector.load %arg11[%c0_85, %c1_86, %c0_87, %c0_88] : memref<2x4x1x8xf32, #tpu.memory_space<vmem>>, vector<1x1x1x8xf32>
    %111 = vector.shape_cast %110 : vector<1x1x1x8xf32> to vector<1x8xf32>
    %112 = vector.broadcast %111 : vector<1x8xf32> to vector<48x8xf32>
    %113 = arith.addf %109, %112 : vector<48x8xf32>
    %114 = vector.extract_strided_slice %99 {offsets = [0, 0], sizes = [24, 8], strides = [1, 1]} : vector<48x8xf32> to vector<24x8xf32>
    %115 = vector.extract_strided_slice %106 {offsets = [0, 0], sizes = [24, 8], strides = [1, 1]} : vector<48x8xf32> to vector<24x8xf32>
    %cst_89 = arith.constant dense<0.000000e+00> : vector<24x24xf32>
    %116 = tpu.matmul %114, %115, %cst_89 {dimension_numbers = #tpu.dot_dimension_numbers<[1], [1], [0], [0], [0, 0, 1, 0], [], []>} : vector<24x8xf32>, vector<24x8xf32>, vector<24x24xf32> -> vector<24x24xf32>
    %117 = vector.broadcast %5 : vector<1x24xf32> to vector<24x24xf32>
    %118 = arith.addf %116, %117 : vector<24x24xf32>
    %cst_90 = arith.constant dense<0xFF800000> : vector<24xf32>
    %119 = vector.multi_reduction <maximumf>, %118, %cst_90 [1] : vector<24x24xf32> to vector<24xf32>
    %120 = vector.shape_cast %119 : vector<24xf32> to vector<24x1xf32>
    %121 = vector.broadcast %120 : vector<24x1xf32> to vector<24x24xf32>
    %122 = arith.subf %118, %121 : vector<24x24xf32>
    %123 = math.exp %122 : vector<24x24xf32>
    %cst_91 = arith.constant dense<0.000000e+00> : vector<24xf32>
    %124 = vector.multi_reduction <add>, %123, %cst_91 [1] : vector<24x24xf32> to vector<24xf32>
    %125 = vector.shape_cast %124 : vector<24xf32> to vector<24x1xf32>
    %126 = tpu.reciprocal %125 {approx = true} : vector<24x1xf32> -> vector<24x1xf32>
    %127 = vector.broadcast %126 : vector<24x1xf32> to vector<24x24xf32>
    %128 = arith.mulf %123, %127 : vector<24x24xf32>
    %129 = vector.extract_strided_slice %113 {offsets = [0, 0], sizes = [24, 8], strides = [1, 1]} : vector<48x8xf32> to vector<24x8xf32>
    %cst_92 = arith.constant dense<0.000000e+00> : vector<24x8xf32>
    %130 = tpu.matmul %128, %129, %cst_92 {dimension_numbers = #tpu.dot_dimension_numbers<[1], [0], [0], [1], [0, 0, 1, 1], [], []>} : vector<24x24xf32>, vector<24x8xf32>, vector<24x8xf32> -> vector<24x8xf32>
    %c0_93 = arith.constant 0 : index
    %c1_94 = arith.constant 1 : index
    %c0_95 = arith.constant 0 : index
    %c0_96 = arith.constant 0 : index
    %131 = vector.load %arg12[%c0_93, %c1_94, %c0_95, %c0_96] : memref<2x4x8x32xf32, #tpu.memory_space<vmem>>, vector<1x1x8x32xf32>
    %132 = vector.shape_cast %131 : vector<1x1x8x32xf32> to vector<8x32xf32>
    %cst_97 = arith.constant dense<0.000000e+00> : vector<24x32xf32>
    %133 = tpu.matmul %130, %132, %cst_97 {dimension_numbers = #tpu.dot_dimension_numbers<[1], [0], [0], [1], [0, 0, 1, 1], [], []>} : vector<24x8xf32>, vector<8x32xf32>, vector<24x32xf32> -> vector<24x32xf32>
    %134 = arith.addf %72, %133 : vector<24x32xf32>
    %135 = vector.extract_strided_slice %99 {offsets = [24, 0], sizes = [24, 8], strides = [1, 1]} : vector<48x8xf32> to vector<24x8xf32>
    %136 = vector.extract_strided_slice %106 {offsets = [24, 0], sizes = [24, 8], strides = [1, 1]} : vector<48x8xf32> to vector<24x8xf32>
    %cst_98 = arith.constant dense<0.000000e+00> : vector<24x24xf32>
    %137 = tpu.matmul %135, %136, %cst_98 {dimension_numbers = #tpu.dot_dimension_numbers<[1], [1], [0], [0], [0, 0, 1, 0], [], []>} : vector<24x8xf32>, vector<24x8xf32>, vector<24x24xf32> -> vector<24x24xf32>
    %138 = vector.broadcast %5 : vector<1x24xf32> to vector<24x24xf32>
    %139 = arith.addf %137, %138 : vector<24x24xf32>
    %cst_99 = arith.constant dense<0xFF800000> : vector<24xf32>
    %140 = vector.multi_reduction <maximumf>, %139, %cst_99 [1] : vector<24x24xf32> to vector<24xf32>
    %141 = vector.shape_cast %140 : vector<24xf32> to vector<24x1xf32>
    %142 = vector.broadcast %141 : vector<24x1xf32> to vector<24x24xf32>
    %143 = arith.subf %139, %142 : vector<24x24xf32>
    %144 = math.exp %143 : vector<24x24xf32>
    %cst_100 = arith.constant dense<0.000000e+00> : vector<24xf32>
    %145 = vector.multi_reduction <add>, %144, %cst_100 [1] : vector<24x24xf32> to vector<24xf32>
    %146 = vector.shape_cast %145 : vector<24xf32> to vector<24x1xf32>
    %147 = tpu.reciprocal %146 {approx = true} : vector<24x1xf32> -> vector<24x1xf32>
    %148 = vector.broadcast %147 : vector<24x1xf32> to vector<24x24xf32>
    %149 = arith.mulf %144, %148 : vector<24x24xf32>
    %150 = vector.extract_strided_slice %113 {offsets = [24, 0], sizes = [24, 8], strides = [1, 1]} : vector<48x8xf32> to vector<24x8xf32>
    %cst_101 = arith.constant dense<0.000000e+00> : vector<24x8xf32>
    %151 = tpu.matmul %149, %150, %cst_101 {dimension_numbers = #tpu.dot_dimension_numbers<[1], [0], [0], [1], [0, 0, 1, 1], [], []>} : vector<24x24xf32>, vector<24x8xf32>, vector<24x8xf32> -> vector<24x8xf32>
    %c0_102 = arith.constant 0 : index
    %c1_103 = arith.constant 1 : index
    %c0_104 = arith.constant 0 : index
    %c0_105 = arith.constant 0 : index
    %152 = vector.load %arg12[%c0_102, %c1_103, %c0_104, %c0_105] : memref<2x4x8x32xf32, #tpu.memory_space<vmem>>, vector<1x1x8x32xf32>
    %153 = vector.shape_cast %152 : vector<1x1x8x32xf32> to vector<8x32xf32>
    %cst_106 = arith.constant dense<0.000000e+00> : vector<24x32xf32>
    %154 = tpu.matmul %151, %153, %cst_106 {dimension_numbers = #tpu.dot_dimension_numbers<[1], [0], [0], [1], [0, 0, 1, 1], [], []>} : vector<24x8xf32>, vector<8x32xf32>, vector<24x32xf32> -> vector<24x32xf32>
    %155 = arith.addf %92, %154 : vector<24x32xf32>
    %c0_107 = arith.constant 0 : index
    %c2 = arith.constant 2 : index
    %c0_108 = arith.constant 0 : index
    %c0_109 = arith.constant 0 : index
    %156 = vector.load %arg6[%c0_107, %c2, %c0_108, %c0_109] : memref<2x4x32x8xf32, #tpu.memory_space<vmem>>, vector<1x1x32x8xf32>
    %157 = vector.shape_cast %156 : vector<1x1x32x8xf32> to vector<32x8xf32>
    %cst_110 = arith.constant dense<0.000000e+00> : vector<48x8xf32>
    %158 = tpu.matmul %31, %157, %cst_110 {dimension_numbers = #tpu.dot_dimension_numbers<[1], [0], [0], [1], [0, 0, 1, 1], [], []>} : vector<48x32xf32>, vector<32x8xf32>, vector<48x8xf32> -> vector<48x8xf32>
    %c0_111 = arith.constant 0 : index
    %c2_112 = arith.constant 2 : index
    %c0_113 = arith.constant 0 : index
    %c0_114 = arith.constant 0 : index
    %159 = vector.load %arg7[%c0_111, %c2_112, %c0_113, %c0_114] : memref<2x4x1x8xf32, #tpu.memory_space<vmem>>, vector<1x1x1x8xf32>
    %160 = vector.shape_cast %159 : vector<1x1x1x8xf32> to vector<1x8xf32>
    %161 = vector.broadcast %160 : vector<1x8xf32> to vector<48x8xf32>
    %162 = arith.addf %158, %161 : vector<48x8xf32>
    %c0_115 = arith.constant 0 : index
    %c2_116 = arith.constant 2 : index
    %c0_117 = arith.constant 0 : index
    %c0_118 = arith.constant 0 : index
    %163 = vector.load %arg8[%c0_115, %c2_116, %c0_117, %c0_118] : memref<2x4x32x8xf32, #tpu.memory_space<vmem>>, vector<1x1x32x8xf32>
    %164 = vector.shape_cast %163 : vector<1x1x32x8xf32> to vector<32x8xf32>
    %cst_119 = arith.constant dense<0.000000e+00> : vector<48x8xf32>
    %165 = tpu.matmul %31, %164, %cst_119 {dimension_numbers = #tpu.dot_dimension_numbers<[1], [0], [0], [1], [0, 0, 1, 1], [], []>} : vector<48x32xf32>, vector<32x8xf32>, vector<48x8xf32> -> vector<48x8xf32>
    %c0_120 = arith.constant 0 : index
    %c2_121 = arith.constant 2 : index
    %c0_122 = arith.constant 0 : index
    %c0_123 = arith.constant 0 : index
    %166 = vector.load %arg9[%c0_120, %c2_121, %c0_122, %c0_123] : memref<2x4x1x8xf32, #tpu.memory_space<vmem>>, vector<1x1x1x8xf32>
    %167 = vector.shape_cast %166 : vector<1x1x1x8xf32> to vector<1x8xf32>
    %168 = vector.broadcast %167 : vector<1x8xf32> to vector<48x8xf32>
    %169 = arith.addf %165, %168 : vector<48x8xf32>
    %c0_124 = arith.constant 0 : index
    %c2_125 = arith.constant 2 : index
    %c0_126 = arith.constant 0 : index
    %c0_127 = arith.constant 0 : index
    %170 = vector.load %arg10[%c0_124, %c2_125, %c0_126, %c0_127] : memref<2x4x32x8xf32, #tpu.memory_space<vmem>>, vector<1x1x32x8xf32>
    %171 = vector.shape_cast %170 : vector<1x1x32x8xf32> to vector<32x8xf32>
    %cst_128 = arith.constant dense<0.000000e+00> : vector<48x8xf32>
    %172 = tpu.matmul %31, %171, %cst_128 {dimension_numbers = #tpu.dot_dimension_numbers<[1], [0], [0], [1], [0, 0, 1, 1], [], []>} : vector<48x32xf32>, vector<32x8xf32>, vector<48x8xf32> -> vector<48x8xf32>
    %c0_129 = arith.constant 0 : index
    %c2_130 = arith.constant 2 : index
    %c0_131 = arith.constant 0 : index
    %c0_132 = arith.constant 0 : index
    %173 = vector.load %arg11[%c0_129, %c2_130, %c0_131, %c0_132] : memref<2x4x1x8xf32, #tpu.memory_space<vmem>>, vector<1x1x1x8xf32>
    %174 = vector.shape_cast %173 : vector<1x1x1x8xf32> to vector<1x8xf32>
    %175 = vector.broadcast %174 : vector<1x8xf32> to vector<48x8xf32>
    %176 = arith.addf %172, %175 : vector<48x8xf32>
    %177 = vector.extract_strided_slice %162 {offsets = [0, 0], sizes = [24, 8], strides = [1, 1]} : vector<48x8xf32> to vector<24x8xf32>
    %178 = vector.extract_strided_slice %169 {offsets = [0, 0], sizes = [24, 8], strides = [1, 1]} : vector<48x8xf32> to vector<24x8xf32>
    %cst_133 = arith.constant dense<0.000000e+00> : vector<24x24xf32>
    %179 = tpu.matmul %177, %178, %cst_133 {dimension_numbers = #tpu.dot_dimension_numbers<[1], [1], [0], [0], [0, 0, 1, 0], [], []>} : vector<24x8xf32>, vector<24x8xf32>, vector<24x24xf32> -> vector<24x24xf32>
    %180 = vector.broadcast %5 : vector<1x24xf32> to vector<24x24xf32>
    %181 = arith.addf %179, %180 : vector<24x24xf32>
    %cst_134 = arith.constant dense<0xFF800000> : vector<24xf32>
    %182 = vector.multi_reduction <maximumf>, %181, %cst_134 [1] : vector<24x24xf32> to vector<24xf32>
    %183 = vector.shape_cast %182 : vector<24xf32> to vector<24x1xf32>
    %184 = vector.broadcast %183 : vector<24x1xf32> to vector<24x24xf32>
    %185 = arith.subf %181, %184 : vector<24x24xf32>
    %186 = math.exp %185 : vector<24x24xf32>
    %cst_135 = arith.constant dense<0.000000e+00> : vector<24xf32>
    %187 = vector.multi_reduction <add>, %186, %cst_135 [1] : vector<24x24xf32> to vector<24xf32>
    %188 = vector.shape_cast %187 : vector<24xf32> to vector<24x1xf32>
    %189 = tpu.reciprocal %188 {approx = true} : vector<24x1xf32> -> vector<24x1xf32>
    %190 = vector.broadcast %189 : vector<24x1xf32> to vector<24x24xf32>
    %191 = arith.mulf %186, %190 : vector<24x24xf32>
    %192 = vector.extract_strided_slice %176 {offsets = [0, 0], sizes = [24, 8], strides = [1, 1]} : vector<48x8xf32> to vector<24x8xf32>
    %cst_136 = arith.constant dense<0.000000e+00> : vector<24x8xf32>
    %193 = tpu.matmul %191, %192, %cst_136 {dimension_numbers = #tpu.dot_dimension_numbers<[1], [0], [0], [1], [0, 0, 1, 1], [], []>} : vector<24x24xf32>, vector<24x8xf32>, vector<24x8xf32> -> vector<24x8xf32>
    %c0_137 = arith.constant 0 : index
    %c2_138 = arith.constant 2 : index
    %c0_139 = arith.constant 0 : index
    %c0_140 = arith.constant 0 : index
    %194 = vector.load %arg12[%c0_137, %c2_138, %c0_139, %c0_140] : memref<2x4x8x32xf32, #tpu.memory_space<vmem>>, vector<1x1x8x32xf32>
    %195 = vector.shape_cast %194 : vector<1x1x8x32xf32> to vector<8x32xf32>
    %cst_141 = arith.constant dense<0.000000e+00> : vector<24x32xf32>
    %196 = tpu.matmul %193, %195, %cst_141 {dimension_numbers = #tpu.dot_dimension_numbers<[1], [0], [0], [1], [0, 0, 1, 1], [], []>} : vector<24x8xf32>, vector<8x32xf32>, vector<24x32xf32> -> vector<24x32xf32>
    %197 = arith.addf %134, %196 : vector<24x32xf32>
    %198 = vector.extract_strided_slice %162 {offsets = [24, 0], sizes = [24, 8], strides = [1, 1]} : vector<48x8xf32> to vector<24x8xf32>
    %199 = vector.extract_strided_slice %169 {offsets = [24, 0], sizes = [24, 8], strides = [1, 1]} : vector<48x8xf32> to vector<24x8xf32>
    %cst_142 = arith.constant dense<0.000000e+00> : vector<24x24xf32>
    %200 = tpu.matmul %198, %199, %cst_142 {dimension_numbers = #tpu.dot_dimension_numbers<[1], [1], [0], [0], [0, 0, 1, 0], [], []>} : vector<24x8xf32>, vector<24x8xf32>, vector<24x24xf32> -> vector<24x24xf32>
    %201 = vector.broadcast %5 : vector<1x24xf32> to vector<24x24xf32>
    %202 = arith.addf %200, %201 : vector<24x24xf32>
    %cst_143 = arith.constant dense<0xFF800000> : vector<24xf32>
    %203 = vector.multi_reduction <maximumf>, %202, %cst_143 [1] : vector<24x24xf32> to vector<24xf32>
    %204 = vector.shape_cast %203 : vector<24xf32> to vector<24x1xf32>
    %205 = vector.broadcast %204 : vector<24x1xf32> to vector<24x24xf32>
    %206 = arith.subf %202, %205 : vector<24x24xf32>
    %207 = math.exp %206 : vector<24x24xf32>
    %cst_144 = arith.constant dense<0.000000e+00> : vector<24xf32>
    %208 = vector.multi_reduction <add>, %207, %cst_144 [1] : vector<24x24xf32> to vector<24xf32>
    %209 = vector.shape_cast %208 : vector<24xf32> to vector<24x1xf32>
    %210 = tpu.reciprocal %209 {approx = true} : vector<24x1xf32> -> vector<24x1xf32>
    %211 = vector.broadcast %210 : vector<24x1xf32> to vector<24x24xf32>
    %212 = arith.mulf %207, %211 : vector<24x24xf32>
    %213 = vector.extract_strided_slice %176 {offsets = [24, 0], sizes = [24, 8], strides = [1, 1]} : vector<48x8xf32> to vector<24x8xf32>
    %cst_145 = arith.constant dense<0.000000e+00> : vector<24x8xf32>
    %214 = tpu.matmul %212, %213, %cst_145 {dimension_numbers = #tpu.dot_dimension_numbers<[1], [0], [0], [1], [0, 0, 1, 1], [], []>} : vector<24x24xf32>, vector<24x8xf32>, vector<24x8xf32> -> vector<24x8xf32>
    %c0_146 = arith.constant 0 : index
    %c2_147 = arith.constant 2 : index
    %c0_148 = arith.constant 0 : index
    %c0_149 = arith.constant 0 : index
    %215 = vector.load %arg12[%c0_146, %c2_147, %c0_148, %c0_149] : memref<2x4x8x32xf32, #tpu.memory_space<vmem>>, vector<1x1x8x32xf32>
    %216 = vector.shape_cast %215 : vector<1x1x8x32xf32> to vector<8x32xf32>
    %cst_150 = arith.constant dense<0.000000e+00> : vector<24x32xf32>
    %217 = tpu.matmul %214, %216, %cst_150 {dimension_numbers = #tpu.dot_dimension_numbers<[1], [0], [0], [1], [0, 0, 1, 1], [], []>} : vector<24x8xf32>, vector<8x32xf32>, vector<24x32xf32> -> vector<24x32xf32>
    %218 = arith.addf %155, %217 : vector<24x32xf32>
    %c0_151 = arith.constant 0 : index
    %c3 = arith.constant 3 : index
    %c0_152 = arith.constant 0 : index
    %c0_153 = arith.constant 0 : index
    %219 = vector.load %arg6[%c0_151, %c3, %c0_152, %c0_153] : memref<2x4x32x8xf32, #tpu.memory_space<vmem>>, vector<1x1x32x8xf32>
    %220 = vector.shape_cast %219 : vector<1x1x32x8xf32> to vector<32x8xf32>
    %cst_154 = arith.constant dense<0.000000e+00> : vector<48x8xf32>
    %221 = tpu.matmul %31, %220, %cst_154 {dimension_numbers = #tpu.dot_dimension_numbers<[1], [0], [0], [1], [0, 0, 1, 1], [], []>} : vector<48x32xf32>, vector<32x8xf32>, vector<48x8xf32> -> vector<48x8xf32>
    %c0_155 = arith.constant 0 : index
    %c3_156 = arith.constant 3 : index
    %c0_157 = arith.constant 0 : index
    %c0_158 = arith.constant 0 : index
    %222 = vector.load %arg7[%c0_155, %c3_156, %c0_157, %c0_158] : memref<2x4x1x8xf32, #tpu.memory_space<vmem>>, vector<1x1x1x8xf32>
    %223 = vector.shape_cast %222 : vector<1x1x1x8xf32> to vector<1x8xf32>
    %224 = vector.broadcast %223 : vector<1x8xf32> to vector<48x8xf32>
    %225 = arith.addf %221, %224 : vector<48x8xf32>
    %c0_159 = arith.constant 0 : index
    %c3_160 = arith.constant 3 : index
    %c0_161 = arith.constant 0 : index
    %c0_162 = arith.constant 0 : index
    %226 = vector.load %arg8[%c0_159, %c3_160, %c0_161, %c0_162] : memref<2x4x32x8xf32, #tpu.memory_space<vmem>>, vector<1x1x32x8xf32>
    %227 = vector.shape_cast %226 : vector<1x1x32x8xf32> to vector<32x8xf32>
    %cst_163 = arith.constant dense<0.000000e+00> : vector<48x8xf32>
    %228 = tpu.matmul %31, %227, %cst_163 {dimension_numbers = #tpu.dot_dimension_numbers<[1], [0], [0], [1], [0, 0, 1, 1], [], []>} : vector<48x32xf32>, vector<32x8xf32>, vector<48x8xf32> -> vector<48x8xf32>
    %c0_164 = arith.constant 0 : index
    %c3_165 = arith.constant 3 : index
    %c0_166 = arith.constant 0 : index
    %c0_167 = arith.constant 0 : index
    %229 = vector.load %arg9[%c0_164, %c3_165, %c0_166, %c0_167] : memref<2x4x1x8xf32, #tpu.memory_space<vmem>>, vector<1x1x1x8xf32>
    %230 = vector.shape_cast %229 : vector<1x1x1x8xf32> to vector<1x8xf32>
    %231 = vector.broadcast %230 : vector<1x8xf32> to vector<48x8xf32>
    %232 = arith.addf %228, %231 : vector<48x8xf32>
    %c0_168 = arith.constant 0 : index
    %c3_169 = arith.constant 3 : index
    %c0_170 = arith.constant 0 : index
    %c0_171 = arith.constant 0 : index
    %233 = vector.load %arg10[%c0_168, %c3_169, %c0_170, %c0_171] : memref<2x4x32x8xf32, #tpu.memory_space<vmem>>, vector<1x1x32x8xf32>
    %234 = vector.shape_cast %233 : vector<1x1x32x8xf32> to vector<32x8xf32>
    %cst_172 = arith.constant dense<0.000000e+00> : vector<48x8xf32>
    %235 = tpu.matmul %31, %234, %cst_172 {dimension_numbers = #tpu.dot_dimension_numbers<[1], [0], [0], [1], [0, 0, 1, 1], [], []>} : vector<48x32xf32>, vector<32x8xf32>, vector<48x8xf32> -> vector<48x8xf32>
    %c0_173 = arith.constant 0 : index
    %c3_174 = arith.constant 3 : index
    %c0_175 = arith.constant 0 : index
    %c0_176 = arith.constant 0 : index
    %236 = vector.load %arg11[%c0_173, %c3_174, %c0_175, %c0_176] : memref<2x4x1x8xf32, #tpu.memory_space<vmem>>, vector<1x1x1x8xf32>
    %237 = vector.shape_cast %236 : vector<1x1x1x8xf32> to vector<1x8xf32>
    %238 = vector.broadcast %237 : vector<1x8xf32> to vector<48x8xf32>
    %239 = arith.addf %235, %238 : vector<48x8xf32>
    %240 = vector.extract_strided_slice %225 {offsets = [0, 0], sizes = [24, 8], strides = [1, 1]} : vector<48x8xf32> to vector<24x8xf32>
    %241 = vector.extract_strided_slice %232 {offsets = [0, 0], sizes = [24, 8], strides = [1, 1]} : vector<48x8xf32> to vector<24x8xf32>
    %cst_177 = arith.constant dense<0.000000e+00> : vector<24x24xf32>
    %242 = tpu.matmul %240, %241, %cst_177 {dimension_numbers = #tpu.dot_dimension_numbers<[1], [1], [0], [0], [0, 0, 1, 0], [], []>} : vector<24x8xf32>, vector<24x8xf32>, vector<24x24xf32> -> vector<24x24xf32>
    %243 = vector.broadcast %5 : vector<1x24xf32> to vector<24x24xf32>
    %244 = arith.addf %242, %243 : vector<24x24xf32>
    %cst_178 = arith.constant dense<0xFF800000> : vector<24xf32>
    %245 = vector.multi_reduction <maximumf>, %244, %cst_178 [1] : vector<24x24xf32> to vector<24xf32>
    %246 = vector.shape_cast %245 : vector<24xf32> to vector<24x1xf32>
    %247 = vector.broadcast %246 : vector<24x1xf32> to vector<24x24xf32>
    %248 = arith.subf %244, %247 : vector<24x24xf32>
    %249 = math.exp %248 : vector<24x24xf32>
    %cst_179 = arith.constant dense<0.000000e+00> : vector<24xf32>
    %250 = vector.multi_reduction <add>, %249, %cst_179 [1] : vector<24x24xf32> to vector<24xf32>
    %251 = vector.shape_cast %250 : vector<24xf32> to vector<24x1xf32>
    %252 = tpu.reciprocal %251 {approx = true} : vector<24x1xf32> -> vector<24x1xf32>
    %253 = vector.broadcast %252 : vector<24x1xf32> to vector<24x24xf32>
    %254 = arith.mulf %249, %253 : vector<24x24xf32>
    %255 = vector.extract_strided_slice %239 {offsets = [0, 0], sizes = [24, 8], strides = [1, 1]} : vector<48x8xf32> to vector<24x8xf32>
    %cst_180 = arith.constant dense<0.000000e+00> : vector<24x8xf32>
    %256 = tpu.matmul %254, %255, %cst_180 {dimension_numbers = #tpu.dot_dimension_numbers<[1], [0], [0], [1], [0, 0, 1, 1], [], []>} : vector<24x24xf32>, vector<24x8xf32>, vector<24x8xf32> -> vector<24x8xf32>
    %c0_181 = arith.constant 0 : index
    %c3_182 = arith.constant 3 : index
    %c0_183 = arith.constant 0 : index
    %c0_184 = arith.constant 0 : index
    %257 = vector.load %arg12[%c0_181, %c3_182, %c0_183, %c0_184] : memref<2x4x8x32xf32, #tpu.memory_space<vmem>>, vector<1x1x8x32xf32>
    %258 = vector.shape_cast %257 : vector<1x1x8x32xf32> to vector<8x32xf32>
    %cst_185 = arith.constant dense<0.000000e+00> : vector<24x32xf32>
    %259 = tpu.matmul %256, %258, %cst_185 {dimension_numbers = #tpu.dot_dimension_numbers<[1], [0], [0], [1], [0, 0, 1, 1], [], []>} : vector<24x8xf32>, vector<8x32xf32>, vector<24x32xf32> -> vector<24x32xf32>
    %260 = arith.addf %197, %259 : vector<24x32xf32>
    %261 = vector.extract_strided_slice %225 {offsets = [24, 0], sizes = [24, 8], strides = [1, 1]} : vector<48x8xf32> to vector<24x8xf32>
    %262 = vector.extract_strided_slice %232 {offsets = [24, 0], sizes = [24, 8], strides = [1, 1]} : vector<48x8xf32> to vector<24x8xf32>
    %cst_186 = arith.constant dense<0.000000e+00> : vector<24x24xf32>
    %263 = tpu.matmul %261, %262, %cst_186 {dimension_numbers = #tpu.dot_dimension_numbers<[1], [1], [0], [0], [0, 0, 1, 0], [], []>} : vector<24x8xf32>, vector<24x8xf32>, vector<24x24xf32> -> vector<24x24xf32>
    %264 = vector.broadcast %5 : vector<1x24xf32> to vector<24x24xf32>
    %265 = arith.addf %263, %264 : vector<24x24xf32>
    %cst_187 = arith.constant dense<0xFF800000> : vector<24xf32>
    %266 = vector.multi_reduction <maximumf>, %265, %cst_187 [1] : vector<24x24xf32> to vector<24xf32>
    %267 = vector.shape_cast %266 : vector<24xf32> to vector<24x1xf32>
    %268 = vector.broadcast %267 : vector<24x1xf32> to vector<24x24xf32>
    %269 = arith.subf %265, %268 : vector<24x24xf32>
    %270 = math.exp %269 : vector<24x24xf32>
    %cst_188 = arith.constant dense<0.000000e+00> : vector<24xf32>
    %271 = vector.multi_reduction <add>, %270, %cst_188 [1] : vector<24x24xf32> to vector<24xf32>
    %272 = vector.shape_cast %271 : vector<24xf32> to vector<24x1xf32>
    %273 = tpu.reciprocal %272 {approx = true} : vector<24x1xf32> -> vector<24x1xf32>
    %274 = vector.broadcast %273 : vector<24x1xf32> to vector<24x24xf32>
    %275 = arith.mulf %270, %274 : vector<24x24xf32>
    %276 = vector.extract_strided_slice %239 {offsets = [24, 0], sizes = [24, 8], strides = [1, 1]} : vector<48x8xf32> to vector<24x8xf32>
    %cst_189 = arith.constant dense<0.000000e+00> : vector<24x8xf32>
    %277 = tpu.matmul %275, %276, %cst_189 {dimension_numbers = #tpu.dot_dimension_numbers<[1], [0], [0], [1], [0, 0, 1, 1], [], []>} : vector<24x24xf32>, vector<24x8xf32>, vector<24x8xf32> -> vector<24x8xf32>
    %c0_190 = arith.constant 0 : index
    %c3_191 = arith.constant 3 : index
    %c0_192 = arith.constant 0 : index
    %c0_193 = arith.constant 0 : index
    %278 = vector.load %arg12[%c0_190, %c3_191, %c0_192, %c0_193] : memref<2x4x8x32xf32, #tpu.memory_space<vmem>>, vector<1x1x8x32xf32>
    %279 = vector.shape_cast %278 : vector<1x1x8x32xf32> to vector<8x32xf32>
    %cst_194 = arith.constant dense<0.000000e+00> : vector<24x32xf32>
    %280 = tpu.matmul %277, %279, %cst_194 {dimension_numbers = #tpu.dot_dimension_numbers<[1], [0], [0], [1], [0, 0, 1, 1], [], []>} : vector<24x8xf32>, vector<8x32xf32>, vector<24x32xf32> -> vector<24x32xf32>
    %281 = arith.addf %218, %280 : vector<24x32xf32>
    %282 = tpu.concatenate %260, %281 in 0 : vector<24x32xf32>, vector<24x32xf32> -> vector<48x32xf32>
    %283 = arith.addf %4, %282 : vector<48x32xf32>
    %c0_195 = arith.constant 0 : index
    %c0_196 = arith.constant 0 : index
    %c0_197 = arith.constant 0 : index
    %284 = vector.load %arg13[%c0_195, %c0_196, %c0_197] : memref<2x1x32xf32, #tpu.memory_space<vmem>>, vector<1x1x32xf32>
    %285 = vector.shape_cast %284 : vector<1x1x32xf32> to vector<1x32xf32>
    %286 = vector.broadcast %285 : vector<1x32xf32> to vector<48x32xf32>
    %287 = arith.addf %283, %286 : vector<48x32xf32>
    %c0_198 = arith.constant 0 : index
    %c0_199 = arith.constant 0 : index
    %c0_200 = arith.constant 0 : index
    %288 = vector.load %arg14[%c0_198, %c0_199, %c0_200] : memref<2x1x32xf32, #tpu.memory_space<vmem>>, vector<1x1x32xf32>
    %289 = vector.shape_cast %288 : vector<1x1x32xf32> to vector<1x32xf32>
    %c0_201 = arith.constant 0 : index
    %c0_202 = arith.constant 0 : index
    %c0_203 = arith.constant 0 : index
    %290 = vector.load %arg15[%c0_201, %c0_202, %c0_203] : memref<2x1x32xf32, #tpu.memory_space<vmem>>, vector<1x1x32xf32>
    %291 = vector.shape_cast %290 : vector<1x1x32xf32> to vector<1x32xf32>
    %cst_204 = arith.constant dense<0.000000e+00> : vector<48xf32>
    %292 = vector.multi_reduction <add>, %287, %cst_204 [1] : vector<48x32xf32> to vector<48xf32>
    %293 = vector.shape_cast %292 : vector<48xf32> to vector<48x1xf32>
    %cst_205 = arith.constant 3.200000e+01 : f32
    %294 = vector.broadcast %cst_205 : f32 to vector<48x1xf32>
    %295 = arith.divf %293, %294 : vector<48x1xf32>
    %296 = vector.broadcast %295 : vector<48x1xf32> to vector<48x32xf32>
    %297 = arith.subf %287, %296 : vector<48x32xf32>
    %298 = arith.mulf %297, %297 : vector<48x32xf32>
    %cst_206 = arith.constant dense<0.000000e+00> : vector<48xf32>
    %299 = vector.multi_reduction <add>, %298, %cst_206 [1] : vector<48x32xf32> to vector<48xf32>
    %300 = vector.shape_cast %299 : vector<48xf32> to vector<48x1xf32>
    %cst_207 = arith.constant 3.200000e+01 : f32
    %301 = vector.broadcast %cst_207 : f32 to vector<48x1xf32>
    %302 = arith.divf %300, %301 : vector<48x1xf32>
    %303 = vector.broadcast %295 : vector<48x1xf32> to vector<48x32xf32>
    %304 = arith.subf %287, %303 : vector<48x32xf32>
    %cst_208 = arith.constant 9.99999974E-6 : f32
    %305 = vector.broadcast %cst_208 : f32 to vector<48x1xf32>
    %306 = arith.addf %302, %305 : vector<48x1xf32>
    %307 = math.rsqrt %306 : vector<48x1xf32>
    %308 = vector.broadcast %307 : vector<48x1xf32> to vector<48x32xf32>
    %309 = arith.mulf %304, %308 : vector<48x32xf32>
    %310 = vector.broadcast %289 : vector<1x32xf32> to vector<48x32xf32>
    %311 = arith.mulf %309, %310 : vector<48x32xf32>
    %312 = vector.broadcast %291 : vector<1x32xf32> to vector<48x32xf32>
    %313 = arith.addf %311, %312 : vector<48x32xf32>
    %c0_209 = arith.constant 0 : index
    %c0_210 = arith.constant 0 : index
    %c0_211 = arith.constant 0 : index
    %314 = vector.load %arg16[%c0_209, %c0_210, %c0_211] : memref<2x32x64xf32, #tpu.memory_space<vmem>>, vector<1x32x64xf32>
    %315 = vector.shape_cast %314 : vector<1x32x64xf32> to vector<32x64xf32>
    %cst_212 = arith.constant dense<0.000000e+00> : vector<48x64xf32>
    %316 = tpu.matmul %313, %315, %cst_212 {dimension_numbers = #tpu.dot_dimension_numbers<[1], [0], [0], [1], [0, 0, 1, 1], [], []>} : vector<48x32xf32>, vector<32x64xf32>, vector<48x64xf32> -> vector<48x64xf32>
    %c0_213 = arith.constant 0 : index
    %c0_214 = arith.constant 0 : index
    %c0_215 = arith.constant 0 : index
    %317 = vector.load %arg17[%c0_213, %c0_214, %c0_215] : memref<2x1x64xf32, #tpu.memory_space<vmem>>, vector<1x1x64xf32>
    %318 = vector.shape_cast %317 : vector<1x1x64xf32> to vector<1x64xf32>
    %319 = vector.broadcast %318 : vector<1x64xf32> to vector<48x64xf32>
    %320 = arith.addf %316, %319 : vector<48x64xf32>
    %cst_216 = arith.constant 5.000000e-01 : f32
    %321 = vector.broadcast %cst_216 : f32 to vector<48x64xf32>
    %322 = arith.mulf %321, %320 : vector<48x64xf32>
    %cst_217 = arith.constant 0.707106769 : f32
    %323 = vector.broadcast %cst_217 : f32 to vector<48x64xf32>
    %324 = arith.mulf %320, %323 : vector<48x64xf32>
    %325 = math.erf %324 : vector<48x64xf32>
    %cst_218 = arith.constant 1.000000e+00 : f32
    %326 = vector.broadcast %cst_218 : f32 to vector<48x64xf32>
    %327 = arith.addf %326, %325 : vector<48x64xf32>
    %328 = arith.mulf %322, %327 : vector<48x64xf32>
    %c0_219 = arith.constant 0 : index
    %c0_220 = arith.constant 0 : index
    %c0_221 = arith.constant 0 : index
    %329 = vector.load %arg18[%c0_219, %c0_220, %c0_221] : memref<2x64x32xf32, #tpu.memory_space<vmem>>, vector<1x64x32xf32>
    %330 = vector.shape_cast %329 : vector<1x64x32xf32> to vector<64x32xf32>
    %cst_222 = arith.constant dense<0.000000e+00> : vector<48x32xf32>
    %331 = tpu.matmul %328, %330, %cst_222 {dimension_numbers = #tpu.dot_dimension_numbers<[1], [0], [0], [1], [0, 0, 1, 1], [], []>} : vector<48x64xf32>, vector<64x32xf32>, vector<48x32xf32> -> vector<48x32xf32>
    %332 = arith.addf %287, %331 : vector<48x32xf32>
    %c0_223 = arith.constant 0 : index
    %c0_224 = arith.constant 0 : index
    %c0_225 = arith.constant 0 : index
    %333 = vector.load %arg19[%c0_223, %c0_224, %c0_225] : memref<2x1x32xf32, #tpu.memory_space<vmem>>, vector<1x1x32xf32>
    %334 = vector.shape_cast %333 : vector<1x1x32xf32> to vector<1x32xf32>
    %335 = vector.broadcast %334 : vector<1x32xf32> to vector<48x32xf32>
    %336 = arith.addf %332, %335 : vector<48x32xf32>
    %c1_226 = arith.constant 1 : index
    %c0_227 = arith.constant 0 : index
    %c0_228 = arith.constant 0 : index
    %337 = vector.load %arg4[%c1_226, %c0_227, %c0_228] : memref<2x1x32xf32, #tpu.memory_space<vmem>>, vector<1x1x32xf32>
    %338 = vector.shape_cast %337 : vector<1x1x32xf32> to vector<1x32xf32>
    %c1_229 = arith.constant 1 : index
    %c0_230 = arith.constant 0 : index
    %c0_231 = arith.constant 0 : index
    %339 = vector.load %arg5[%c1_229, %c0_230, %c0_231] : memref<2x1x32xf32, #tpu.memory_space<vmem>>, vector<1x1x32xf32>
    %340 = vector.shape_cast %339 : vector<1x1x32xf32> to vector<1x32xf32>
    %cst_232 = arith.constant dense<0.000000e+00> : vector<48xf32>
    %341 = vector.multi_reduction <add>, %336, %cst_232 [1] : vector<48x32xf32> to vector<48xf32>
    %342 = vector.shape_cast %341 : vector<48xf32> to vector<48x1xf32>
    %cst_233 = arith.constant 3.200000e+01 : f32
    %343 = vector.broadcast %cst_233 : f32 to vector<48x1xf32>
    %344 = arith.divf %342, %343 : vector<48x1xf32>
    %345 = vector.broadcast %344 : vector<48x1xf32> to vector<48x32xf32>
    %346 = arith.subf %336, %345 : vector<48x32xf32>
    %347 = arith.mulf %346, %346 : vector<48x32xf32>
    %cst_234 = arith.constant dense<0.000000e+00> : vector<48xf32>
    %348 = vector.multi_reduction <add>, %347, %cst_234 [1] : vector<48x32xf32> to vector<48xf32>
    %349 = vector.shape_cast %348 : vector<48xf32> to vector<48x1xf32>
    %cst_235 = arith.constant 3.200000e+01 : f32
    %350 = vector.broadcast %cst_235 : f32 to vector<48x1xf32>
    %351 = arith.divf %349, %350 : vector<48x1xf32>
    %352 = vector.broadcast %344 : vector<48x1xf32> to vector<48x32xf32>
    %353 = arith.subf %336, %352 : vector<48x32xf32>
    %cst_236 = arith.constant 9.99999974E-6 : f32
    %354 = vector.broadcast %cst_236 : f32 to vector<48x1xf32>
    %355 = arith.addf %351, %354 : vector<48x1xf32>
    %356 = math.rsqrt %355 : vector<48x1xf32>
    %357 = vector.broadcast %356 : vector<48x1xf32> to vector<48x32xf32>
    %358 = arith.mulf %353, %357 : vector<48x32xf32>
    %359 = vector.broadcast %338 : vector<1x32xf32> to vector<48x32xf32>
    %360 = arith.mulf %358, %359 : vector<48x32xf32>
    %361 = vector.broadcast %340 : vector<1x32xf32> to vector<48x32xf32>
    %362 = arith.addf %360, %361 : vector<48x32xf32>
    %c1_237 = arith.constant 1 : index
    %c0_238 = arith.constant 0 : index
    %c0_239 = arith.constant 0 : index
    %c0_240 = arith.constant 0 : index
    %363 = vector.load %arg6[%c1_237, %c0_238, %c0_239, %c0_240] : memref<2x4x32x8xf32, #tpu.memory_space<vmem>>, vector<1x1x32x8xf32>
    %364 = vector.shape_cast %363 : vector<1x1x32x8xf32> to vector<32x8xf32>
    %cst_241 = arith.constant dense<0.000000e+00> : vector<48x8xf32>
    %365 = tpu.matmul %362, %364, %cst_241 {dimension_numbers = #tpu.dot_dimension_numbers<[1], [0], [0], [1], [0, 0, 1, 1], [], []>} : vector<48x32xf32>, vector<32x8xf32>, vector<48x8xf32> -> vector<48x8xf32>
    %c1_242 = arith.constant 1 : index
    %c0_243 = arith.constant 0 : index
    %c0_244 = arith.constant 0 : index
    %c0_245 = arith.constant 0 : index
    %366 = vector.load %arg7[%c1_242, %c0_243, %c0_244, %c0_245] : memref<2x4x1x8xf32, #tpu.memory_space<vmem>>, vector<1x1x1x8xf32>
    %367 = vector.shape_cast %366 : vector<1x1x1x8xf32> to vector<1x8xf32>
    %368 = vector.broadcast %367 : vector<1x8xf32> to vector<48x8xf32>
    %369 = arith.addf %365, %368 : vector<48x8xf32>
    %c1_246 = arith.constant 1 : index
    %c0_247 = arith.constant 0 : index
    %c0_248 = arith.constant 0 : index
    %c0_249 = arith.constant 0 : index
    %370 = vector.load %arg8[%c1_246, %c0_247, %c0_248, %c0_249] : memref<2x4x32x8xf32, #tpu.memory_space<vmem>>, vector<1x1x32x8xf32>
    %371 = vector.shape_cast %370 : vector<1x1x32x8xf32> to vector<32x8xf32>
    %cst_250 = arith.constant dense<0.000000e+00> : vector<48x8xf32>
    %372 = tpu.matmul %362, %371, %cst_250 {dimension_numbers = #tpu.dot_dimension_numbers<[1], [0], [0], [1], [0, 0, 1, 1], [], []>} : vector<48x32xf32>, vector<32x8xf32>, vector<48x8xf32> -> vector<48x8xf32>
    %c1_251 = arith.constant 1 : index
    %c0_252 = arith.constant 0 : index
    %c0_253 = arith.constant 0 : index
    %c0_254 = arith.constant 0 : index
    %373 = vector.load %arg9[%c1_251, %c0_252, %c0_253, %c0_254] : memref<2x4x1x8xf32, #tpu.memory_space<vmem>>, vector<1x1x1x8xf32>
    %374 = vector.shape_cast %373 : vector<1x1x1x8xf32> to vector<1x8xf32>
    %375 = vector.broadcast %374 : vector<1x8xf32> to vector<48x8xf32>
    %376 = arith.addf %372, %375 : vector<48x8xf32>
    %c1_255 = arith.constant 1 : index
    %c0_256 = arith.constant 0 : index
    %c0_257 = arith.constant 0 : index
    %c0_258 = arith.constant 0 : index
    %377 = vector.load %arg10[%c1_255, %c0_256, %c0_257, %c0_258] : memref<2x4x32x8xf32, #tpu.memory_space<vmem>>, vector<1x1x32x8xf32>
    %378 = vector.shape_cast %377 : vector<1x1x32x8xf32> to vector<32x8xf32>
    %cst_259 = arith.constant dense<0.000000e+00> : vector<48x8xf32>
    %379 = tpu.matmul %362, %378, %cst_259 {dimension_numbers = #tpu.dot_dimension_numbers<[1], [0], [0], [1], [0, 0, 1, 1], [], []>} : vector<48x32xf32>, vector<32x8xf32>, vector<48x8xf32> -> vector<48x8xf32>
    %c1_260 = arith.constant 1 : index
    %c0_261 = arith.constant 0 : index
    %c0_262 = arith.constant 0 : index
    %c0_263 = arith.constant 0 : index
    %380 = vector.load %arg11[%c1_260, %c0_261, %c0_262, %c0_263] : memref<2x4x1x8xf32, #tpu.memory_space<vmem>>, vector<1x1x1x8xf32>
    %381 = vector.shape_cast %380 : vector<1x1x1x8xf32> to vector<1x8xf32>
    %382 = vector.broadcast %381 : vector<1x8xf32> to vector<48x8xf32>
    %383 = arith.addf %379, %382 : vector<48x8xf32>
    %384 = vector.extract_strided_slice %369 {offsets = [0, 0], sizes = [24, 8], strides = [1, 1]} : vector<48x8xf32> to vector<24x8xf32>
    %385 = vector.extract_strided_slice %376 {offsets = [0, 0], sizes = [24, 8], strides = [1, 1]} : vector<48x8xf32> to vector<24x8xf32>
    %cst_264 = arith.constant dense<0.000000e+00> : vector<24x24xf32>
    %386 = tpu.matmul %384, %385, %cst_264 {dimension_numbers = #tpu.dot_dimension_numbers<[1], [1], [0], [0], [0, 0, 1, 0], [], []>} : vector<24x8xf32>, vector<24x8xf32>, vector<24x24xf32> -> vector<24x24xf32>
    %387 = vector.broadcast %5 : vector<1x24xf32> to vector<24x24xf32>
    %388 = arith.addf %386, %387 : vector<24x24xf32>
    %cst_265 = arith.constant dense<0xFF800000> : vector<24xf32>
    %389 = vector.multi_reduction <maximumf>, %388, %cst_265 [1] : vector<24x24xf32> to vector<24xf32>
    %390 = vector.shape_cast %389 : vector<24xf32> to vector<24x1xf32>
    %391 = vector.broadcast %390 : vector<24x1xf32> to vector<24x24xf32>
    %392 = arith.subf %388, %391 : vector<24x24xf32>
    %393 = math.exp %392 : vector<24x24xf32>
    %cst_266 = arith.constant dense<0.000000e+00> : vector<24xf32>
    %394 = vector.multi_reduction <add>, %393, %cst_266 [1] : vector<24x24xf32> to vector<24xf32>
    %395 = vector.shape_cast %394 : vector<24xf32> to vector<24x1xf32>
    %396 = tpu.reciprocal %395 {approx = true} : vector<24x1xf32> -> vector<24x1xf32>
    %397 = vector.broadcast %396 : vector<24x1xf32> to vector<24x24xf32>
    %398 = arith.mulf %393, %397 : vector<24x24xf32>
    %399 = vector.extract_strided_slice %383 {offsets = [0, 0], sizes = [24, 8], strides = [1, 1]} : vector<48x8xf32> to vector<24x8xf32>
    %cst_267 = arith.constant dense<0.000000e+00> : vector<24x8xf32>
    %400 = tpu.matmul %398, %399, %cst_267 {dimension_numbers = #tpu.dot_dimension_numbers<[1], [0], [0], [1], [0, 0, 1, 1], [], []>} : vector<24x24xf32>, vector<24x8xf32>, vector<24x8xf32> -> vector<24x8xf32>
    %c1_268 = arith.constant 1 : index
    %c0_269 = arith.constant 0 : index
    %c0_270 = arith.constant 0 : index
    %c0_271 = arith.constant 0 : index
    %401 = vector.load %arg12[%c1_268, %c0_269, %c0_270, %c0_271] : memref<2x4x8x32xf32, #tpu.memory_space<vmem>>, vector<1x1x8x32xf32>
    %402 = vector.shape_cast %401 : vector<1x1x8x32xf32> to vector<8x32xf32>
    %cst_272 = arith.constant dense<0.000000e+00> : vector<24x32xf32>
    %403 = tpu.matmul %400, %402, %cst_272 {dimension_numbers = #tpu.dot_dimension_numbers<[1], [0], [0], [1], [0, 0, 1, 1], [], []>} : vector<24x8xf32>, vector<8x32xf32>, vector<24x32xf32> -> vector<24x32xf32>
    %404 = vector.extract_strided_slice %369 {offsets = [24, 0], sizes = [24, 8], strides = [1, 1]} : vector<48x8xf32> to vector<24x8xf32>
    %405 = vector.extract_strided_slice %376 {offsets = [24, 0], sizes = [24, 8], strides = [1, 1]} : vector<48x8xf32> to vector<24x8xf32>
    %cst_273 = arith.constant dense<0.000000e+00> : vector<24x24xf32>
    %406 = tpu.matmul %404, %405, %cst_273 {dimension_numbers = #tpu.dot_dimension_numbers<[1], [1], [0], [0], [0, 0, 1, 0], [], []>} : vector<24x8xf32>, vector<24x8xf32>, vector<24x24xf32> -> vector<24x24xf32>
    %407 = vector.broadcast %5 : vector<1x24xf32> to vector<24x24xf32>
    %408 = arith.addf %406, %407 : vector<24x24xf32>
    %cst_274 = arith.constant dense<0xFF800000> : vector<24xf32>
    %409 = vector.multi_reduction <maximumf>, %408, %cst_274 [1] : vector<24x24xf32> to vector<24xf32>
    %410 = vector.shape_cast %409 : vector<24xf32> to vector<24x1xf32>
    %411 = vector.broadcast %410 : vector<24x1xf32> to vector<24x24xf32>
    %412 = arith.subf %408, %411 : vector<24x24xf32>
    %413 = math.exp %412 : vector<24x24xf32>
    %cst_275 = arith.constant dense<0.000000e+00> : vector<24xf32>
    %414 = vector.multi_reduction <add>, %413, %cst_275 [1] : vector<24x24xf32> to vector<24xf32>
    %415 = vector.shape_cast %414 : vector<24xf32> to vector<24x1xf32>
    %416 = tpu.reciprocal %415 {approx = true} : vector<24x1xf32> -> vector<24x1xf32>
    %417 = vector.broadcast %416 : vector<24x1xf32> to vector<24x24xf32>
    %418 = arith.mulf %413, %417 : vector<24x24xf32>
    %419 = vector.extract_strided_slice %383 {offsets = [24, 0], sizes = [24, 8], strides = [1, 1]} : vector<48x8xf32> to vector<24x8xf32>
    %cst_276 = arith.constant dense<0.000000e+00> : vector<24x8xf32>
    %420 = tpu.matmul %418, %419, %cst_276 {dimension_numbers = #tpu.dot_dimension_numbers<[1], [0], [0], [1], [0, 0, 1, 1], [], []>} : vector<24x24xf32>, vector<24x8xf32>, vector<24x8xf32> -> vector<24x8xf32>
    %c1_277 = arith.constant 1 : index
    %c0_278 = arith.constant 0 : index
    %c0_279 = arith.constant 0 : index
    %c0_280 = arith.constant 0 : index
    %421 = vector.load %arg12[%c1_277, %c0_278, %c0_279, %c0_280] : memref<2x4x8x32xf32, #tpu.memory_space<vmem>>, vector<1x1x8x32xf32>
    %422 = vector.shape_cast %421 : vector<1x1x8x32xf32> to vector<8x32xf32>
    %cst_281 = arith.constant dense<0.000000e+00> : vector<24x32xf32>
    %423 = tpu.matmul %420, %422, %cst_281 {dimension_numbers = #tpu.dot_dimension_numbers<[1], [0], [0], [1], [0, 0, 1, 1], [], []>} : vector<24x8xf32>, vector<8x32xf32>, vector<24x32xf32> -> vector<24x32xf32>
    %c1_282 = arith.constant 1 : index
    %c1_283 = arith.constant 1 : index
    %c0_284 = arith.constant 0 : index
    %c0_285 = arith.constant 0 : index
    %424 = vector.load %arg6[%c1_282, %c1_283, %c0_284, %c0_285] : memref<2x4x32x8xf32, #tpu.memory_space<vmem>>, vector<1x1x32x8xf32>
    %425 = vector.shape_cast %424 : vector<1x1x32x8xf32> to vector<32x8xf32>
    %cst_286 = arith.constant dense<0.000000e+00> : vector<48x8xf32>
    %426 = tpu.matmul %362, %425, %cst_286 {dimension_numbers = #tpu.dot_dimension_numbers<[1], [0], [0], [1], [0, 0, 1, 1], [], []>} : vector<48x32xf32>, vector<32x8xf32>, vector<48x8xf32> -> vector<48x8xf32>
    %c1_287 = arith.constant 1 : index
    %c1_288 = arith.constant 1 : index
    %c0_289 = arith.constant 0 : index
    %c0_290 = arith.constant 0 : index
    %427 = vector.load %arg7[%c1_287, %c1_288, %c0_289, %c0_290] : memref<2x4x1x8xf32, #tpu.memory_space<vmem>>, vector<1x1x1x8xf32>
    %428 = vector.shape_cast %427 : vector<1x1x1x8xf32> to vector<1x8xf32>
    %429 = vector.broadcast %428 : vector<1x8xf32> to vector<48x8xf32>
    %430 = arith.addf %426, %429 : vector<48x8xf32>
    %c1_291 = arith.constant 1 : index
    %c1_292 = arith.constant 1 : index
    %c0_293 = arith.constant 0 : index
    %c0_294 = arith.constant 0 : index
    %431 = vector.load %arg8[%c1_291, %c1_292, %c0_293, %c0_294] : memref<2x4x32x8xf32, #tpu.memory_space<vmem>>, vector<1x1x32x8xf32>
    %432 = vector.shape_cast %431 : vector<1x1x32x8xf32> to vector<32x8xf32>
    %cst_295 = arith.constant dense<0.000000e+00> : vector<48x8xf32>
    %433 = tpu.matmul %362, %432, %cst_295 {dimension_numbers = #tpu.dot_dimension_numbers<[1], [0], [0], [1], [0, 0, 1, 1], [], []>} : vector<48x32xf32>, vector<32x8xf32>, vector<48x8xf32> -> vector<48x8xf32>
    %c1_296 = arith.constant 1 : index
    %c1_297 = arith.constant 1 : index
    %c0_298 = arith.constant 0 : index
    %c0_299 = arith.constant 0 : index
    %434 = vector.load %arg9[%c1_296, %c1_297, %c0_298, %c0_299] : memref<2x4x1x8xf32, #tpu.memory_space<vmem>>, vector<1x1x1x8xf32>
    %435 = vector.shape_cast %434 : vector<1x1x1x8xf32> to vector<1x8xf32>
    %436 = vector.broadcast %435 : vector<1x8xf32> to vector<48x8xf32>
    %437 = arith.addf %433, %436 : vector<48x8xf32>
    %c1_300 = arith.constant 1 : index
    %c1_301 = arith.constant 1 : index
    %c0_302 = arith.constant 0 : index
    %c0_303 = arith.constant 0 : index
    %438 = vector.load %arg10[%c1_300, %c1_301, %c0_302, %c0_303] : memref<2x4x32x8xf32, #tpu.memory_space<vmem>>, vector<1x1x32x8xf32>
    %439 = vector.shape_cast %438 : vector<1x1x32x8xf32> to vector<32x8xf32>
    %cst_304 = arith.constant dense<0.000000e+00> : vector<48x8xf32>
    %440 = tpu.matmul %362, %439, %cst_304 {dimension_numbers = #tpu.dot_dimension_numbers<[1], [0], [0], [1], [0, 0, 1, 1], [], []>} : vector<48x32xf32>, vector<32x8xf32>, vector<48x8xf32> -> vector<48x8xf32>
    %c1_305 = arith.constant 1 : index
    %c1_306 = arith.constant 1 : index
    %c0_307 = arith.constant 0 : index
    %c0_308 = arith.constant 0 : index
    %441 = vector.load %arg11[%c1_305, %c1_306, %c0_307, %c0_308] : memref<2x4x1x8xf32, #tpu.memory_space<vmem>>, vector<1x1x1x8xf32>
    %442 = vector.shape_cast %441 : vector<1x1x1x8xf32> to vector<1x8xf32>
    %443 = vector.broadcast %442 : vector<1x8xf32> to vector<48x8xf32>
    %444 = arith.addf %440, %443 : vector<48x8xf32>
    %445 = vector.extract_strided_slice %430 {offsets = [0, 0], sizes = [24, 8], strides = [1, 1]} : vector<48x8xf32> to vector<24x8xf32>
    %446 = vector.extract_strided_slice %437 {offsets = [0, 0], sizes = [24, 8], strides = [1, 1]} : vector<48x8xf32> to vector<24x8xf32>
    %cst_309 = arith.constant dense<0.000000e+00> : vector<24x24xf32>
    %447 = tpu.matmul %445, %446, %cst_309 {dimension_numbers = #tpu.dot_dimension_numbers<[1], [1], [0], [0], [0, 0, 1, 0], [], []>} : vector<24x8xf32>, vector<24x8xf32>, vector<24x24xf32> -> vector<24x24xf32>
    %448 = vector.broadcast %5 : vector<1x24xf32> to vector<24x24xf32>
    %449 = arith.addf %447, %448 : vector<24x24xf32>
    %cst_310 = arith.constant dense<0xFF800000> : vector<24xf32>
    %450 = vector.multi_reduction <maximumf>, %449, %cst_310 [1] : vector<24x24xf32> to vector<24xf32>
    %451 = vector.shape_cast %450 : vector<24xf32> to vector<24x1xf32>
    %452 = vector.broadcast %451 : vector<24x1xf32> to vector<24x24xf32>
    %453 = arith.subf %449, %452 : vector<24x24xf32>
    %454 = math.exp %453 : vector<24x24xf32>
    %cst_311 = arith.constant dense<0.000000e+00> : vector<24xf32>
    %455 = vector.multi_reduction <add>, %454, %cst_311 [1] : vector<24x24xf32> to vector<24xf32>
    %456 = vector.shape_cast %455 : vector<24xf32> to vector<24x1xf32>
    %457 = tpu.reciprocal %456 {approx = true} : vector<24x1xf32> -> vector<24x1xf32>
    %458 = vector.broadcast %457 : vector<24x1xf32> to vector<24x24xf32>
    %459 = arith.mulf %454, %458 : vector<24x24xf32>
    %460 = vector.extract_strided_slice %444 {offsets = [0, 0], sizes = [24, 8], strides = [1, 1]} : vector<48x8xf32> to vector<24x8xf32>
    %cst_312 = arith.constant dense<0.000000e+00> : vector<24x8xf32>
    %461 = tpu.matmul %459, %460, %cst_312 {dimension_numbers = #tpu.dot_dimension_numbers<[1], [0], [0], [1], [0, 0, 1, 1], [], []>} : vector<24x24xf32>, vector<24x8xf32>, vector<24x8xf32> -> vector<24x8xf32>
    %c1_313 = arith.constant 1 : index
    %c1_314 = arith.constant 1 : index
    %c0_315 = arith.constant 0 : index
    %c0_316 = arith.constant 0 : index
    %462 = vector.load %arg12[%c1_313, %c1_314, %c0_315, %c0_316] : memref<2x4x8x32xf32, #tpu.memory_space<vmem>>, vector<1x1x8x32xf32>
    %463 = vector.shape_cast %462 : vector<1x1x8x32xf32> to vector<8x32xf32>
    %cst_317 = arith.constant dense<0.000000e+00> : vector<24x32xf32>
    %464 = tpu.matmul %461, %463, %cst_317 {dimension_numbers = #tpu.dot_dimension_numbers<[1], [0], [0], [1], [0, 0, 1, 1], [], []>} : vector<24x8xf32>, vector<8x32xf32>, vector<24x32xf32> -> vector<24x32xf32>
    %465 = arith.addf %403, %464 : vector<24x32xf32>
    %466 = vector.extract_strided_slice %430 {offsets = [24, 0], sizes = [24, 8], strides = [1, 1]} : vector<48x8xf32> to vector<24x8xf32>
    %467 = vector.extract_strided_slice %437 {offsets = [24, 0], sizes = [24, 8], strides = [1, 1]} : vector<48x8xf32> to vector<24x8xf32>
    %cst_318 = arith.constant dense<0.000000e+00> : vector<24x24xf32>
    %468 = tpu.matmul %466, %467, %cst_318 {dimension_numbers = #tpu.dot_dimension_numbers<[1], [1], [0], [0], [0, 0, 1, 0], [], []>} : vector<24x8xf32>, vector<24x8xf32>, vector<24x24xf32> -> vector<24x24xf32>
    %469 = vector.broadcast %5 : vector<1x24xf32> to vector<24x24xf32>
    %470 = arith.addf %468, %469 : vector<24x24xf32>
    %cst_319 = arith.constant dense<0xFF800000> : vector<24xf32>
    %471 = vector.multi_reduction <maximumf>, %470, %cst_319 [1] : vector<24x24xf32> to vector<24xf32>
    %472 = vector.shape_cast %471 : vector<24xf32> to vector<24x1xf32>
    %473 = vector.broadcast %472 : vector<24x1xf32> to vector<24x24xf32>
    %474 = arith.subf %470, %473 : vector<24x24xf32>
    %475 = math.exp %474 : vector<24x24xf32>
    %cst_320 = arith.constant dense<0.000000e+00> : vector<24xf32>
    %476 = vector.multi_reduction <add>, %475, %cst_320 [1] : vector<24x24xf32> to vector<24xf32>
    %477 = vector.shape_cast %476 : vector<24xf32> to vector<24x1xf32>
    %478 = tpu.reciprocal %477 {approx = true} : vector<24x1xf32> -> vector<24x1xf32>
    %479 = vector.broadcast %478 : vector<24x1xf32> to vector<24x24xf32>
    %480 = arith.mulf %475, %479 : vector<24x24xf32>
    %481 = vector.extract_strided_slice %444 {offsets = [24, 0], sizes = [24, 8], strides = [1, 1]} : vector<48x8xf32> to vector<24x8xf32>
    %cst_321 = arith.constant dense<0.000000e+00> : vector<24x8xf32>
    %482 = tpu.matmul %480, %481, %cst_321 {dimension_numbers = #tpu.dot_dimension_numbers<[1], [0], [0], [1], [0, 0, 1, 1], [], []>} : vector<24x24xf32>, vector<24x8xf32>, vector<24x8xf32> -> vector<24x8xf32>
    %c1_322 = arith.constant 1 : index
    %c1_323 = arith.constant 1 : index
    %c0_324 = arith.constant 0 : index
    %c0_325 = arith.constant 0 : index
    %483 = vector.load %arg12[%c1_322, %c1_323, %c0_324, %c0_325] : memref<2x4x8x32xf32, #tpu.memory_space<vmem>>, vector<1x1x8x32xf32>
    %484 = vector.shape_cast %483 : vector<1x1x8x32xf32> to vector<8x32xf32>
    %cst_326 = arith.constant dense<0.000000e+00> : vector<24x32xf32>
    %485 = tpu.matmul %482, %484, %cst_326 {dimension_numbers = #tpu.dot_dimension_numbers<[1], [0], [0], [1], [0, 0, 1, 1], [], []>} : vector<24x8xf32>, vector<8x32xf32>, vector<24x32xf32> -> vector<24x32xf32>
    %486 = arith.addf %423, %485 : vector<24x32xf32>
    %c1_327 = arith.constant 1 : index
    %c2_328 = arith.constant 2 : index
    %c0_329 = arith.constant 0 : index
    %c0_330 = arith.constant 0 : index
    %487 = vector.load %arg6[%c1_327, %c2_328, %c0_329, %c0_330] : memref<2x4x32x8xf32, #tpu.memory_space<vmem>>, vector<1x1x32x8xf32>
    %488 = vector.shape_cast %487 : vector<1x1x32x8xf32> to vector<32x8xf32>
    %cst_331 = arith.constant dense<0.000000e+00> : vector<48x8xf32>
    %489 = tpu.matmul %362, %488, %cst_331 {dimension_numbers = #tpu.dot_dimension_numbers<[1], [0], [0], [1], [0, 0, 1, 1], [], []>} : vector<48x32xf32>, vector<32x8xf32>, vector<48x8xf32> -> vector<48x8xf32>
    %c1_332 = arith.constant 1 : index
    %c2_333 = arith.constant 2 : index
    %c0_334 = arith.constant 0 : index
    %c0_335 = arith.constant 0 : index
    %490 = vector.load %arg7[%c1_332, %c2_333, %c0_334, %c0_335] : memref<2x4x1x8xf32, #tpu.memory_space<vmem>>, vector<1x1x1x8xf32>
    %491 = vector.shape_cast %490 : vector<1x1x1x8xf32> to vector<1x8xf32>
    %492 = vector.broadcast %491 : vector<1x8xf32> to vector<48x8xf32>
    %493 = arith.addf %489, %492 : vector<48x8xf32>
    %c1_336 = arith.constant 1 : index
    %c2_337 = arith.constant 2 : index
    %c0_338 = arith.constant 0 : index
    %c0_339 = arith.constant 0 : index
    %494 = vector.load %arg8[%c1_336, %c2_337, %c0_338, %c0_339] : memref<2x4x32x8xf32, #tpu.memory_space<vmem>>, vector<1x1x32x8xf32>
    %495 = vector.shape_cast %494 : vector<1x1x32x8xf32> to vector<32x8xf32>
    %cst_340 = arith.constant dense<0.000000e+00> : vector<48x8xf32>
    %496 = tpu.matmul %362, %495, %cst_340 {dimension_numbers = #tpu.dot_dimension_numbers<[1], [0], [0], [1], [0, 0, 1, 1], [], []>} : vector<48x32xf32>, vector<32x8xf32>, vector<48x8xf32> -> vector<48x8xf32>
    %c1_341 = arith.constant 1 : index
    %c2_342 = arith.constant 2 : index
    %c0_343 = arith.constant 0 : index
    %c0_344 = arith.constant 0 : index
    %497 = vector.load %arg9[%c1_341, %c2_342, %c0_343, %c0_344] : memref<2x4x1x8xf32, #tpu.memory_space<vmem>>, vector<1x1x1x8xf32>
    %498 = vector.shape_cast %497 : vector<1x1x1x8xf32> to vector<1x8xf32>
    %499 = vector.broadcast %498 : vector<1x8xf32> to vector<48x8xf32>
    %500 = arith.addf %496, %499 : vector<48x8xf32>
    %c1_345 = arith.constant 1 : index
    %c2_346 = arith.constant 2 : index
    %c0_347 = arith.constant 0 : index
    %c0_348 = arith.constant 0 : index
    %501 = vector.load %arg10[%c1_345, %c2_346, %c0_347, %c0_348] : memref<2x4x32x8xf32, #tpu.memory_space<vmem>>, vector<1x1x32x8xf32>
    %502 = vector.shape_cast %501 : vector<1x1x32x8xf32> to vector<32x8xf32>
    %cst_349 = arith.constant dense<0.000000e+00> : vector<48x8xf32>
    %503 = tpu.matmul %362, %502, %cst_349 {dimension_numbers = #tpu.dot_dimension_numbers<[1], [0], [0], [1], [0, 0, 1, 1], [], []>} : vector<48x32xf32>, vector<32x8xf32>, vector<48x8xf32> -> vector<48x8xf32>
    %c1_350 = arith.constant 1 : index
    %c2_351 = arith.constant 2 : index
    %c0_352 = arith.constant 0 : index
    %c0_353 = arith.constant 0 : index
    %504 = vector.load %arg11[%c1_350, %c2_351, %c0_352, %c0_353] : memref<2x4x1x8xf32, #tpu.memory_space<vmem>>, vector<1x1x1x8xf32>
    %505 = vector.shape_cast %504 : vector<1x1x1x8xf32> to vector<1x8xf32>
    %506 = vector.broadcast %505 : vector<1x8xf32> to vector<48x8xf32>
    %507 = arith.addf %503, %506 : vector<48x8xf32>
    %508 = vector.extract_strided_slice %493 {offsets = [0, 0], sizes = [24, 8], strides = [1, 1]} : vector<48x8xf32> to vector<24x8xf32>
    %509 = vector.extract_strided_slice %500 {offsets = [0, 0], sizes = [24, 8], strides = [1, 1]} : vector<48x8xf32> to vector<24x8xf32>
    %cst_354 = arith.constant dense<0.000000e+00> : vector<24x24xf32>
    %510 = tpu.matmul %508, %509, %cst_354 {dimension_numbers = #tpu.dot_dimension_numbers<[1], [1], [0], [0], [0, 0, 1, 0], [], []>} : vector<24x8xf32>, vector<24x8xf32>, vector<24x24xf32> -> vector<24x24xf32>
    %511 = vector.broadcast %5 : vector<1x24xf32> to vector<24x24xf32>
    %512 = arith.addf %510, %511 : vector<24x24xf32>
    %cst_355 = arith.constant dense<0xFF800000> : vector<24xf32>
    %513 = vector.multi_reduction <maximumf>, %512, %cst_355 [1] : vector<24x24xf32> to vector<24xf32>
    %514 = vector.shape_cast %513 : vector<24xf32> to vector<24x1xf32>
    %515 = vector.broadcast %514 : vector<24x1xf32> to vector<24x24xf32>
    %516 = arith.subf %512, %515 : vector<24x24xf32>
    %517 = math.exp %516 : vector<24x24xf32>
    %cst_356 = arith.constant dense<0.000000e+00> : vector<24xf32>
    %518 = vector.multi_reduction <add>, %517, %cst_356 [1] : vector<24x24xf32> to vector<24xf32>
    %519 = vector.shape_cast %518 : vector<24xf32> to vector<24x1xf32>
    %520 = tpu.reciprocal %519 {approx = true} : vector<24x1xf32> -> vector<24x1xf32>
    %521 = vector.broadcast %520 : vector<24x1xf32> to vector<24x24xf32>
    %522 = arith.mulf %517, %521 : vector<24x24xf32>
    %523 = vector.extract_strided_slice %507 {offsets = [0, 0], sizes = [24, 8], strides = [1, 1]} : vector<48x8xf32> to vector<24x8xf32>
    %cst_357 = arith.constant dense<0.000000e+00> : vector<24x8xf32>
    %524 = tpu.matmul %522, %523, %cst_357 {dimension_numbers = #tpu.dot_dimension_numbers<[1], [0], [0], [1], [0, 0, 1, 1], [], []>} : vector<24x24xf32>, vector<24x8xf32>, vector<24x8xf32> -> vector<24x8xf32>
    %c1_358 = arith.constant 1 : index
    %c2_359 = arith.constant 2 : index
    %c0_360 = arith.constant 0 : index
    %c0_361 = arith.constant 0 : index
    %525 = vector.load %arg12[%c1_358, %c2_359, %c0_360, %c0_361] : memref<2x4x8x32xf32, #tpu.memory_space<vmem>>, vector<1x1x8x32xf32>
    %526 = vector.shape_cast %525 : vector<1x1x8x32xf32> to vector<8x32xf32>
    %cst_362 = arith.constant dense<0.000000e+00> : vector<24x32xf32>
    %527 = tpu.matmul %524, %526, %cst_362 {dimension_numbers = #tpu.dot_dimension_numbers<[1], [0], [0], [1], [0, 0, 1, 1], [], []>} : vector<24x8xf32>, vector<8x32xf32>, vector<24x32xf32> -> vector<24x32xf32>
    %528 = arith.addf %465, %527 : vector<24x32xf32>
    %529 = vector.extract_strided_slice %493 {offsets = [24, 0], sizes = [24, 8], strides = [1, 1]} : vector<48x8xf32> to vector<24x8xf32>
    %530 = vector.extract_strided_slice %500 {offsets = [24, 0], sizes = [24, 8], strides = [1, 1]} : vector<48x8xf32> to vector<24x8xf32>
    %cst_363 = arith.constant dense<0.000000e+00> : vector<24x24xf32>
    %531 = tpu.matmul %529, %530, %cst_363 {dimension_numbers = #tpu.dot_dimension_numbers<[1], [1], [0], [0], [0, 0, 1, 0], [], []>} : vector<24x8xf32>, vector<24x8xf32>, vector<24x24xf32> -> vector<24x24xf32>
    %532 = vector.broadcast %5 : vector<1x24xf32> to vector<24x24xf32>
    %533 = arith.addf %531, %532 : vector<24x24xf32>
    %cst_364 = arith.constant dense<0xFF800000> : vector<24xf32>
    %534 = vector.multi_reduction <maximumf>, %533, %cst_364 [1] : vector<24x24xf32> to vector<24xf32>
    %535 = vector.shape_cast %534 : vector<24xf32> to vector<24x1xf32>
    %536 = vector.broadcast %535 : vector<24x1xf32> to vector<24x24xf32>
    %537 = arith.subf %533, %536 : vector<24x24xf32>
    %538 = math.exp %537 : vector<24x24xf32>
    %cst_365 = arith.constant dense<0.000000e+00> : vector<24xf32>
    %539 = vector.multi_reduction <add>, %538, %cst_365 [1] : vector<24x24xf32> to vector<24xf32>
    %540 = vector.shape_cast %539 : vector<24xf32> to vector<24x1xf32>
    %541 = tpu.reciprocal %540 {approx = true} : vector<24x1xf32> -> vector<24x1xf32>
    %542 = vector.broadcast %541 : vector<24x1xf32> to vector<24x24xf32>
    %543 = arith.mulf %538, %542 : vector<24x24xf32>
    %544 = vector.extract_strided_slice %507 {offsets = [24, 0], sizes = [24, 8], strides = [1, 1]} : vector<48x8xf32> to vector<24x8xf32>
    %cst_366 = arith.constant dense<0.000000e+00> : vector<24x8xf32>
    %545 = tpu.matmul %543, %544, %cst_366 {dimension_numbers = #tpu.dot_dimension_numbers<[1], [0], [0], [1], [0, 0, 1, 1], [], []>} : vector<24x24xf32>, vector<24x8xf32>, vector<24x8xf32> -> vector<24x8xf32>
    %c1_367 = arith.constant 1 : index
    %c2_368 = arith.constant 2 : index
    %c0_369 = arith.constant 0 : index
    %c0_370 = arith.constant 0 : index
    %546 = vector.load %arg12[%c1_367, %c2_368, %c0_369, %c0_370] : memref<2x4x8x32xf32, #tpu.memory_space<vmem>>, vector<1x1x8x32xf32>
    %547 = vector.shape_cast %546 : vector<1x1x8x32xf32> to vector<8x32xf32>
    %cst_371 = arith.constant dense<0.000000e+00> : vector<24x32xf32>
    %548 = tpu.matmul %545, %547, %cst_371 {dimension_numbers = #tpu.dot_dimension_numbers<[1], [0], [0], [1], [0, 0, 1, 1], [], []>} : vector<24x8xf32>, vector<8x32xf32>, vector<24x32xf32> -> vector<24x32xf32>
    %549 = arith.addf %486, %548 : vector<24x32xf32>
    %c1_372 = arith.constant 1 : index
    %c3_373 = arith.constant 3 : index
    %c0_374 = arith.constant 0 : index
    %c0_375 = arith.constant 0 : index
    %550 = vector.load %arg6[%c1_372, %c3_373, %c0_374, %c0_375] : memref<2x4x32x8xf32, #tpu.memory_space<vmem>>, vector<1x1x32x8xf32>
    %551 = vector.shape_cast %550 : vector<1x1x32x8xf32> to vector<32x8xf32>
    %cst_376 = arith.constant dense<0.000000e+00> : vector<48x8xf32>
    %552 = tpu.matmul %362, %551, %cst_376 {dimension_numbers = #tpu.dot_dimension_numbers<[1], [0], [0], [1], [0, 0, 1, 1], [], []>} : vector<48x32xf32>, vector<32x8xf32>, vector<48x8xf32> -> vector<48x8xf32>
    %c1_377 = arith.constant 1 : index
    %c3_378 = arith.constant 3 : index
    %c0_379 = arith.constant 0 : index
    %c0_380 = arith.constant 0 : index
    %553 = vector.load %arg7[%c1_377, %c3_378, %c0_379, %c0_380] : memref<2x4x1x8xf32, #tpu.memory_space<vmem>>, vector<1x1x1x8xf32>
    %554 = vector.shape_cast %553 : vector<1x1x1x8xf32> to vector<1x8xf32>
    %555 = vector.broadcast %554 : vector<1x8xf32> to vector<48x8xf32>
    %556 = arith.addf %552, %555 : vector<48x8xf32>
    %c1_381 = arith.constant 1 : index
    %c3_382 = arith.constant 3 : index
    %c0_383 = arith.constant 0 : index
    %c0_384 = arith.constant 0 : index
    %557 = vector.load %arg8[%c1_381, %c3_382, %c0_383, %c0_384] : memref<2x4x32x8xf32, #tpu.memory_space<vmem>>, vector<1x1x32x8xf32>
    %558 = vector.shape_cast %557 : vector<1x1x32x8xf32> to vector<32x8xf32>
    %cst_385 = arith.constant dense<0.000000e+00> : vector<48x8xf32>
    %559 = tpu.matmul %362, %558, %cst_385 {dimension_numbers = #tpu.dot_dimension_numbers<[1], [0], [0], [1], [0, 0, 1, 1], [], []>} : vector<48x32xf32>, vector<32x8xf32>, vector<48x8xf32> -> vector<48x8xf32>
    %c1_386 = arith.constant 1 : index
    %c3_387 = arith.constant 3 : index
    %c0_388 = arith.constant 0 : index
    %c0_389 = arith.constant 0 : index
    %560 = vector.load %arg9[%c1_386, %c3_387, %c0_388, %c0_389] : memref<2x4x1x8xf32, #tpu.memory_space<vmem>>, vector<1x1x1x8xf32>
    %561 = vector.shape_cast %560 : vector<1x1x1x8xf32> to vector<1x8xf32>
    %562 = vector.broadcast %561 : vector<1x8xf32> to vector<48x8xf32>
    %563 = arith.addf %559, %562 : vector<48x8xf32>
    %c1_390 = arith.constant 1 : index
    %c3_391 = arith.constant 3 : index
    %c0_392 = arith.constant 0 : index
    %c0_393 = arith.constant 0 : index
    %564 = vector.load %arg10[%c1_390, %c3_391, %c0_392, %c0_393] : memref<2x4x32x8xf32, #tpu.memory_space<vmem>>, vector<1x1x32x8xf32>
    %565 = vector.shape_cast %564 : vector<1x1x32x8xf32> to vector<32x8xf32>
    %cst_394 = arith.constant dense<0.000000e+00> : vector<48x8xf32>
    %566 = tpu.matmul %362, %565, %cst_394 {dimension_numbers = #tpu.dot_dimension_numbers<[1], [0], [0], [1], [0, 0, 1, 1], [], []>} : vector<48x32xf32>, vector<32x8xf32>, vector<48x8xf32> -> vector<48x8xf32>
    %c1_395 = arith.constant 1 : index
    %c3_396 = arith.constant 3 : index
    %c0_397 = arith.constant 0 : index
    %c0_398 = arith.constant 0 : index
    %567 = vector.load %arg11[%c1_395, %c3_396, %c0_397, %c0_398] : memref<2x4x1x8xf32, #tpu.memory_space<vmem>>, vector<1x1x1x8xf32>
    %568 = vector.shape_cast %567 : vector<1x1x1x8xf32> to vector<1x8xf32>
    %569 = vector.broadcast %568 : vector<1x8xf32> to vector<48x8xf32>
    %570 = arith.addf %566, %569 : vector<48x8xf32>
    %571 = vector.extract_strided_slice %556 {offsets = [0, 0], sizes = [24, 8], strides = [1, 1]} : vector<48x8xf32> to vector<24x8xf32>
    %572 = vector.extract_strided_slice %563 {offsets = [0, 0], sizes = [24, 8], strides = [1, 1]} : vector<48x8xf32> to vector<24x8xf32>
    %cst_399 = arith.constant dense<0.000000e+00> : vector<24x24xf32>
    %573 = tpu.matmul %571, %572, %cst_399 {dimension_numbers = #tpu.dot_dimension_numbers<[1], [1], [0], [0], [0, 0, 1, 0], [], []>} : vector<24x8xf32>, vector<24x8xf32>, vector<24x24xf32> -> vector<24x24xf32>
    %574 = vector.broadcast %5 : vector<1x24xf32> to vector<24x24xf32>
    %575 = arith.addf %573, %574 : vector<24x24xf32>
    %cst_400 = arith.constant dense<0xFF800000> : vector<24xf32>
    %576 = vector.multi_reduction <maximumf>, %575, %cst_400 [1] : vector<24x24xf32> to vector<24xf32>
    %577 = vector.shape_cast %576 : vector<24xf32> to vector<24x1xf32>
    %578 = vector.broadcast %577 : vector<24x1xf32> to vector<24x24xf32>
    %579 = arith.subf %575, %578 : vector<24x24xf32>
    %580 = math.exp %579 : vector<24x24xf32>
    %cst_401 = arith.constant dense<0.000000e+00> : vector<24xf32>
    %581 = vector.multi_reduction <add>, %580, %cst_401 [1] : vector<24x24xf32> to vector<24xf32>
    %582 = vector.shape_cast %581 : vector<24xf32> to vector<24x1xf32>
    %583 = tpu.reciprocal %582 {approx = true} : vector<24x1xf32> -> vector<24x1xf32>
    %584 = vector.broadcast %583 : vector<24x1xf32> to vector<24x24xf32>
    %585 = arith.mulf %580, %584 : vector<24x24xf32>
    %586 = vector.extract_strided_slice %570 {offsets = [0, 0], sizes = [24, 8], strides = [1, 1]} : vector<48x8xf32> to vector<24x8xf32>
    %cst_402 = arith.constant dense<0.000000e+00> : vector<24x8xf32>
    %587 = tpu.matmul %585, %586, %cst_402 {dimension_numbers = #tpu.dot_dimension_numbers<[1], [0], [0], [1], [0, 0, 1, 1], [], []>} : vector<24x24xf32>, vector<24x8xf32>, vector<24x8xf32> -> vector<24x8xf32>
    %c1_403 = arith.constant 1 : index
    %c3_404 = arith.constant 3 : index
    %c0_405 = arith.constant 0 : index
    %c0_406 = arith.constant 0 : index
    %588 = vector.load %arg12[%c1_403, %c3_404, %c0_405, %c0_406] : memref<2x4x8x32xf32, #tpu.memory_space<vmem>>, vector<1x1x8x32xf32>
    %589 = vector.shape_cast %588 : vector<1x1x8x32xf32> to vector<8x32xf32>
    %cst_407 = arith.constant dense<0.000000e+00> : vector<24x32xf32>
    %590 = tpu.matmul %587, %589, %cst_407 {dimension_numbers = #tpu.dot_dimension_numbers<[1], [0], [0], [1], [0, 0, 1, 1], [], []>} : vector<24x8xf32>, vector<8x32xf32>, vector<24x32xf32> -> vector<24x32xf32>
    %591 = arith.addf %528, %590 : vector<24x32xf32>
    %592 = vector.extract_strided_slice %556 {offsets = [24, 0], sizes = [24, 8], strides = [1, 1]} : vector<48x8xf32> to vector<24x8xf32>
    %593 = vector.extract_strided_slice %563 {offsets = [24, 0], sizes = [24, 8], strides = [1, 1]} : vector<48x8xf32> to vector<24x8xf32>
    %cst_408 = arith.constant dense<0.000000e+00> : vector<24x24xf32>
    %594 = tpu.matmul %592, %593, %cst_408 {dimension_numbers = #tpu.dot_dimension_numbers<[1], [1], [0], [0], [0, 0, 1, 0], [], []>} : vector<24x8xf32>, vector<24x8xf32>, vector<24x24xf32> -> vector<24x24xf32>
    %595 = vector.broadcast %5 : vector<1x24xf32> to vector<24x24xf32>
    %596 = arith.addf %594, %595 : vector<24x24xf32>
    %cst_409 = arith.constant dense<0xFF800000> : vector<24xf32>
    %597 = vector.multi_reduction <maximumf>, %596, %cst_409 [1] : vector<24x24xf32> to vector<24xf32>
    %598 = vector.shape_cast %597 : vector<24xf32> to vector<24x1xf32>
    %599 = vector.broadcast %598 : vector<24x1xf32> to vector<24x24xf32>
    %600 = arith.subf %596, %599 : vector<24x24xf32>
    %601 = math.exp %600 : vector<24x24xf32>
    %cst_410 = arith.constant dense<0.000000e+00> : vector<24xf32>
    %602 = vector.multi_reduction <add>, %601, %cst_410 [1] : vector<24x24xf32> to vector<24xf32>
    %603 = vector.shape_cast %602 : vector<24xf32> to vector<24x1xf32>
    %604 = tpu.reciprocal %603 {approx = true} : vector<24x1xf32> -> vector<24x1xf32>
    %605 = vector.broadcast %604 : vector<24x1xf32> to vector<24x24xf32>
    %606 = arith.mulf %601, %605 : vector<24x24xf32>
    %607 = vector.extract_strided_slice %570 {offsets = [24, 0], sizes = [24, 8], strides = [1, 1]} : vector<48x8xf32> to vector<24x8xf32>
    %cst_411 = arith.constant dense<0.000000e+00> : vector<24x8xf32>
    %608 = tpu.matmul %606, %607, %cst_411 {dimension_numbers = #tpu.dot_dimension_numbers<[1], [0], [0], [1], [0, 0, 1, 1], [], []>} : vector<24x24xf32>, vector<24x8xf32>, vector<24x8xf32> -> vector<24x8xf32>
    %c1_412 = arith.constant 1 : index
    %c3_413 = arith.constant 3 : index
    %c0_414 = arith.constant 0 : index
    %c0_415 = arith.constant 0 : index
    %609 = vector.load %arg12[%c1_412, %c3_413, %c0_414, %c0_415] : memref<2x4x8x32xf32, #tpu.memory_space<vmem>>, vector<1x1x8x32xf32>
    %610 = vector.shape_cast %609 : vector<1x1x8x32xf32> to vector<8x32xf32>
    %cst_416 = arith.constant dense<0.000000e+00> : vector<24x32xf32>
    %611 = tpu.matmul %608, %610, %cst_416 {dimension_numbers = #tpu.dot_dimension_numbers<[1], [0], [0], [1], [0, 0, 1, 1], [], []>} : vector<24x8xf32>, vector<8x32xf32>, vector<24x32xf32> -> vector<24x32xf32>
    %612 = arith.addf %549, %611 : vector<24x32xf32>
    %613 = tpu.concatenate %591, %612 in 0 : vector<24x32xf32>, vector<24x32xf32> -> vector<48x32xf32>
    %614 = arith.addf %336, %613 : vector<48x32xf32>
    %c1_417 = arith.constant 1 : index
    %c0_418 = arith.constant 0 : index
    %c0_419 = arith.constant 0 : index
    %615 = vector.load %arg13[%c1_417, %c0_418, %c0_419] : memref<2x1x32xf32, #tpu.memory_space<vmem>>, vector<1x1x32xf32>
    %616 = vector.shape_cast %615 : vector<1x1x32xf32> to vector<1x32xf32>
    %617 = vector.broadcast %616 : vector<1x32xf32> to vector<48x32xf32>
    %618 = arith.addf %614, %617 : vector<48x32xf32>
    %c1_420 = arith.constant 1 : index
    %c0_421 = arith.constant 0 : index
    %c0_422 = arith.constant 0 : index
    %619 = vector.load %arg14[%c1_420, %c0_421, %c0_422] : memref<2x1x32xf32, #tpu.memory_space<vmem>>, vector<1x1x32xf32>
    %620 = vector.shape_cast %619 : vector<1x1x32xf32> to vector<1x32xf32>
    %c1_423 = arith.constant 1 : index
    %c0_424 = arith.constant 0 : index
    %c0_425 = arith.constant 0 : index
    %621 = vector.load %arg15[%c1_423, %c0_424, %c0_425] : memref<2x1x32xf32, #tpu.memory_space<vmem>>, vector<1x1x32xf32>
    %622 = vector.shape_cast %621 : vector<1x1x32xf32> to vector<1x32xf32>
    %cst_426 = arith.constant dense<0.000000e+00> : vector<48xf32>
    %623 = vector.multi_reduction <add>, %618, %cst_426 [1] : vector<48x32xf32> to vector<48xf32>
    %624 = vector.shape_cast %623 : vector<48xf32> to vector<48x1xf32>
    %cst_427 = arith.constant 3.200000e+01 : f32
    %625 = vector.broadcast %cst_427 : f32 to vector<48x1xf32>
    %626 = arith.divf %624, %625 : vector<48x1xf32>
    %627 = vector.broadcast %626 : vector<48x1xf32> to vector<48x32xf32>
    %628 = arith.subf %618, %627 : vector<48x32xf32>
    %629 = arith.mulf %628, %628 : vector<48x32xf32>
    %cst_428 = arith.constant dense<0.000000e+00> : vector<48xf32>
    %630 = vector.multi_reduction <add>, %629, %cst_428 [1] : vector<48x32xf32> to vector<48xf32>
    %631 = vector.shape_cast %630 : vector<48xf32> to vector<48x1xf32>
    %cst_429 = arith.constant 3.200000e+01 : f32
    %632 = vector.broadcast %cst_429 : f32 to vector<48x1xf32>
    %633 = arith.divf %631, %632 : vector<48x1xf32>
    %634 = vector.broadcast %626 : vector<48x1xf32> to vector<48x32xf32>
    %635 = arith.subf %618, %634 : vector<48x32xf32>
    %cst_430 = arith.constant 9.99999974E-6 : f32
    %636 = vector.broadcast %cst_430 : f32 to vector<48x1xf32>
    %637 = arith.addf %633, %636 : vector<48x1xf32>
    %638 = math.rsqrt %637 : vector<48x1xf32>
    %639 = vector.broadcast %638 : vector<48x1xf32> to vector<48x32xf32>
    %640 = arith.mulf %635, %639 : vector<48x32xf32>
    %641 = vector.broadcast %620 : vector<1x32xf32> to vector<48x32xf32>
    %642 = arith.mulf %640, %641 : vector<48x32xf32>
    %643 = vector.broadcast %622 : vector<1x32xf32> to vector<48x32xf32>
    %644 = arith.addf %642, %643 : vector<48x32xf32>
    %c1_431 = arith.constant 1 : index
    %c0_432 = arith.constant 0 : index
    %c0_433 = arith.constant 0 : index
    %645 = vector.load %arg16[%c1_431, %c0_432, %c0_433] : memref<2x32x64xf32, #tpu.memory_space<vmem>>, vector<1x32x64xf32>
    %646 = vector.shape_cast %645 : vector<1x32x64xf32> to vector<32x64xf32>
    %cst_434 = arith.constant dense<0.000000e+00> : vector<48x64xf32>
    %647 = tpu.matmul %644, %646, %cst_434 {dimension_numbers = #tpu.dot_dimension_numbers<[1], [0], [0], [1], [0, 0, 1, 1], [], []>} : vector<48x32xf32>, vector<32x64xf32>, vector<48x64xf32> -> vector<48x64xf32>
    %c1_435 = arith.constant 1 : index
    %c0_436 = arith.constant 0 : index
    %c0_437 = arith.constant 0 : index
    %648 = vector.load %arg17[%c1_435, %c0_436, %c0_437] : memref<2x1x64xf32, #tpu.memory_space<vmem>>, vector<1x1x64xf32>
    %649 = vector.shape_cast %648 : vector<1x1x64xf32> to vector<1x64xf32>
    %650 = vector.broadcast %649 : vector<1x64xf32> to vector<48x64xf32>
    %651 = arith.addf %647, %650 : vector<48x64xf32>
    %cst_438 = arith.constant 5.000000e-01 : f32
    %652 = vector.broadcast %cst_438 : f32 to vector<48x64xf32>
    %653 = arith.mulf %652, %651 : vector<48x64xf32>
    %cst_439 = arith.constant 0.707106769 : f32
    %654 = vector.broadcast %cst_439 : f32 to vector<48x64xf32>
    %655 = arith.mulf %651, %654 : vector<48x64xf32>
    %656 = math.erf %655 : vector<48x64xf32>
    %cst_440 = arith.constant 1.000000e+00 : f32
    %657 = vector.broadcast %cst_440 : f32 to vector<48x64xf32>
    %658 = arith.addf %657, %656 : vector<48x64xf32>
    %659 = arith.mulf %653, %658 : vector<48x64xf32>
    %c1_441 = arith.constant 1 : index
    %c0_442 = arith.constant 0 : index
    %c0_443 = arith.constant 0 : index
    %660 = vector.load %arg18[%c1_441, %c0_442, %c0_443] : memref<2x64x32xf32, #tpu.memory_space<vmem>>, vector<1x64x32xf32>
    %661 = vector.shape_cast %660 : vector<1x64x32xf32> to vector<64x32xf32>
    %cst_444 = arith.constant dense<0.000000e+00> : vector<48x32xf32>
    %662 = tpu.matmul %659, %661, %cst_444 {dimension_numbers = #tpu.dot_dimension_numbers<[1], [0], [0], [1], [0, 0, 1, 1], [], []>} : vector<48x64xf32>, vector<64x32xf32>, vector<48x32xf32> -> vector<48x32xf32>
    %663 = arith.addf %618, %662 : vector<48x32xf32>
    %c1_445 = arith.constant 1 : index
    %c0_446 = arith.constant 0 : index
    %c0_447 = arith.constant 0 : index
    %664 = vector.load %arg19[%c1_445, %c0_446, %c0_447] : memref<2x1x32xf32, #tpu.memory_space<vmem>>, vector<1x1x32xf32>
    %665 = vector.shape_cast %664 : vector<1x1x32xf32> to vector<1x32xf32>
    %666 = vector.broadcast %665 : vector<1x32xf32> to vector<48x32xf32>
    %667 = arith.addf %663, %666 : vector<48x32xf32>
    %c0_448 = arith.constant 0 : index
    %c0_449 = arith.constant 0 : index
    %668 = vector.load %arg26[%c0_448, %c0_449] : memref<48x32xf32, #tpu.memory_space<vmem>>, vector<48x32xf32>
    tpu.vector_store %arg26[%c0_448, %c0_449], %667 {strides = array<i32>} : memref<48x32xf32, #tpu.memory_space<vmem>>, vector<48x32xf32>,
    %669 = vector.extract_strided_slice %667 {offsets = [0, 0], sizes = [1, 32], strides = [1, 1]} : vector<48x32xf32> to vector<1x32xf32>
    %670 = vector.extract_strided_slice %667 {offsets = [24, 0], sizes = [1, 32], strides = [1, 1]} : vector<48x32xf32> to vector<1x32xf32>
    %671 = tpu.concatenate %669, %670 in 0 : vector<1x32xf32>, vector<1x32xf32> -> vector<2x32xf32>
    %c0_450 = arith.constant 0 : index
    %c0_451 = arith.constant 0 : index
    %672 = vector.load %arg20[%c0_450, %c0_451] : memref<1x32xf32, #tpu.memory_space<vmem>>, vector<1x32xf32>
    %c0_452 = arith.constant 0 : index
    %c0_453 = arith.constant 0 : index
    %673 = vector.load %arg21[%c0_452, %c0_453] : memref<1x32xf32, #tpu.memory_space<vmem>>, vector<1x32xf32>
    %cst_454 = arith.constant dense<0.000000e+00> : vector<2xf32>
    %674 = vector.multi_reduction <add>, %671, %cst_454 [1] : vector<2x32xf32> to vector<2xf32>
    %675 = vector.shape_cast %674 : vector<2xf32> to vector<2x1xf32>
    %cst_455 = arith.constant 3.200000e+01 : f32
    %676 = vector.broadcast %cst_455 : f32 to vector<2x1xf32>
    %677 = arith.divf %675, %676 : vector<2x1xf32>
    %678 = vector.broadcast %677 : vector<2x1xf32> to vector<2x32xf32>
    %679 = arith.subf %671, %678 : vector<2x32xf32>
    %680 = arith.mulf %679, %679 : vector<2x32xf32>
    %cst_456 = arith.constant dense<0.000000e+00> : vector<2xf32>
    %681 = vector.multi_reduction <add>, %680, %cst_456 [1] : vector<2x32xf32> to vector<2xf32>
    %682 = vector.shape_cast %681 : vector<2xf32> to vector<2x1xf32>
    %cst_457 = arith.constant 3.200000e+01 : f32
    %683 = vector.broadcast %cst_457 : f32 to vector<2x1xf32>
    %684 = arith.divf %682, %683 : vector<2x1xf32>
    %685 = vector.broadcast %677 : vector<2x1xf32> to vector<2x32xf32>
    %686 = arith.subf %671, %685 : vector<2x32xf32>
    %cst_458 = arith.constant 9.99999974E-6 : f32
    %687 = vector.broadcast %cst_458 : f32 to vector<2x1xf32>
    %688 = arith.addf %684, %687 : vector<2x1xf32>
    %689 = math.rsqrt %688 : vector<2x1xf32>
    %690 = vector.broadcast %689 : vector<2x1xf32> to vector<2x32xf32>
    %691 = arith.mulf %686, %690 : vector<2x32xf32>
    %692 = vector.broadcast %672 : vector<1x32xf32> to vector<2x32xf32>
    %693 = arith.mulf %691, %692 : vector<2x32xf32>
    %694 = vector.broadcast %673 : vector<1x32xf32> to vector<2x32xf32>
    %695 = arith.addf %693, %694 : vector<2x32xf32>
    %c0_459 = arith.constant 0 : index
    %c0_460 = arith.constant 0 : index
    %696 = vector.load %arg22[%c0_459, %c0_460] : memref<32x24xf32, #tpu.memory_space<vmem>>, vector<32x24xf32>
    %cst_461 = arith.constant dense<0.000000e+00> : vector<2x24xf32>
    %697 = tpu.matmul %695, %696, %cst_461 {dimension_numbers = #tpu.dot_dimension_numbers<[1], [0], [0], [1], [0, 0, 1, 1], [], []>} : vector<2x32xf32>, vector<32x24xf32>, vector<2x24xf32> -> vector<2x24xf32>
    %c0_462 = arith.constant 0 : index
    %c0_463 = arith.constant 0 : index
    %698 = vector.load %arg23[%c0_462, %c0_463] : memref<1x24xf32, #tpu.memory_space<vmem>>, vector<1x24xf32>
    %699 = vector.broadcast %698 : vector<1x24xf32> to vector<2x24xf32>
    %700 = arith.addf %697, %699 : vector<2x24xf32>
    %701 = math.tanh %700 : vector<2x24xf32>
    %c0_464 = arith.constant 0 : index
    %c0_465 = arith.constant 0 : index
    %702 = vector.load %arg24[%c0_464, %c0_465] : memref<24x10xf32, #tpu.memory_space<vmem>>, vector<24x10xf32>
    %cst_466 = arith.constant dense<0.000000e+00> : vector<2x10xf32>
    %703 = tpu.matmul %701, %702, %cst_466 {dimension_numbers = #tpu.dot_dimension_numbers<[1], [0], [0], [1], [0, 0, 1, 1], [], []>} : vector<2x24xf32>, vector<24x10xf32>, vector<2x10xf32> -> vector<2x10xf32>
    %c0_467 = arith.constant 0 : index
    %c0_468 = arith.constant 0 : index
    %704 = vector.load %arg25[%c0_467, %c0_468] : memref<1x10xf32, #tpu.memory_space<vmem>>, vector<1x10xf32>
    %705 = vector.broadcast %704 : vector<1x10xf32> to vector<2x10xf32>
    %706 = arith.addf %703, %705 : vector<2x10xf32>
    %c0_469 = arith.constant 0 : index
    %c0_470 = arith.constant 0 : index
    %707 = vector.load %arg27[%c0_469, %c0_470] : memref<2x10xf32, #tpu.memory_space<vmem>>, vector<2x10xf32>
    tpu.vector_store %arg27[%c0_469, %c0_470], %706 {strides = array<i32>} : memref<2x10xf32, #tpu.memory_space<vmem>>, vector<2x10xf32>,
    return
  }
}

</mosaic_0001>

<bundles_post_ra>
// kernel: vit_forward_fused.1
= control target key start
LH: loop header
LB: loop body
LE: loop exit
PB: predicated region body
PF: predicated region fallthrough
CT: control target
= control target key end

     0   :  { %s8353_s0 = inlined_call_operand.vmem [shape: f32[48,48], index: 0, kind: input, shape index: {}]   ;;  %s8354_s1 = inlined_call_operand.vmem [shape: f32[48,32], index: 1, kind: input, shape index: {}]   ;;  %s8355_s2 = inlined_call_operand.vmem [shape: f32[1,24], index: 2, kind: input, shape index: {}]   ;;  %s8356_s3 = inlined_call_operand.vmem [shape: f32[48,32], index: 3, kind: input, shape index: {}]   ;;  %s8357_s4 = inlined_call_operand.vmem [shape: f32[2,1,32], index: 4, kind: input, shape index: {}]   ;;  %s8358_s5 = inlined_call_operand.vmem [shape: f32[2,1,32], index: 5, kind: input, shape index: {}]   ;;  %s8359_s6 = inlined_call_operand.vmem [shape: f32[2,4,32,8], index: 6, kind: input, shape index: {}]   ;;  %s8360_s7 = inlined_call_operand.vmem [shape: f32[2,4,1,8], index: 7, kind: input, shape index: {}]   ;;  %s8361_s8 = inlined_call_operand.vmem [shape: f32[2,4,32,8], index: 8, kind: input, shape index: {}]   ;;  %s8362_s9 = inlined_call_operand.vmem [shape: f32[2,4,1,8], index: 9, kind: input, shape index: {}]   ;;  %s8363_s10 = inlined_call_operand.vmem [shape: f32[2,4,32,8], index: 10, kind: input, shape index: {}]   ;;  %s8364_s11 = inlined_call_operand.vmem [shape: f32[2,4,1,8], index: 11, kind: input, shape index: {}]   ;;  %s8365_s12 = inlined_call_operand.vmem [shape: f32[2,4,8,32], index: 12, kind: input, shape index: {}]   ;;  %s8366_s13 = inlined_call_operand.vmem [shape: f32[2,1,32], index: 13, kind: input, shape index: {}]   ;;  %s8367_s14 = inlined_call_operand.vmem [shape: f32[2,1,32], index: 14, kind: input, shape index: {}]   ;;  %s8368_s15 = inlined_call_operand.vmem [shape: f32[2,1,32], index: 15, kind: input, shape index: {}]   ;;  %s8369_s16 = inlined_call_operand.vmem [shape: f32[2,32,64], index: 16, kind: input, shape index: {}]   ;;  %s8370_s17 = inlined_call_operand.vmem [shape: f32[2,1,64], index: 17, kind: input, shape index: {}]   ;;  %s8371_s18 = inlined_call_operand.vmem [shape: f32[2,64,32], index: 18, kind: input, shape index: {}]   ;;  %s8372_s19 = inlined_call_operand.vmem [shape: f32[2,1,32], index: 19, kind: input, shape index: {}]   ;;  %s8373_s20 = inlined_call_operand.vmem [shape: f32[1,32], index: 20, kind: input, shape index: {}]   ;;  %s8374_s21 = inlined_call_operand.vmem [shape: f32[1,32], index: 21, kind: input, shape index: {}]   ;;  %s8375_s22 = inlined_call_operand.vmem [shape: f32[32,24], index: 22, kind: input, shape index: {}]   ;;  %s8376_s23 = inlined_call_operand.vmem [shape: f32[1,24], index: 23, kind: input, shape index: {}]   ;;  %s8377_s24 = inlined_call_operand.vmem [shape: f32[24,10], index: 24, kind: input, shape index: {}]   ;;  %s8378_s25 = inlined_call_operand.vmem [shape: f32[1,10], index: 25, kind: input, shape index: {}]   ;;  %s8379_s26 = inlined_call_operand.vmem [shape: f32[48,32], index: 26, kind: output, shape index: {0}]   ;;  %s8380_s27 = inlined_call_operand.hbm [shape: f32[2,10], index: 27, kind: output, shape index: {1}]  }
   0x1   :  { %8394 = sst [smem:[#allocation5_spill]] %s8353_s0 }
   0x2   :  { %8395 = sst [smem:[#allocation6_spill]] %s8354_s1 }
   0x3   :  { %8396 = sst [smem:[#allocation7_spill]] %s8355_s2 }
   0x4   :  { %8397 = sst [smem:[#allocation8_spill]] %s8356_s3 }
   0x5   :  { %8398 = sst [smem:[#allocation9_spill]] %s8357_s4 }
   0x6   :  { %8399 = sst [smem:[#allocation10_spill]] %s8358_s5 }
   0x7   :  { %8400 = sst [smem:[#allocation11_spill]] %s8359_s6 }
   0x8   :  { %8401 = sst [smem:[#allocation12_spill]] %s8360_s7 }
   0x9   :  { %8402 = sst [smem:[#allocation13_spill]] %s8361_s8 }
   0xa   :  { %8403 = sst [smem:[#allocation14_spill]] %s8362_s9 }
   0xb   :  { %8404 = sst [smem:[#allocation15_spill]] %s8363_s10 }
   0xc   :  { %8405 = sst [smem:[#allocation16_spill]] %s8364_s11 }
   0xd   :  { %8406 = sst [smem:[#allocation17_spill]] %s8376_s23 }
   0xe   :  { %8407 = sst [smem:[#allocation18_spill]] %s8377_s24 }
   0xf   :  { %8408 = sst [smem:[#allocation19_spill]] %s8378_s25 }
  0x10   :  { %8409 = sst [smem:[#allocation20_spill]] %s8380_s27 }
  0x11   :  { %s8410_s8 = sld [smem:[#allocation8_spill]]  ;;  %vm104_vm0 = vcmask 392192  }
  0x12   :  { %s8411_s7 = sld [smem:[#allocation5_spill]] }
  0x17   :  { %v97_v0 = vld [vmem:[%s8410_s8 + $0x28] sm:$0xff]  ;;  %v96_v1 = vld [vmem:[%s8410_s8 + $0x20] sm:$0xff]  ;;  %v95_v2 = vld [vmem:[%s8410_s8 + $0x18] sm:$0xff] }
  0x18   :  { %133 = vmatpush.msra.mxu0 %v97_v0  ;;  %5766 = vmatpush.msra.mxu1 %v97_v0  ;;  %v94_v3 = vld [vmem:[%s8410_s8 + $0x10] sm:$0xff]  ;;  %v93_v4 = vld [vmem:[%s8410_s8 + $0x8] sm:$0xff]  ;;  %v92_v5 = vld [vmem:[%s8410_s8] sm:$0xff] }
  0x19   :  { %v86_v6 = vld [vmem:[%s8411_s7] sm:$0xff]  ;;  %v87_v7 = vld [vmem:[%s8411_s7 + $0x8] sm:$0xff] }
  0x1a   :  { %134 = vmatpush.msra.mxu0 %v96_v1  ;;  %5767 = vmatpush.msra.mxu1 %v96_v1 }
  0x1c   :  { %135 = vmatpush.msra.mxu0 %v95_v2  ;;  %5768 = vmatpush.msra.mxu1 %v95_v2 }
  0x1e   :  { %136 = vmatpush.msra.mxu0 %v94_v3  ;;  %5769 = vmatpush.msra.mxu1 %v94_v3 }
  0x20   :  { %137 = vmatpush.msra.mxu0 %v93_v4  ;;  %5770 = vmatpush.msra.mxu1 %v93_v4 }
  0x22   :  { %138 = vmatpush.msra.mxu0 %v92_v5  ;;  %5771 = vmatpush.msra.mxu1 %v92_v5 }
  0x23   :  { %5255 = vmatmul.msk.f32.vlgmr.msra.gmra.mxu0 %vm104_vm0, %v86_v6 }
  0x24   :  { %33 = vsyncpa [#allocation3], 0  ;;  %v88_v8 = vld [vmem:[%s8411_s7 + $0x10] sm:$0xff]  ;;  %v89_v9 = vld [vmem:[%s8411_s7 + $0x18] sm:$0xff]  ;;  %s8412_s2 = sld [smem:[#allocation6_spill]]  ;;  %vm161_vm1 = vcmask 261120  }
  0x25   :  { %v90_v10 = vld [vmem:[%s8411_s7 + $0x20] sm:$0xff]  ;;  %v91_v11 = vld [vmem:[%s8411_s7 + $0x28] sm:$0xff]  ;;  %v6116_v28 = vmov 32.0   ;;  %s8413_s6 = sld [smem:[#allocation11_spill]] }
  0x26   :  { %5260 = vmatmul.msk.f32.vlgmr.msra.gmra.mxu1 %vm104_vm0, %v91_v11  ;;  %5817 = vrcp.f32 %v6116_v28  ;;  %s8414_s3 = sld [smem:[#allocation13_spill]] }
  0x27   :  { %s8415_s30 = sld [smem:[#allocation15_spill]] }
  0x28   :  { %s8416_s11 = sld [smem:[#allocation9_spill]] }
  0x29   :  { %s8417_s7 = sld [smem:[#allocation10_spill]] }
  0x2a   :  { %v98_v12 = vld [vmem:[%s8412_s2] sm:$0xff]  ;;  %v99_v16 = vld [vmem:[%s8412_s2 + $0x8] sm:$0xff]  ;;  %v100_v20 = vld [vmem:[%s8412_s2 + $0x10] sm:$0xff]  ;;  %s8418_s5 = sld [smem:[#allocation14_spill]] }
  0x2b   :  { %5256 = vmatmul.msk.f32.gmra.mxu0 %vm104_vm0, %v87_v7  ;;  %v101_v24 = vld [vmem:[%s8412_s2 + $0x18] sm:$0xff]  ;;  %v102_v39 = vld [vmem:[%s8412_s2 + $0x20] sm:$0xff]  ;;  %v103_v53 = vld [vmem:[%s8412_s2 + $0x28] sm:$0xff]  ;;  %s8419_s10 = sld [smem:[#allocation16_spill]] }
  0x2c   :  { %v5818_v29 = vpop.eup %5817  ;;  %v322_v63 = vld [vmem:[%s8413_s6 + $0x18] sm:$0xff]  ;;  %v321_v2 = vld [vmem:[%s8413_s6 + $0x10] sm:$0xff]  ;;  %v320_v5 = vld [vmem:[%s8413_s6 + $0x8] sm:$0xff]  ;;  %s8420_s2 = sld [smem:[#allocation12_spill]] }
  0x2d   :  { %v181_v30 = vmul.f32 32.0, %v5818_v29  ;;  %vm185_vm2 = vweird.f32 %v5818_v29  ;;  %v383_v0 = vld [vmem:[%s8414_s3 + $0x18] sm:$0xff]  ;;  %357 = vmatpush.msrb.mxu1 %v322_v63  ;;  %v382_v3 = vld [vmem:[%s8414_s3 + $0x10] sm:$0xff]  ;;  %v381_v6 = vld [vmem:[%s8414_s3 + $0x8] sm:$0xff]  ;;  %s8421_s28 = sld [smem:[#allocation7_spill]] }
  0x2e   :  { %v426_v1 = vld [vmem:[%s8415_s30 + $0x18] sm:$0xff]  ;;  %400 = vmatpush.msra.mxu2 %v383_v0  ;;  %v425_v4 = vld [vmem:[%s8415_s30 + $0x10] sm:$0xff]  ;;  %v424_v7 = vld [vmem:[%s8415_s30 + $0x8] sm:$0xff]  ;;  %s8422_s24 = sld [smem:[#allocation18_spill]] }
  0x2f   :  { %v182_v31 = vsub.f32 1.0, %v181_v30  ;;  %443 = vmatpush.msra.mxu3 %v426_v1  ;;  %358 = vmatpush.msrb.mxu1 %v321_v2  ;;  %s8423_s9 = sld [smem:[#allocation17_spill]] }
  0x30   :  { %401 = vmatpush.msra.mxu2 %v382_v3  ;;  %s8424_s27 = sld [smem:[#allocation19_spill]] }
  0x31   :  { %v183_v32 = vmul.f32 %v5818_v29, %v182_v31  ;;  %444 = vmatpush.msra.mxu3 %v425_v4  ;;  %359 = vmatpush.msrb.mxu1 %v320_v5 }
  0x32   :  { %402 = vmatpush.msra.mxu2 %v381_v6 }
  0x33   :  { %5257 = vmatmul.msk.f32.gmra.mxu0 %vm104_vm0, %v88_v8  ;;  %v184_v33 = vadd.f32 %v5818_v29, %v183_v32  ;;  %445 = vmatpush.msra.mxu3 %v424_v7  ;;  %v319_v8 = vld [vmem:[%s8413_s6] sm:$0xff] }
  0x34   :  { %360 = vmatpush.msrb.mxu1 %v319_v8 }
  0x35   :  { %v6328_v34 = vsel %vm185_vm2, %v5818_v29, %v184_v33 }
  0x3b   :  { %5258 = vmatmul.msk.f32.gmra.mxu0 %vm104_vm0, %v89_v9  ;;  %v380_v9 = vld [vmem:[%s8414_s3] sm:$0xff] }
  0x3c   :  { %403 = vmatpush.msra.mxu2 %v380_v9 }
  0x43   :  { %5259 = vmatmul.msk.f32.gmra.mxu0 %vm104_vm0, %v90_v10  ;;  %v423_v10 = vld [vmem:[%s8415_s30] sm:$0xff] }
  0x44   :  { %446 = vmatpush.msra.mxu3 %v423_v10 }
  0xa0   :  { %v140_v13 = vpop.f32.mrf.mxu0 }
  0xa1   :  { %v6303_v14 = vadd.f32 %v140_v13, %v98_v12 }
  0xa3   :  { %v162_v15 = vsel %vm161_vm1, %v6303_v14, 0.0  ;;  %v155_v54 = vpop.f32.mrf.mxu1 }
  0xa4   :  { %163 = vadd.xlane.f32.xlu0 %v162_v15  ;;  %v6362_v58 = vadd.f32 %v155_v54, %v103_v53 }
  0xa6   :  { %v177_v60 = vsel %vm161_vm1, %v6362_v58, 0.0 }
  0xa8   :  { %v143_v17 = vpop.f32.mrf.mxu0 }
  0xa9   :  { %v6310_v18 = vadd.f32 %v143_v17, %v99_v16 }
  0xab   :  { %v165_v19 = vsel %vm161_vm1, %v6310_v18, 0.0 }
  0xac   :  { %166 = vadd.xlane.f32.xlu0 %v165_v19 }
  0xb0   :  { %v146_v21 = vpop.f32.mrf.mxu0 }
  0xb1   :  { %v6317_v22 = vadd.f32 %v146_v21, %v100_v20 }
  0xb3   :  { %v168_v23 = vsel %vm161_vm1, %v6317_v22, 0.0 }
  0xb4   :  { %169 = vadd.xlane.f32.xlu1 %v168_v23 }
  0xb8   :  { %v149_v25 = vpop.f32.mrf.mxu0 }
  0xb9   :  { %v6324_v26 = vadd.f32 %v149_v25, %v101_v24 }
  0xbb   :  { %v171_v27 = vsel %vm161_vm1, %v6324_v26, 0.0 }
  0xbc   :  { %172 = vadd.xlane.f32.xlu0 %v171_v27 }
  0xc0   :  { %v152_v40 = vpop.f32.mrf.mxu0 }
  0xc1   :  { %v6341_v44 = vadd.f32 %v152_v40, %v102_v39  ;;  %v6421_v39 = vld [vmem:[%s8416_s11] ss:$0 sm:$0xff] }
  0xc3   :  { %v174_v46 = vsel %vm161_vm1, %v6341_v44, 0.0 }
 0x117   :  { %v164_v35 = vpop.xlane.xlu0 %163 }
 0x118   :  { %v187_v36 = vmul.f32 %v6328_v34, %v164_v35 }
 0x11a   :  { %v6332_v37 = vsub.f32 %v6303_v14, %v187_v36 }
 0x11c   :  { %v199_v38 = vmul.f32 %v6332_v37, %v6332_v37 }
 0x11e   :  { %v205_v41 = vsel %vm161_vm1, %v199_v38, 0.0 }
 0x11f   :  { %206 = vadd.xlane.f32.xlu1 %v205_v41  ;;  %v167_v42 = vpop.xlane.xlu0 %166 }
 0x120   :  { %v188_v43 = vmul.f32 %v6328_v34, %v167_v42  ;;  %v6426_v42 = vld [vmem:[%s8417_s7] ss:$0 sm:$0xff] }
 0x122   :  { %v6344_v45 = vsub.f32 %v6310_v18, %v188_v43 }
 0x124   :  { %v200_v47 = vmul.f32 %v6344_v45, %v6344_v45 }
 0x126   :  { %v208_v48 = vsel %vm161_vm1, %v200_v47, 0.0 }
 0x127   :  { %v170_v49 = vpop.xlane.xlu1 %169  ;;  %175 = vadd.xlane.f32.xlu1 %v174_v46  ;;  %209 = vadd.xlane.f32.xlu2 %v208_v48 }
 0x128   :  { %v189_v50 = vmul.f32 %v6328_v34, %v170_v49 }
 0x12a   :  { %v6353_v51 = vsub.f32 %v6317_v22, %v189_v50 }
 0x12c   :  { %v201_v52 = vmul.f32 %v6353_v51, %v6353_v51 }
 0x12e   :  { %v211_v55 = vsel %vm161_vm1, %v201_v52, 0.0 }
 0x12f   :  { %212 = vadd.xlane.f32.xlu2 %v211_v55  ;;  %v173_v56 = vpop.xlane.xlu0 %172 }
 0x130   :  { %v190_v57 = vmul.f32 %v6328_v34, %v173_v56 }
 0x132   :  { %v6365_v59 = vsub.f32 %v6324_v26, %v190_v57 }
 0x134   :  { %v202_v61 = vmul.f32 %v6365_v59, %v6365_v59 }
 0x136   :  { %v214_v62 = vsel %vm161_vm1, %v202_v61, 0.0 }
 0x137   :  { %178 = vadd.xlane.f32.xlu2 %v177_v60  ;;  %215 = vadd.xlane.f32.xlu0 %v214_v62 }
 0x192   :  { %v207_v11 = vpop.xlane.xlu1 %206 }
 0x193   :  { %v223_v12 = vmul.f32 %v207_v11, %v6328_v34 }
 0x195   :  { %v229_v13 = vadd.f32 1e-05, %v223_v12 }
 0x197   :  { %5819 = vrsqrt.f32 %v229_v13  ;;  %vm241_vm4 = vweird.f32 %v229_v13 }
 0x19a   :  { %v176_v15 = vpop.xlane.xlu1 %175  ;;  %v210_v16 = vpop.xlane.xlu2 %209 }
 0x19b   :  { %v191_v17 = vmul.f32 %v6328_v34, %v176_v15  ;;  %v224_v19 = vmul.f32 %v210_v16, %v6328_v34 }
 0x19d   :  { %v5820_v20 = vpop.eup %5819  ;;  %v6412_v21 = vsub.f32 %v6341_v44, %v191_v17  ;;  %v230_v23 = vadd.f32 1e-05, %v224_v19 }
 0x19e   :  { %v236_v24 = vmul.f32 %v5820_v20, %v229_v13  ;;  %vm242_vm3 = vweird.f32 %v5820_v20 }
 0x19f   :  { %5821 = vrsqrt.f32 %v230_v23  ;;  %v203_v25 = vmul.f32 %v6412_v21, %v6412_v21  ;;  %vm243_vm5 = vmor %vm241_vm4, %vm242_vm3  ;;  %vm251_vm7 = vweird.f32 %v230_v23 }
 0x1a0   :  { %v237_v27 = vmul.f32 %v5820_v20, %v236_v24 }
 0x1a1   :  { %v217_v28 = vsel %vm161_vm1, %v203_v25, 0.0 }
 0x1a2   :  { %v238_v29 = vmul.f32 0.5, %v237_v27  ;;  %218 = vadd.xlane.f32.xlu1 %v217_v28  ;;  %v213_v30 = vpop.xlane.xlu2 %212 }
 0x1a3   :  { %v225_v31 = vmul.f32 %v213_v30, %v6328_v34 }
 0x1a4   :  { %v239_v32 = vsub.f32 1.5, %v238_v29 }
 0x1a5   :  { %v5822_v33 = vpop.eup %5821  ;;  %v231_v35 = vadd.f32 1e-05, %v225_v31 }
 0x1a6   :  { %v240_v36 = vmul.f32 %v5820_v20, %v239_v32  ;;  %v246_v38 = vmul.f32 %v5822_v33, %v230_v23  ;;  %vm252_vm6 = vweird.f32 %v5822_v33 }
 0x1a7   :  { %5823 = vrsqrt.f32 %v231_v35  ;;  %vm253_vm8 = vmor %vm251_vm7, %vm252_vm6  ;;  %vm261_vm10 = vweird.f32 %v231_v35  ;;  %vm469_vm6 = vcmask 64512   ;;  %vm514_vm7 = vcmask 195584  }
 0x1a8   :  { %v244_v40 = vsel %vm243_vm5, %v5820_v20, %v240_v36  ;;  %v247_v41 = vmul.f32 %v5822_v33, %v246_v38 }
 0x1a9   :  { %v295_v43 = vmul.f32 %v244_v40, %v6332_v37 }
 0x1aa   :  { %v248_v46 = vmul.f32 0.5, %v247_v41  ;;  %v179_v47 = vpop.xlane.xlu2 %178  ;;  %v216_v48 = vpop.xlane.xlu0 %215 }
 0x1ab   :  { %v304_v49 = vmul.f32 %v6421_v39, %v295_v43  ;;  %v192_v50 = vmul.f32 %v6328_v34, %v179_v47  ;;  %v226_v52 = vmul.f32 %v216_v48, %v6328_v34 }
 0x1ac   :  { %v249_v53 = vsub.f32 1.5, %v248_v46 }
 0x1ad   :  { %v5824_v54 = vpop.eup %5823  ;;  %v6433_v55 = vadd.f32 %v6426_v42, %v304_v49  ;;  %v6436_v56 = vsub.f32 %v6362_v58, %v192_v50  ;;  %v232_v57 = vadd.f32 1e-05, %v226_v52 }
 0x1ae   :  { %v250_v37 = vmul.f32 %v5822_v33, %v249_v53  ;;  %v256_v60 = vmul.f32 %v5824_v54, %v231_v35  ;;  %vm262_vm9 = vweird.f32 %v5824_v54 }
 0x1af   :  { %5825 = vrsqrt.f32 %v232_v57  ;;  %5261 = vmatmul.msk.f32.vlgmr.msrb.gmra.mxu1 %vm161_vm1, %v6433_v55  ;;  %5267 = vmatmul.msk.f32.vlgmr.msra.gmra.mxu2 %vm161_vm1, %v6433_v55  ;;  %v204_v61 = vmul.f32 %v6436_v56, %v6436_v56  ;;  %vm263_vm11 = vmor %vm261_vm10, %vm262_vm9  ;;  %vm271_vm13 = vweird.f32 %v232_v57 }
 0x1b0   :  { %v254_v62 = vsel %vm253_vm8, %v5822_v33, %v250_v37  ;;  %v257_v63 = vmul.f32 %v5824_v54, %v256_v60  ;;  %5273 = vmatmul.msk.f32.vlgmr.msra.gmra.mxu3 %vm161_vm1, %v6433_v55 }
 0x1b1   :  { %v296_v0 = vmul.f32 %v254_v62, %v6344_v45  ;;  %v220_v1 = vsel %vm161_vm1, %v204_v61, 0.0  ;;  %v6501_v62 = vld [vmem:[%s8418_s5] ss:$0 sm:$0xff] }
 0x1b2   :  { %v258_v2 = vmul.f32 0.5, %v257_v63  ;;  %221 = vadd.xlane.f32.xlu2 %v220_v1 }
 0x1b3   :  { %v305_v3 = vmul.f32 %v6421_v39, %v296_v0 }
 0x1b4   :  { %v259_v4 = vsub.f32 1.5, %v258_v2 }
 0x1b5   :  { %v5826_v5 = vpop.eup %5825  ;;  %v6450_v6 = vadd.f32 %v6426_v42, %v305_v3 }
 0x1b6   :  { %v260_v7 = vmul.f32 %v5824_v54, %v259_v4  ;;  %v266_v8 = vmul.f32 %v5826_v5, %v232_v57  ;;  %vm272_vm12 = vweird.f32 %v5826_v5 }
 0x1b7   :  { %5262 = vmatmul.msk.f32.gmra.mxu1 %vm161_vm1, %v6450_v6  ;;  %5268 = vmatmul.msk.f32.gmra.mxu2 %vm161_vm1, %v6450_v6  ;;  %vm273_vm14 = vmor %vm271_vm13, %vm272_vm12 }
 0x1b8   :  { %v264_v45 = vsel %vm263_vm11, %v5824_v54, %v260_v7  ;;  %v267_v9 = vmul.f32 %v5826_v5, %v266_v8  ;;  %5274 = vmatmul.msk.f32.gmra.mxu3 %vm161_vm1, %v6450_v6  ;;  %v5300_v8 = vld [vmem:[%s8413_s6 + $0x38] sm:$0xff] }
 0x1b9   :  { %v297_v10 = vmul.f32 %v264_v45, %v6353_v51 }
 0x1ba   :  { %v268_v11 = vmul.f32 0.5, %v267_v9  ;;  %v5299_v9 = vld [vmem:[%s8413_s6 + $0x30] sm:$0xff] }
 0x1bb   :  { %v306_v12 = vmul.f32 %v6421_v39, %v297_v10  ;;  %v5298_v10 = vld [vmem:[%s8413_s6 + $0x28] sm:$0xff] }
 0x1bc   :  { %v269_v13 = vsub.f32 1.5, %v268_v11 }
 0x1bd   :  { %v6461_v15 = vadd.f32 %v6426_v42, %v306_v12  ;;  %v5297_v12 = vld [vmem:[%s8413_s6 + $0x20] sm:$0xff] }
 0x1be   :  { %v270_v16 = vmul.f32 %v5826_v5, %v269_v13 }
 0x1bf   :  { %5263 = vmatmul.msk.f32.gmra.mxu1 %vm161_vm1, %v6461_v15  ;;  %5269 = vmatmul.msk.f32.gmra.mxu2 %vm161_vm1, %v6461_v15 }
 0x1c0   :  { %v274_v17 = vsel %vm273_vm14, %v5826_v5, %v270_v16  ;;  %5275 = vmatmul.msk.f32.gmra.mxu3 %vm161_vm1, %v6461_v15  ;;  %v6519_v5 = vld [vmem:[%s8420_s2] ss:$0 sm:$0xff] }
 0x1c1   :  { %v298_v51 = vmul.f32 %v274_v17, %v6365_v59 }
 0x1c3   :  { %v307_v19 = vmul.f32 %v6421_v39, %v298_v51 }
 0x1c5   :  { %v6472_v20 = vadd.f32 %v6426_v42, %v307_v19 }
 0x1c7   :  { %5264 = vmatmul.msk.f32.gmra.mxu1 %vm161_vm1, %v6472_v20  ;;  %5270 = vmatmul.msk.f32.gmra.mxu2 %vm161_vm1, %v6472_v20 }
 0x1c8   :  { %5276 = vmatmul.msk.f32.gmra.mxu3 %vm161_vm1, %v6472_v20 }
 0x215   :  { %v219_v23 = vpop.xlane.xlu1 %218 }
 0x216   :  { %v227_v24 = vmul.f32 %v219_v23, %v6328_v34 }
 0x218   :  { %v233_v25 = vadd.f32 1e-05, %v227_v24 }
 0x21a   :  { %5827 = vrsqrt.f32 %v233_v25  ;;  %vm281_vm0 = vweird.f32 %v233_v25 }
 0x220   :  { %v5828_v59 = vpop.eup %5827 }
 0x221   :  { %v276_v27 = vmul.f32 %v5828_v59, %v233_v25  ;;  %vm282_vm15 = vweird.f32 %v5828_v59 }
 0x222   :  { %vm283_vm2 = vmor %vm281_vm0, %vm282_vm15 }
 0x223   :  { %v277_v28 = vmul.f32 %v5828_v59, %v276_v27 }
 0x225   :  { %v278_v29 = vmul.f32 0.5, %v277_v28  ;;  %v222_v30 = vpop.xlane.xlu2 %221 }
 0x226   :  { %v228_v31 = vmul.f32 %v222_v30, %v6328_v34 }
 0x227   :  { %v279_v32 = vsub.f32 1.5, %v278_v29 }
 0x228   :  { %v234_v33 = vadd.f32 1e-05, %v228_v31 }
 0x229   :  { %v280_v35 = vmul.f32 %v5828_v59, %v279_v32 }
 0x22a   :  { %5829 = vrsqrt.f32 %v234_v33  ;;  %vm291_vm4 = vweird.f32 %v234_v33 }
 0x22b   :  { %v284_v36 = vsel %vm283_vm2, %v5828_v59, %v280_v35  ;;  %v6559_v35 = vld [vmem:[%s8421_s28] ss:$0 sm:$0xff] }
 0x22c   :  { %v299_v38 = vmul.f32 %v284_v36, %v6412_v21  ;;  %v362_v2 = vpop.f32.mrf.mxu1 }
 0x22d   :  { %v363_v45 = vadd.f32 %v6519_v5, %v362_v2 }
 0x22e   :  { %v308_v40 = vmul.f32 %v6421_v39, %v299_v38 }
 0x230   :  { %v5830_v41 = vpop.eup %5829  ;;  %v6485_v43 = vadd.f32 %v6426_v42, %v308_v40 }
 0x231   :  { %v286_v46 = vmul.f32 %v5830_v41, %v234_v33  ;;  %vm292_vm3 = vweird.f32 %v5830_v41 }
 0x232   :  { %5265 = vmatmul.msk.f32.gmra.mxu1 %vm161_vm1, %v6485_v43  ;;  %v405_v47 = vpop.f32.mrf.mxu2  ;;  %5271 = vmatmul.msk.f32.gmra.mxu2 %vm161_vm1, %v6485_v43  ;;  %vm293_vm5 = vmor %vm291_vm4, %vm292_vm3 }
 0x233   :  { %v287_v48 = vmul.f32 %v5830_v41, %v286_v46  ;;  %v448_v49 = vpop.f32.mrf.mxu3  ;;  %5277 = vmatmul.msk.f32.gmra.mxu3 %vm161_vm1, %v6485_v43  ;;  %v406_v7 = vadd.f32 %v6501_v62, %v405_v47  ;;  %v5322_v46 = vld [vmem:[%s8415_s30 + $0x38] sm:$0xff] }
 0x234   :  { %v365_v11 = vpop.f32.mrf.mxu1 }
 0x235   :  { %v288_v21 = vmul.f32 0.5, %v287_v48  ;;  %v366_v13 = vadd.f32 %v6519_v5, %v365_v11 }
 0x237   :  { %v289_v50 = vsub.f32 1.5, %v288_v21  ;;  %v5320_v21 = vld [vmem:[%s8415_s30 + $0x28] sm:$0xff] }
 0x239   :  { %v290_v52 = vmul.f32 %v5830_v41, %v289_v50 }
 0x23a   :  { %v408_v53 = vpop.f32.mrf.mxu2 }
 0x23b   :  { %v294_v54 = vsel %vm293_vm5, %v5830_v41, %v290_v52  ;;  %v451_v57 = vpop.f32.mrf.mxu3  ;;  %v409_v3 = vadd.f32 %v6501_v62, %v408_v53  ;;  %v5319_v52 = vld [vmem:[%s8415_s30 + $0x20] sm:$0xff] }
 0x23c   :  { %v300_v37 = vmul.f32 %v294_v54, %v6436_v56  ;;  %v368_v16 = vpop.f32.mrf.mxu1 }
 0x23d   :  { %v369_v17 = vadd.f32 %v6519_v5, %v368_v16 }
 0x23e   :  { %v309_v60 = vmul.f32 %v6421_v39, %v300_v37  ;;  %v5778_v39 = vld [vmem:[%s8419_s10] ss:$0 sm:$0xff] }
 0x23f   :  { %v452_v1 = vadd.f32 %v5778_v39, %v451_v57  ;;  %v449_v4 = vadd.f32 %v5778_v39, %v448_v49  ;;  %v5321_v49 = vld [vmem:[%s8415_s30 + $0x30] sm:$0xff] }
 0x240   :  { %v6496_v61 = vadd.f32 %v6426_v42, %v309_v60 }
 0x242   :  { %5266 = vmatmul.msk.f32.gmra.mxu1 %vm161_vm1, %v6496_v61  ;;  %v411_v63 = vpop.f32.mrf.mxu2  ;;  %5272 = vmatmul.msk.f32.gmra.mxu2 %vm161_vm1, %v6496_v61 }
 0x243   :  { %v412_v42 = vadd.f32 %v6501_v62, %v411_v63  ;;  %v454_v56 = vpop.f32.mrf.mxu3  ;;  %5278 = vmatmul.msk.f32.gmra.mxu3 %vm161_vm1, %v6496_v61 }
 0x244   :  { %v455_v0 = vadd.f32 %v5778_v39, %v454_v56  ;;  %v371_v51 = vpop.f32.mrf.mxu1 }
 0x245   :  { %5279 = vmatpush.xpose.msk.msra.mxu1 %vm469_vm6, %v412_v42  ;;  %v372_v48 = vadd.f32 %v6519_v5, %v371_v51 }
 0x246   :  { %570 = vmatpush.msrb.mxu2 %v455_v0 }
 0x248   :  { %571 = vmatpush.msrb.mxu2 %v452_v1 }
 0x249   :  { %5280 = vmatpush.xpose.msk.msra.mxu1 %vm469_vm6, %v409_v3 }
 0x24a   :  { %572 = vmatpush.msrb.mxu2 %v449_v4  ;;  %v414_v19 = vpop.f32.mrf.mxu2 }
 0x24b   :  { %v457_v23 = vpop.f32.mrf.mxu3  ;;  %v415_v40 = vadd.f32 %v6501_v62, %v414_v19 }
 0x24c   :  { %v458_v36 = vadd.f32 %v5778_v39, %v457_v23 }
 0x24d   :  { %5281 = vmatpush.xpose.msk.msra.mxu1 %vm469_vm6, %v406_v7 }
 0x250   :  { %5282 = vmatmul.msk.f32.vlgmr.msra.gmra.mxu1 %vm469_vm6, %v363_v45 }
 0x251   :  { %718 = vmatpush.msrb.mxu1 %v5300_v8 }
 0x253   :  { %719 = vmatpush.msrb.mxu1 %v5299_v9 }
 0x255   :  { %720 = vmatpush.msrb.mxu1 %v5298_v10 }
 0x257   :  { %721 = vmatpush.msrb.mxu1 %v5297_v12 }
 0x258   :  { %5283 = vmatmul.msk.f32.gmra.mxu1 %vm469_vm6, %v366_v13 }
 0x260   :  { %5284 = vmatmul.msk.f32.gmra.mxu1 %vm469_vm6, %v369_v17 }
 0x268   :  { %5302 = vmatmul.msk.f32.vlgmr.msrb.gmra.mxu1 %vm161_vm1, %v6433_v55 }
 0x270   :  { %5303 = vmatmul.msk.f32.gmra.mxu1 %vm161_vm1, %v6450_v6 }
 0x278   :  { %5304 = vmatmul.msk.f32.gmra.mxu1 %vm161_vm1, %v6461_v15 }
 0x280   :  { %5305 = vmatmul.msk.f32.gmra.mxu1 %vm161_vm1, %v6472_v20 }
 0x288   :  { %5306 = vmatmul.msk.f32.gmra.mxu1 %vm161_vm1, %v6485_v43 }
 0x290   :  { %5307 = vmatmul.msk.f32.gmra.mxu1 %vm161_vm1, %v6496_v61 }
 0x2af   :  { %v374_v24 = vpop.f32.mrf.mxu1 }
 0x2b0   :  { %v375_v57 = vadd.f32 %v6519_v5, %v374_v24 }
 0x2b5   :  { %v417_v25 = vpop.f32.mrf.mxu2 }
 0x2b6   :  { %v460_v59 = vpop.f32.mrf.mxu3  ;;  %v418_v33 = vadd.f32 %v6501_v62, %v417_v25 }
 0x2b7   :  { %v461_v32 = vadd.f32 %v5778_v39, %v460_v59  ;;  %v5311_v59 = vld [vmem:[%s8414_s3 + $0x38] sm:$0xff] }
 0x2b8   :  { %763 = vmatpush.msra.mxu2 %v5311_v59 }
 0x2bf   :  { %v377_v27 = vpop.f32.mrf.mxu1 }
 0x2c0   :  { %v378_v63 = vadd.f32 %v6519_v5, %v377_v27  ;;  %v5310_v27 = vld [vmem:[%s8414_s3 + $0x30] sm:$0xff] }
 0x2c1   :  { %764 = vmatpush.msra.mxu2 %v5310_v27 }
 0x2c5   :  { %v420_v28 = vpop.f32.mrf.mxu2 }
 0x2c6   :  { %v421_v29 = vadd.f32 %v6501_v62, %v420_v28  ;;  %v463_v30 = vpop.f32.mrf.mxu3  ;;  %v5309_v28 = vld [vmem:[%s8414_s3 + $0x28] sm:$0xff] }
 0x2c7   :  { %v464_v31 = vadd.f32 %v5778_v39, %v463_v30  ;;  %765 = vmatpush.msra.mxu2 %v5309_v28 }
 0x2c8   :  { %5288 = vmatpush.xpose.msk.msrb.mxu3 %vm469_vm6, %v421_v29  ;;  %v5308_v29 = vld [vmem:[%s8414_s3 + $0x20] sm:$0xff] }
 0x2c9   :  { %683 = vmatpush.msrb.mxu0 %v464_v31  ;;  %766 = vmatpush.msra.mxu2 %v5308_v29  ;;  %v5780_v29 = vld [vmem:[%s8420_s2 + $0x1] ss:$0 sm:$0xff] }
 0x2cb   :  { %684 = vmatpush.msrb.mxu0 %v461_v32 }
 0x2cc   :  { %5289 = vmatpush.xpose.msk.msrb.mxu3 %vm469_vm6, %v418_v33 }
 0x2cd   :  { %685 = vmatpush.msrb.mxu0 %v458_v36  ;;  %v505_v38 = vpop.f32.mrf.mxu1 }
 0x2ce   :  { %v506_v41 = vadd.f32 %v6559_v35, %v505_v38 }
 0x2d0   :  { %5290 = vmatpush.xpose.msk.msrb.mxu3 %vm469_vm6, %v415_v40  ;;  %v515_v47 = vsel %vm514_vm7, %v506_v41, -inf }
 0x2d1   :  { %516 = vmax.xlane.f32.xlu0 %v515_v47 }
 0x2d3   :  { %5291 = vmatmul.msk.f32.vlgmr.msrb.gmra.mxu3 %vm469_vm6, %v372_v48 }
 0x2d4   :  { %808 = vmatpush.msra.mxu3 %v5322_v46 }
 0x2d5   :  { %v508_v50 = vpop.f32.mrf.mxu1 }
 0x2d6   :  { %809 = vmatpush.msra.mxu3 %v5321_v49  ;;  %v509_v53 = vadd.f32 %v6559_v35, %v508_v50 }
 0x2d8   :  { %810 = vmatpush.msra.mxu3 %v5320_v21  ;;  %v518_v54 = vsel %vm514_vm7, %v509_v53, -inf }
 0x2d9   :  { %519 = vmax.xlane.f32.xlu1 %v518_v54 }
 0x2da   :  { %811 = vmatpush.msra.mxu3 %v5319_v52 }
 0x2db   :  { %5292 = vmatmul.msk.f32.gmra.mxu3 %vm469_vm6, %v375_v57 }
 0x2dd   :  { %v511_v37 = vpop.f32.mrf.mxu1 }
 0x2de   :  { %v512_v60 = vadd.f32 %v6559_v35, %v511_v37 }
 0x2e0   :  { %v521_v62 = vsel %vm514_vm7, %v512_v60, -inf }
 0x2e1   :  { %522 = vmax.xlane.f32.xlu2 %v521_v62 }
 0x2e3   :  { %5293 = vmatmul.msk.f32.gmra.mxu3 %vm469_vm6, %v378_v63 }
 0x2eb   :  { %5324 = vmatmul.msk.f32.vlgmr.msra.gmra.mxu3 %vm161_vm1, %v6433_v55 }
 0x2f3   :  { %5325 = vmatmul.msk.f32.gmra.mxu3 %vm161_vm1, %v6450_v6 }
 0x2fb   :  { %5326 = vmatmul.msk.f32.gmra.mxu3 %vm161_vm1, %v6461_v15 }
 0x303   :  { %5327 = vmatmul.msk.f32.gmra.mxu3 %vm161_vm1, %v6472_v20 }
 0x30b   :  { %5328 = vmatmul.msk.f32.gmra.mxu3 %vm161_vm1, %v6485_v43 }
 0x313   :  { %5329 = vmatmul.msk.f32.gmra.mxu3 %vm161_vm1, %v6496_v61 }
 0x344   :  { %v517_v39 = vpop.xlane.xlu0 %516 }
 0x345   :  { %v524_v42 = vsub.f32 %v506_v41, %v517_v39 }
 0x347   :  { %v527_v56 = vmul.f32 1.442695, %v524_v42 }
 0x349   :  { %5831 = vpow2.f32 %v527_v56  ;;  %v583_v56 = vld [vmem:[%s8365_s12] sm:$0xff] }
 0x34c   :  { %v520_v0 = vpop.xlane.xlu1 %519 }
 0x34d   :  { %v525_v1 = vsub.f32 %v509_v53, %v520_v0 }
 0x34f   :  { %v5832_v2 = vpop.eup %5831  ;;  %v529_v3 = vmul.f32 1.442695, %v525_v1 }
 0x350   :  { %v533_v4 = vsel %vm514_vm7, %v5832_v2, 0.0 }
 0x351   :  { %5833 = vpow2.f32 %v529_v3  ;;  %534 = vadd.xlane.f32.xlu0 %v533_v4 }
 0x354   :  { %v523_v5 = vpop.xlane.xlu2 %522 }
 0x355   :  { %v526_v7 = vsub.f32 %v512_v60, %v523_v5 }
 0x356   :  { %v619_v8 = vpop.f32.mrf.mxu3 }
 0x357   :  { %v5834_v45 = vpop.eup %5833  ;;  %v531_v9 = vmul.f32 1.442695, %v526_v7  ;;  %v620_v10 = vadd.f32 %v6559_v35, %v619_v8 }
 0x358   :  { %v536_v11 = vsel %vm514_vm7, %v5834_v45, 0.0 }
 0x359   :  { %5835 = vpow2.f32 %v531_v9  ;;  %537 = vadd.xlane.f32.xlu1 %v536_v11  ;;  %v628_v12 = vsel %vm514_vm7, %v620_v10, -inf }
 0x35a   :  { %629 = vmax.xlane.f32.xlu0 %v628_v12 }
 0x35e   :  { %v622_v13 = vpop.f32.mrf.mxu3 }
 0x35f   :  { %v5836_v16 = vpop.eup %5835  ;;  %v623_v17 = vadd.f32 %v6559_v35, %v622_v13 }
 0x360   :  { %v539_v51 = vsel %vm514_vm7, %v5836_v16, 0.0 }
 0x361   :  { %540 = vadd.xlane.f32.xlu2 %v539_v51  ;;  %v631_v19 = vsel %vm514_vm7, %v623_v17, -inf }
 0x362   :  { %632 = vmax.xlane.f32.xlu1 %v631_v19 }
 0x366   :  { %v625_v23 = vpop.f32.mrf.mxu3 }
 0x367   :  { %v626_v24 = vadd.f32 %v6559_v35, %v625_v23  ;;  %v723_v23 = vpop.f32.mrf.mxu1 }
 0x369   :  { %v634_v25 = vsel %vm514_vm7, %v626_v24, -inf }
 0x36a   :  { %635 = vmax.xlane.f32.xlu2 %v634_v25 }
 0x36e   :  { %v813_v3 = vpop.f32.mrf.mxu3 }
 0x3c4   :  { %v535_v30 = vpop.xlane.xlu0 %534 }
 0x3c5   :  { %5837 = vrcp.f32 %v535_v30  ;;  %v5781_v30 = vld [vmem:[%s8419_s10 + $0x1] ss:$0 sm:$0xff] }
 0x3cb   :  { %v5838_v31 = vpop.eup %5837 }
 0x3cc   :  { %v538_v32 = vpop.xlane.xlu1 %537  ;;  %v545_v33 = vmul.f32 %v5838_v31, %v5832_v2 }
 0x3cd   :  { %5839 = vrcp.f32 %v538_v32  ;;  %v630_v36 = vpop.xlane.xlu0 %629  ;;  %v726_v32 = vpop.f32.mrf.mxu1 }
 0x3ce   :  { %v637_v38 = vsub.f32 %v620_v10, %v630_v36  ;;  %5285 = vmatmul.msk.f32.vlgmr.msrb.gmra.mxu2 %vm514_vm7, %v545_v33  ;;  %v816_v10 = vpop.f32.mrf.mxu3 }
 0x3cf   :  { %1004 = vmatpush.msrb.mxu2 %v583_v56 }
 0x3d0   :  { %v640_v40 = vmul.f32 1.442695, %v637_v38  ;;  %v724_v38 = vadd.f32 %v5780_v29, %v723_v23 }
 0x3d2   :  { %5841 = vpow2.f32 %v640_v40  ;;  %v817_v40 = vadd.f32 %v5781_v30, %v816_v10 }
 0x3d3   :  { %v5840_v41 = vpop.eup %5839 }
 0x3d4   :  { %v541_v46 = vpop.xlane.xlu2 %540  ;;  %v546_v47 = vmul.f32 %v5840_v41, %v5834_v45 }
 0x3d5   :  { %5843 = vrcp.f32 %v541_v46  ;;  %v633_v48 = vpop.xlane.xlu1 %632  ;;  %v814_v46 = vadd.f32 %v5781_v30, %v813_v3 }
 0x3d6   :  { %v638_v49 = vsub.f32 %v623_v17, %v633_v48  ;;  %5286 = vmatmul.msk.f32.gmra.mxu2 %vm514_vm7, %v546_v47 }
 0x3d8   :  { %v5842_v21 = vpop.eup %5841  ;;  %v642_v50 = vmul.f32 1.442695, %v638_v49 }
 0x3d9   :  { %v646_v52 = vsel %vm514_vm7, %v5842_v21, 0.0 }
 0x3da   :  { %5845 = vpow2.f32 %v642_v50  ;;  %647 = vadd.xlane.f32.xlu0 %v646_v52  ;;  %v727_v52 = vadd.f32 %v5780_v29, %v726_v32 }
 0x3db   :  { %v5844_v53 = vpop.eup %5843 }
 0x3dc   :  { %v547_v54 = vmul.f32 %v5844_v53, %v5836_v16  ;;  %v819_v16 = vpop.f32.mrf.mxu3 }
 0x3dd   :  { %v636_v57 = vpop.xlane.xlu2 %635  ;;  %v820_v36 = vadd.f32 %v5781_v30, %v819_v16 }
 0x3de   :  { %v639_v37 = vsub.f32 %v626_v24, %v636_v57  ;;  %5287 = vmatmul.msk.f32.gmra.mxu2 %vm514_vm7, %v547_v54  ;;  %v5782_v24 = vld [vmem:[%s8418_s5 + $0x1] ss:$0 sm:$0xff] }
 0x3e0   :  { %v5846_v60 = vpop.eup %5845  ;;  %v644_v62 = vmul.f32 1.442695, %v639_v37 }
 0x3e1   :  { %v649_v63 = vsel %vm514_vm7, %v5846_v60, 0.0 }
 0x3e2   :  { %5847 = vpow2.f32 %v644_v62  ;;  %650 = vadd.xlane.f32.xlu1 %v649_v63  ;;  %v5364_v63 = vld [vmem:[%s8413_s6 + $0x58] sm:$0xff] }
 0x3e4   :  { %v822_v19 = vpop.f32.mrf.mxu3 }
 0x3e5   :  { %v823_v50 = vadd.f32 %v5781_v30, %v822_v19 }
 0x3e6   :  { %5313 = vmatmul.msk.f32.vlgmr.msra.gmra.mxu2 %vm161_vm1, %v6433_v55 }
 0x3e7   :  { %1186 = vmatpush.msra.mxu2 %v583_v56  ;;  %v5362_v56 = vld [vmem:[%s8413_s6 + $0x48] sm:$0xff] }
 0x3e8   :  { %v5848_v39 = vpop.eup %5847 }
 0x3e9   :  { %v652_v42 = vsel %vm514_vm7, %v5848_v39, 0.0 }
 0x3ea   :  { %653 = vadd.xlane.f32.xlu2 %v652_v42  ;;  %v5363_v42 = vld [vmem:[%s8413_s6 + $0x50] sm:$0xff] }
 0x3ec   :  { %v825_v27 = vpop.f32.mrf.mxu3 }
 0x3ed   :  { %v826_v49 = vadd.f32 %v5781_v30, %v825_v27 }
 0x3ee   :  { %5314 = vmatmul.msk.f32.gmra.mxu2 %vm161_vm1, %v6450_v6 }
 0x3f4   :  { %v828_v41 = vpop.f32.mrf.mxu3 }
 0x3f5   :  { %v829_v47 = vadd.f32 %v5781_v30, %v828_v41 }
 0x3f6   :  { %5315 = vmatmul.msk.f32.gmra.mxu2 %vm161_vm1, %v6461_v15 }
 0x3fe   :  { %5316 = vmatmul.msk.f32.gmra.mxu2 %vm161_vm1, %v6472_v20 }
 0x406   :  { %5317 = vmatmul.msk.f32.gmra.mxu2 %vm161_vm1, %v6485_v43 }
 0x40e   :  { %5318 = vmatmul.msk.f32.gmra.mxu2 %vm161_vm1, %v6496_v61 }
 0x44d   :  { %v648_v0 = vpop.xlane.xlu0 %647 }
 0x44e   :  { %5849 = vrcp.f32 %v648_v0 }
 0x451   :  { %v574_v1 = vpop.f32.mrf.mxu2 }
 0x452   :  { %5343 = vmatmul.msk.f32.vlgmr.msrb.gmra.mxu2 %vm469_vm6, %v574_v1  ;;  %v5361_v1 = vld [vmem:[%s8413_s6 + $0x40] sm:$0xff] }
 0x454   :  { %v5850_v2 = vpop.eup %5849 }
 0x455   :  { %v651_v4 = vpop.xlane.xlu1 %650  ;;  %v658_v5 = vmul.f32 %v5850_v2, %v5842_v21  ;;  %v729_v21 = vpop.f32.mrf.mxu1 }
 0x456   :  { %5851 = vrcp.f32 %v651_v4  ;;  %v730_v57 = vadd.f32 %v5780_v29, %v729_v21 }
 0x457   :  { %5294 = vmatmul.msk.f32.vlgmr.msrb.gmra.mxu0 %vm514_vm7, %v658_v5 }
 0x459   :  { %v577_v7 = vpop.f32.mrf.mxu2 }
 0x45a   :  { %5344 = vmatmul.msk.f32.gmra.mxu2 %vm469_vm6, %v577_v7 }
 0x45c   :  { %v5852_v8 = vpop.eup %5851 }
 0x45d   :  { %v654_v45 = vpop.xlane.xlu2 %653  ;;  %v659_v9 = vmul.f32 %v5852_v8, %v5846_v60  ;;  %v732_v37 = vpop.f32.mrf.mxu1 }
 0x45e   :  { %5853 = vrcp.f32 %v654_v45 }
 0x45f   :  { %5295 = vmatmul.msk.f32.gmra.mxu0 %vm514_vm7, %v659_v9 }
 0x461   :  { %v580_v11 = vpop.f32.mrf.mxu2 }
 0x462   :  { %5345 = vmatmul.msk.f32.gmra.mxu2 %vm469_vm6, %v580_v11 }
 0x464   :  { %v5854_v12 = vpop.eup %5853 }
 0x465   :  { %v660_v13 = vmul.f32 %v5854_v12, %v5848_v39  ;;  %v733_v39 = vadd.f32 %v5780_v29, %v732_v37  ;;  %v735_v0 = vpop.f32.mrf.mxu1 }
 0x466   :  { %v736_v2 = vadd.f32 %v5780_v29, %v735_v0 }
 0x467   :  { %5296 = vmatmul.msk.f32.gmra.mxu0 %vm514_vm7, %v660_v13 }
 0x469   :  { %v768_v17 = vpop.f32.mrf.mxu2 }
 0x46a   :  { %v769_v33 = vadd.f32 %v5782_v24, %v768_v17 }
 0x46d   :  { %v738_v3 = vpop.f32.mrf.mxu1 }
 0x46e   :  { %v739_v4 = vadd.f32 %v5780_v29, %v738_v3 }
 0x471   :  { %v771_v51 = vpop.f32.mrf.mxu2 }
 0x472   :  { %v772_v28 = vadd.f32 %v5782_v24, %v771_v51 }
 0x479   :  { %v774_v25 = vpop.f32.mrf.mxu2 }
 0x47a   :  { %v775_v59 = vadd.f32 %v5782_v24, %v774_v25 }
 0x47c   :  { %5330 = vmatpush.xpose.msk.msra.mxu0 %vm469_vm6, %v775_v59 }
 0x480   :  { %5331 = vmatpush.xpose.msk.msra.mxu0 %vm469_vm6, %v772_v28 }
 0x481   :  { %v777_v31 = vpop.f32.mrf.mxu2 }
 0x482   :  { %v778_v62 = vadd.f32 %v5782_v24, %v777_v31 }
 0x484   :  { %5332 = vmatpush.xpose.msk.msra.mxu0 %vm469_vm6, %v769_v33 }
 0x487   :  { %5333 = vmatmul.msk.f32.vlgmr.msra.gmra.mxu0 %vm469_vm6, %v724_v38 }
 0x488   :  { %930 = vmatpush.msrb.mxu0 %v820_v36 }
 0x489   :  { %v780_v48 = vpop.f32.mrf.mxu2 }
 0x48a   :  { %931 = vmatpush.msrb.mxu0 %v817_v40  ;;  %v781_v60 = vadd.f32 %v5782_v24, %v780_v48 }
 0x48c   :  { %932 = vmatpush.msrb.mxu0 %v814_v46 }
 0x48e   :  { %1114 = vmatpush.msra.mxu0 %v829_v47 }
 0x48f   :  { %5334 = vmatmul.msk.f32.gmra.mxu0 %vm469_vm6, %v727_v52 }
 0x490   :  { %1115 = vmatpush.msra.mxu0 %v826_v49 }
 0x491   :  { %v783_v53 = vpop.f32.mrf.mxu2 }
 0x492   :  { %1116 = vmatpush.msra.mxu0 %v823_v50  ;;  %v784_v54 = vadd.f32 %v5782_v24, %v783_v53 }
 0x494   :  { %5346 = vmatpush.xpose.msk.msrb.mxu3 %vm469_vm6, %v784_v54 }
 0x497   :  { %5335 = vmatmul.msk.f32.gmra.mxu0 %vm469_vm6, %v730_v57 }
 0x498   :  { %5347 = vmatpush.xpose.msk.msrb.mxu3 %vm469_vm6, %v781_v60 }
 0x49c   :  { %5348 = vmatpush.xpose.msk.msrb.mxu3 %vm469_vm6, %v778_v62 }
 0x49f   :  { %5349 = vmatmul.msk.f32.vlgmr.msrb.gmra.mxu3 %vm469_vm6, %v733_v39 }
 0x4a0   :  { %1219 = vmatpush.msra.mxu3 %v5364_v63 }
 0x4a2   :  { %1220 = vmatpush.msra.mxu3 %v5363_v42 }
 0x4a4   :  { %1221 = vmatpush.msra.mxu3 %v5362_v56 }
 0x4a6   :  { %1222 = vmatpush.msra.mxu3 %v5361_v1 }
 0x4a7   :  { %5350 = vmatmul.msk.f32.gmra.mxu3 %vm469_vm6, %v736_v2 }
 0x4af   :  { %5351 = vmatmul.msk.f32.gmra.mxu3 %vm469_vm6, %v739_v4 }
 0x4b7   :  { %5366 = vmatmul.msk.f32.vlgmr.msra.gmra.mxu3 %vm161_vm1, %v6433_v55 }
 0x4bf   :  { %5367 = vmatmul.msk.f32.gmra.mxu3 %vm161_vm1, %v6450_v6 }
 0x4c7   :  { %5368 = vmatmul.msk.f32.gmra.mxu3 %vm161_vm1, %v6461_v15 }
 0x4cf   :  { %5369 = vmatmul.msk.f32.gmra.mxu3 %vm161_vm1, %v6472_v20 }
 0x4d4   :  { %v687_v5 = vpop.f32.mrf.mxu0 }
 0x4d5   :  { %5358 = vmatmul.msk.f32.vlgmr.msra.gmra.mxu2 %vm469_vm6, %v687_v5 }
 0x4d7   :  { %5370 = vmatmul.msk.f32.gmra.mxu3 %vm161_vm1, %v6485_v43 }
 0x4dc   :  { %v690_v7 = vpop.f32.mrf.mxu0 }
 0x4dd   :  { %5359 = vmatmul.msk.f32.gmra.mxu2 %vm469_vm6, %v690_v7 }
 0x4df   :  { %5371 = vmatmul.msk.f32.gmra.mxu3 %vm161_vm1, %v6496_v61 }
 0x4e4   :  { %v693_v8 = vpop.f32.mrf.mxu0 }
 0x4e5   :  { %5360 = vmatmul.msk.f32.gmra.mxu2 %vm469_vm6, %v693_v8 }
 0x504   :  { %v866_v45 = vpop.f32.mrf.mxu0 }
 0x505   :  { %v867_v9 = vadd.f32 %v6559_v35, %v866_v45 }
 0x507   :  { %v875_v10 = vsel %vm514_vm7, %v867_v9, -inf }
 0x508   :  { %876 = vmax.xlane.f32.xlu0 %v875_v10 }
 0x50c   :  { %v869_v11 = vpop.f32.mrf.mxu0 }
 0x50d   :  { %v870_v12 = vadd.f32 %v6559_v35, %v869_v11 }
 0x50f   :  { %v878_v13 = vsel %vm514_vm7, %v870_v12, -inf }
 0x510   :  { %879 = vmax.xlane.f32.xlu1 %v878_v13 }
 0x514   :  { %v872_v16 = vpop.f32.mrf.mxu0 }
 0x515   :  { %v873_v17 = vadd.f32 %v6559_v35, %v872_v16  ;;  %v5375_v16 = vld [vmem:[%s8414_s3 + $0x58] sm:$0xff] }
 0x517   :  { %v881_v51 = vsel %vm514_vm7, %v873_v17, -inf }
 0x518   :  { %882 = vmax.xlane.f32.xlu2 %v881_v51  ;;  %v5374_v51 = vld [vmem:[%s8414_s3 + $0x50] sm:$0xff] }
 0x522   :  { %v1050_v19 = vpop.f32.mrf.mxu3 }
 0x523   :  { %v1051_v23 = vadd.f32 %v6559_v35, %v1050_v19  ;;  %v5373_v19 = vld [vmem:[%s8414_s3 + $0x48] sm:$0xff] }
 0x525   :  { %v1059_v24 = vsel %vm514_vm7, %v1051_v23, -inf }
 0x526   :  { %1060 = vmax.xlane.f32.xlu0 %v1059_v24 }
 0x52a   :  { %v1053_v25 = vpop.f32.mrf.mxu3 }
 0x52b   :  { %v1054_v59 = vadd.f32 %v6559_v35, %v1053_v25 }
 0x52d   :  { %v1062_v27 = vsel %vm514_vm7, %v1054_v59, -inf }
 0x52e   :  { %1063 = vmax.xlane.f32.xlu1 %v1062_v27 }
 0x532   :  { %v1056_v28 = vpop.f32.mrf.mxu3 }
 0x533   :  { %v1057_v29 = vadd.f32 %v6559_v35, %v1056_v28 }
 0x535   :  { %v1065_v30 = vsel %vm514_vm7, %v1057_v29, -inf }
 0x536   :  { %1066 = vmax.xlane.f32.xlu2 %v1065_v30 }
 0x57b   :  { %v877_v31 = vpop.xlane.xlu0 %876 }
 0x57c   :  { %v884_v32 = vsub.f32 %v867_v9, %v877_v31 }
 0x57e   :  { %v887_v33 = vmul.f32 1.442695, %v884_v32 }
 0x580   :  { %5855 = vpow2.f32 %v887_v33  ;;  %v5339_v33 = vld [vmem:[%s8365_s12 + $0x8] sm:$0xff] }
 0x581   :  { %969 = vmatpush.msra.mxu1 %v5339_v33 }
 0x583   :  { %v880_v36 = vpop.xlane.xlu1 %879  ;;  %1151 = vmatpush.msrb.mxu1 %v5339_v33 }
 0x584   :  { %v885_v38 = vsub.f32 %v870_v12, %v880_v36 }
 0x586   :  { %v5856_v40 = vpop.eup %5855  ;;  %v889_v41 = vmul.f32 1.442695, %v885_v38 }
 0x587   :  { %v893_v46 = vsel %vm514_vm7, %v5856_v40, 0.0 }
 0x588   :  { %894 = vadd.xlane.f32.xlu0 %v893_v46  ;;  %5857 = vpow2.f32 %v889_v41  ;;  %v5385_v41 = vld [vmem:[%s8415_s30 + $0x50] sm:$0xff] }
 0x58b   :  { %v883_v47 = vpop.xlane.xlu2 %882 }
 0x58c   :  { %v886_v48 = vsub.f32 %v873_v17, %v883_v47  ;;  %v5384_v47 = vld [vmem:[%s8415_s30 + $0x48] sm:$0xff] }
 0x58e   :  { %v5858_v49 = vpop.eup %5857  ;;  %v891_v21 = vmul.f32 1.442695, %v886_v48  ;;  %v5383_v48 = vld [vmem:[%s8415_s30 + $0x40] sm:$0xff] }
 0x58f   :  { %v896_v50 = vsel %vm514_vm7, %v5858_v49, 0.0 }
 0x590   :  { %5859 = vpow2.f32 %v891_v21  ;;  %897 = vadd.xlane.f32.xlu1 %v896_v50 }
 0x596   :  { %v5860_v52 = vpop.eup %5859 }
 0x597   :  { %v899_v53 = vsel %vm514_vm7, %v5860_v52, 0.0 }
 0x598   :  { %900 = vadd.xlane.f32.xlu2 %v899_v53 }
 0x599   :  { %v1061_v54 = vpop.xlane.xlu0 %1060 }
 0x59a   :  { %v1068_v57 = vsub.f32 %v1051_v23, %v1061_v54  ;;  %v5372_v23 = vld [vmem:[%s8414_s3 + $0x40] sm:$0xff]  ;;  %v1224_v54 = vpop.f32.mrf.mxu3 }
 0x59c   :  { %v1071_v37 = vmul.f32 1.442695, %v1068_v57  ;;  %v5784_v57 = vld [vmem:[%s8418_s5 + $0x2] ss:$0 sm:$0xff] }
 0x59e   :  { %5861 = vpow2.f32 %v1071_v37 }
 0x5a1   :  { %v1064_v60 = vpop.xlane.xlu1 %1063 }
 0x5a2   :  { %v1069_v62 = vsub.f32 %v1054_v59, %v1064_v60 }
 0x5a4   :  { %v5862_v63 = vpop.eup %5861  ;;  %v1073_v39 = vmul.f32 1.442695, %v1069_v62 }
 0x5a5   :  { %v1077_v42 = vsel %vm514_vm7, %v5862_v63, 0.0 }
 0x5a6   :  { %5863 = vpow2.f32 %v1073_v39  ;;  %1078 = vadd.xlane.f32.xlu0 %v1077_v42  ;;  %v1227_v42 = vpop.f32.mrf.mxu3 }
 0x5a9   :  { %v1067_v56 = vpop.xlane.xlu2 %1066 }
 0x5aa   :  { %v1070_v0 = vsub.f32 %v1057_v29, %v1067_v56 }
 0x5ac   :  { %v5864_v1 = vpop.eup %5863  ;;  %v1075_v2 = vmul.f32 1.442695, %v1070_v0 }
 0x5ad   :  { %v1080_v3 = vsel %vm514_vm7, %v5864_v1, 0.0 }
 0x5ae   :  { %5865 = vpow2.f32 %v1075_v2  ;;  %1081 = vadd.xlane.f32.xlu1 %v1080_v3  ;;  %v1230_v2 = vpop.f32.mrf.mxu3 }
 0x5b4   :  { %v5866_v4 = vpop.eup %5865 }
 0x5b5   :  { %v1083_v5 = vsel %vm514_vm7, %v5866_v4, 0.0 }
 0x5b6   :  { %1084 = vadd.xlane.f32.xlu2 %v1083_v5 }
 0x5fb   :  { %v895_v7 = vpop.xlane.xlu0 %894 }
 0x5fc   :  { %5867 = vrcp.f32 %v895_v7 }
 0x602   :  { %v5868_v8 = vpop.eup %5867 }
 0x603   :  { %v905_v45 = vmul.f32 %v5868_v8, %v5856_v40  ;;  %v898_v9 = vpop.xlane.xlu1 %897  ;;  %v5386_v40 = vld [vmem:[%s8415_s30 + $0x58] sm:$0xff]  ;;  %v1233_v8 = vpop.f32.mrf.mxu3 }
 0x604   :  { %5869 = vrcp.f32 %v898_v9 }
 0x605   :  { %5336 = vmatmul.msk.f32.vlgmr.msrb.gmra.mxu0 %vm514_vm7, %v905_v45 }
 0x606   :  { %1264 = vmatpush.msrb.mxu0 %v5375_v16 }
 0x608   :  { %1265 = vmatpush.msrb.mxu0 %v5374_v51 }
 0x60a   :  { %v5870_v10 = vpop.eup %5869  ;;  %1266 = vmatpush.msrb.mxu0 %v5373_v19 }
 0x60b   :  { %v901_v11 = vpop.xlane.xlu2 %900  ;;  %v906_v12 = vmul.f32 %v5870_v10, %v5858_v49  ;;  %v5433_v10 = vld [vmem:[%s8414_s3 + $0x78] sm:$0xff]  ;;  %v1236_v16 = vpop.f32.mrf.mxu3 }
 0x60c   :  { %5871 = vrcp.f32 %v901_v11  ;;  %1267 = vmatpush.msrb.mxu0 %v5372_v23 }
 0x60d   :  { %5337 = vmatmul.msk.f32.gmra.mxu0 %vm514_vm7, %v906_v12  ;;  %v5432_v12 = vld [vmem:[%s8414_s3 + $0x70] sm:$0xff] }
 0x612   :  { %v5872_v13 = vpop.eup %5871 }
 0x613   :  { %v907_v17 = vmul.f32 %v5872_v13, %v5860_v52  ;;  %v5431_v13 = vld [vmem:[%s8414_s3 + $0x68] sm:$0xff]  ;;  %v1239_v19 = vpop.f32.mrf.mxu3 }
 0x615   :  { %5338 = vmatmul.msk.f32.gmra.mxu0 %vm514_vm7, %v907_v17  ;;  %v5430_v17 = vld [vmem:[%s8414_s3 + $0x60] sm:$0xff] }
 0x619   :  { %v1079_v24 = vpop.xlane.xlu0 %1078 }
 0x61a   :  { %5873 = vrcp.f32 %v1079_v24 }
 0x620   :  { %v5874_v25 = vpop.eup %5873 }
 0x621   :  { %v1089_v59 = vmul.f32 %v5874_v25, %v5862_v63  ;;  %v1082_v27 = vpop.xlane.xlu1 %1081  ;;  %v5783_v63 = vld [vmem:[%s8420_s2 + $0x2] ss:$0 sm:$0xff] }
 0x622   :  { %5875 = vrcp.f32 %v1082_v27  ;;  %v1225_v0 = vadd.f32 %v5783_v63, %v1224_v54  ;;  %v1228_v3 = vadd.f32 %v5783_v63, %v1227_v42  ;;  %v1231_v7 = vadd.f32 %v5783_v63, %v1230_v2 }
 0x623   :  { %5352 = vmatmul.msk.f32.vlgmr.msra.gmra.mxu0 %vm514_vm7, %v1089_v59  ;;  %v1234_v11 = vadd.f32 %v5783_v63, %v1233_v8  ;;  %v1237_v51 = vadd.f32 %v5783_v63, %v1236_v16  ;;  %v1240_v23 = vadd.f32 %v5783_v63, %v1239_v19 }
 0x628   :  { %v5876_v28 = vpop.eup %5875 }
 0x629   :  { %v1085_v29 = vpop.xlane.xlu2 %1084  ;;  %v1090_v30 = vmul.f32 %v5876_v28, %v5864_v1  ;;  %v6823_v28 = vpop.f32.mrf.mxu2 }
 0x62a   :  { %5877 = vrcp.f32 %v1085_v29 }
 0x62b   :  { %5353 = vmatmul.msk.f32.gmra.mxu0 %vm514_vm7, %v1090_v30 }
 0x630   :  { %v5878_v31 = vpop.eup %5877 }
 0x631   :  { %v1091_v32 = vmul.f32 %v5878_v31, %v5866_v4  ;;  %v6829_v30 = vpop.f32.mrf.mxu2 }
 0x633   :  { %5354 = vmatmul.msk.f32.gmra.mxu0 %vm514_vm7, %v1091_v32 }
 0x639   :  { %v6835_v32 = vpop.f32.mrf.mxu2 }
 0x63b   :  { %5377 = vmatmul.msk.f32.vlgmr.msrb.gmra.mxu0 %vm161_vm1, %v6433_v55 }
 0x643   :  { %5378 = vmatmul.msk.f32.gmra.mxu0 %vm161_vm1, %v6450_v6 }
 0x64b   :  { %5379 = vmatmul.msk.f32.gmra.mxu0 %vm161_vm1, %v6461_v15 }
 0x653   :  { %5380 = vmatmul.msk.f32.gmra.mxu0 %vm161_vm1, %v6472_v20 }
 0x65b   :  { %5381 = vmatmul.msk.f32.gmra.mxu0 %vm161_vm1, %v6485_v43 }
 0x663   :  { %5382 = vmatmul.msk.f32.gmra.mxu0 %vm161_vm1, %v6496_v61 }
 0x682   :  { %v934_v36 = vpop.f32.mrf.mxu0 }
 0x683   :  { %5340 = vmatmul.msk.f32.vlgmr.msra.gmra.mxu1 %vm469_vm6, %v934_v36  ;;  %v6837_v36 = vpop.f32.mrf.mxu2 }
 0x684   :  { %1309 = vmatpush.msra.mxu1 %v5386_v40  ;;  %v5785_v40 = vld [vmem:[%s8419_s10 + $0x2] ss:$0 sm:$0xff] }
 0x686   :  { %1310 = vmatpush.msra.mxu1 %v5385_v41 }
 0x688   :  { %1311 = vmatpush.msra.mxu1 %v5384_v47 }
 0x68a   :  { %v937_v38 = vpop.f32.mrf.mxu0  ;;  %1312 = vmatpush.msra.mxu1 %v5383_v48 }
 0x68b   :  { %5341 = vmatmul.msk.f32.gmra.mxu1 %vm469_vm6, %v937_v38 }
 0x692   :  { %v940_v46 = vpop.f32.mrf.mxu0 }
 0x693   :  { %5342 = vmatmul.msk.f32.gmra.mxu1 %vm469_vm6, %v940_v46  ;;  %v6842_v46 = vpop.f32.mrf.mxu2 }
 0x6a0   :  { %v1118_v49 = vpop.f32.mrf.mxu0 }
 0x6a1   :  { %5355 = vmatmul.msk.f32.vlgmr.msrb.gmra.mxu1 %vm469_vm6, %v1118_v49 }
 0x6a8   :  { %v1121_v21 = vpop.f32.mrf.mxu0 }
 0x6a9   :  { %5356 = vmatmul.msk.f32.gmra.mxu1 %vm469_vm6, %v1121_v21 }
 0x6b0   :  { %v1124_v50 = vpop.f32.mrf.mxu0 }
 0x6b1   :  { %5357 = vmatmul.msk.f32.gmra.mxu1 %vm469_vm6, %v1124_v50  ;;  %v6844_v50 = vpop.f32.mrf.mxu2 }
 0x6b8   :  { %v1269_v52 = vpop.f32.mrf.mxu0 }
 0x6b9   :  { %5388 = vmatmul.msk.f32.vlgmr.msra.gmra.mxu1 %vm161_vm1, %v6433_v55  ;;  %v1270_v56 = vadd.f32 %v5784_v57, %v1269_v52 }
 0x6c0   :  { %v1272_v53 = vpop.f32.mrf.mxu0 }
 0x6c1   :  { %5389 = vmatmul.msk.f32.gmra.mxu1 %vm161_vm1, %v6450_v6  ;;  %v1273_v62 = vadd.f32 %v5784_v57, %v1272_v53 }
 0x6c8   :  { %v1275_v37 = vpop.f32.mrf.mxu0 }
 0x6c9   :  { %v1276_v60 = vadd.f32 %v5784_v57, %v1275_v37  ;;  %5390 = vmatmul.msk.f32.gmra.mxu1 %vm161_vm1, %v6461_v15 }
 0x6cb   :  { %5394 = vmatpush.xpose.msk.msrb.mxu2 %vm469_vm6, %v1276_v60 }
 0x6cf   :  { %5395 = vmatpush.xpose.msk.msrb.mxu2 %vm469_vm6, %v1273_v62 }
 0x6d0   :  { %v1278_v39 = vpop.f32.mrf.mxu0 }
 0x6d1   :  { %5391 = vmatmul.msk.f32.gmra.mxu1 %vm161_vm1, %v6472_v20  ;;  %v1279_v9 = vadd.f32 %v5784_v57, %v1278_v39 }
 0x6d3   :  { %5396 = vmatpush.xpose.msk.msrb.mxu2 %vm469_vm6, %v1270_v56 }
 0x6d6   :  { %5397 = vmatmul.msk.f32.vlgmr.msrb.gmra.mxu2 %vm469_vm6, %v1225_v0 }
 0x6d8   :  { %v1281_v1 = vpop.f32.mrf.mxu0 }
 0x6d9   :  { %5392 = vmatmul.msk.f32.gmra.mxu1 %vm161_vm1, %v6485_v43  ;;  %v1282_v45 = vadd.f32 %v5784_v57, %v1281_v1 }
 0x6de   :  { %5398 = vmatmul.msk.f32.gmra.mxu2 %vm469_vm6, %v1228_v3 }
 0x6e0   :  { %v1284_v4 = vpop.f32.mrf.mxu0 }
 0x6e1   :  { %v1285_v5 = vadd.f32 %v5784_v57, %v1284_v4  ;;  %5393 = vmatmul.msk.f32.gmra.mxu1 %vm161_vm1, %v6496_v61 }
 0x6e3   :  { %5407 = vmatpush.xpose.msk.msra.mxu0 %vm469_vm6, %v1285_v5 }
 0x6e6   :  { %5399 = vmatmul.msk.f32.gmra.mxu2 %vm469_vm6, %v1231_v7 }
 0x6e7   :  { %5408 = vmatpush.xpose.msk.msra.mxu0 %vm469_vm6, %v1282_v45 }
 0x6eb   :  { %5409 = vmatpush.xpose.msk.msra.mxu0 %vm469_vm6, %v1279_v9 }
 0x6ee   :  { %5410 = vmatmul.msk.f32.vlgmr.msra.gmra.mxu0 %vm469_vm6, %v1234_v11  ;;  %v5786_v11 = vld [vmem:[%s8418_s5 + $0x3] ss:$0 sm:$0xff] }
 0x6ef   :  { %1701 = vmatpush.msrb.mxu0 %v5433_v10 }
 0x6f1   :  { %1702 = vmatpush.msrb.mxu0 %v5432_v12 }
 0x6f3   :  { %1703 = vmatpush.msrb.mxu0 %v5431_v13 }
 0x6f5   :  { %1704 = vmatpush.msrb.mxu0 %v5430_v17 }
 0x6f6   :  { %5411 = vmatmul.msk.f32.gmra.mxu0 %vm469_vm6, %v1237_v51 }
 0x6fe   :  { %5412 = vmatmul.msk.f32.gmra.mxu0 %vm469_vm6, %v1240_v23 }
 0x700   :  { %v6807_v24 = vpop.f32.mrf.mxu1 }
 0x706   :  { %5435 = vmatmul.msk.f32.vlgmr.msrb.gmra.mxu0 %vm161_vm1, %v6433_v55 }
 0x708   :  { %v6811_v25 = vpop.f32.mrf.mxu1 }
 0x70e   :  { %5436 = vmatmul.msk.f32.gmra.mxu0 %vm161_vm1, %v6450_v6 }
 0x710   :  { %v6815_v59 = vpop.f32.mrf.mxu1 }
 0x716   :  { %5437 = vmatmul.msk.f32.gmra.mxu0 %vm161_vm1, %v6461_v15 }
 0x71e   :  { %v6819_v27 = vpop.f32.mrf.mxu1  ;;  %5438 = vmatmul.msk.f32.gmra.mxu0 %vm161_vm1, %v6472_v20 }
 0x726   :  { %v6825_v29 = vpop.f32.mrf.mxu1  ;;  %5439 = vmatmul.msk.f32.gmra.mxu0 %vm161_vm1, %v6485_v43 }
 0x72e   :  { %v6831_v31 = vpop.f32.mrf.mxu1  ;;  %5440 = vmatmul.msk.f32.gmra.mxu0 %vm161_vm1, %v6496_v61 }
 0x736   :  { %v1314_v33 = vpop.f32.mrf.mxu1 }
 0x737   :  { %v1315_v49 = vadd.f32 %v5785_v40, %v1314_v33 }
 0x73e   :  { %v1317_v38 = vpop.f32.mrf.mxu1 }
 0x73f   :  { %v1318_v48 = vadd.f32 %v5785_v40, %v1317_v38 }
 0x746   :  { %v1320_v41 = vpop.f32.mrf.mxu1 }
 0x747   :  { %v1321_v47 = vadd.f32 %v5785_v40, %v1320_v41 }
 0x749   :  { %1431 = vmatpush.msra.mxu2 %v1321_v47 }
 0x74b   :  { %1432 = vmatpush.msra.mxu2 %v1318_v48 }
 0x74d   :  { %1433 = vmatpush.msra.mxu2 %v1315_v49 }
 0x74e   :  { %v1323_v21 = vpop.f32.mrf.mxu1 }
 0x74f   :  { %v1324_v42 = vadd.f32 %v5785_v40, %v1323_v21 }
 0x756   :  { %v1326_v52 = vpop.f32.mrf.mxu1 }
 0x757   :  { %v1327_v62 = vadd.f32 %v5785_v40, %v1326_v52 }
 0x759   :  { %v1367_v53 = vpop.f32.mrf.mxu2 }
 0x75a   :  { %v1368_v54 = vadd.f32 %v6559_v35, %v1367_v53 }
 0x75c   :  { %v1376_v57 = vsel %vm514_vm7, %v1368_v54, -inf }
 0x75d   :  { %1377 = vmax.xlane.f32.xlu0 %v1376_v57 }
 0x75e   :  { %v1329_v37 = vpop.f32.mrf.mxu1 }
 0x75f   :  { %v1330_v60 = vadd.f32 %v5785_v40, %v1329_v37 }
 0x761   :  { %v1370_v63 = vpop.f32.mrf.mxu2  ;;  %1583 = vmatpush.msrb.mxu1 %v1330_v60 }
 0x762   :  { %v1371_v39 = vadd.f32 %v6559_v35, %v1370_v63 }
 0x763   :  { %1584 = vmatpush.msrb.mxu1 %v1327_v62 }
 0x764   :  { %v1379_v56 = vsel %vm514_vm7, %v1371_v39, -inf }
 0x765   :  { %1380 = vmax.xlane.f32.xlu1 %v1379_v56  ;;  %1585 = vmatpush.msrb.mxu1 %v1324_v42  ;;  %v5403_v56 = vld [vmem:[%s8365_s12 + $0x10] sm:$0xff] }
 0x766   :  { %1620 = vmatpush.msrb.mxu2 %v5403_v56  ;;  %1470 = vmatpush.msrb.mxu3 %v5403_v56 }
 0x769   :  { %v1373_v0 = vpop.f32.mrf.mxu2 }
 0x76a   :  { %v1374_v1 = vadd.f32 %v6559_v35, %v1373_v0 }
 0x76b   :  { %v1519_v2 = vpop.f32.mrf.mxu0 }
 0x76c   :  { %v1382_v3 = vsel %vm514_vm7, %v1374_v1, -inf  ;;  %v1520_v48 = vadd.f32 %v6559_v35, %v1519_v2 }
 0x76d   :  { %1383 = vmax.xlane.f32.xlu2 %v1382_v3 }
 0x773   :  { %v1522_v4 = vpop.f32.mrf.mxu0 }
 0x774   :  { %v1523_v37 = vadd.f32 %v6559_v35, %v1522_v4 }
 0x776   :  { %v1531_v63 = vsel %vm514_vm7, %v1523_v37, -inf }
 0x77b   :  { %v1525_v5 = vpop.f32.mrf.mxu0 }
 0x783   :  { %v6852_v7 = vpop.f32.mrf.mxu0 }
 0x78b   :  { %v1709_v8 = vpop.f32.mrf.mxu0 }
 0x793   :  { %v1712_v45 = vpop.f32.mrf.mxu0 }
 0x79b   :  { %v1715_v9 = vpop.f32.mrf.mxu0 }
 0x79c   :  { %v1716_v17 = vadd.f32 %v5786_v11, %v1715_v9  ;;  %v1713_v9 = vadd.f32 %v5786_v11, %v1712_v45 }
 0x7a3   :  { %v1718_v10 = vpop.f32.mrf.mxu0 }
 0x7a4   :  { %v1719_v16 = vadd.f32 %v5786_v11, %v1718_v10 }
 0x7ab   :  { %v1721_v12 = vpop.f32.mrf.mxu0 }
 0x7ac   :  { %v1722_v13 = vadd.f32 %v5786_v11, %v1721_v12 }
 0x7ae   :  { %5465 = vmatpush.xpose.msk.msra.mxu0 %vm469_vm6, %v1722_v13 }
 0x7b2   :  { %5466 = vmatpush.xpose.msk.msra.mxu0 %vm469_vm6, %v1719_v16 }
 0x7b6   :  { %5467 = vmatpush.xpose.msk.msra.mxu0 %vm469_vm6, %v1716_v17 }
 0x7d0   :  { %v1378_v51 = vpop.xlane.xlu0 %1377 }
 0x7d1   :  { %v1385_v19 = vsub.f32 %v1368_v54, %v1378_v51  ;;  %v1528_v54 = vsel %vm514_vm7, %v1520_v48, -inf  ;;  %v1707_v51 = vadd.f32 %v5786_v11, %v6852_v7 }
 0x7d3   :  { %v1388_v23 = vmul.f32 1.442695, %v1385_v19 }
 0x7d5   :  { %5879 = vpow2.f32 %v1388_v23 }
 0x7d8   :  { %v1381_v33 = vpop.xlane.xlu1 %1380 }
 0x7d9   :  { %v1386_v38 = vsub.f32 %v1371_v39, %v1381_v33  ;;  %v1526_v39 = vadd.f32 %v6559_v35, %v1525_v5  ;;  %v1710_v5 = vadd.f32 %v5786_v11, %v1709_v8 }
 0x7db   :  { %v5880_v40 = vpop.eup %5879  ;;  %v1390_v41 = vmul.f32 1.442695, %v1386_v38  ;;  %v1534_v42 = vsel %vm514_vm7, %v1526_v39, -inf }
 0x7dc   :  { %v1394_v47 = vsel %vm514_vm7, %v5880_v40, 0.0 }
 0x7dd   :  { %5881 = vpow2.f32 %v1390_v41  ;;  %1395 = vadd.xlane.f32.xlu0 %v1394_v47 }
 0x7e0   :  { %v1384_v49 = vpop.xlane.xlu2 %1383 }
 0x7e1   :  { %v1387_v21 = vsub.f32 %v1374_v1, %v1384_v49 }
 0x7e3   :  { %v5882_v52 = vpop.eup %5881  ;;  %v1392_v53 = vmul.f32 1.442695, %v1387_v21  ;;  %v5422_v21 = vld [vmem:[%s8413_s6 + $0x78] sm:$0xff] }
 0x7e4   :  { %v1397_v57 = vsel %vm514_vm7, %v5882_v52, 0.0  ;;  %1656 = vmatpush.msra.mxu3 %v5422_v21 }
 0x7e5   :  { %5883 = vpow2.f32 %v1392_v53  ;;  %1398 = vadd.xlane.f32.xlu1 %v1397_v57  ;;  %1529 = vmax.xlane.f32.xlu0 %v1528_v54  ;;  %v5420_v53 = vld [vmem:[%s8413_s6 + $0x68] sm:$0xff]  ;;  %v5444_v57 = vld [vmem:[%s8415_s30 + $0x78] sm:$0xff]  ;;  %v5419_v54 = vld [vmem:[%s8413_s6 + $0x60] sm:$0xff] }
 0x7e6   :  { %1746 = vmatpush.msra.mxu1 %v5444_v57 }
 0x7eb   :  { %v5884_v60 = vpop.eup %5883 }
 0x7ec   :  { %v1400_v62 = vsel %vm514_vm7, %v5884_v60, 0.0 }
 0x7ed   :  { %1401 = vadd.xlane.f32.xlu2 %v1400_v62  ;;  %1532 = vmax.xlane.f32.xlu1 %v1531_v63  ;;  %v5441_v62 = vld [vmem:[%s8415_s30 + $0x60] sm:$0xff] }
 0x7f5   :  { %1535 = vmax.xlane.f32.xlu2 %v1534_v42 }
 0x850   :  { %v1396_v0 = vpop.xlane.xlu0 %1395 }
 0x851   :  { %5885 = vrcp.f32 %v1396_v0 }
 0x857   :  { %v5886_v1 = vpop.eup %5885 }
 0x858   :  { %v1406_v2 = vmul.f32 %v5886_v1, %v5880_v40  ;;  %v1399_v3 = vpop.xlane.xlu1 %1398  ;;  %v1530_v4 = vpop.xlane.xlu0 %1529 }
 0x859   :  { %5887 = vrcp.f32 %v1399_v3  ;;  %v1537_v10 = vsub.f32 %v1520_v48, %v1530_v4 }
 0x85a   :  { %5400 = vmatmul.msk.f32.vlgmr.msra.gmra.mxu2 %vm514_vm7, %v1406_v2 }
 0x85b   :  { %v1540_v35 = vmul.f32 1.442695, %v1537_v10  ;;  %5452 = vmatpush.xpose.msk.msra.mxu2 %vm469_vm6, %v1713_v9 }
 0x85d   :  { %5889 = vpow2.f32 %v1540_v35 }
 0x85f   :  { %v5888_v12 = vpop.eup %5887  ;;  %5453 = vmatpush.xpose.msk.msra.mxu2 %vm469_vm6, %v1710_v5 }
 0x860   :  { %v1402_v13 = vpop.xlane.xlu2 %1401  ;;  %v1533_v16 = vpop.xlane.xlu1 %1532  ;;  %v1407_v17 = vmul.f32 %v5888_v12, %v5882_v52  ;;  %v5421_v52 = vld [vmem:[%s8413_s6 + $0x70] sm:$0xff]  ;;  %v5788_v12 = vld [vmem:[%s8420_s2 + $0x3] ss:$0 sm:$0xff] }
 0x861   :  { %5891 = vrcp.f32 %v1402_v13  ;;  %v1538_v19 = vsub.f32 %v1523_v37, %v1533_v16  ;;  %1657 = vmatpush.msra.mxu3 %v5421_v52  ;;  %v5443_v37 = vld [vmem:[%s8415_s30 + $0x70] sm:$0xff] }
 0x862   :  { %5401 = vmatmul.msk.f32.gmra.mxu2 %vm514_vm7, %v1407_v17  ;;  %1747 = vmatpush.msra.mxu1 %v5443_v37 }
 0x863   :  { %v5890_v45 = vpop.eup %5889  ;;  %v1542_v23 = vmul.f32 1.442695, %v1538_v19  ;;  %5454 = vmatpush.xpose.msk.msra.mxu2 %vm469_vm6, %v1707_v51  ;;  %1658 = vmatpush.msra.mxu3 %v5420_v53 }
 0x864   :  { %v1546_v33 = vsel %vm514_vm7, %v5890_v45, 0.0 }
 0x865   :  { %5893 = vpow2.f32 %v1542_v23  ;;  %1547 = vadd.xlane.f32.xlu0 %v1546_v33  ;;  %1659 = vmatpush.msra.mxu3 %v5419_v54 }
 0x867   :  { %v5892_v8 = vpop.eup %5891 }
 0x868   :  { %v1536_v38 = vpop.xlane.xlu2 %1535  ;;  %v1408_v40 = vmul.f32 %v5892_v8, %v5884_v60  ;;  %v5442_v60 = vld [vmem:[%s8415_s30 + $0x68] sm:$0xff] }
 0x869   :  { %v1539_v41 = vsub.f32 %v1526_v39, %v1536_v38  ;;  %1748 = vmatpush.msra.mxu1 %v5442_v60 }
 0x86a   :  { %5402 = vmatmul.msk.f32.gmra.mxu2 %vm514_vm7, %v1408_v40 }
 0x86b   :  { %v5894_v47 = vpop.eup %5893  ;;  %v1544_v7 = vmul.f32 1.442695, %v1539_v41  ;;  %1749 = vmatpush.msra.mxu1 %v5441_v62 }
 0x86c   :  { %v1549_v11 = vsel %vm514_vm7, %v5894_v47, 0.0 }
 0x86d   :  { %5895 = vpow2.f32 %v1544_v7  ;;  %1550 = vadd.xlane.f32.xlu1 %v1549_v11 }
 0x873   :  { %v5896_v48 = vpop.eup %5895 }
 0x874   :  { %v1552_v49 = vsel %vm514_vm7, %v5896_v48, 0.0 }
 0x875   :  { %1553 = vadd.xlane.f32.xlu2 %v1552_v49 }
 0x8d8   :  { %v1548_v63 = vpop.xlane.xlu0 %1547 }
 0x8d9   :  { %5897 = vrcp.f32 %v1548_v63 }
 0x8dd   :  { %v1435_v39 = vpop.f32.mrf.mxu2 }
 0x8de   :  { %5404 = vmatmul.msk.f32.vlgmr.msrb.gmra.mxu3 %vm469_vm6, %v1435_v39 }
 0x8df   :  { %v5898_v42 = vpop.eup %5897 }
 0x8e0   :  { %v1558_v56 = vmul.f32 %v5898_v42, %v5890_v45  ;;  %v1551_v0 = vpop.xlane.xlu1 %1550  ;;  %v5787_v45 = vld [vmem:[%s8419_s10 + $0x3] ss:$0 sm:$0xff] }
 0x8e1   :  { %5899 = vrcp.f32 %v1551_v0 }
 0x8e2   :  { %5413 = vmatmul.msk.f32.vlgmr.msrb.gmra.mxu1 %vm514_vm7, %v1558_v56  ;;  %v6087_v56 = vld [vmem:[%s8421_s28] ss:$0 sm:$0xff] }
 0x8e5   :  { %v1438_v1 = vpop.f32.mrf.mxu2 }
 0x8e6   :  { %5405 = vmatmul.msk.f32.gmra.mxu3 %vm469_vm6, %v1438_v1 }
 0x8e7   :  { %v5900_v2 = vpop.eup %5899 }
 0x8e8   :  { %v1554_v3 = vpop.xlane.xlu2 %1553  ;;  %v1559_v4 = vmul.f32 %v5900_v2, %v5894_v47 }
 0x8e9   :  { %5901 = vrcp.f32 %v1554_v3 }
 0x8ea   :  { %5414 = vmatmul.msk.f32.gmra.mxu1 %vm514_vm7, %v1559_v4 }
 0x8ed   :  { %v1441_v9 = vpop.f32.mrf.mxu2 }
 0x8ee   :  { %5406 = vmatmul.msk.f32.gmra.mxu3 %vm469_vm6, %v1441_v9 }
 0x8ef   :  { %v5902_v10 = vpop.eup %5901 }
 0x8f0   :  { %v1560_v35 = vmul.f32 %v5902_v10, %v5896_v48 }
 0x8f2   :  { %5415 = vmatmul.msk.f32.gmra.mxu1 %vm514_vm7, %v1560_v35 }
 0x8f6   :  { %5424 = vmatmul.msk.f32.vlgmr.msra.gmra.mxu3 %vm161_vm1, %v6433_v55 }
 0x8fa   :  { %5446 = vmatmul.msk.f32.vlgmr.msra.gmra.mxu1 %vm161_vm1, %v6433_v55 }
 0x8fe   :  { %5425 = vmatmul.msk.f32.gmra.mxu3 %vm161_vm1, %v6450_v6 }
 0x902   :  { %5447 = vmatmul.msk.f32.gmra.mxu1 %vm161_vm1, %v6450_v6 }
 0x906   :  { %5426 = vmatmul.msk.f32.gmra.mxu3 %vm161_vm1, %v6461_v15 }
 0x90a   :  { %5448 = vmatmul.msk.f32.gmra.mxu1 %vm161_vm1, %v6461_v15 }
 0x90e   :  { %5427 = vmatmul.msk.f32.gmra.mxu3 %vm161_vm1, %v6472_v20 }
 0x912   :  { %5449 = vmatmul.msk.f32.gmra.mxu1 %vm161_vm1, %v6472_v20 }
 0x916   :  { %5428 = vmatmul.msk.f32.gmra.mxu3 %vm161_vm1, %v6485_v43 }
 0x91a   :  { %5450 = vmatmul.msk.f32.gmra.mxu1 %vm161_vm1, %v6485_v43 }
 0x91e   :  { %5429 = vmatmul.msk.f32.gmra.mxu3 %vm161_vm1, %v6496_v61 }
 0x922   :  { %5451 = vmatmul.msk.f32.gmra.mxu1 %vm161_vm1, %v6496_v61 }
 0x95f   :  { %v1587_v55 = vpop.f32.mrf.mxu1 }
 0x960   :  { %5416 = vmatmul.msk.f32.vlgmr.msrb.gmra.mxu2 %vm469_vm6, %v1587_v55 }
 0x961   :  { %v6937_v6 = vpop.f32.mrf.mxu3 }
 0x967   :  { %v1590_v15 = vpop.f32.mrf.mxu1 }
 0x968   :  { %5417 = vmatmul.msk.f32.gmra.mxu2 %vm469_vm6, %v1590_v15 }
 0x969   :  { %v6940_v20 = vpop.f32.mrf.mxu3 }
 0x96f   :  { %v1593_v5 = vpop.f32.mrf.mxu1 }
 0x970   :  { %5418 = vmatmul.msk.f32.gmra.mxu2 %vm469_vm6, %v1593_v5 }
 0x971   :  { %v6943_v43 = vpop.f32.mrf.mxu3 }
 0x977   :  { %v1751_v61 = vpop.f32.mrf.mxu1 }
 0x978   :  { %v1752_v41 = vadd.f32 %v5787_v45, %v1751_v61 }
 0x979   :  { %v1661_v13 = vpop.f32.mrf.mxu3 }
 0x97a   :  { %v1662_v16 = vadd.f32 %v5788_v12, %v1661_v13 }
 0x97c   :  { %5455 = vmatmul.msk.f32.vlgmr.msra.gmra.mxu2 %vm469_vm6, %v1662_v16 }
 0x97f   :  { %v1754_v17 = vpop.f32.mrf.mxu1 }
 0x980   :  { %v1755_v40 = vadd.f32 %v5787_v45, %v1754_v17 }
 0x981   :  { %v1664_v51 = vpop.f32.mrf.mxu3 }
 0x982   :  { %v1665_v19 = vadd.f32 %v5788_v12, %v1664_v51 }
 0x984   :  { %5456 = vmatmul.msk.f32.gmra.mxu2 %vm469_vm6, %v1665_v19 }
 0x987   :  { %v1757_v23 = vpop.f32.mrf.mxu1 }
 0x988   :  { %v1758_v33 = vadd.f32 %v5787_v45, %v1757_v23 }
 0x989   :  { %v1667_v8 = vpop.f32.mrf.mxu3 }
 0x98a   :  { %v1668_v38 = vadd.f32 %v5788_v12, %v1667_v8  ;;  %1868 = vmatpush.msrb.mxu2 %v1758_v33 }
 0x98c   :  { %5457 = vmatmul.msk.f32.gmra.mxu2 %vm469_vm6, %v1668_v38 }
 0x98d   :  { %1869 = vmatpush.msrb.mxu2 %v1755_v40 }
 0x98f   :  { %1870 = vmatpush.msrb.mxu2 %v1752_v41  ;;  %v1760_v47 = vpop.f32.mrf.mxu1 }
 0x990   :  { %v1761_v60 = vadd.f32 %v5787_v45, %v1760_v47 }
 0x991   :  { %v1670_v7 = vpop.f32.mrf.mxu3 }
 0x992   :  { %v1671_v11 = vadd.f32 %v5788_v12, %v1670_v7 }
 0x994   :  { %5468 = vmatmul.msk.f32.vlgmr.msra.gmra.mxu0 %vm469_vm6, %v1671_v11 }
 0x997   :  { %v1763_v48 = vpop.f32.mrf.mxu1 }
 0x998   :  { %v1764_v54 = vadd.f32 %v5787_v45, %v1763_v48 }
 0x999   :  { %v1673_v49 = vpop.f32.mrf.mxu3 }
 0x99a   :  { %v1674_v21 = vadd.f32 %v5788_v12, %v1673_v49 }
 0x99c   :  { %5469 = vmatmul.msk.f32.gmra.mxu0 %vm469_vm6, %v1674_v21 }
 0x99f   :  { %v1766_v52 = vpop.f32.mrf.mxu1 }
 0x9a0   :  { %v1767_v53 = vadd.f32 %v5787_v45, %v1766_v52 }
 0x9a1   :  { %v1676_v57 = vpop.f32.mrf.mxu3 }
 0x9a2   :  { %v1677_v37 = vadd.f32 %v5788_v12, %v1676_v57  ;;  %2020 = vmatpush.msrb.mxu1 %v1767_v53  ;;  %v5461_v57 = vld [vmem:[%s8365_s12 + $0x18] sm:$0xff] }
 0x9a3   :  { %1907 = vmatpush.msrb.mxu3 %v5461_v57  ;;  %2057 = vmatpush.msra.mxu2 %v5461_v57 }
 0x9a4   :  { %5470 = vmatmul.msk.f32.gmra.mxu0 %vm469_vm6, %v1677_v37  ;;  %2021 = vmatpush.msrb.mxu1 %v1764_v54 }
 0x9a6   :  { %2022 = vmatpush.msrb.mxu1 %v1761_v60 }
 0x9e3   :  { %v6957_v62 = vpop.f32.mrf.mxu2 }
 0x9eb   :  { %v6959_v63 = vpop.f32.mrf.mxu2 }
 0x9f3   :  { %v6961_v39 = vpop.f32.mrf.mxu2 }
 0x9ff   :  { %v1804_v42 = vpop.f32.mrf.mxu2 }
 0xa00   :  { %v1805_v0 = vadd.f32 %v6087_v56, %v1804_v42 }
 0xa02   :  { %v1813_v1 = vsel %vm514_vm7, %v1805_v0, -inf }
 0xa03   :  { %1814 = vmax.xlane.f32.xlu0 %v1813_v1 }
 0xa07   :  { %v1807_v2 = vpop.f32.mrf.mxu2 }
 0xa08   :  { %v1808_v3 = vadd.f32 %v6087_v56, %v1807_v2 }
 0xa0a   :  { %v1816_v4 = vsel %vm514_vm7, %v1808_v3, -inf }
 0xa0b   :  { %1817 = vmax.xlane.f32.xlu1 %v1816_v4 }
 0xa0f   :  { %v1810_v9 = vpop.f32.mrf.mxu2 }
 0xa10   :  { %v1811_v10 = vadd.f32 %v6087_v56, %v1810_v9 }
 0xa11   :  { %v1956_v61 = vpop.f32.mrf.mxu0 }
 0xa12   :  { %v1819_v35 = vsel %vm514_vm7, %v1811_v10, -inf  ;;  %v1957_v19 = vadd.f32 %v6087_v56, %v1956_v61 }
 0xa13   :  { %1820 = vmax.xlane.f32.xlu2 %v1819_v35 }
 0xa14   :  { %v1965_v41 = vsel %vm514_vm7, %v1957_v19, -inf }
 0xa19   :  { %v1959_v8 = vpop.f32.mrf.mxu0 }
 0xa1a   :  { %v1960_v47 = vadd.f32 %v6087_v56, %v1959_v8 }
 0xa1c   :  { %v1968_v48 = vsel %vm514_vm7, %v1960_v47, -inf }
 0xa21   :  { %v1962_v49 = vpop.f32.mrf.mxu0 }
 0xa22   :  { %v1963_v21 = vadd.f32 %v6087_v56, %v1962_v49 }
 0xa24   :  { %v1971_v52 = vsel %vm514_vm7, %v1963_v21, -inf }
 0xa76   :  { %v1815_v55 = vpop.xlane.xlu0 %1814 }
 0xa77   :  { %v1822_v15 = vsub.f32 %v1805_v0, %v1815_v55 }
 0xa79   :  { %v1825_v5 = vmul.f32 1.442695, %v1822_v15 }
 0xa7b   :  { %5903 = vpow2.f32 %v1825_v5 }
 0xa7e   :  { %v1818_v12 = vpop.xlane.xlu1 %1817 }
 0xa7f   :  { %v1823_v13 = vsub.f32 %v1808_v3, %v1818_v12 }
 0xa81   :  { %v5904_v16 = vpop.eup %5903  ;;  %v1827_v17 = vmul.f32 1.442695, %v1823_v13 }
 0xa82   :  { %v1831_v51 = vsel %vm514_vm7, %v5904_v16, 0.0 }
 0xa83   :  { %5905 = vpow2.f32 %v1827_v17  ;;  %1832 = vadd.xlane.f32.xlu0 %v1831_v51 }
 0xa86   :  { %v1821_v45 = vpop.xlane.xlu2 %1820 }
 0xa87   :  { %v1824_v23 = vsub.f32 %v1811_v10, %v1821_v45 }
 0xa89   :  { %v5906_v33 = vpop.eup %5905  ;;  %v1829_v38 = vmul.f32 1.442695, %v1824_v23 }
 0xa8a   :  { %v1834_v40 = vsel %vm514_vm7, %v5906_v33, 0.0 }
 0xa8b   :  { %5907 = vpow2.f32 %v1829_v38  ;;  %1835 = vadd.xlane.f32.xlu1 %v1834_v40  ;;  %1966 = vmax.xlane.f32.xlu0 %v1965_v41 }
 0xa91   :  { %v5908_v7 = vpop.eup %5907 }
 0xa92   :  { %v1837_v11 = vsel %vm514_vm7, %v5908_v7, 0.0 }
 0xa93   :  { %1838 = vadd.xlane.f32.xlu2 %v1837_v11  ;;  %1969 = vmax.xlane.f32.xlu1 %v1968_v48 }
 0xa9b   :  { %1972 = vmax.xlane.f32.xlu2 %v1971_v52 }
 0xaf6   :  { %v1833_v53 = vpop.xlane.xlu0 %1832 }
 0xaf7   :  { %5909 = vrcp.f32 %v1833_v53 }
 0xafd   :  { %v5910_v54 = vpop.eup %5909 }
 0xafe   :  { %v1843_v37 = vmul.f32 %v5910_v54, %v5904_v16  ;;  %v1836_v60 = vpop.xlane.xlu1 %1835  ;;  %v1967_v42 = vpop.xlane.xlu0 %1966 }
 0xaff   :  { %5911 = vrcp.f32 %v1836_v60  ;;  %v1974_v0 = vsub.f32 %v1957_v19, %v1967_v42  ;;  %v1010_v42 = vadd.f32 %v6829_v30, %v6811_v25 }
 0xb00   :  { %5458 = vmatmul.msk.f32.vlgmr.msrb.gmra.mxu2 %vm514_vm7, %v1843_v37  ;;  %v6997_v37 = vld [vmem:[%s8366_s13] ss:$0 sm:$0xff] }
 0xb01   :  { %v1977_v56 = vmul.f32 1.442695, %v1974_v0 }
 0xb03   :  { %5913 = vpow2.f32 %v1977_v56 }
 0xb05   :  { %v5912_v1 = vpop.eup %5911 }
 0xb06   :  { %v1839_v2 = vpop.xlane.xlu2 %1838  ;;  %v1970_v3 = vpop.xlane.xlu1 %1969  ;;  %v1844_v4 = vmul.f32 %v5912_v1, %v5906_v33 }
 0xb07   :  { %5915 = vrcp.f32 %v1839_v2  ;;  %v1975_v9 = vsub.f32 %v1960_v47, %v1970_v3 }
 0xb08   :  { %5459 = vmatmul.msk.f32.gmra.mxu2 %vm514_vm7, %v1844_v4 }
 0xb09   :  { %v5914_v10 = vpop.eup %5913  ;;  %v1979_v35 = vmul.f32 1.442695, %v1975_v9 }
 0xb0a   :  { %v1983_v55 = vsel %vm514_vm7, %v5914_v10, 0.0 }
 0xb0b   :  { %5917 = vpow2.f32 %v1979_v35  ;;  %1984 = vadd.xlane.f32.xlu0 %v1983_v55  ;;  %v1189_v55 = vadd.f32 %v6837_v36, %v6819_v27  ;;  %v1192_v27 = vadd.f32 %v6842_v46, %v6825_v29 }
 0xb0d   :  { %v5916_v15 = vpop.eup %5915 }
 0xb0e   :  { %v1973_v5 = vpop.xlane.xlu2 %1972  ;;  %v1845_v12 = vmul.f32 %v5916_v15, %v5908_v7 }
 0xb0f   :  { %v1976_v61 = vsub.f32 %v1963_v21, %v1973_v5  ;;  %v1007_v21 = vadd.f32 %v6823_v28, %v6807_v24  ;;  %v1482_v28 = vadd.f32 %v6940_v20, %v1010_v42 }
 0xb10   :  { %5460 = vmatmul.msk.f32.gmra.mxu2 %vm514_vm7, %v1845_v12 }
 0xb11   :  { %v5918_v13 = vpop.eup %5917  ;;  %v1981_v16 = vmul.f32 1.442695, %v1976_v61  ;;  %v1481_v53 = vadd.f32 %v6937_v6, %v1007_v21  ;;  %v2241_v21 = vld [vmem:[%s8369_s16 + $0x10] sm:$0xff] }
 0xb12   :  { %v1986_v17 = vsel %vm514_vm7, %v5918_v13, 0.0 }
 0xb13   :  { %5919 = vpow2.f32 %v1981_v16  ;;  %1987 = vadd.xlane.f32.xlu1 %v1986_v17 }
 0xb19   :  { %v5920_v51 = vpop.eup %5919 }
 0xb1a   :  { %v1989_v19 = vsel %vm514_vm7, %v5920_v51, 0.0 }
 0xb1b   :  { %1990 = vadd.xlane.f32.xlu2 %v1989_v19  ;;  %v1632_v19 = vadd.f32 %v6959_v63, %v1192_v27  ;;  %v1195_v63 = vadd.f32 %v6844_v50, %v6831_v31 }
 0xb7e   :  { %v1985_v45 = vpop.xlane.xlu0 %1984 }
 0xb7f   :  { %5921 = vrcp.f32 %v1985_v45 }
 0xb83   :  { %v1872_v23 = vpop.f32.mrf.mxu2 }
 0xb84   :  { %5462 = vmatmul.msk.f32.vlgmr.msrb.gmra.mxu3 %vm469_vm6, %v1872_v23 }
 0xb85   :  { %v5922_v33 = vpop.eup %5921 }
 0xb86   :  { %v1995_v8 = vmul.f32 %v5922_v33, %v5914_v10  ;;  %v1988_v38 = vpop.xlane.xlu1 %1987 }
 0xb87   :  { %5923 = vrcp.f32 %v1988_v38 }
 0xb88   :  { %5471 = vmatmul.msk.f32.vlgmr.msrb.gmra.mxu1 %vm514_vm7, %v1995_v8 }
 0xb8b   :  { %v1875_v40 = vpop.f32.mrf.mxu2 }
 0xb8c   :  { %5463 = vmatmul.msk.f32.gmra.mxu3 %vm469_vm6, %v1875_v40 }
 0xb8d   :  { %v5924_v41 = vpop.eup %5923 }
 0xb8e   :  { %v1991_v47 = vpop.xlane.xlu2 %1990  ;;  %v1996_v7 = vmul.f32 %v5924_v41, %v5918_v13 }
 0xb8f   :  { %5925 = vrcp.f32 %v1991_v47  ;;  %v1633_v47 = vadd.f32 %v6961_v39, %v1195_v63  ;;  %v2242_v39 = vld [vmem:[%s8369_s16 + $0x18] sm:$0xff] }
 0xb90   :  { %5472 = vmatmul.msk.f32.gmra.mxu1 %vm514_vm7, %v1996_v7  ;;  %2277 = vmatpush.msra.mxu3 %v2242_v39 }
 0xb92   :  { %2278 = vmatpush.msra.mxu3 %v2241_v21 }
 0xb93   :  { %v1878_v11 = vpop.f32.mrf.mxu2 }
 0xb94   :  { %5464 = vmatmul.msk.f32.gmra.mxu3 %vm469_vm6, %v1878_v11 }
 0xb95   :  { %v5926_v48 = vpop.eup %5925 }
 0xb96   :  { %v1997_v49 = vmul.f32 %v5926_v48, %v5920_v51 }
 0xb98   :  { %5473 = vmatmul.msk.f32.gmra.mxu1 %vm514_vm7, %v1997_v49 }
 0xc05   :  { %v2024_v52 = vpop.f32.mrf.mxu1 }
 0xc06   :  { %5474 = vmatmul.msk.f32.vlgmr.msra.gmra.mxu2 %vm469_vm6, %v2024_v52  ;;  %v2239_v52 = vld [vmem:[%s8369_s16] sm:$0xff] }
 0xc07   :  { %v1909_v57 = vpop.f32.mrf.mxu3 }
 0xc08   :  { %v1918_v54 = vadd.f32 %v1909_v57, %v1481_v53 }
 0xc0a   :  { %v2071_v60 = vadd.f32 %v1918_v54, %v6303_v14  ;;  %v1013_v14 = vadd.f32 %v6835_v32, %v6815_v59 }
 0xc0c   :  { %v7003_v0 = vadd.f32 %v6997_v37, %v2071_v60  ;;  %v1483_v3 = vadd.f32 %v6943_v43, %v1013_v14 }
 0xc0d   :  { %v2027_v24 = vpop.f32.mrf.mxu1 }
 0xc0e   :  { %5475 = vmatmul.msk.f32.gmra.mxu2 %vm469_vm6, %v2027_v24  ;;  %v2089_v6 = vsel %vm161_vm1, %v7003_v0, 0.0 }
 0xc0f   :  { %v1912_v56 = vpop.f32.mrf.mxu3  ;;  %2090 = vadd.xlane.f32.xlu0 %v2089_v6 }
 0xc10   :  { %v1919_v1 = vadd.f32 %v1912_v56, %v1482_v28 }
 0xc12   :  { %v2072_v2 = vadd.f32 %v1919_v1, %v6310_v18 }
 0xc14   :  { %v7013_v25 = vadd.f32 %v6997_v37, %v2072_v2 }
 0xc15   :  { %v2030_v30 = vpop.f32.mrf.mxu1 }
 0xc16   :  { %5476 = vmatmul.msk.f32.gmra.mxu2 %vm469_vm6, %v2030_v30  ;;  %v2092_v20 = vsel %vm161_vm1, %v7013_v25, 0.0 }
 0xc17   :  { %2093 = vadd.xlane.f32.xlu1 %v2092_v20  ;;  %v1915_v4 = vpop.f32.mrf.mxu3 }
 0xc18   :  { %v1920_v9 = vadd.f32 %v1915_v4, %v1483_v3 }
 0xc1a   :  { %v2073_v10 = vadd.f32 %v1920_v9, %v6317_v22  ;;  %v1631_v22 = vadd.f32 %v6957_v62, %v1189_v55 }
 0xc1c   :  { %v7021_v18 = vadd.f32 %v6997_v37, %v2073_v10 }
 0xc1e   :  { %v2095_v59 = vsel %vm161_vm1, %v7021_v18, 0.0 }
 0xc1f   :  { %2096 = vadd.xlane.f32.xlu2 %v2095_v59 }
 0xc82   :  { %v2091_v32 = vpop.xlane.xlu0 %2090 }
 0xc83   :  { %v2107_v43 = vmul.f32 %v2091_v32, %v6328_v34 }
 0xc85   :  { %v7027_v35 = vsub.f32 %v7003_v0, %v2107_v43 }
 0xc87   :  { %v2119_v15 = vmul.f32 %v7027_v35, %v7027_v35 }
 0xc89   :  { %v2059_v5 = vpop.f32.mrf.mxu2  ;;  %v2125_v12 = vsel %vm161_vm1, %v2119_v15, 0.0 }
 0xc8a   :  { %v2068_v61 = vadd.f32 %v2059_v5, %v1631_v22  ;;  %v2094_v13 = vpop.xlane.xlu1 %2093  ;;  %2126 = vadd.xlane.f32.xlu0 %v2125_v12  ;;  %v7102_v5 = vld [vmem:[%s8367_s14] ss:$0 sm:$0xff] }
 0xc8b   :  { %v2108_v16 = vmul.f32 %v2094_v13, %v6328_v34 }
 0xc8c   :  { %v2074_v17 = vadd.f32 %v2068_v61, %v6324_v26 }
 0xc8d   :  { %v7038_v51 = vsub.f32 %v7013_v25, %v2108_v16  ;;  %v7109_v16 = vld [vmem:[%s8368_s15] ss:$0 sm:$0xff] }
 0xc8e   :  { %v7043_v36 = vadd.f32 %v6997_v37, %v2074_v17 }
 0xc8f   :  { %v2120_v62 = vmul.f32 %v7038_v51, %v7038_v51 }
 0xc90   :  { %v2098_v45 = vsel %vm161_vm1, %v7043_v36, 0.0 }
 0xc91   :  { %v2062_v23 = vpop.f32.mrf.mxu2  ;;  %v2128_v26 = vsel %vm161_vm1, %v2120_v62, 0.0 }
 0xc92   :  { %v2069_v33 = vadd.f32 %v2062_v23, %v1632_v19  ;;  %2129 = vadd.xlane.f32.xlu1 %v2128_v26  ;;  %2099 = vadd.xlane.f32.xlu0 %v2098_v45  ;;  %v2097_v8 = vpop.xlane.xlu2 %2096 }
 0xc93   :  { %v2109_v29 = vmul.f32 %v2097_v8, %v6328_v34 }
 0xc94   :  { %v2075_v46 = vadd.f32 %v2069_v33, %v6341_v44 }
 0xc95   :  { %v7054_v38 = vsub.f32 %v7021_v18, %v2109_v29 }
 0xc96   :  { %v7059_v40 = vadd.f32 %v6997_v37, %v2075_v46 }
 0xc97   :  { %v2121_v41 = vmul.f32 %v7054_v38, %v7054_v38 }
 0xc98   :  { %v2101_v7 = vsel %vm161_vm1, %v7059_v40, 0.0 }
 0xc99   :  { %v2065_v11 = vpop.f32.mrf.mxu2  ;;  %v2131_v44 = vsel %vm161_vm1, %v2121_v41, 0.0 }
 0xc9a   :  { %v2070_v48 = vadd.f32 %v2065_v11, %v1633_v47  ;;  %2102 = vadd.xlane.f32.xlu1 %v2101_v7  ;;  %2132 = vadd.xlane.f32.xlu2 %v2131_v44 }
 0xc9c   :  { %v2076_v49 = vadd.f32 %v2070_v48, %v6362_v58  ;;  %v2240_v58 = vld [vmem:[%s8369_s16 + $0x8] sm:$0xff] }
 0xc9d   :  { %2279 = vmatpush.msra.mxu3 %v2240_v58 }
 0xc9e   :  { %v7069_v31 = vadd.f32 %v6997_v37, %v2076_v49 }
 0xc9f   :  { %2280 = vmatpush.msra.mxu3 %v2239_v52 }
 0xca0   :  { %v2104_v50 = vsel %vm161_vm1, %v7069_v31, 0.0 }
 0xca2   :  { %2105 = vadd.xlane.f32.xlu2 %v2104_v50 }
 0xcfd   :  { %v2127_v53 = vpop.xlane.xlu0 %2126 }
 0xcfe   :  { %v2143_v57 = vmul.f32 %v2127_v53, %v6328_v34 }
 0xd00   :  { %v2149_v54 = vadd.f32 1e-05, %v2143_v57 }
 0xd02   :  { %5927 = vrsqrt.f32 %v2149_v54  ;;  %vm2161_vm9 = vweird.f32 %v2149_v54 }
 0xd05   :  { %v2130_v37 = vpop.xlane.xlu1 %2129  ;;  %v2100_v60 = vpop.xlane.xlu0 %2099 }
 0xd06   :  { %v2144_v42 = vmul.f32 %v2130_v37, %v6328_v34  ;;  %v2110_v24 = vmul.f32 %v2100_v60, %v6328_v34 }
 0xd08   :  { %v5928_v28 = vpop.eup %5927  ;;  %v2150_v6 = vadd.f32 1e-05, %v2144_v42  ;;  %v7089_v56 = vsub.f32 %v7043_v36, %v2110_v24 }
 0xd09   :  { %v2156_v1 = vmul.f32 %v5928_v28, %v2149_v54  ;;  %vm2162_vm8 = vweird.f32 %v5928_v28 }
 0xd0a   :  { %5929 = vrsqrt.f32 %v2150_v6  ;;  %v2122_v2 = vmul.f32 %v7089_v56, %v7089_v56  ;;  %vm2163_vm10 = vmor %vm2161_vm9, %vm2162_vm8  ;;  %vm2171_vm12 = vweird.f32 %v2150_v6 }
 0xd0b   :  { %v2157_v14 = vmul.f32 %v5928_v28, %v2156_v1 }
 0xd0c   :  { %v2134_v30 = vsel %vm161_vm1, %v2122_v2, 0.0 }
 0xd0d   :  { %v2158_v3 = vmul.f32 0.5, %v2157_v14  ;;  %v2103_v20 = vpop.xlane.xlu1 %2102  ;;  %2135 = vadd.xlane.f32.xlu0 %v2134_v30  ;;  %v2133_v4 = vpop.xlane.xlu2 %2132 }
 0xd0e   :  { %v2111_v9 = vmul.f32 %v2103_v20, %v6328_v34  ;;  %v2145_v10 = vmul.f32 %v2133_v4, %v6328_v34 }
 0xd0f   :  { %v2159_v59 = vsub.f32 1.5, %v2158_v3 }
 0xd10   :  { %v5930_v32 = vpop.eup %5929  ;;  %v7097_v43 = vsub.f32 %v7059_v40, %v2111_v9  ;;  %v2151_v55 = vadd.f32 1e-05, %v2145_v10 }
 0xd11   :  { %v2160_v15 = vmul.f32 %v5928_v28, %v2159_v59  ;;  %v2166_v22 = vmul.f32 %v5930_v32, %v2150_v6  ;;  %vm2172_vm11 = vweird.f32 %v5930_v32 }
 0xd12   :  { %5931 = vrsqrt.f32 %v2151_v55  ;;  %v2123_v12 = vmul.f32 %v7097_v43, %v7097_v43  ;;  %vm2173_vm13 = vmor %vm2171_vm12, %vm2172_vm11  ;;  %vm2181_vm15 = vweird.f32 %v2151_v55 }
 0xd13   :  { %v2164_v61 = vsel %vm2163_vm10, %v5928_v28, %v2160_v15  ;;  %v2167_v13 = vmul.f32 %v5930_v32, %v2166_v22  ;;  %v7139_v22 = vld [vmem:[%s8370_s17] ss:$0 sm:$0xff] }
 0xd14   :  { %v2215_v17 = vmul.f32 %v2164_v61, %v7027_v35  ;;  %v2137_v27 = vsel %vm161_vm1, %v2123_v12, 0.0 }
 0xd15   :  { %v2168_v62 = vmul.f32 0.5, %v2167_v13  ;;  %2138 = vadd.xlane.f32.xlu1 %v2137_v27  ;;  %v2106_v19 = vpop.xlane.xlu2 %2105 }
 0xd16   :  { %v2224_v45 = vmul.f32 %v7102_v5, %v2215_v17  ;;  %v2112_v23 = vmul.f32 %v2106_v19, %v6328_v34 }
 0xd17   :  { %v2169_v26 = vsub.f32 1.5, %v2168_v62 }
 0xd18   :  { %v5932_v33 = vpop.eup %5931  ;;  %v2233_v8 = vadd.f32 %v7109_v16, %v2224_v45  ;;  %v7117_v29 = vsub.f32 %v7069_v31, %v2112_v23 }
 0xd19   :  { %v2170_v46 = vmul.f32 %v5930_v32, %v2169_v26  ;;  %v2176_v35 = vmul.f32 %v5932_v33, %v2151_v55  ;;  %vm2182_vm14 = vweird.f32 %v5932_v33 }
 0xd1a   :  { %5477 = vmatmul.msk.f32.vlgmr.msra.gmra.mxu3 %vm161_vm1, %v2233_v8  ;;  %v2124_v63 = vmul.f32 %v7117_v29, %v7117_v29  ;;  %vm2183_vm0 = vmor %vm2181_vm15, %vm2182_vm14 }
 0xd1b   :  { %v2174_v41 = vsel %vm2173_vm13, %v5930_v32, %v2170_v46  ;;  %v2177_v47 = vmul.f32 %v5932_v33, %v2176_v35 }
 0xd1c   :  { %v2216_v7 = vmul.f32 %v2174_v41, %v7038_v51  ;;  %v2140_v11 = vsel %vm161_vm1, %v2124_v63, 0.0 }
 0xd1d   :  { %v2178_v44 = vmul.f32 0.5, %v2177_v47  ;;  %2141 = vadd.xlane.f32.xlu2 %v2140_v11 }
 0xd1e   :  { %v2225_v48 = vmul.f32 %v7102_v5, %v2216_v7 }
 0xd1f   :  { %v2179_v49 = vsub.f32 1.5, %v2178_v44 }
 0xd20   :  { %v2234_v50 = vadd.f32 %v7109_v16, %v2225_v48 }
 0xd21   :  { %v2180_v39 = vmul.f32 %v5932_v33, %v2179_v49 }
 0xd22   :  { %5478 = vmatmul.msk.f32.gmra.mxu3 %vm161_vm1, %v2234_v50 }
 0xd23   :  { %v2184_v21 = vsel %vm2183_vm0, %v5932_v33, %v2180_v39 }
 0xd24   :  { %v2217_v58 = vmul.f32 %v2184_v21, %v7054_v38 }
 0xd26   :  { %v2226_v51 = vmul.f32 %v7102_v5, %v2217_v58  ;;  %v2571_v58 = vld [vmem:[%s8371_s18 + $0x38] sm:$0xff] }
 0xd27   :  { %2599 = vmatpush.msrb.mxu0 %v2571_v58 }
 0xd28   :  { %v2235_v52 = vadd.f32 %v7109_v16, %v2226_v51 }
 0xd2a   :  { %5479 = vmatmul.msk.f32.gmra.mxu3 %vm161_vm1, %v2235_v52 }
 0xd80   :  { %v2136_v53 = vpop.xlane.xlu0 %2135 }
 0xd81   :  { %v2146_v57 = vmul.f32 %v2136_v53, %v6328_v34 }
 0xd83   :  { %v2152_v54 = vadd.f32 1e-05, %v2146_v57  ;;  %v2570_v57 = vld [vmem:[%s8371_s18 + $0x30] sm:$0xff] }
 0xd84   :  { %2600 = vmatpush.msrb.mxu0 %v2570_v57 }
 0xd85   :  { %5933 = vrsqrt.f32 %v2152_v54  ;;  %vm2191_vm3 = vweird.f32 %v2152_v54 }
 0xd88   :  { %v2139_v37 = vpop.xlane.xlu1 %2138 }
 0xd89   :  { %v2147_v60 = vmul.f32 %v2139_v37, %v6328_v34 }
 0xd8b   :  { %v5934_v42 = vpop.eup %5933  ;;  %v2153_v24 = vadd.f32 1e-05, %v2147_v60 }
 0xd8c   :  { %v2186_v28 = vmul.f32 %v5934_v42, %v2152_v54  ;;  %vm2192_vm2 = vweird.f32 %v5934_v42 }
 0xd8d   :  { %5935 = vrsqrt.f32 %v2153_v24  ;;  %vm2193_vm4 = vmor %vm2191_vm3, %vm2192_vm2  ;;  %vm2201_vm8 = vweird.f32 %v2153_v24 }
 0xd8e   :  { %v2187_v6 = vmul.f32 %v5934_v42, %v2186_v28 }
 0xd90   :  { %v2188_v38 = vmul.f32 0.5, %v2187_v6  ;;  %v2142_v1 = vpop.xlane.xlu2 %2141 }
 0xd91   :  { %v2148_v2 = vmul.f32 %v2142_v1, %v6328_v34 }
 0xd92   :  { %v2189_v14 = vsub.f32 1.5, %v2188_v38  ;;  %v2568_v38 = vld [vmem:[%s8371_s18 + $0x20] sm:$0xff] }
 0xd93   :  { %v5936_v30 = vpop.eup %5935  ;;  %v2154_v3 = vadd.f32 1e-05, %v2148_v2 }
 0xd94   :  { %v2190_v20 = vmul.f32 %v5934_v42, %v2189_v14  ;;  %v2196_v4 = vmul.f32 %v5936_v30, %v2153_v24  ;;  %vm2202_vm5 = vweird.f32 %v5936_v30 }
 0xd95   :  { %5937 = vrsqrt.f32 %v2154_v3  ;;  %vm2203_vm9 = vmor %vm2201_vm8, %vm2202_vm5  ;;  %vm2211_vm11 = vweird.f32 %v2154_v3 }
 0xd96   :  { %v2194_v9 = vsel %vm2193_vm4, %v5934_v42, %v2190_v20  ;;  %v2197_v10 = vmul.f32 %v5936_v30, %v2196_v4  ;;  %v2569_v42 = vld [vmem:[%s8371_s18 + $0x28] sm:$0xff]  ;;  %v2567_v4 = vld [vmem:[%s8371_s18 + $0x18] sm:$0xff]  ;;  %vm2572_vm4 = vcmask 523264  }
 0xd97   :  { %v2218_v59 = vmul.f32 %v2194_v9, %v7089_v56  ;;  %2601 = vmatpush.msrb.mxu0 %v2569_v42 }
 0xd98   :  { %v2198_v32 = vmul.f32 0.5, %v2197_v10 }
 0xd99   :  { %v2227_v55 = vmul.f32 %v7102_v5, %v2218_v59  ;;  %2602 = vmatpush.msrb.mxu0 %v2568_v38 }
 0xd9a   :  { %v2199_v15 = vsub.f32 1.5, %v2198_v32  ;;  %v2566_v32 = vld [vmem:[%s8371_s18 + $0x10] sm:$0xff] }
 0xd9b   :  { %v5938_v12 = vpop.eup %5937  ;;  %v2236_v61 = vadd.f32 %v7109_v16, %v2227_v55  ;;  %2603 = vmatpush.msrb.mxu0 %v2567_v4 }
 0xd9c   :  { %v2200_v13 = vmul.f32 %v5936_v30, %v2199_v15  ;;  %v2206_v17 = vmul.f32 %v5938_v12, %v2154_v3  ;;  %vm2212_vm10 = vweird.f32 %v5938_v12 }
 0xd9d   :  { %v2282_v27 = vpop.f32.mrf.mxu3  ;;  %5480 = vmatmul.msk.f32.gmra.mxu3 %vm161_vm1, %v2236_v61  ;;  %vm2213_vm12 = vmor %vm2211_vm11, %vm2212_vm10  ;;  %2604 = vmatpush.msrb.mxu0 %v2566_v32 }
 0xd9e   :  { %v2204_v56 = vsel %vm2203_vm9, %v5936_v30, %v2200_v13  ;;  %v2207_v62 = vmul.f32 %v5938_v12, %v2206_v17  ;;  %v7144_v19 = vadd.f32 %v7139_v22, %v2282_v27  ;;  %v2565_v13 = vld [vmem:[%s8371_s18 + $0x8] sm:$0xff] }
 0xd9f   :  { %v2219_v45 = vmul.f32 %v2204_v56, %v7097_v43  ;;  %2605 = vmatpush.msrb.mxu0 %v2565_v13 }
 0xda0   :  { %v2208_v23 = vmul.f32 0.5, %v2207_v62  ;;  %v7148_v26 = vmul.f32 0.70710677, %v7144_v19 }
 0xda1   :  { %v2228_v33 = vmul.f32 %v7102_v5, %v2219_v45  ;;  %v2564_v45 = vld [vmem:[%s8371_s18] sm:$0xff] }
 0xda2   :  { %v2209_v8 = vsub.f32 1.5, %v2208_v23  ;;  %v2312_v46 = vmul.f32 %v7148_v26, %v7148_v26  ;;  %2606 = vmatpush.msrb.mxu0 %v2564_v45 }
 0xda3   :  { %v2237_v35 = vadd.f32 %v7109_v16, %v2228_v33 }
 0xda4   :  { %v2210_v63 = vmul.f32 %v5938_v12, %v2209_v8  ;;  %v7154_v41 = vmin.f32 %v2312_v46, 16.0 }
 0xda5   :  { %v2285_v47 = vpop.f32.mrf.mxu3  ;;  %5481 = vmatmul.msk.f32.gmra.mxu3 %vm161_vm1, %v2237_v35 }
 0xda6   :  { %v2214_v43 = vsel %vm2213_vm12, %v5938_v12, %v2210_v63  ;;  %v2314_v7 = vmul.f32 2.1237322e-06, %v7154_v41  ;;  %v2325_v11 = vmul.f32 3.8918573e-05, %v7154_v41  ;;  %v7160_v44 = vadd.f32 %v7139_v22, %v2285_v47 }
 0xda7   :  { %v2220_v48 = vmul.f32 %v2214_v43, %v7117_v29 }
 0xda8   :  { %v2315_v49 = vadd.f32 0.00028619796, %v2314_v7  ;;  %v2326_v50 = vadd.f32 0.001143296, %v2325_v11  ;;  %v7164_v39 = vmul.f32 0.70710677, %v7160_v44 }
 0xda9   :  { %v2229_v21 = vmul.f32 %v7102_v5, %v2220_v48 }
 0xdaa   :  { %v2316_v51 = vmul.f32 %v2315_v49, %v7154_v41  ;;  %v2327_v52 = vmul.f32 %v2326_v50, %v7154_v41  ;;  %v2352_v53 = vmul.f32 %v7164_v39, %v7164_v39 }
 0xdab   :  { %v2238_v29 = vadd.f32 %v7109_v16, %v2229_v21 }
 0xdac   :  { %v2317_v54 = vadd.f32 0.0036580483, %v2316_v51  ;;  %v2328_v5 = vadd.f32 0.014752088, %v2327_v52  ;;  %v7178_v37 = vmin.f32 %v2352_v53, 16.0 }
 0xdad   :  { %v2288_v60 = vpop.f32.mrf.mxu3  ;;  %5482 = vmatmul.msk.f32.gmra.mxu3 %vm161_vm1, %v2238_v29 }
 0xdae   :  { %v2329_v24 = vmul.f32 %v2328_v5, %v7154_v41  ;;  %v7186_v16 = vadd.f32 %v7139_v22, %v2288_v60  ;;  %v2354_v28 = vmul.f32 2.1237322e-06, %v7178_v37  ;;  %v2365_v6 = vmul.f32 3.8918573e-05, %v7178_v37 }
 0xdaf   :  { %v2318_v1 = vmul.f32 %v2317_v54, %v7154_v41 }
 0xdb0   :  { %v2330_v2 = vadd.f32 0.112945676, %v2329_v24  ;;  %v2355_v14 = vadd.f32 0.00028619796, %v2354_v28  ;;  %v2366_v30 = vadd.f32 0.001143296, %v2365_v6 }
 0xdb1   :  { %v7195_v3 = vmul.f32 0.70710677, %v7186_v16  ;;  %v2319_v55 = vadd.f32 0.05243302, %v2318_v1 }
 0xdb2   :  { %v2331_v20 = vmul.f32 %v2330_v2, %v7154_v41  ;;  %v2356_v9 = vmul.f32 %v2355_v14, %v7178_v37  ;;  %v2367_v10 = vmul.f32 %v2366_v30, %v7178_v37 }
 0xdb3   :  { %v2392_v59 = vmul.f32 %v7195_v3, %v7195_v3  ;;  %v2320_v23 = vmul.f32 %v2319_v55, %v7154_v41 }
 0xdb4   :  { %v2332_v15 = vadd.f32 0.4994258, %v2331_v20  ;;  %v2368_v12 = vadd.f32 0.014752088, %v2367_v10  ;;  %v2357_v27 = vadd.f32 0.0036580483, %v2356_v9 }
 0xdb5   :  { %v7208_v61 = vmin.f32 %v2392_v59, 16.0  ;;  %v2321_v43 = vadd.f32 0.18741608, %v2320_v23 }
 0xdb6   :  { %v2333_v17 = vmul.f32 %v2332_v15, %v7154_v41  ;;  %v2369_v56 = vmul.f32 %v2368_v12, %v7178_v37  ;;  %v2358_v63 = vmul.f32 %v2357_v27, %v7178_v37 }
 0xdb7   :  { %v2394_v62 = vmul.f32 2.1237322e-06, %v7208_v61  ;;  %v2405_v8 = vmul.f32 3.8918573e-05, %v7208_v61  ;;  %v2322_v51 = vmul.f32 %v2321_v43, %v7154_v41 }
 0xdb8   :  { %v2334_v33 = vadd.f32 1.0, %v2333_v17  ;;  %v2370_v46 = vadd.f32 0.112945676, %v2369_v56  ;;  %v2359_v49 = vadd.f32 0.05243302, %v2358_v63 }
 0xdb9   :  { %v2395_v35 = vadd.f32 0.00028619796, %v2394_v62  ;;  %v2406_v7 = vadd.f32 0.001143296, %v2405_v8  ;;  %v2323_v42 = vadd.f32 1.1283791, %v2322_v51 }
 0xdba   :  { %5939 = vrcp.f32 %v2334_v33  ;;  %v2371_v47 = vmul.f32 %v2370_v46, %v7178_v37  ;;  %v2360_v54 = vmul.f32 %v2359_v49, %v7178_v37  ;;  %v2346_v24 = vand.u32 2147483648, %v2334_v33 }
 0xdbb   :  { %v2396_v48 = vmul.f32 %v2395_v35, %v7208_v61  ;;  %v2407_v50 = vmul.f32 %v2406_v7, %v7208_v61  ;;  %v2344_v38 = vand.u32 2147483647, %v2334_v33  ;;  %vm2340_vm14 = vweird.f32 %v2334_v33 }
 0xdbc   :  { %v2372_v11 = vadd.f32 0.4994258, %v2371_v47  ;;  %v2361_v2 = vadd.f32 0.18741608, %v2360_v54  ;;  %v2347_v30 = vor.u32 1.1754944e-38, %v2346_v24  ;;  %v2324_v9 = vmul.f32 %v2323_v42, %v7148_v26 }
 0xdbd   :  { %v2408_v52 = vadd.f32 0.014752088, %v2407_v50  ;;  %v2397_v57 = vadd.f32 0.0036580483, %v2396_v48  ;;  %vm2345_vm0 = vcmp.eq.f32.partialorder %v2344_v38, 8.507059e+37  ;;  %v2300_v8 = vmul.f32 0.5, %v7144_v19 }
 0xdbe   :  { %v2373_v21 = vmul.f32 %v2372_v11, %v7178_v37  ;;  %v2362_v55 = vmul.f32 %v2361_v2, %v7178_v37 }
 0xdbf   :  { %v2409_v5 = vmul.f32 %v2408_v52, %v7208_v61  ;;  %v2398_v1 = vmul.f32 %v2397_v57, %v7208_v61 }
 0xdc0   :  { %v5940_v58 = vpop.eup %5939  ;;  %v2374_v29 = vadd.f32 1.0, %v2373_v21  ;;  %v2363_v23 = vadd.f32 1.1283791, %v2362_v55 }
 0xdc1   :  { %v2336_v53 = vmul.f32 %v5940_v58, %v2334_v33  ;;  %v2410_v28 = vadd.f32 0.112945676, %v2409_v5  ;;  %vm2341_vm13 = vweird.f32 %v5940_v58  ;;  %v2399_v59 = vadd.f32 0.05243302, %v2398_v1 }
 0xdc2   :  { %5941 = vrcp.f32 %v2374_v29  ;;  %vm2342_vm15 = vmor %vm2340_vm14, %vm2341_vm13  ;;  %v2386_v56 = vand.u32 2147483648, %v2374_v29  ;;  %v2384_v26 = vand.u32 2147483647, %v2374_v29  ;;  %vm2380_vm3 = vweird.f32 %v2374_v29 }
 0xdc3   :  { %v2337_v60 = vsub.f32 1.0, %v2336_v53  ;;  %v2411_v41 = vmul.f32 %v2410_v28, %v7208_v61  ;;  %v2400_v62 = vmul.f32 %v2399_v59, %v7208_v61  ;;  %v2364_v43 = vmul.f32 %v2363_v23, %v7164_v39 }
 0xdc4   :  { %v2387_v63 = vor.u32 1.1754944e-38, %v2386_v56  ;;  %vm2385_vm8 = vcmp.eq.f32.partialorder %v2384_v26, 8.507059e+37 }
 0xdc5   :  { %v2338_v6 = vmul.f32 %v5940_v58, %v2337_v60  ;;  %v2412_v20 = vadd.f32 0.4994258, %v2411_v41  ;;  %v2401_v47 = vadd.f32 0.18741608, %v2400_v62 }
 0xdc7   :  { %v2339_v14 = vadd.f32 %v5940_v58, %v2338_v6  ;;  %v2413_v13 = vmul.f32 %v2412_v20, %v7208_v61  ;;  %v2402_v19 = vmul.f32 %v2401_v47, %v7208_v61  ;;  %v2302_v6 = vmul.f32 0.5, %v7186_v16 }
 0xdc8   :  { %v5942_v4 = vpop.eup %5941 }
 0xdc9   :  { %v2343_v10 = vsel %vm2342_vm15, %v5940_v58, %v2339_v14  ;;  %v2376_v15 = vmul.f32 %v5942_v4, %v2374_v29  ;;  %v2414_v45 = vadd.f32 1.0, %v2413_v13  ;;  %vm2381_vm2 = vweird.f32 %v5942_v4 }
 0xdca   :  { %v2348_v32 = vsel %vm2345_vm0, %v2347_v30, %v2343_v10  ;;  %vm2382_vm5 = vmor %vm2380_vm3, %vm2381_vm2  ;;  %v2301_v58 = vmul.f32 0.5, %v7160_v44  ;;  %v2403_v53 = vadd.f32 1.1283791, %v2402_v19 }
 0xdcb   :  { %v2349_v12 = vmul.f32 %v2348_v32, %v2324_v9  ;;  %v2377_v17 = vsub.f32 1.0, %v2376_v15  ;;  %5943 = vrcp.f32 %v2414_v45  ;;  %v2426_v29 = vand.u32 2147483648, %v2414_v45 }
 0xdcc   :  { %v2424_v39 = vand.u32 2147483647, %v2414_v45  ;;  %vm2420_vm10 = vweird.f32 %v2414_v45  ;;  %v2404_v61 = vmul.f32 %v2403_v53, %v7195_v3 }
 0xdcd   :  { %v5483_v27 = vclamps-f32 %v2349_v12, 1.0  ;;  %v2378_v33 = vmul.f32 %v5942_v4, %v2377_v17  ;;  %v2427_v60 = vor.u32 1.1754944e-38, %v2426_v29 }
 0xdce   :  { %vm2425_vm12 = vcmp.eq.f32.partialorder %v2424_v39, 8.507059e+37 }
 0xdcf   :  { %v2552_v46 = vadd.f32 1.0, %v5483_v27  ;;  %v2379_v35 = vadd.f32 %v5942_v4, %v2378_v33 }
 0xdd1   :  { %v2558_v37 = vmul.f32 %v2552_v46, %v2300_v8  ;;  %v2383_v7 = vsel %vm2382_vm5, %v5942_v4, %v2379_v35  ;;  %v5944_v49 = vpop.eup %5943 }
 0xdd2   :  { %v2388_v11 = vsel %vm2385_vm8, %v2387_v63, %v2383_v7  ;;  %v2416_v21 = vmul.f32 %v5944_v49, %v2414_v45  ;;  %vm2421_vm9 = vweird.f32 %v5944_v49 }
 0xdd3   :  { %5489 = vmatmul.msk.f32.vlgmr.msrb.gmra.mxu0 %vm2572_vm4, %v2558_v37  ;;  %v2389_v48 = vmul.f32 %v2388_v11, %v2364_v43  ;;  %vm2422_vm11 = vmor %vm2420_vm10, %vm2421_vm9 }
 0xdd4   :  { %v2417_v52 = vsub.f32 1.0, %v2416_v21 }
 0xdd5   :  { %v5484_v50 = vclamps-f32 %v2389_v48, 1.0 }
 0xdd6   :  { %v2418_v54 = vmul.f32 %v5944_v49, %v2417_v52 }
 0xdd7   :  { %v2553_v51 = vadd.f32 1.0, %v5484_v50 }
 0xdd8   :  { %v2419_v5 = vadd.f32 %v5944_v49, %v2418_v54 }
 0xdd9   :  { %v2559_v57 = vmul.f32 %v2553_v51, %v2301_v58 }
 0xdda   :  { %v2423_v42 = vsel %vm2422_vm11, %v5944_v49, %v2419_v5 }
 0xddb   :  { %5490 = vmatmul.msk.f32.gmra.mxu0 %vm2572_vm4, %v2559_v57  ;;  %v2428_v24 = vsel %vm2425_vm12, %v2427_v60, %v2423_v42 }
 0xddc   :  { %v2429_v44 = vmul.f32 %v2428_v24, %v2404_v61 }
 0xdde   :  { %v5485_v28 = vclamps-f32 %v2429_v44, 1.0 }
 0xde0   :  { %v2554_v38 = vadd.f32 1.0, %v5485_v28 }
 0xde2   :  { %v2560_v1 = vmul.f32 %v2554_v38, %v2302_v6 }
 0xde4   :  { %5491 = vmatmul.msk.f32.gmra.mxu0 %vm2572_vm4, %v2560_v1 }
 0xe20   :  { %v2291_v2 = vpop.f32.mrf.mxu3 }
 0xe21   :  { %v7245_v41 = vadd.f32 %v7139_v22, %v2291_v2 }
 0xe23   :  { %v7248_v14 = vmul.f32 0.70710677, %v7245_v41 }
 0xe25   :  { %v2432_v3 = vmul.f32 %v7248_v14, %v7248_v14 }
 0xe27   :  { %v2433_v30 = vmin.f32 %v2432_v3, 16.0 }
 0xe28   :  { %v2294_v20 = vpop.f32.mrf.mxu3 }
 0xe29   :  { %v2434_v4 = vmul.f32 2.1237322e-06, %v2433_v30  ;;  %v2445_v9 = vmul.f32 3.8918573e-05, %v2433_v30  ;;  %v7253_v16 = vadd.f32 %v7139_v22, %v2294_v20 }
 0xe2b   :  { %v2435_v10 = vadd.f32 0.00028619796, %v2434_v4  ;;  %v2446_v59 = vadd.f32 0.001143296, %v2445_v9  ;;  %v7256_v32 = vmul.f32 0.70710677, %v7253_v16 }
 0xe2d   :  { %v2436_v55 = vmul.f32 %v2435_v10, %v2433_v30  ;;  %v2447_v15 = vmul.f32 %v2446_v59, %v2433_v30  ;;  %v2472_v12 = vmul.f32 %v7256_v32, %v7256_v32 }
 0xe2f   :  { %v2437_v13 = vadd.f32 0.0036580483, %v2436_v55  ;;  %v2448_v17 = vadd.f32 0.014752088, %v2447_v15  ;;  %v2473_v27 = vmin.f32 %v2472_v12, 16.0 }
 0xe30   :  { %v2297_v56 = vpop.f32.mrf.mxu3 }
 0xe31   :  { %v2449_v62 = vmul.f32 %v2448_v17, %v2433_v30  ;;  %v7261_v45 = vadd.f32 %v7139_v22, %v2297_v56  ;;  %v2438_v23 = vmul.f32 %v2437_v13, %v2433_v30  ;;  %v2474_v33 = vmul.f32 2.1237322e-06, %v2473_v27 }
 0xe32   :  { %v2485_v26 = vmul.f32 3.8918573e-05, %v2473_v27 }
 0xe33   :  { %v2450_v8 = vadd.f32 0.112945676, %v2449_v62  ;;  %v2475_v46 = vadd.f32 0.00028619796, %v2474_v33  ;;  %v7264_v37 = vmul.f32 0.70710677, %v7261_v45 }
 0xe34   :  { %v2486_v35 = vadd.f32 0.001143296, %v2485_v26  ;;  %v2439_v47 = vadd.f32 0.05243302, %v2438_v23 }
 0xe35   :  { %v2451_v63 = vmul.f32 %v2450_v8, %v2433_v30  ;;  %v2476_v43 = vmul.f32 %v2475_v46, %v2473_v27  ;;  %v2512_v11 = vmul.f32 %v7264_v37, %v7264_v37 }
 0xe36   :  { %v2487_v7 = vmul.f32 %v2486_v35, %v2473_v27  ;;  %v2440_v21 = vmul.f32 %v2439_v47, %v2433_v30 }
 0xe37   :  { %v2452_v48 = vadd.f32 0.4994258, %v2451_v63  ;;  %v2477_v49 = vadd.f32 0.0036580483, %v2476_v43  ;;  %v7268_v19 = vmin.f32 %v2512_v11, 16.0 }
 0xe38   :  { %v2488_v22 = vadd.f32 0.014752088, %v2487_v7  ;;  %v2441_v39 = vadd.f32 0.18741608, %v2440_v21 }
 0xe39   :  { %v2453_v50 = vmul.f32 %v2452_v48, %v2433_v30  ;;  %v2514_v51 = vmul.f32 2.1237322e-06, %v7268_v19  ;;  %v2478_v53 = vmul.f32 %v2477_v49, %v2473_v27  ;;  %v2525_v29 = vmul.f32 3.8918573e-05, %v7268_v19 }
 0xe3a   :  { %v2489_v58 = vmul.f32 %v2488_v22, %v2473_v27  ;;  %v2442_v28 = vmul.f32 %v2441_v39, %v2433_v30  ;;  %v7282_v22 = vld [vmem:[%s8372_s19] ss:$0 sm:$0xff] }
 0xe3b   :  { %v2454_v52 = vadd.f32 1.0, %v2453_v50  ;;  %v2515_v54 = vadd.f32 0.00028619796, %v2514_v51  ;;  %v2479_v60 = vadd.f32 0.05243302, %v2478_v53 }
 0xe3c   :  { %v2490_v57 = vadd.f32 0.112945676, %v2489_v58  ;;  %v2526_v61 = vadd.f32 0.001143296, %v2525_v29  ;;  %v2443_v10 = vadd.f32 1.1283791, %v2442_v28 }
 0xe3d   :  { %5945 = vrcp.f32 %v2454_v52  ;;  %v2516_v24 = vmul.f32 %v2515_v54, %v7268_v19  ;;  %v2480_v1 = vmul.f32 %v2479_v60, %v2473_v27  ;;  %v2466_v55 = vand.u32 2147483648, %v2454_v52 }
 0xe3e   :  { %v2491_v5 = vmul.f32 %v2490_v57, %v2473_v27  ;;  %v2527_v44 = vmul.f32 %v2526_v61, %v7268_v19  ;;  %v2464_v17 = vand.u32 2147483647, %v2454_v52  ;;  %vm2460_vm14 = vweird.f32 %v2454_v52 }
 0xe3f   :  { %v2517_v4 = vadd.f32 0.0036580483, %v2516_v24  ;;  %v2481_v15 = vadd.f32 0.18741608, %v2480_v1  ;;  %v2467_v23 = vor.u32 1.1754944e-38, %v2466_v55  ;;  %v2444_v46 = vmul.f32 %v2443_v10, %v7248_v14 }
 0xe40   :  { %v2492_v42 = vadd.f32 0.4994258, %v2491_v5  ;;  %v2528_v2 = vadd.f32 0.014752088, %v2527_v44  ;;  %vm2465_vm0 = vcmp.eq.f32.partialorder %v2464_v17, 8.507059e+37  ;;  %v2303_v29 = vmul.f32 0.5, %v7245_v41 }
 0xe41   :  { %v2518_v30 = vmul.f32 %v2517_v4, %v7268_v19  ;;  %v2482_v33 = vmul.f32 %v2481_v15, %v2473_v27 }
 0xe42   :  { %v2493_v6 = vmul.f32 %v2492_v42, %v2473_v27  ;;  %v2529_v9 = vmul.f32 %v2528_v2, %v7268_v19 }
 0xe43   :  { %v5946_v38 = vpop.eup %5945  ;;  %v2519_v63 = vadd.f32 0.05243302, %v2518_v30  ;;  %v2483_v48 = vadd.f32 1.1283791, %v2482_v33 }
 0xe44   :  { %v2456_v3 = vmul.f32 %v5946_v38, %v2454_v52  ;;  %v2494_v20 = vadd.f32 1.0, %v2493_v6  ;;  %v2530_v12 = vadd.f32 0.112945676, %v2529_v9  ;;  %vm2461_vm13 = vweird.f32 %v5946_v38 }
 0xe45   :  { %vm2462_vm15 = vmor %vm2460_vm14, %vm2461_vm13  ;;  %v2520_v21 = vmul.f32 %v2519_v63, %v7268_v19  ;;  %v2484_v42 = vmul.f32 %v2483_v48, %v7256_v32  ;;  %v2304_v32 = vmul.f32 0.5, %v7253_v16 }
 0xe46   :  { %v2457_v59 = vsub.f32 1.0, %v2456_v3  ;;  %5947 = vrcp.f32 %v2494_v20  ;;  %v2531_v56 = vmul.f32 %v2530_v12, %v7268_v19  ;;  %v2506_v50 = vand.u32 2147483648, %v2494_v20 }
 0xe47   :  { %v2504_v52 = vand.u32 2147483647, %v2494_v20  ;;  %vm2500_vm3 = vweird.f32 %v2494_v20  ;;  %v2521_v61 = vadd.f32 0.18741608, %v2520_v21 }
 0xe48   :  { %v2458_v13 = vmul.f32 %v5946_v38, %v2457_v59  ;;  %v2532_v26 = vadd.f32 0.4994258, %v2531_v56  ;;  %v2507_v60 = vor.u32 1.1754944e-38, %v2506_v50 }
 0xe49   :  { %vm2505_vm8 = vcmp.eq.f32.partialorder %v2504_v52, 8.507059e+37  ;;  %v2522_v6 = vmul.f32 %v2521_v61, %v7268_v19 }
 0xe4a   :  { %v2459_v62 = vadd.f32 %v5946_v38, %v2458_v13  ;;  %v2533_v11 = vmul.f32 %v2532_v26, %v7268_v19  ;;  %v2305_v26 = vmul.f32 0.5, %v7261_v45 }
 0xe4b   :  { %v2523_v9 = vadd.f32 1.1283791, %v2522_v6  ;;  %v5498_v6 = vld [vmem:[%s8413_s6 + $0x88] sm:$0xff] }
 0xe4c   :  { %v5948_v8 = vpop.eup %5947  ;;  %v2463_v35 = vsel %vm2462_vm15, %v5946_v38, %v2459_v62  ;;  %v2534_v14 = vadd.f32 1.0, %v2533_v11 }
 0xe4d   :  { %v2468_v47 = vsel %vm2465_vm0, %v2467_v23, %v2463_v35  ;;  %v2496_v43 = vmul.f32 %v5948_v8, %v2494_v20  ;;  %vm2501_vm2 = vweird.f32 %v5948_v8  ;;  %v2524_v16 = vmul.f32 %v2523_v9, %v7264_v37 }
 0xe4e   :  { %v2469_v7 = vmul.f32 %v2468_v47, %v2444_v46  ;;  %5949 = vrcp.f32 %v2534_v14  ;;  %vm2502_vm5 = vmor %vm2500_vm3, %vm2501_vm2  ;;  %v2546_v10 = vand.u32 2147483648, %v2534_v14  ;;  %v2544_v12 = vand.u32 2147483647, %v2534_v14 }
 0xe4f   :  { %v2497_v49 = vsub.f32 1.0, %v2496_v43  ;;  %vm2540_vm10 = vweird.f32 %v2534_v14 }
 0xe50   :  { %v5486_v27 = vclamps-f32 %v2469_v7, 1.0  ;;  %v2608_v58 = vpop.f32.mrf.mxu0  ;;  %vm2545_vm12 = vcmp.eq.f32.partialorder %v2544_v12, 8.507059e+37 }
 0xe51   :  { %v2498_v51 = vmul.f32 %v5948_v8, %v2497_v49  ;;  %v2626_v53 = vadd.f32 %v2608_v58, %v7003_v0 }
 0xe52   :  { %v2555_v57 = vadd.f32 1.0, %v5486_v27 }
 0xe53   :  { %v2499_v54 = vadd.f32 %v5948_v8, %v2498_v51  ;;  %v7288_v39 = vadd.f32 %v7282_v22, %v2626_v53 }
 0xe54   :  { %v2561_v5 = vmul.f32 %v2555_v57, %v2303_v29  ;;  %v5950_v28 = vpop.eup %5949 }
 0xe55   :  { %v2503_v24 = vsel %vm2502_vm5, %v5948_v8, %v2499_v54  ;;  %v2646_v0 = vsel %vm161_vm1, %v7288_v39, 0.0  ;;  %v2536_v1 = vmul.f32 %v5950_v28, %v2534_v14  ;;  %vm2541_vm9 = vweird.f32 %v5950_v28 }
 0xe56   :  { %v2508_v44 = vsel %vm2505_vm8, %v2507_v60, %v2503_v24  ;;  %2647 = vadd.xlane.f32.xlu0 %v2646_v0  ;;  %5492 = vmatmul.msk.f32.gmra.mxu0 %vm2572_vm4, %v2561_v5  ;;  %vm2542_vm11 = vmor %vm2540_vm10, %vm2541_vm9  ;;  %v5500_v0 = vld [vmem:[%s8413_s6 + $0x98] sm:$0xff] }
 0xe57   :  { %v2509_v41 = vmul.f32 %v2508_v44, %v2484_v42  ;;  %v2537_v4 = vsub.f32 1.0, %v2536_v1  ;;  %v5511_v44 = vld [vmem:[%s8414_s3 + $0x98] sm:$0xff]  ;;  %2836 = vmatpush.msra.mxu1 %v5500_v0  ;;  %v5520_v1 = vld [vmem:[%s8415_s30 + $0x88] sm:$0xff] }
 0xe58   :  { %v2611_v2 = vpop.f32.mrf.mxu0  ;;  %2881 = vmatpush.msrb.mxu2 %v5511_v44 }
 0xe59   :  { %v5487_v38 = vclamps-f32 %v2509_v41, 1.0  ;;  %v2627_v3 = vadd.f32 %v2611_v2, %v7013_v25  ;;  %v2538_v15 = vmul.f32 %v5950_v28, %v2537_v4  ;;  %v2547_v25 = vor.u32 1.1754944e-38, %v2546_v10  ;;  %v5522_v41 = vld [vmem:[%s8415_s30 + $0x98] sm:$0xff]  ;;  %v5519_v4 = vld [vmem:[%s8415_s30 + $0x80] sm:$0xff] }
 0xe5a   :  { %2926 = vmatpush.msrb.mxu3 %v5522_v41 }
 0xe5b   :  { %v2556_v20 = vadd.f32 1.0, %v5487_v38  ;;  %v7298_v59 = vadd.f32 %v7282_v22, %v2627_v3  ;;  %v2539_v13 = vadd.f32 %v5950_v28, %v2538_v15  ;;  %v5509_v38 = vld [vmem:[%s8414_s3 + $0x88] sm:$0xff] }
 0xe5d   :  { %v2562_v55 = vmul.f32 %v2556_v20, %v2304_v32  ;;  %v2649_v19 = vsel %vm161_vm1, %v7298_v59, 0.0  ;;  %v2543_v17 = vsel %vm2542_vm11, %v5950_v28, %v2539_v13  ;;  %v5521_v28 = vld [vmem:[%s8415_s30 + $0x90] sm:$0xff]  ;;  %v5497_v32 = vld [vmem:[%s8413_s6 + $0x80] sm:$0xff] }
 0xe5e   :  { %2650 = vadd.xlane.f32.xlu1 %v2649_v19  ;;  %v2548_v30 = vsel %vm2545_vm12, %v2547_v25, %v2543_v17  ;;  %2927 = vmatpush.msrb.mxu3 %v5521_v28  ;;  %v5508_v20 = vld [vmem:[%s8414_s3 + $0x80] sm:$0xff] }
 0xe5f   :  { %5493 = vmatmul.msk.f32.gmra.mxu0 %vm2572_vm4, %v2562_v55  ;;  %v2549_v56 = vmul.f32 %v2548_v30, %v2524_v16 }
 0xe60   :  { %2928 = vmatpush.msrb.mxu3 %v5520_v1 }
 0xe61   :  { %v5488_v62 = vclamps-f32 %v2549_v56, 1.0  ;;  %v2614_v23 = vpop.f32.mrf.mxu0 }
 0xe62   :  { %v2628_v33 = vadd.f32 %v2614_v23, %v7021_v18  ;;  %2929 = vmatpush.msrb.mxu3 %v5519_v4 }
 0xe63   :  { %v2557_v8 = vadd.f32 1.0, %v5488_v62 }
 0xe64   :  { %v7307_v46 = vadd.f32 %v7282_v22, %v2628_v33 }
 0xe65   :  { %v2563_v35 = vmul.f32 %v2557_v8, %v2305_v26 }
 0xe66   :  { %v2652_v63 = vsel %vm161_vm1, %v7307_v46, 0.0 }
 0xe67   :  { %2653 = vadd.xlane.f32.xlu2 %v2652_v63  ;;  %5494 = vmatmul.msk.f32.gmra.mxu0 %vm2572_vm4, %v2563_v35 }
 0xec9   :  { %v2648_v37 = vpop.xlane.xlu0 %2647 }
 0xeca   :  { %v2664_v47 = vmul.f32 %v2648_v37, %v6328_v34  ;;  %v7403_v37 = vld [vmem:[%s8416_s11 + $0x1] ss:$0 sm:$0xff] }
 0xecc   :  { %v7314_v43 = vsub.f32 %v7288_v39, %v2664_v47 }
 0xece   :  { %v2676_v18 = vmul.f32 %v7314_v43, %v7314_v43 }
 0xed0   :  { %v2682_v45 = vsel %vm161_vm1, %v2676_v18, 0.0 }
 0xed1   :  { %2683 = vadd.xlane.f32.xlu0 %v2682_v45  ;;  %v2651_v7 = vpop.xlane.xlu1 %2650 }
 0xed2   :  { %v2665_v11 = vmul.f32 %v2651_v7, %v6328_v34 }
 0xed3   :  { %v2617_v48 = vpop.f32.mrf.mxu0 }
 0xed4   :  { %v2629_v49 = vadd.f32 %v2617_v48, %v7043_v36  ;;  %v7322_v27 = vsub.f32 %v7298_v59, %v2665_v11  ;;  %v7411_v48 = vld [vmem:[%s8417_s7 + $0x1] ss:$0 sm:$0xff] }
 0xed6   :  { %v7325_v50 = vadd.f32 %v7282_v22, %v2629_v49  ;;  %v2677_v21 = vmul.f32 %v7322_v27, %v7322_v27 }
 0xed8   :  { %v2655_v14 = vsel %vm161_vm1, %v7325_v50, 0.0  ;;  %v2685_v58 = vsel %vm161_vm1, %v2677_v21, 0.0 }
 0xed9   :  { %2656 = vadd.xlane.f32.xlu0 %v2655_v14  ;;  %2686 = vadd.xlane.f32.xlu1 %v2685_v58 }
 0xeda   :  { %v2654_v36 = vpop.xlane.xlu2 %2653 }
 0xedb   :  { %v2666_v53 = vmul.f32 %v2654_v36, %v6328_v34 }
 0xedc   :  { %v2620_v51 = vpop.f32.mrf.mxu0 }
 0xedd   :  { %v2630_v52 = vadd.f32 %v2620_v51, %v7059_v40  ;;  %v7338_v57 = vsub.f32 %v7307_v46, %v2666_v53 }
 0xedf   :  { %v7335_v29 = vadd.f32 %v7282_v22, %v2630_v52  ;;  %v2678_v5 = vmul.f32 %v7338_v57, %v7338_v57 }
 0xee1   :  { %v2658_v54 = vsel %vm161_vm1, %v7335_v29, 0.0  ;;  %v2688_v60 = vsel %vm161_vm1, %v2678_v5, 0.0 }
 0xee2   :  { %2659 = vadd.xlane.f32.xlu1 %v2658_v54  ;;  %2689 = vadd.xlane.f32.xlu2 %v2688_v60 }
 0xee4   :  { %v2623_v40 = vpop.f32.mrf.mxu0 }
 0xee5   :  { %v2631_v61 = vadd.f32 %v2623_v40, %v7069_v31  ;;  %v5499_v31 = vld [vmem:[%s8413_s6 + $0x90] sm:$0xff] }
 0xee6   :  { %2837 = vmatpush.msra.mxu1 %v5499_v31 }
 0xee7   :  { %v7347_v42 = vadd.f32 %v7282_v22, %v2631_v61  ;;  %v5510_v22 = vld [vmem:[%s8414_s3 + $0x90] sm:$0xff] }
 0xee8   :  { %2882 = vmatpush.msrb.mxu2 %v5510_v22  ;;  %2838 = vmatpush.msra.mxu1 %v5498_v6 }
 0xee9   :  { %v2661_v24 = vsel %vm161_vm1, %v7347_v42, 0.0 }
 0xeea   :  { %2662 = vadd.xlane.f32.xlu2 %v2661_v24  ;;  %2883 = vmatpush.msrb.mxu2 %v5509_v38 }
 0xeeb   :  { %2839 = vmatpush.msra.mxu1 %v5497_v32 }
 0xeec   :  { %2884 = vmatpush.msrb.mxu2 %v5508_v20 }
 0xf44   :  { %v2684_v2 = vpop.xlane.xlu0 %2683 }
 0xf45   :  { %v2700_v3 = vmul.f32 %v2684_v2, %v6328_v34 }
 0xf47   :  { %v2706_v9 = vadd.f32 1e-05, %v2700_v3 }
 0xf49   :  { %5951 = vrsqrt.f32 %v2706_v9  ;;  %vm2718_vm14 = vweird.f32 %v2706_v9 }
 0xf4c   :  { %v2657_v10 = vpop.xlane.xlu0 %2656  ;;  %v2687_v55 = vpop.xlane.xlu1 %2686 }
 0xf4d   :  { %v2667_v15 = vmul.f32 %v2657_v10, %v6328_v34  ;;  %v2701_v12 = vmul.f32 %v2687_v55, %v6328_v34 }
 0xf4f   :  { %v5952_v19 = vpop.eup %5951  ;;  %v7391_v13 = vsub.f32 %v7325_v50, %v2667_v15  ;;  %v2707_v16 = vadd.f32 1e-05, %v2701_v12 }
 0xf50   :  { %v2713_v25 = vmul.f32 %v5952_v19, %v2706_v9  ;;  %vm2719_vm13 = vweird.f32 %v5952_v19 }
 0xf51   :  { %v2679_v17 = vmul.f32 %v7391_v13, %v7391_v13  ;;  %5953 = vrsqrt.f32 %v2707_v16  ;;  %vm2720_vm15 = vmor %vm2718_vm14, %vm2719_vm13  ;;  %vm2728_vm2 = vweird.f32 %v2707_v16 }
 0xf52   :  { %v2714_v30 = vmul.f32 %v5952_v19, %v2713_v25 }
 0xf53   :  { %v2691_v56 = vsel %vm161_vm1, %v2679_v17, 0.0  ;;  %v5574_v17 = vld [vmem:[%s8415_s30 + $0xb8] sm:$0xff] }
 0xf54   :  { %v2715_v62 = vmul.f32 0.5, %v2714_v30  ;;  %2692 = vadd.xlane.f32.xlu0 %v2691_v56  ;;  %3287 = vmatpush.msra.mxu3 %v5574_v17 }
 0xf55   :  { %v2660_v23 = vpop.xlane.xlu1 %2659  ;;  %v2690_v18 = vpop.xlane.xlu2 %2689 }
 0xf56   :  { %v2716_v33 = vsub.f32 1.5, %v2715_v62  ;;  %v2668_v26 = vmul.f32 %v2660_v23, %v6328_v34  ;;  %v2702_v7 = vmul.f32 %v2690_v18, %v6328_v34  ;;  %v5572_v18 = vld [vmem:[%s8415_s30 + $0xa8] sm:$0xff] }
 0xf57   :  { %v5954_v8 = vpop.eup %5953 }
 0xf58   :  { %v2717_v35 = vmul.f32 %v5952_v19, %v2716_v33  ;;  %v7398_v63 = vsub.f32 %v7335_v29, %v2668_v26  ;;  %v2723_v47 = vmul.f32 %v5954_v8, %v2707_v16  ;;  %v2708_v14 = vadd.f32 1e-05, %v2702_v7  ;;  %v5573_v33 = vld [vmem:[%s8415_s30 + $0xb0] sm:$0xff] }
 0xf59   :  { %vm2729_vm0 = vweird.f32 %v5954_v8  ;;  %3288 = vmatpush.msra.mxu3 %v5573_v33 }
 0xf5a   :  { %v2721_v45 = vsel %vm2720_vm15, %v5952_v19, %v2717_v35  ;;  %v2680_v11 = vmul.f32 %v7398_v63, %v7398_v63  ;;  %v2724_v21 = vmul.f32 %v5954_v8, %v2723_v47  ;;  %5955 = vrsqrt.f32 %v2708_v14  ;;  %vm2730_vm3 = vmor %vm2728_vm2, %vm2729_vm0 }
 0xf5b   :  { %v2772_v49 = vmul.f32 %v2721_v45, %v7314_v43  ;;  %vm2738_vm8 = vweird.f32 %v2708_v14  ;;  %3289 = vmatpush.msra.mxu3 %v5572_v18 }
 0xf5c   :  { %v2694_v58 = vsel %vm161_vm1, %v2680_v11, 0.0  ;;  %v2725_v52 = vmul.f32 0.5, %v2724_v21 }
 0xf5d   :  { %v2781_v51 = vmul.f32 %v7403_v37, %v2772_v49  ;;  %2695 = vadd.xlane.f32.xlu1 %v2694_v58  ;;  %v2663_v5 = vpop.xlane.xlu2 %2662  ;;  %v5571_v49 = vld [vmem:[%s8415_s30 + $0xa0] sm:$0xff] }
 0xf5e   :  { %v2726_v53 = vsub.f32 1.5, %v2725_v52  ;;  %v2669_v43 = vmul.f32 %v2663_v5, %v6328_v34  ;;  %3290 = vmatpush.msra.mxu3 %v5571_v49 }
 0xf5f   :  { %v7417_v36 = vadd.f32 %v7411_v48, %v2781_v51 }
 0xf60   :  { %v2727_v54 = vmul.f32 %v5954_v8, %v2726_v53  ;;  %v5956_v40 = vpop.eup %5955  ;;  %v7428_v24 = vsub.f32 %v7347_v42, %v2669_v43 }
 0xf61   :  { %5502 = vmatmul.msk.f32.vlgmr.msra.gmra.mxu1 %vm161_vm1, %v7417_v36  ;;  %5513 = vmatmul.msk.f32.vlgmr.msrb.gmra.mxu2 %vm161_vm1, %v7417_v36  ;;  %v2733_v0 = vmul.f32 %v5956_v40, %v2708_v14  ;;  %vm2739_vm5 = vweird.f32 %v5956_v40 }
 0xf62   :  { %5524 = vmatmul.msk.f32.vlgmr.msrb.gmra.mxu3 %vm161_vm1, %v7417_v36  ;;  %v2731_v60 = vsel %vm2730_vm3, %v5954_v8, %v2727_v54  ;;  %v2681_v41 = vmul.f32 %v7428_v24, %v7428_v24  ;;  %vm2740_vm9 = vmor %vm2738_vm8, %vm2739_vm5 }
 0xf63   :  { %v2773_v61 = vmul.f32 %v2731_v60, %v7322_v27  ;;  %v2734_v31 = vmul.f32 %v5956_v40, %v2733_v0 }
 0xf64   :  { %v2697_v28 = vsel %vm161_vm1, %v2681_v41, 0.0 }
 0xf65   :  { %v2782_v44 = vmul.f32 %v7403_v37, %v2773_v61  ;;  %v2735_v6 = vmul.f32 0.5, %v2734_v31  ;;  %2698 = vadd.xlane.f32.xlu2 %v2697_v28 }
 0xf67   :  { %v7434_v22 = vadd.f32 %v7411_v48, %v2782_v44  ;;  %v2736_v27 = vsub.f32 1.5, %v2735_v6 }
 0xf69   :  { %5503 = vmatmul.msk.f32.gmra.mxu1 %vm161_vm1, %v7434_v22  ;;  %5514 = vmatmul.msk.f32.gmra.mxu2 %vm161_vm1, %v7434_v22  ;;  %v2737_v38 = vmul.f32 %v5956_v40, %v2736_v27 }
 0xf6a   :  { %5525 = vmatmul.msk.f32.gmra.mxu3 %vm161_vm1, %v7434_v22 }
 0xf6b   :  { %v2741_v1 = vsel %vm2740_vm9, %v5956_v40, %v2737_v38  ;;  %v5797_v38 = vld [vmem:[%s8418_s5 + $0x4] ss:$0 sm:$0xff] }
 0xf6c   :  { %v2774_v2 = vmul.f32 %v2741_v1, %v7338_v57  ;;  %v5798_v1 = vld [vmem:[%s8419_s10 + $0x4] ss:$0 sm:$0xff] }
 0xf6e   :  { %v2783_v3 = vmul.f32 %v7403_v37, %v2774_v2 }
 0xf70   :  { %v7446_v32 = vadd.f32 %v7411_v48, %v2783_v3 }
 0xf72   :  { %5504 = vmatmul.msk.f32.gmra.mxu1 %vm161_vm1, %v7446_v32  ;;  %5515 = vmatmul.msk.f32.gmra.mxu2 %vm161_vm1, %v7446_v32 }
 0xf73   :  { %5526 = vmatmul.msk.f32.gmra.mxu3 %vm161_vm1, %v7446_v32 }
 0xfc7   :  { %v2693_v20 = vpop.xlane.xlu0 %2692 }
 0xfc8   :  { %v2703_v4 = vmul.f32 %v2693_v20, %v6328_v34 }
 0xfca   :  { %v2709_v9 = vadd.f32 1e-05, %v2703_v4 }
 0xfcc   :  { %5957 = vrsqrt.f32 %v2709_v9  ;;  %vm2748_vm11 = vweird.f32 %v2709_v9 }
 0xfd0   :  { %v2696_v57 = vpop.xlane.xlu1 %2695 }
 0xfd1   :  { %v2704_v10 = vmul.f32 %v2696_v57, %v6328_v34  ;;  %v7513_v57 = vld [vmem:[%s8420_s2 + $0x4] ss:$0 sm:$0xff] }
 0xfd2   :  { %v5958_v55 = vpop.eup %5957 }
 0xfd3   :  { %v2743_v15 = vmul.f32 %v5958_v55, %v2709_v9  ;;  %v2710_v12 = vadd.f32 1e-05, %v2704_v10  ;;  %vm2749_vm10 = vweird.f32 %v5958_v55 }
 0xfd4   :  { %vm2750_vm12 = vmor %vm2748_vm11, %vm2749_vm10 }
 0xfd5   :  { %v2744_v19 = vmul.f32 %v5958_v55, %v2743_v15  ;;  %5959 = vrsqrt.f32 %v2710_v12  ;;  %vm2758_vm14 = vweird.f32 %v2710_v12 }
 0xfd7   :  { %v2745_v25 = vmul.f32 0.5, %v2744_v19 }
 0xfd8   :  { %v2699_v23 = vpop.xlane.xlu2 %2698 }
 0xfd9   :  { %v2746_v16 = vsub.f32 1.5, %v2745_v25  ;;  %v2705_v8 = vmul.f32 %v2699_v23, %v6328_v34 }
 0xfdb   :  { %v5960_v30 = vpop.eup %5959  ;;  %v2747_v56 = vmul.f32 %v5958_v55, %v2746_v16  ;;  %v2711_v45 = vadd.f32 1e-05, %v2705_v8 }
 0xfdc   :  { %v2753_v62 = vmul.f32 %v5960_v30, %v2710_v12  ;;  %vm2759_vm13 = vweird.f32 %v5960_v30 }
 0xfdd   :  { %v2751_v26 = vsel %vm2750_vm12, %v5958_v55, %v2747_v56  ;;  %5961 = vrsqrt.f32 %v2711_v45  ;;  %vm2760_vm15 = vmor %vm2758_vm14, %vm2759_vm13  ;;  %vm2768_vm2 = vweird.f32 %v2711_v45 }
 0xfde   :  { %v2775_v35 = vmul.f32 %v2751_v26, %v7391_v13  ;;  %v2754_v47 = vmul.f32 %v5960_v30, %v2753_v62  ;;  %v2841_v20 = vpop.f32.mrf.mxu1 }
 0xfdf   :  { %v2842_v55 = vadd.f32 %v7513_v57, %v2841_v20 }
 0xfe0   :  { %v2784_v7 = vmul.f32 %v7403_v37, %v2775_v35  ;;  %v2755_v11 = vmul.f32 0.5, %v2754_v47 }
 0xfe2   :  { %v7472_v21 = vadd.f32 %v7411_v48, %v2784_v7  ;;  %v2756_v13 = vsub.f32 1.5, %v2755_v11  ;;  %v7539_v11 = vld [vmem:[%s8421_s28] ss:$0 sm:$0xff] }
 0xfe3   :  { %v5962_v53 = vpop.eup %5961 }
 0xfe4   :  { %v2757_v14 = vmul.f32 %v5960_v30, %v2756_v13  ;;  %5505 = vmatmul.msk.f32.gmra.mxu1 %vm161_vm1, %v7472_v21  ;;  %5516 = vmatmul.msk.f32.gmra.mxu2 %vm161_vm1, %v7472_v21  ;;  %v2886_v58 = vpop.f32.mrf.mxu2  ;;  %v2763_v5 = vmul.f32 %v5962_v53, %v2711_v45  ;;  %vm2769_vm0 = vweird.f32 %v5962_v53  ;;  %v5563_v13 = vld [vmem:[%s8414_s3 + $0xb8] sm:$0xff] }
 0xfe5   :  { %5527 = vmatmul.msk.f32.gmra.mxu3 %vm161_vm1, %v7472_v21  ;;  %v2931_v52 = vpop.f32.mrf.mxu3  ;;  %vm2770_vm3 = vmor %vm2768_vm2, %vm2769_vm0  ;;  %v2887_v10 = vadd.f32 %v5797_v38, %v2886_v58 }
 0xfe6   :  { %v2761_v51 = vsel %vm2760_vm15, %v5960_v30, %v2757_v14  ;;  %v2764_v60 = vmul.f32 %v5962_v53, %v2763_v5  ;;  %v2932_v9 = vadd.f32 %v5798_v1, %v2931_v52  ;;  %v2844_v15 = vpop.f32.mrf.mxu1  ;;  %v5561_v52 = vld [vmem:[%s8414_s3 + $0xa8] sm:$0xff]  ;;  %v5560_v5 = vld [vmem:[%s8414_s3 + $0xa0] sm:$0xff] }
 0xfe7   :  { %v2776_v54 = vmul.f32 %v2761_v51, %v7398_v63  ;;  %v2845_v12 = vadd.f32 %v7513_v57, %v2844_v15  ;;  %v5562_v51 = vld [vmem:[%s8414_s3 + $0xb0] sm:$0xff] }
 0xfe8   :  { %v2765_v61 = vmul.f32 0.5, %v2764_v60 }
 0xfe9   :  { %v2785_v43 = vmul.f32 %v7403_v37, %v2776_v54 }
 0xfea   :  { %v2766_v0 = vsub.f32 1.5, %v2765_v61 }
 0xfeb   :  { %v7483_v40 = vadd.f32 %v7411_v48, %v2785_v43 }
 0xfec   :  { %v2889_v63 = vpop.f32.mrf.mxu2  ;;  %v2767_v44 = vmul.f32 %v5962_v53, %v2766_v0 }
 0xfed   :  { %5506 = vmatmul.msk.f32.gmra.mxu1 %vm161_vm1, %v7483_v40  ;;  %5517 = vmatmul.msk.f32.gmra.mxu2 %vm161_vm1, %v7483_v40  ;;  %v2934_v41 = vpop.f32.mrf.mxu3  ;;  %v2890_v4 = vadd.f32 %v5797_v38, %v2889_v63 }
 0xfee   :  { %5528 = vmatmul.msk.f32.gmra.mxu3 %vm161_vm1, %v7483_v40  ;;  %v2771_v31 = vsel %vm2770_vm3, %v5962_v53, %v2767_v44  ;;  %v2935_v3 = vadd.f32 %v5798_v1, %v2934_v41 }
 0xfef   :  { %v2777_v28 = vmul.f32 %v2771_v31, %v7428_v24  ;;  %v2847_v19 = vpop.f32.mrf.mxu1 }
 0xff0   :  { %v2848_v25 = vadd.f32 %v7513_v57, %v2847_v19 }
 0xff1   :  { %v2786_v6 = vmul.f32 %v7403_v37, %v2777_v28 }
 0xff3   :  { %v7494_v27 = vadd.f32 %v7411_v48, %v2786_v6 }
 0xff5   :  { %5507 = vmatmul.msk.f32.gmra.mxu1 %vm161_vm1, %v7494_v27  ;;  %v2892_v2 = vpop.f32.mrf.mxu2  ;;  %5518 = vmatmul.msk.f32.gmra.mxu2 %vm161_vm1, %v7494_v27 }
 0xff6   :  { %v2893_v24 = vadd.f32 %v5797_v38, %v2892_v2  ;;  %v2937_v37 = vpop.f32.mrf.mxu3  ;;  %5529 = vmatmul.msk.f32.gmra.mxu3 %vm161_vm1, %v7494_v27 }
 0xff7   :  { %v2938_v48 = vadd.f32 %v5798_v1, %v2937_v37 }
 0xff8   :  { %5530 = vmatpush.xpose.msk.msra.mxu0 %vm469_vm6, %v2893_v24 }
 0xff9   :  { %3048 = vmatpush.msrb.mxu1 %v2938_v48 }
 0xffb   :  { %3049 = vmatpush.msrb.mxu1 %v2935_v3 }
 0xffc   :  { %5531 = vmatpush.xpose.msk.msra.mxu0 %vm469_vm6, %v2890_v4 }
 0xffd   :  { %3050 = vmatpush.msrb.mxu1 %v2932_v9 }
 0xffe   :  { %5576 = vmatmul.msk.f32.vlgmr.msra.gmra.mxu3 %vm161_vm1, %v7417_v36 }
0x1000   :  { %5532 = vmatpush.xpose.msk.msra.mxu0 %vm469_vm6, %v2887_v10 }
0x1003   :  { %5533 = vmatmul.msk.f32.vlgmr.msra.gmra.mxu0 %vm469_vm6, %v2842_v55 }
0x1006   :  { %5577 = vmatmul.msk.f32.gmra.mxu3 %vm161_vm1, %v7434_v22 }
0x100b   :  { %5534 = vmatmul.msk.f32.gmra.mxu0 %vm469_vm6, %v2845_v12 }
0x100e   :  { %5578 = vmatmul.msk.f32.gmra.mxu3 %vm161_vm1, %v7446_v32 }
0x1013   :  { %5535 = vmatmul.msk.f32.gmra.mxu0 %vm469_vm6, %v2848_v25 }
0x1016   :  { %5579 = vmatmul.msk.f32.gmra.mxu3 %vm161_vm1, %v7472_v21 }
0x101e   :  { %5580 = vmatmul.msk.f32.gmra.mxu3 %vm161_vm1, %v7483_v40 }
0x1026   :  { %5581 = vmatmul.msk.f32.gmra.mxu3 %vm161_vm1, %v7494_v27 }
0x1061   :  { %v2850_v35 = vpop.f32.mrf.mxu1 }
0x1062   :  { %v2851_v58 = vadd.f32 %v7513_v57, %v2850_v35 }
0x1067   :  { %v2895_v16 = vpop.f32.mrf.mxu2 }
0x1068   :  { %v2940_v17 = vpop.f32.mrf.mxu3  ;;  %v2896_v7 = vadd.f32 %v5797_v38, %v2895_v16 }
0x1069   :  { %v2941_v18 = vadd.f32 %v5798_v1, %v2940_v17 }
0x106a   :  { %v2853_v53 = vpop.f32.mrf.mxu1 }
0x106b   :  { %v2854_v61 = vadd.f32 %v7513_v57, %v2853_v53  ;;  %v5550_v53 = vld [vmem:[%s8413_s6 + $0xa8] sm:$0xff] }
0x1070   :  { %v2898_v30 = vpop.f32.mrf.mxu2 }
0x1071   :  { %v2943_v56 = vpop.f32.mrf.mxu3  ;;  %v2899_v47 = vadd.f32 %v5797_v38, %v2898_v30 }
0x1072   :  { %v2944_v8 = vadd.f32 %v5798_v1, %v2943_v56  ;;  %v2856_v63 = vpop.f32.mrf.mxu1 }
0x1073   :  { %v2857_v31 = vadd.f32 %v7513_v57, %v2856_v63 }
0x1078   :  { %v2901_v62 = vpop.f32.mrf.mxu2 }
0x1079   :  { %v2902_v23 = vadd.f32 %v5797_v38, %v2901_v62  ;;  %v2946_v33 = vpop.f32.mrf.mxu3 }
0x107a   :  { %v2947_v26 = vadd.f32 %v5798_v1, %v2946_v33 }
0x107b   :  { %5540 = vmatpush.xpose.msk.msra.mxu2 %vm469_vm6, %v2902_v23 }
0x107c   :  { %3162 = vmatpush.msrb.mxu0 %v2947_v26  ;;  %v5800_v26 = vld [vmem:[%s8418_s5 + $0x5] ss:$0 sm:$0xff] }
0x107e   :  { %3163 = vmatpush.msrb.mxu0 %v2944_v8 }
0x107f   :  { %5541 = vmatpush.xpose.msk.msra.mxu2 %vm469_vm6, %v2899_v47 }
0x1080   :  { %3164 = vmatpush.msrb.mxu0 %v2941_v18  ;;  %v2984_v45 = vpop.f32.mrf.mxu0 }
0x1081   :  { %v2985_v49 = vadd.f32 %v7539_v11, %v2984_v45 }
0x1083   :  { %5542 = vmatpush.xpose.msk.msra.mxu2 %vm469_vm6, %v2896_v7  ;;  %v2993_v14 = vsel %vm514_vm7, %v2985_v49, -inf }
0x1084   :  { %2994 = vmax.xlane.f32.xlu0 %v2993_v14 }
0x1086   :  { %5543 = vmatmul.msk.f32.vlgmr.msra.gmra.mxu2 %vm469_vm6, %v2851_v58 }
0x1087   :  { %3242 = vmatpush.msrb.mxu2 %v5563_v13 }
0x1088   :  { %v2987_v54 = vpop.f32.mrf.mxu0 }
0x1089   :  { %3243 = vmatpush.msrb.mxu2 %v5562_v51  ;;  %v2988_v43 = vadd.f32 %v7539_v11, %v2987_v54  ;;  %v5552_v51 = vld [vmem:[%s8413_s6 + $0xb8] sm:$0xff]  ;;  %v5549_v54 = vld [vmem:[%s8413_s6 + $0xa0] sm:$0xff] }
0x108a   :  { %3197 = vmatpush.msra.mxu1 %v5552_v51 }
0x108b   :  { %3244 = vmatpush.msrb.mxu2 %v5561_v52  ;;  %v2996_v60 = vsel %vm514_vm7, %v2988_v43, -inf  ;;  %v5551_v52 = vld [vmem:[%s8413_s6 + $0xb0] sm:$0xff] }
0x108c   :  { %2997 = vmax.xlane.f32.xlu1 %v2996_v60  ;;  %3198 = vmatpush.msra.mxu1 %v5551_v52  ;;  %v5801_v52 = vld [vmem:[%s8420_s2 + $0x5] ss:$0 sm:$0xff] }
0x108d   :  { %3245 = vmatpush.msrb.mxu2 %v5560_v5 }
0x108e   :  { %5544 = vmatmul.msk.f32.gmra.mxu2 %vm469_vm6, %v2854_v61  ;;  %3199 = vmatpush.msra.mxu1 %v5550_v53 }
0x1090   :  { %v2990_v0 = vpop.f32.mrf.mxu0  ;;  %3200 = vmatpush.msra.mxu1 %v5549_v54 }
0x1091   :  { %v2991_v44 = vadd.f32 %v7539_v11, %v2990_v0 }
0x1093   :  { %v2999_v41 = vsel %vm514_vm7, %v2991_v44, -inf }
0x1094   :  { %3000 = vmax.xlane.f32.xlu2 %v2999_v41 }
0x1096   :  { %5545 = vmatmul.msk.f32.gmra.mxu2 %vm469_vm6, %v2857_v31 }
0x109e   :  { %5565 = vmatmul.msk.f32.vlgmr.msrb.gmra.mxu2 %vm161_vm1, %v7417_v36 }
0x10a6   :  { %5566 = vmatmul.msk.f32.gmra.mxu2 %vm161_vm1, %v7434_v22 }
0x10ae   :  { %5567 = vmatmul.msk.f32.gmra.mxu2 %vm161_vm1, %v7446_v32 }
0x10b6   :  { %5568 = vmatmul.msk.f32.gmra.mxu2 %vm161_vm1, %v7472_v21 }
0x10be   :  { %5569 = vmatmul.msk.f32.gmra.mxu2 %vm161_vm1, %v7483_v40 }
0x10c6   :  { %5570 = vmatmul.msk.f32.gmra.mxu2 %vm161_vm1, %v7494_v27 }
0x10f7   :  { %v2995_v28 = vpop.xlane.xlu0 %2994 }
0x10f8   :  { %v3002_v6 = vsub.f32 %v2985_v49, %v2995_v28 }
0x10fa   :  { %v3005_v38 = vmul.f32 1.442695, %v3002_v6 }
0x10fc   :  { %5963 = vpow2.f32 %v3005_v38 }
0x10ff   :  { %v2998_v1 = vpop.xlane.xlu1 %2997 }
0x1100   :  { %v3003_v2 = vsub.f32 %v2988_v43, %v2998_v1 }
0x1102   :  { %v5964_v24 = vpop.eup %5963  ;;  %v3007_v37 = vmul.f32 1.442695, %v3003_v2 }
0x1103   :  { %v3011_v48 = vsel %vm514_vm7, %v5964_v24, 0.0 }
0x1104   :  { %5965 = vpow2.f32 %v3007_v37  ;;  %3012 = vadd.xlane.f32.xlu0 %v3011_v48 }
0x1107   :  { %v3001_v3 = vpop.xlane.xlu2 %3000 }
0x1108   :  { %v3004_v20 = vsub.f32 %v2991_v44, %v3001_v3 }
0x1109   :  { %v3098_v4 = vpop.f32.mrf.mxu2 }
0x110a   :  { %v5966_v9 = vpop.eup %5965  ;;  %v3009_v57 = vmul.f32 1.442695, %v3004_v20  ;;  %v3099_v10 = vadd.f32 %v7539_v11, %v3098_v4 }
0x110b   :  { %v3014_v55 = vsel %vm514_vm7, %v5966_v9, 0.0 }
0x110c   :  { %5967 = vpow2.f32 %v3009_v57  ;;  %3015 = vadd.xlane.f32.xlu1 %v3014_v55  ;;  %v3107_v15 = vsel %vm514_vm7, %v3099_v10, -inf }
0x110d   :  { %3108 = vmax.xlane.f32.xlu0 %v3107_v15  ;;  %v5539_v15 = vld [vmem:[%s8365_s12 + $0x20] sm:$0xff] }
0x110e   :  { %3483 = vmatpush.msra.mxu2 %v5539_v15 }
0x1110   :  { %3665 = vmatpush.msrb.mxu2 %v5539_v15 }
0x1111   :  { %v3101_v12 = vpop.f32.mrf.mxu2 }
0x1112   :  { %v5968_v19 = vpop.eup %5967  ;;  %v3102_v25 = vadd.f32 %v7539_v11, %v3101_v12  ;;  %v3292_v12 = vpop.f32.mrf.mxu3 }
0x1113   :  { %v3017_v16 = vsel %vm514_vm7, %v5968_v19, 0.0 }
0x1114   :  { %3018 = vadd.xlane.f32.xlu2 %v3017_v16  ;;  %v3110_v17 = vsel %vm514_vm7, %v3102_v25, -inf }
0x1115   :  { %3111 = vmax.xlane.f32.xlu1 %v3110_v17 }
0x1119   :  { %v3104_v30 = vpop.f32.mrf.mxu2 }
0x111a   :  { %v3105_v56 = vadd.f32 %v7539_v11, %v3104_v30 }
0x111c   :  { %v3113_v62 = vsel %vm514_vm7, %v3105_v56, -inf }
0x111d   :  { %3114 = vmax.xlane.f32.xlu2 %v3113_v62  ;;  %v5799_v62 = vld [vmem:[%s8419_s10 + $0x5] ss:$0 sm:$0xff] }
0x1121   :  { %v3247_v23 = vpop.f32.mrf.mxu2 }
0x1122   :  { %v3248_v45 = vadd.f32 %v5800_v26, %v3247_v23 }
0x1129   :  { %v3250_v33 = vpop.f32.mrf.mxu2 }
0x112a   :  { %v3251_v47 = vadd.f32 %v5800_v26, %v3250_v33 }
0x1131   :  { %v3253_v8 = vpop.f32.mrf.mxu2 }
0x1132   :  { %v3254_v35 = vadd.f32 %v5800_v26, %v3253_v8 }
0x1134   :  { %5582 = vmatpush.xpose.msk.msra.mxu0 %vm469_vm6, %v3254_v35 }
0x1138   :  { %5583 = vmatpush.xpose.msk.msra.mxu0 %vm469_vm6, %v3251_v47  ;;  %v3293_v47 = vadd.f32 %v5799_v62, %v3292_v12 }
0x1139   :  { %v3256_v18 = vpop.f32.mrf.mxu2 }
0x113a   :  { %v3257_v58 = vadd.f32 %v5800_v26, %v3256_v18 }
0x113c   :  { %5584 = vmatpush.xpose.msk.msra.mxu0 %vm469_vm6, %v3248_v45 }
0x1141   :  { %v3259_v7 = vpop.f32.mrf.mxu2 }
0x1142   :  { %v3260_v14 = vadd.f32 %v5800_v26, %v3259_v7 }
0x1149   :  { %v3262_v49 = vpop.f32.mrf.mxu2 }
0x114a   :  { %v3263_v13 = vadd.f32 %v5800_v26, %v3262_v49 }
0x114c   :  { %5598 = vmatpush.xpose.msk.msrb.mxu3 %vm469_vm6, %v3263_v13 }
0x1150   :  { %5599 = vmatpush.xpose.msk.msrb.mxu3 %vm469_vm6, %v3260_v14 }
0x1154   :  { %5600 = vmatpush.xpose.msk.msrb.mxu3 %vm469_vm6, %v3257_v58 }
0x1177   :  { %v3013_v5 = vpop.xlane.xlu0 %3012 }
0x1178   :  { %5969 = vrcp.f32 %v3013_v5 }
0x117e   :  { %v5970_v43 = vpop.eup %5969 }
0x117f   :  { %v3023_v60 = vmul.f32 %v5970_v43, %v5964_v24  ;;  %v3016_v61 = vpop.xlane.xlu1 %3015 }
0x1180   :  { %5971 = vrcp.f32 %v3016_v61  ;;  %v3109_v0 = vpop.xlane.xlu0 %3108  ;;  %v5615_v61 = vld [vmem:[%s8413_s6 + $0xd0] sm:$0xff] }
0x1181   :  { %v3116_v63 = vsub.f32 %v3099_v10, %v3109_v0  ;;  %5536 = vmatmul.msk.f32.vlgmr.msrb.gmra.mxu1 %vm514_vm7, %v3023_v60  ;;  %v5616_v60 = vld [vmem:[%s8413_s6 + $0xd8] sm:$0xff] }
0x1182   :  { %3698 = vmatpush.msra.mxu3 %v5616_v60 }
0x1183   :  { %v3119_v44 = vmul.f32 1.442695, %v3116_v63  ;;  %v5614_v63 = vld [vmem:[%s8413_s6 + $0xc8] sm:$0xff] }
0x1184   :  { %3699 = vmatpush.msra.mxu3 %v5615_v61 }
0x1185   :  { %5973 = vpow2.f32 %v3119_v44 }
0x1186   :  { %v5972_v41 = vpop.eup %5971  ;;  %3700 = vmatpush.msra.mxu3 %v5614_v63 }
0x1187   :  { %v3019_v31 = vpop.xlane.xlu2 %3018  ;;  %v3024_v28 = vmul.f32 %v5972_v41, %v5966_v9  ;;  %v5613_v41 = vld [vmem:[%s8413_s6 + $0xc0] sm:$0xff] }
0x1188   :  { %5975 = vrcp.f32 %v3019_v31  ;;  %v3112_v6 = vpop.xlane.xlu1 %3111  ;;  %3701 = vmatpush.msra.mxu3 %v5613_v41 }
0x1189   :  { %v3117_v38 = vsub.f32 %v3102_v25, %v3112_v6  ;;  %5537 = vmatmul.msk.f32.gmra.mxu1 %vm514_vm7, %v3024_v28 }
0x118b   :  { %v5974_v1 = vpop.eup %5973  ;;  %v3121_v2 = vmul.f32 1.442695, %v3117_v38 }
0x118c   :  { %v3125_v24 = vsel %vm514_vm7, %v5974_v1, 0.0 }
0x118d   :  { %5977 = vpow2.f32 %v3121_v2  ;;  %3126 = vadd.xlane.f32.xlu0 %v3125_v24 }
0x118e   :  { %v5976_v37 = vpop.eup %5975 }
0x118f   :  { %v3025_v48 = vmul.f32 %v5976_v37, %v5968_v19  ;;  %v3295_v19 = vpop.f32.mrf.mxu3 }
0x1190   :  { %v3115_v3 = vpop.xlane.xlu2 %3114  ;;  %v3296_v35 = vadd.f32 %v5799_v62, %v3295_v19 }
0x1191   :  { %v3118_v20 = vsub.f32 %v3105_v56, %v3115_v3  ;;  %5538 = vmatmul.msk.f32.gmra.mxu1 %vm514_vm7, %v3025_v48 }
0x1193   :  { %v5978_v4 = vpop.eup %5977  ;;  %v3123_v57 = vmul.f32 1.442695, %v3118_v20 }
0x1194   :  { %v3128_v9 = vsel %vm514_vm7, %v5978_v4, 0.0 }
0x1195   :  { %5979 = vpow2.f32 %v3123_v57  ;;  %3129 = vadd.xlane.f32.xlu1 %v3128_v9 }
0x1197   :  { %v3298_v16 = vpop.f32.mrf.mxu3 }
0x1198   :  { %v3299_v26 = vadd.f32 %v5799_v62, %v3298_v16 }
0x1199   :  { %5554 = vmatmul.msk.f32.vlgmr.msra.gmra.mxu1 %vm161_vm1, %v7417_v36 }
0x119b   :  { %v5980_v10 = vpop.eup %5979 }
0x119c   :  { %v3131_v55 = vsel %vm514_vm7, %v5980_v10, 0.0 }
0x119d   :  { %3132 = vadd.xlane.f32.xlu2 %v3131_v55 }
0x119f   :  { %v3301_v8 = vpop.f32.mrf.mxu3 }
0x11a0   :  { %v3302_v44 = vadd.f32 %v5799_v62, %v3301_v8 }
0x11a1   :  { %5555 = vmatmul.msk.f32.gmra.mxu1 %vm161_vm1, %v7434_v22 }
0x11a7   :  { %v3304_v13 = vpop.f32.mrf.mxu3 }
0x11a8   :  { %v3305_v0 = vadd.f32 %v5799_v62, %v3304_v13 }
0x11a9   :  { %5556 = vmatmul.msk.f32.gmra.mxu1 %vm161_vm1, %v7446_v32 }
0x11af   :  { %v3307_v53 = vpop.f32.mrf.mxu3 }
0x11b0   :  { %v3308_v43 = vadd.f32 %v5799_v62, %v3307_v53 }
0x11b1   :  { %5557 = vmatmul.msk.f32.gmra.mxu1 %vm161_vm1, %v7472_v21 }
0x11b9   :  { %5558 = vmatmul.msk.f32.gmra.mxu1 %vm161_vm1, %v7483_v40 }
0x11c1   :  { %5559 = vmatmul.msk.f32.gmra.mxu1 %vm161_vm1, %v7494_v27 }
0x11fe   :  { %v3052_v25 = vpop.f32.mrf.mxu1 }
0x11ff   :  { %5595 = vmatmul.msk.f32.vlgmr.msra.gmra.mxu2 %vm469_vm6, %v3052_v25 }
0x1200   :  { %v3127_v17 = vpop.xlane.xlu0 %3126 }
0x1201   :  { %5981 = vrcp.f32 %v3127_v17 }
0x1206   :  { %v3055_v30 = vpop.f32.mrf.mxu1 }
0x1207   :  { %v5982_v56 = vpop.eup %5981  ;;  %5596 = vmatmul.msk.f32.gmra.mxu2 %vm469_vm6, %v3055_v30 }
0x1208   :  { %v3137_v23 = vmul.f32 %v5982_v56, %v5974_v1  ;;  %v3130_v33 = vpop.xlane.xlu1 %3129 }
0x1209   :  { %5983 = vrcp.f32 %v3130_v33 }
0x120a   :  { %5546 = vmatmul.msk.f32.vlgmr.msrb.gmra.mxu0 %vm514_vm7, %v3137_v23 }
0x120b   :  { %3409 = vmatpush.msrb.mxu0 %v3299_v26 }
0x120d   :  { %3410 = vmatpush.msrb.mxu0 %v3296_v35 }
0x120e   :  { %v3058_v18 = vpop.f32.mrf.mxu1 }
0x120f   :  { %v5984_v45 = vpop.eup %5983  ;;  %3411 = vmatpush.msrb.mxu0 %v3293_v47  ;;  %5597 = vmatmul.msk.f32.gmra.mxu2 %vm469_vm6, %v3058_v18 }
0x1210   :  { %v3133_v7 = vpop.xlane.xlu2 %3132  ;;  %v3138_v49 = vmul.f32 %v5984_v45, %v5978_v4 }
0x1211   :  { %5985 = vrcp.f32 %v3133_v7 }
0x1212   :  { %5547 = vmatmul.msk.f32.gmra.mxu0 %vm514_vm7, %v3138_v49 }
0x1216   :  { %v3202_v14 = vpop.f32.mrf.mxu1 }
0x1217   :  { %v5986_v58 = vpop.eup %5985  ;;  %v3203_v5 = vadd.f32 %v5801_v52, %v3202_v14 }
0x1218   :  { %v3139_v51 = vmul.f32 %v5986_v58, %v5980_v10 }
0x121a   :  { %5548 = vmatmul.msk.f32.gmra.mxu0 %vm514_vm7, %v3139_v51 }
0x121e   :  { %v3205_v54 = vpop.f32.mrf.mxu1 }
0x121f   :  { %v3206_v28 = vadd.f32 %v5801_v52, %v3205_v54 }
0x1222   :  { %5585 = vmatmul.msk.f32.vlgmr.msra.gmra.mxu0 %vm469_vm6, %v3203_v5 }
0x1223   :  { %3593 = vmatpush.msra.mxu0 %v3308_v43 }
0x1225   :  { %3594 = vmatpush.msra.mxu0 %v3305_v0 }
0x1226   :  { %v3208_v31 = vpop.f32.mrf.mxu1 }
0x1227   :  { %3595 = vmatpush.msra.mxu0 %v3302_v44  ;;  %v3209_v1 = vadd.f32 %v5801_v52, %v3208_v31 }
0x122a   :  { %5586 = vmatmul.msk.f32.gmra.mxu0 %vm469_vm6, %v3206_v28 }
0x122e   :  { %v3211_v6 = vpop.f32.mrf.mxu1 }
0x122f   :  { %v3212_v38 = vadd.f32 %v5801_v52, %v3211_v6 }
0x1231   :  { %5601 = vmatmul.msk.f32.vlgmr.msrb.gmra.mxu3 %vm469_vm6, %v3212_v38 }
0x1232   :  { %5587 = vmatmul.msk.f32.gmra.mxu0 %vm469_vm6, %v3209_v1 }
0x1236   :  { %v3214_v2 = vpop.f32.mrf.mxu1 }
0x1237   :  { %v3215_v24 = vadd.f32 %v5801_v52, %v3214_v2 }
0x1239   :  { %5602 = vmatmul.msk.f32.gmra.mxu3 %vm469_vm6, %v3215_v24 }
0x123e   :  { %v3217_v37 = vpop.f32.mrf.mxu1 }
0x123f   :  { %v3218_v48 = vadd.f32 %v5801_v52, %v3217_v37 }
0x1241   :  { %5603 = vmatmul.msk.f32.gmra.mxu3 %vm469_vm6, %v3218_v48 }
0x1249   :  { %5618 = vmatmul.msk.f32.vlgmr.msra.gmra.mxu3 %vm161_vm1, %v7417_v36 }
0x1251   :  { %5619 = vmatmul.msk.f32.gmra.mxu3 %vm161_vm1, %v7434_v22 }
0x1259   :  { %5620 = vmatmul.msk.f32.gmra.mxu3 %vm161_vm1, %v7446_v32 }
0x1261   :  { %5621 = vmatmul.msk.f32.gmra.mxu3 %vm161_vm1, %v7472_v21 }
0x1269   :  { %5622 = vmatmul.msk.f32.gmra.mxu3 %vm161_vm1, %v7483_v40 }
0x1271   :  { %5623 = vmatmul.msk.f32.gmra.mxu3 %vm161_vm1, %v7494_v27 }
0x1287   :  { %v3166_v3 = vpop.f32.mrf.mxu0 }
0x1288   :  { %5610 = vmatmul.msk.f32.vlgmr.msrb.gmra.mxu2 %vm469_vm6, %v3166_v3 }
0x128f   :  { %v3169_v20 = vpop.f32.mrf.mxu0 }
0x1290   :  { %5611 = vmatmul.msk.f32.gmra.mxu2 %vm469_vm6, %v3169_v20 }
0x1297   :  { %v3172_v4 = vpop.f32.mrf.mxu0 }
0x1298   :  { %5612 = vmatmul.msk.f32.gmra.mxu2 %vm469_vm6, %v3172_v4 }
0x129f   :  { %v3345_v57 = vpop.f32.mrf.mxu0 }
0x12a0   :  { %v3346_v9 = vadd.f32 %v7539_v11, %v3345_v57 }
0x12a2   :  { %v3354_v10 = vsel %vm514_vm7, %v3346_v9, -inf }
0x12a3   :  { %3355 = vmax.xlane.f32.xlu0 %v3354_v10 }
0x12a7   :  { %v3348_v55 = vpop.f32.mrf.mxu0 }
0x12a8   :  { %v3349_v15 = vadd.f32 %v7539_v11, %v3348_v55 }
0x12aa   :  { %v3357_v12 = vsel %vm514_vm7, %v3349_v15, -inf }
0x12ab   :  { %3358 = vmax.xlane.f32.xlu1 %v3357_v12  ;;  %v5627_v12 = vld [vmem:[%s8414_s3 + $0xd8] sm:$0xff] }
0x12af   :  { %v3351_v19 = vpop.f32.mrf.mxu0 }
0x12b0   :  { %v3352_v25 = vadd.f32 %v7539_v11, %v3351_v19  ;;  %v5626_v19 = vld [vmem:[%s8414_s3 + $0xd0] sm:$0xff] }
0x12b2   :  { %v3360_v16 = vsel %vm514_vm7, %v3352_v25, -inf }
0x12b3   :  { %3361 = vmax.xlane.f32.xlu2 %v3360_v16 }
0x12b4   :  { %v3529_v17 = vpop.f32.mrf.mxu3 }
0x12b5   :  { %v3530_v30 = vadd.f32 %v7539_v11, %v3529_v17  ;;  %v5624_v17 = vld [vmem:[%s8414_s3 + $0xc0] sm:$0xff] }
0x12b7   :  { %v3538_v56 = vsel %vm514_vm7, %v3530_v30, -inf }
0x12b8   :  { %3539 = vmax.xlane.f32.xlu0 %v3538_v56 }
0x12bc   :  { %v3532_v62 = vpop.f32.mrf.mxu3 }
0x12bd   :  { %v3533_v23 = vadd.f32 %v7539_v11, %v3532_v62 }
0x12bf   :  { %v3541_v33 = vsel %vm514_vm7, %v3533_v23, -inf }
0x12c0   :  { %3542 = vmax.xlane.f32.xlu1 %v3541_v33 }
0x12c4   :  { %v3535_v26 = vpop.f32.mrf.mxu3 }
0x12c5   :  { %v3536_v8 = vadd.f32 %v7539_v11, %v3535_v26 }
0x12c7   :  { %v3544_v35 = vsel %vm514_vm7, %v3536_v8, -inf }
0x12c8   :  { %3545 = vmax.xlane.f32.xlu2 %v3544_v35 }
0x1316   :  { %v3356_v47 = vpop.xlane.xlu0 %3355 }
0x1317   :  { %v3363_v18 = vsub.f32 %v3346_v9, %v3356_v47 }
0x1319   :  { %v3366_v45 = vmul.f32 1.442695, %v3363_v18 }
0x131b   :  { %5987 = vpow2.f32 %v3366_v45  ;;  %v5591_v45 = vld [vmem:[%s8365_s12 + $0x28] sm:$0xff] }
0x131c   :  { %3448 = vmatpush.msrb.mxu1 %v5591_v45 }
0x131e   :  { %v3359_v7 = vpop.xlane.xlu1 %3358  ;;  %3630 = vmatpush.msra.mxu1 %v5591_v45 }
0x131f   :  { %v3364_v49 = vsub.f32 %v3349_v15, %v3359_v7 }
0x1321   :  { %v5988_v13 = vpop.eup %5987  ;;  %v3368_v14 = vmul.f32 1.442695, %v3364_v49 }
0x1322   :  { %v3372_v58 = vsel %vm514_vm7, %v5988_v13, 0.0 }
0x1323   :  { %5989 = vpow2.f32 %v3368_v14  ;;  %3373 = vadd.xlane.f32.xlu0 %v3372_v58  ;;  %v5637_v14 = vld [vmem:[%s8415_s30 + $0xd0] sm:$0xff]  ;;  %v5636_v58 = vld [vmem:[%s8415_s30 + $0xc8] sm:$0xff] }
0x1326   :  { %v3362_v51 = vpop.xlane.xlu2 %3361 }
0x1327   :  { %v3365_v52 = vsub.f32 %v3352_v25, %v3362_v51  ;;  %v5625_v25 = vld [vmem:[%s8414_s3 + $0xc8] sm:$0xff] }
0x1329   :  { %v5990_v53 = vpop.eup %5989  ;;  %v3370_v54 = vmul.f32 1.442695, %v3365_v52  ;;  %v5635_v52 = vld [vmem:[%s8415_s30 + $0xc0] sm:$0xff] }
0x132a   :  { %v3375_v5 = vsel %vm514_vm7, %v5990_v53, 0.0 }
0x132b   :  { %5991 = vpow2.f32 %v3370_v54  ;;  %3376 = vadd.xlane.f32.xlu1 %v3375_v5  ;;  %v3540_v43 = vpop.xlane.xlu0 %3539 }
0x132c   :  { %v3547_v60 = vsub.f32 %v3530_v30, %v3540_v43 }
0x132e   :  { %v3550_v61 = vmul.f32 1.442695, %v3547_v60 }
0x1330   :  { %5993 = vpow2.f32 %v3550_v61  ;;  %v3703_v61 = vpop.f32.mrf.mxu3 }
0x1331   :  { %v5992_v0 = vpop.eup %5991 }
0x1332   :  { %v3378_v63 = vsel %vm514_vm7, %v5992_v0, 0.0 }
0x1333   :  { %3379 = vadd.xlane.f32.xlu2 %v3378_v63  ;;  %v3543_v44 = vpop.xlane.xlu1 %3542 }
0x1334   :  { %v3548_v41 = vsub.f32 %v3533_v23, %v3543_v44 }
0x1336   :  { %v5994_v31 = vpop.eup %5993  ;;  %v3552_v28 = vmul.f32 1.442695, %v3548_v41 }
0x1337   :  { %v3556_v6 = vsel %vm514_vm7, %v5994_v31, 0.0 }
0x1338   :  { %5995 = vpow2.f32 %v3552_v28  ;;  %3557 = vadd.xlane.f32.xlu0 %v3556_v6  ;;  %v3706_v6 = vpop.f32.mrf.mxu3 }
0x133b   :  { %v3546_v38 = vpop.xlane.xlu2 %3545 }
0x133c   :  { %v3549_v1 = vsub.f32 %v3536_v8, %v3546_v38 }
0x133e   :  { %v5996_v2 = vpop.eup %5995  ;;  %v3554_v24 = vmul.f32 1.442695, %v3549_v1 }
0x133f   :  { %v3559_v37 = vsel %vm514_vm7, %v5996_v2, 0.0 }
0x1340   :  { %5997 = vpow2.f32 %v3554_v24  ;;  %3560 = vadd.xlane.f32.xlu1 %v3559_v37  ;;  %v3709_v24 = vpop.f32.mrf.mxu3 }
0x1346   :  { %v5998_v48 = vpop.eup %5997 }
0x1347   :  { %v3562_v3 = vsel %vm514_vm7, %v5998_v48, 0.0 }
0x1348   :  { %3563 = vadd.xlane.f32.xlu2 %v3562_v3 }
0x1396   :  { %v3374_v20 = vpop.xlane.xlu0 %3373 }
0x1397   :  { %5999 = vrcp.f32 %v3374_v20 }
0x139d   :  { %v6000_v4 = vpop.eup %5999 }
0x139e   :  { %v3384_v57 = vmul.f32 %v6000_v4, %v5988_v13  ;;  %v3377_v9 = vpop.xlane.xlu1 %3376  ;;  %v5638_v13 = vld [vmem:[%s8415_s30 + $0xd8] sm:$0xff]  ;;  %v3712_v4 = vpop.f32.mrf.mxu3 }
0x139f   :  { %6001 = vrcp.f32 %v3377_v9 }
0x13a0   :  { %5588 = vmatmul.msk.f32.vlgmr.msrb.gmra.mxu0 %vm514_vm7, %v3384_v57 }
0x13a1   :  { %3743 = vmatpush.msrb.mxu0 %v5627_v12  ;;  %v5683_v12 = vld [vmem:[%s8414_s3 + $0xe8] sm:$0xff] }
0x13a3   :  { %3744 = vmatpush.msrb.mxu0 %v5626_v19 }
0x13a5   :  { %v6002_v10 = vpop.eup %6001  ;;  %3745 = vmatpush.msrb.mxu0 %v5625_v25  ;;  %v5682_v25 = vld [vmem:[%s8414_s3 + $0xe0] sm:$0xff] }
0x13a6   :  { %v3380_v55 = vpop.xlane.xlu2 %3379  ;;  %v3385_v15 = vmul.f32 %v6002_v10, %v5990_v53  ;;  %v5685_v10 = vld [vmem:[%s8414_s3 + $0xf8] sm:$0xff]  ;;  %v3715_v19 = vpop.f32.mrf.mxu3 }
0x13a7   :  { %6003 = vrcp.f32 %v3380_v55  ;;  %3746 = vmatpush.msrb.mxu0 %v5624_v17 }
0x13a8   :  { %5589 = vmatmul.msk.f32.gmra.mxu0 %vm514_vm7, %v3385_v15  ;;  %v5684_v15 = vld [vmem:[%s8414_s3 + $0xf0] sm:$0xff] }
0x13ab   :  { %v3558_v16 = vpop.xlane.xlu0 %3557 }
0x13ac   :  { %6005 = vrcp.f32 %v3558_v16 }
0x13ad   :  { %v6004_v30 = vpop.eup %6003 }
0x13ae   :  { %v3386_v56 = vmul.f32 %v6004_v30, %v5992_v0  ;;  %v5803_v0 = vld [vmem:[%s8418_s5 + $0x6] ss:$0 sm:$0xff]  ;;  %v3718_v17 = vpop.f32.mrf.mxu3 }
0x13b0   :  { %5590 = vmatmul.msk.f32.gmra.mxu0 %vm514_vm7, %v3386_v56  ;;  %v7784_v56 = vpop.f32.mrf.mxu2 }
0x13b2   :  { %v6006_v62 = vpop.eup %6005 }
0x13b3   :  { %v3561_v23 = vpop.xlane.xlu1 %3560  ;;  %v3568_v33 = vmul.f32 %v6006_v62, %v5994_v31  ;;  %v5802_v31 = vld [vmem:[%s8420_s2 + $0x6] ss:$0 sm:$0xff] }
0x13b4   :  { %6007 = vrcp.f32 %v3561_v23  ;;  %v3704_v1 = vadd.f32 %v5802_v31, %v3703_v61  ;;  %v3707_v37 = vadd.f32 %v5802_v31, %v3706_v6  ;;  %v3710_v20 = vadd.f32 %v5802_v31, %v3709_v24 }
0x13b5   :  { %v3713_v55 = vadd.f32 %v5802_v31, %v3712_v4  ;;  %v3716_v16 = vadd.f32 %v5802_v31, %v3715_v19  ;;  %v3719_v30 = vadd.f32 %v5802_v31, %v3718_v17  ;;  %v5805_v4 = vld [vmem:[%s8418_s5 + $0x7] ss:$0 sm:$0xff] }
0x13b8   :  { %5604 = vmatmul.msk.f32.vlgmr.msra.gmra.mxu0 %vm514_vm7, %v3568_v33  ;;  %v7791_v23 = vpop.f32.mrf.mxu2 }
0x13ba   :  { %v6008_v26 = vpop.eup %6007 }
0x13bb   :  { %v3564_v8 = vpop.xlane.xlu2 %3563  ;;  %v3569_v35 = vmul.f32 %v6008_v26, %v5996_v2 }
0x13bc   :  { %6009 = vrcp.f32 %v3564_v8 }
0x13c0   :  { %5605 = vmatmul.msk.f32.gmra.mxu0 %vm514_vm7, %v3569_v35  ;;  %v7797_v26 = vpop.f32.mrf.mxu2 }
0x13c2   :  { %v6010_v47 = vpop.eup %6009 }
0x13c3   :  { %v3570_v18 = vmul.f32 %v6010_v47, %v5998_v48 }
0x13c8   :  { %5606 = vmatmul.msk.f32.gmra.mxu0 %vm514_vm7, %v3570_v18  ;;  %v7803_v35 = vpop.f32.mrf.mxu2 }
0x13d0   :  { %5629 = vmatmul.msk.f32.vlgmr.msrb.gmra.mxu0 %vm161_vm1, %v7417_v36  ;;  %v7809_v18 = vpop.f32.mrf.mxu2 }
0x13d8   :  { %5630 = vmatmul.msk.f32.gmra.mxu0 %vm161_vm1, %v7434_v22 }
0x13e0   :  { %5631 = vmatmul.msk.f32.gmra.mxu0 %vm161_vm1, %v7446_v32 }
0x13e8   :  { %5632 = vmatmul.msk.f32.gmra.mxu0 %vm161_vm1, %v7472_v21 }
0x13f0   :  { %5633 = vmatmul.msk.f32.gmra.mxu0 %vm161_vm1, %v7483_v40 }
0x13f8   :  { %5634 = vmatmul.msk.f32.gmra.mxu0 %vm161_vm1, %v7494_v27 }
0x141d   :  { %v3413_v7 = vpop.f32.mrf.mxu0 }
0x141e   :  { %5592 = vmatmul.msk.f32.vlgmr.msrb.gmra.mxu1 %vm469_vm6, %v3413_v7  ;;  %v3673_v7 = vpop.f32.mrf.mxu2 }
0x141f   :  { %3788 = vmatpush.msrb.mxu1 %v5638_v13 }
0x1421   :  { %3789 = vmatpush.msrb.mxu1 %v5637_v14 }
0x1423   :  { %3790 = vmatpush.msrb.mxu1 %v5636_v58 }
0x1425   :  { %v3416_v49 = vpop.f32.mrf.mxu0  ;;  %3791 = vmatpush.msrb.mxu1 %v5635_v52 }
0x1426   :  { %5593 = vmatmul.msk.f32.gmra.mxu1 %vm469_vm6, %v3416_v49 }
0x142d   :  { %v3419_v51 = vpop.f32.mrf.mxu0 }
0x142e   :  { %5594 = vmatmul.msk.f32.gmra.mxu1 %vm469_vm6, %v3419_v51  ;;  %v5804_v51 = vld [vmem:[%s8419_s10 + $0x6] ss:$0 sm:$0xff] }
0x1435   :  { %v3597_v53 = vpop.f32.mrf.mxu0 }
0x1436   :  { %5607 = vmatmul.msk.f32.vlgmr.msra.gmra.mxu1 %vm469_vm6, %v3597_v53 }
0x143d   :  { %v3600_v54 = vpop.f32.mrf.mxu0 }
0x143e   :  { %5608 = vmatmul.msk.f32.gmra.mxu1 %vm469_vm6, %v3600_v54 }
0x1445   :  { %v3603_v5 = vpop.f32.mrf.mxu0 }
0x1446   :  { %5609 = vmatmul.msk.f32.gmra.mxu1 %vm469_vm6, %v3603_v5 }
0x144d   :  { %v3748_v43 = vpop.f32.mrf.mxu0 }
0x144e   :  { %5640 = vmatmul.msk.f32.vlgmr.msrb.gmra.mxu1 %vm161_vm1, %v7417_v36  ;;  %v3749_v38 = vadd.f32 %v5803_v0, %v3748_v43 }
0x1455   :  { %v3751_v60 = vpop.f32.mrf.mxu0 }
0x1456   :  { %5641 = vmatmul.msk.f32.gmra.mxu1 %vm161_vm1, %v7434_v22  ;;  %v3752_v41 = vadd.f32 %v5803_v0, %v3751_v60 }
0x145d   :  { %v3754_v63 = vpop.f32.mrf.mxu0 }
0x145e   :  { %v3755_v44 = vadd.f32 %v5803_v0, %v3754_v63  ;;  %5642 = vmatmul.msk.f32.gmra.mxu1 %vm161_vm1, %v7446_v32 }
0x1460   :  { %5646 = vmatpush.xpose.msk.msra.mxu2 %vm469_vm6, %v3755_v44 }
0x1464   :  { %5647 = vmatpush.xpose.msk.msra.mxu2 %vm469_vm6, %v3752_v41 }
0x1465   :  { %v3757_v28 = vpop.f32.mrf.mxu0 }
0x1466   :  { %5643 = vmatmul.msk.f32.gmra.mxu1 %vm161_vm1, %v7472_v21  ;;  %v3758_v9 = vadd.f32 %v5803_v0, %v3757_v28 }
0x1468   :  { %5648 = vmatpush.xpose.msk.msra.mxu2 %vm469_vm6, %v3749_v38 }
0x146b   :  { %5649 = vmatmul.msk.f32.vlgmr.msra.gmra.mxu2 %vm469_vm6, %v3704_v1 }
0x146d   :  { %v3760_v2 = vpop.f32.mrf.mxu0 }
0x146e   :  { %5644 = vmatmul.msk.f32.gmra.mxu1 %vm161_vm1, %v7483_v40  ;;  %v3761_v57 = vadd.f32 %v5803_v0, %v3760_v2 }
0x1473   :  { %5650 = vmatmul.msk.f32.gmra.mxu2 %vm469_vm6, %v3707_v37 }
0x1475   :  { %v3763_v48 = vpop.f32.mrf.mxu0 }
0x1476   :  { %v3764_v3 = vadd.f32 %v5803_v0, %v3763_v48  ;;  %5645 = vmatmul.msk.f32.gmra.mxu1 %vm161_vm1, %v7494_v27 }
0x1478   :  { %5659 = vmatpush.xpose.msk.msra.mxu0 %vm469_vm6, %v3764_v3 }
0x147b   :  { %5651 = vmatmul.msk.f32.gmra.mxu2 %vm469_vm6, %v3710_v20 }
0x147c   :  { %5660 = vmatpush.xpose.msk.msra.mxu0 %vm469_vm6, %v3761_v57 }
0x1480   :  { %5661 = vmatpush.xpose.msk.msra.mxu0 %vm469_vm6, %v3758_v9 }
0x1483   :  { %5662 = vmatmul.msk.f32.vlgmr.msra.gmra.mxu0 %vm469_vm6, %v3713_v55 }
0x1484   :  { %4180 = vmatpush.msrb.mxu0 %v5685_v10 }
0x1486   :  { %4181 = vmatpush.msrb.mxu0 %v5684_v15 }
0x1488   :  { %4182 = vmatpush.msrb.mxu0 %v5683_v12 }
0x148a   :  { %4183 = vmatpush.msrb.mxu0 %v5682_v25 }
0x148b   :  { %5663 = vmatmul.msk.f32.gmra.mxu0 %vm469_vm6, %v3716_v16 }
0x1493   :  { %5664 = vmatmul.msk.f32.gmra.mxu0 %vm469_vm6, %v3719_v30 }
0x149b   :  { %v7787_v62 = vpop.f32.mrf.mxu1  ;;  %5687 = vmatmul.msk.f32.vlgmr.msrb.gmra.mxu0 %vm161_vm1, %v7417_v36 }
0x14a3   :  { %v7793_v33 = vpop.f32.mrf.mxu1  ;;  %5688 = vmatmul.msk.f32.gmra.mxu0 %vm161_vm1, %v7434_v22 }
0x14ab   :  { %v7799_v8 = vpop.f32.mrf.mxu1  ;;  %5689 = vmatmul.msk.f32.gmra.mxu0 %vm161_vm1, %v7446_v32 }
0x14b3   :  { %v7805_v47 = vpop.f32.mrf.mxu1  ;;  %5690 = vmatmul.msk.f32.gmra.mxu0 %vm161_vm1, %v7472_v21 }
0x14bb   :  { %v7811_v45 = vpop.f32.mrf.mxu1  ;;  %5691 = vmatmul.msk.f32.gmra.mxu0 %vm161_vm1, %v7483_v40 }
0x14c3   :  { %v3638_v49 = vpop.f32.mrf.mxu1  ;;  %5692 = vmatmul.msk.f32.gmra.mxu0 %vm161_vm1, %v7494_v27 }
0x14c4   :  { %v7817_v13 = vadd.f32 %v3673_v7, %v3638_v49 }
0x14cb   :  { %v3793_v14 = vpop.f32.mrf.mxu1 }
0x14cc   :  { %v3794_v5 = vadd.f32 %v5804_v51, %v3793_v14 }
0x14d3   :  { %v3796_v58 = vpop.f32.mrf.mxu1 }
0x14d4   :  { %v3797_v54 = vadd.f32 %v5804_v51, %v3796_v58 }
0x14db   :  { %v3799_v52 = vpop.f32.mrf.mxu1 }
0x14dc   :  { %v3800_v53 = vadd.f32 %v5804_v51, %v3799_v52 }
0x14de   :  { %3910 = vmatpush.msrb.mxu2 %v3800_v53 }
0x14e0   :  { %3911 = vmatpush.msrb.mxu2 %v3797_v54 }
0x14e2   :  { %3912 = vmatpush.msrb.mxu2 %v3794_v5 }
0x14e3   :  { %v3802_v43 = vpop.f32.mrf.mxu1 }
0x14e4   :  { %v3803_v38 = vadd.f32 %v5804_v51, %v3802_v43 }
0x14eb   :  { %v3805_v60 = vpop.f32.mrf.mxu1 }
0x14ec   :  { %v3806_v31 = vadd.f32 %v5804_v51, %v3805_v60 }
0x14ee   :  { %v3846_v61 = vpop.f32.mrf.mxu2 }
0x14ef   :  { %v3847_v0 = vadd.f32 %v7539_v11, %v3846_v61 }
0x14f1   :  { %v3855_v63 = vsel %vm514_vm7, %v3847_v0, -inf }
0x14f2   :  { %3856 = vmax.xlane.f32.xlu0 %v3855_v63 }
0x14f3   :  { %v3808_v44 = vpop.f32.mrf.mxu1 }
0x14f4   :  { %v3809_v41 = vadd.f32 %v5804_v51, %v3808_v44 }
0x14f6   :  { %v3849_v28 = vpop.f32.mrf.mxu2  ;;  %4062 = vmatpush.msra.mxu1 %v3809_v41 }
0x14f7   :  { %v3850_v6 = vadd.f32 %v7539_v11, %v3849_v28 }
0x14f8   :  { %4063 = vmatpush.msra.mxu1 %v3806_v31 }
0x14f9   :  { %v3858_v1 = vsel %vm514_vm7, %v3850_v6, -inf }
0x14fa   :  { %3859 = vmax.xlane.f32.xlu1 %v3858_v1  ;;  %4064 = vmatpush.msra.mxu1 %v3803_v38 }
0x14fe   :  { %v3852_v2 = vpop.f32.mrf.mxu2 }
0x14ff   :  { %v3853_v24 = vadd.f32 %v7539_v11, %v3852_v2 }
0x1500   :  { %v3998_v37 = vpop.f32.mrf.mxu0 }
0x1501   :  { %v3861_v48 = vsel %vm514_vm7, %v3853_v24, -inf  ;;  %v3999_v43 = vadd.f32 %v7539_v11, %v3998_v37 }
0x1502   :  { %3862 = vmax.xlane.f32.xlu2 %v3861_v48 }
0x1508   :  { %v4001_v3 = vpop.f32.mrf.mxu0 }
0x1509   :  { %v4002_v31 = vadd.f32 %v7539_v11, %v4001_v3 }
0x150b   :  { %v4010_v38 = vsel %vm514_vm7, %v4002_v31, -inf }
0x1510   :  { %v4004_v20 = vpop.f32.mrf.mxu0 }
0x1511   :  { %v4005_v1 = vadd.f32 %v7539_v11, %v4004_v20 }
0x1513   :  { %v4013_v2 = vsel %vm514_vm7, %v4005_v1, -inf }
0x1518   :  { %v4185_v57 = vpop.f32.mrf.mxu0 }
0x1519   :  { %v7831_v9 = vadd.f32 %v5805_v4, %v4185_v57 }
0x1520   :  { %v4188_v10 = vpop.f32.mrf.mxu0 }
0x1521   :  { %v4189_v55 = vadd.f32 %v5805_v4, %v4188_v10 }
0x1528   :  { %v4191_v15 = vpop.f32.mrf.mxu0 }
0x1529   :  { %v4192_v12 = vadd.f32 %v5805_v4, %v4191_v15 }
0x1530   :  { %v4194_v19 = vpop.f32.mrf.mxu0 }
0x1531   :  { %v4195_v7 = vadd.f32 %v5805_v4, %v4194_v19 }
0x1538   :  { %v4197_v25 = vpop.f32.mrf.mxu0 }
0x1539   :  { %v4198_v30 = vadd.f32 %v5805_v4, %v4197_v25 }
0x1540   :  { %v4200_v16 = vpop.f32.mrf.mxu0 }
0x1541   :  { %v4201_v17 = vadd.f32 %v5805_v4, %v4200_v16 }
0x1543   :  { %5717 = vmatpush.xpose.msk.msra.mxu0 %vm469_vm6, %v4201_v17 }
0x1547   :  { %5718 = vmatpush.xpose.msk.msra.mxu0 %vm469_vm6, %v4198_v30 }
0x154b   :  { %5719 = vmatpush.xpose.msk.msra.mxu0 %vm469_vm6, %v4195_v7 }
0x1565   :  { %v3857_v49 = vpop.xlane.xlu0 %3856 }
0x1566   :  { %v3864_v14 = vsub.f32 %v3847_v0, %v3857_v49  ;;  %v4007_v0 = vsel %vm514_vm7, %v3999_v43, -inf }
0x1568   :  { %v3867_v58 = vmul.f32 1.442695, %v3864_v14 }
0x156a   :  { %6011 = vpow2.f32 %v3867_v58 }
0x156d   :  { %v3860_v51 = vpop.xlane.xlu1 %3859 }
0x156e   :  { %v3865_v52 = vsub.f32 %v3850_v6, %v3860_v51 }
0x1570   :  { %v6012_v53 = vpop.eup %6011  ;;  %v3869_v54 = vmul.f32 1.442695, %v3865_v52 }
0x1571   :  { %v3873_v5 = vsel %vm514_vm7, %v6012_v53, 0.0 }
0x1572   :  { %6013 = vpow2.f32 %v3869_v54  ;;  %3874 = vadd.xlane.f32.xlu0 %v3873_v5  ;;  %v5673_v5 = vld [vmem:[%s8413_s6 + $0xf0] sm:$0xff] }
0x1575   :  { %v3863_v60 = vpop.xlane.xlu2 %3862 }
0x1576   :  { %v3866_v61 = vsub.f32 %v3853_v24, %v3863_v60  ;;  %v5655_v24 = vld [vmem:[%s8365_s12 + $0x30] sm:$0xff]  ;;  %v5696_v60 = vld [vmem:[%s8415_s30 + $0xf8] sm:$0xff] }
0x1577   :  { %4099 = vmatpush.msra.mxu2 %v5655_v24  ;;  %3949 = vmatpush.msrb.mxu3 %v5655_v24 }
0x1578   :  { %v6014_v63 = vpop.eup %6013  ;;  %v3871_v44 = vmul.f32 1.442695, %v3866_v61  ;;  %v5671_v61 = vld [vmem:[%s8413_s6 + $0xe0] sm:$0xff]  ;;  %4225 = vmatpush.msrb.mxu1 %v5696_v60 }
0x1579   :  { %v3876_v41 = vsel %vm514_vm7, %v6014_v63, 0.0 }
0x157a   :  { %6015 = vpow2.f32 %v3871_v44  ;;  %3877 = vadd.xlane.f32.xlu1 %v3876_v41  ;;  %4008 = vmax.xlane.f32.xlu0 %v4007_v0  ;;  %v5694_v44 = vld [vmem:[%s8415_s30 + $0xe8] sm:$0xff]  ;;  %v5693_v41 = vld [vmem:[%s8415_s30 + $0xe0] sm:$0xff] }
0x1580   :  { %v6016_v28 = vpop.eup %6015 }
0x1581   :  { %v3879_v6 = vsel %vm514_vm7, %v6016_v28, 0.0 }
0x1582   :  { %3880 = vadd.xlane.f32.xlu2 %v3879_v6  ;;  %4011 = vmax.xlane.f32.xlu1 %v4010_v38 }
0x158a   :  { %4014 = vmax.xlane.f32.xlu2 %v4013_v2 }
0x15e5   :  { %v3875_v37 = vpop.xlane.xlu0 %3874 }
0x15e6   :  { %6017 = vrcp.f32 %v3875_v37 }
0x15ec   :  { %v6018_v48 = vpop.eup %6017 }
0x15ed   :  { %v3885_v3 = vmul.f32 %v6018_v48, %v6012_v53  ;;  %v3878_v4 = vpop.xlane.xlu1 %3877  ;;  %v4009_v57 = vpop.xlane.xlu0 %4008 }
0x15ee   :  { %6019 = vrcp.f32 %v3878_v4  ;;  %v4016_v10 = vsub.f32 %v3999_v43, %v4009_v57  ;;  %v5672_v43 = vld [vmem:[%s8413_s6 + $0xe8] sm:$0xff] }
0x15ef   :  { %5652 = vmatmul.msk.f32.vlgmr.msrb.gmra.mxu2 %vm514_vm7, %v3885_v3 }
0x15f0   :  { %v4019_v11 = vmul.f32 1.442695, %v4016_v10  ;;  %5704 = vmatpush.xpose.msk.msrb.mxu2 %vm469_vm6, %v4192_v12 }
0x15f2   :  { %6021 = vpow2.f32 %v4019_v11  ;;  %v3492_v11 = vadd.f32 %v7797_v26, %v7799_v8  ;;  %v5806_v26 = vld [vmem:[%s8419_s10 + $0x7] ss:$0 sm:$0xff] }
0x15f4   :  { %v6020_v20 = vpop.eup %6019  ;;  %5705 = vmatpush.xpose.msk.msrb.mxu2 %vm469_vm6, %v4189_v55 }
0x15f5   :  { %v3881_v15 = vpop.xlane.xlu2 %3880  ;;  %v4012_v19 = vpop.xlane.xlu1 %4011  ;;  %v3886_v25 = vmul.f32 %v6020_v20, %v6014_v63  ;;  %v5695_v63 = vld [vmem:[%s8415_s30 + $0xf0] sm:$0xff]  ;;  %s8425_s30 = sld [smem:[#allocation20_spill]] }
0x15f6   :  { %6023 = vrcp.f32 %v3881_v15  ;;  %v4017_v16 = vsub.f32 %v4002_v31, %v4012_v19  ;;  %4226 = vmatpush.msrb.mxu1 %v5695_v63  ;;  %v5807_v15 = vld [vmem:[%s8420_s2 + $0x7] ss:$0 sm:$0xff] }
0x15f7   :  { %5653 = vmatmul.msk.f32.gmra.mxu2 %vm514_vm7, %v3886_v25 }
0x15f8   :  { %v6022_v17 = vpop.eup %6021  ;;  %v4021_v30 = vmul.f32 1.442695, %v4017_v16  ;;  %5706 = vmatpush.xpose.msk.msrb.mxu2 %vm469_vm6, %v7831_v9  ;;  %v5674_v9 = vld [vmem:[%s8413_s6 + $0xf8] sm:$0xff]  ;;  %4227 = vmatpush.msrb.mxu1 %v5694_v44  ;;  %v3668_v44 = vadd.f32 %v7803_v35, %v7805_v47 }
0x15f9   :  { %v4025_v7 = vsel %vm514_vm7, %v6022_v17, 0.0  ;;  %4135 = vmatpush.msra.mxu3 %v5674_v9 }
0x15fa   :  { %6025 = vpow2.f32 %v4021_v30  ;;  %4026 = vadd.xlane.f32.xlu0 %v4025_v7  ;;  %4228 = vmatpush.msrb.mxu1 %v5693_v41 }
0x15fb   :  { %4136 = vmatpush.msra.mxu3 %v5673_v5  ;;  %s5244_s11 = sshll.u32 %s8425_s30, 4  ;;  %s5245_s11 = int_to_ptr.hbm [resolvable:$true] %s5244_s11 }
0x15fc   :  { %v6024_v12 = vpop.eup %6023 }
0x15fd   :  { %v4015_v49 = vpop.xlane.xlu2 %4014  ;;  %v3887_v14 = vmul.f32 %v6024_v12, %v6016_v28  ;;  %4137 = vmatpush.msra.mxu3 %v5672_v43 }
0x15fe   :  { %v4018_v55 = vsub.f32 %v4005_v1, %v4015_v49 }
0x15ff   :  { %5654 = vmatmul.msk.f32.gmra.mxu2 %vm514_vm7, %v3887_v14  ;;  %4138 = vmatpush.msra.mxu3 %v5671_v61 }
0x1600   :  { %v6026_v58 = vpop.eup %6025  ;;  %v4023_v51 = vmul.f32 1.442695, %v4018_v55 }
0x1601   :  { %v4028_v52 = vsel %vm514_vm7, %v6026_v58, 0.0 }
0x1602   :  { %6027 = vpow2.f32 %v4023_v51  ;;  %4029 = vadd.xlane.f32.xlu1 %v4028_v52 }
0x1608   :  { %v6028_v53 = vpop.eup %6027 }
0x1609   :  { %v4031_v54 = vsel %vm514_vm7, %v6028_v53, 0.0 }
0x160a   :  { %4032 = vadd.xlane.f32.xlu2 %v4031_v54 }
0x166d   :  { %v4027_v0 = vpop.xlane.xlu0 %4026 }
0x166e   :  { %6029 = vrcp.f32 %v4027_v0 }
0x1672   :  { %v3914_v31 = vpop.f32.mrf.mxu2 }
0x1673   :  { %5656 = vmatmul.msk.f32.vlgmr.msrb.gmra.mxu3 %vm469_vm6, %v3914_v31  ;;  %v3671_v31 = vadd.f32 %v7809_v18, %v7811_v45 }
0x1674   :  { %v6030_v28 = vpop.eup %6029 }
0x1675   :  { %v4037_v6 = vmul.f32 %v6030_v28, %v6022_v17  ;;  %v4030_v38 = vpop.xlane.xlu1 %4029 }
0x1676   :  { %6031 = vrcp.f32 %v4030_v38 }
0x1677   :  { %5665 = vmatmul.msk.f32.vlgmr.msra.gmra.mxu1 %vm514_vm7, %v4037_v6 }
0x167a   :  { %v3917_v1 = vpop.f32.mrf.mxu2 }
0x167b   :  { %5657 = vmatmul.msk.f32.gmra.mxu3 %vm469_vm6, %v3917_v1 }
0x167c   :  { %v6032_v2 = vpop.eup %6031 }
0x167d   :  { %v4033_v24 = vpop.xlane.xlu2 %4032  ;;  %v4038_v37 = vmul.f32 %v6032_v2, %v6026_v58 }
0x167e   :  { %6033 = vrcp.f32 %v4033_v24  ;;  %v7951_v24 = vld [vmem:[%s8421_s28] ss:$0 sm:$0xff] }
0x167f   :  { %5666 = vmatmul.msk.f32.gmra.mxu1 %vm514_vm7, %v4038_v37 }
0x1682   :  { %v3920_v48 = vpop.f32.mrf.mxu2 }
0x1683   :  { %5658 = vmatmul.msk.f32.gmra.mxu3 %vm469_vm6, %v3920_v48 }
0x1684   :  { %v6034_v3 = vpop.eup %6033 }
0x1685   :  { %v4039_v4 = vmul.f32 %v6034_v3, %v6028_v53 }
0x1687   :  { %5667 = vmatmul.msk.f32.gmra.mxu1 %vm514_vm7, %v4039_v4 }
0x168b   :  { %5676 = vmatmul.msk.f32.vlgmr.msra.gmra.mxu3 %vm161_vm1, %v7417_v36 }
0x168f   :  { %5698 = vmatmul.msk.f32.vlgmr.msrb.gmra.mxu1 %vm161_vm1, %v7417_v36 }
0x1693   :  { %5677 = vmatmul.msk.f32.gmra.mxu3 %vm161_vm1, %v7434_v22 }
0x1697   :  { %5699 = vmatmul.msk.f32.gmra.mxu1 %vm161_vm1, %v7434_v22 }
0x169b   :  { %5678 = vmatmul.msk.f32.gmra.mxu3 %vm161_vm1, %v7446_v32 }
0x169f   :  { %5700 = vmatmul.msk.f32.gmra.mxu1 %vm161_vm1, %v7446_v32 }
0x16a3   :  { %5679 = vmatmul.msk.f32.gmra.mxu3 %vm161_vm1, %v7472_v21 }
0x16a7   :  { %5701 = vmatmul.msk.f32.gmra.mxu1 %vm161_vm1, %v7472_v21  ;;  %v3489_v21 = vadd.f32 %v7791_v23, %v7793_v33 }
0x16ab   :  { %5680 = vmatmul.msk.f32.gmra.mxu3 %vm161_vm1, %v7483_v40 }
0x16af   :  { %5702 = vmatmul.msk.f32.gmra.mxu1 %vm161_vm1, %v7483_v40 }
0x16b3   :  { %5681 = vmatmul.msk.f32.gmra.mxu3 %vm161_vm1, %v7494_v27 }
0x16b7   :  { %5703 = vmatmul.msk.f32.gmra.mxu1 %vm161_vm1, %v7494_v27 }
0x16f4   :  { %v4066_v36 = vpop.f32.mrf.mxu1 }
0x16f5   :  { %5668 = vmatmul.msk.f32.vlgmr.msra.gmra.mxu2 %vm469_vm6, %v4066_v36 }
0x16f6   :  { %v7913_v22 = vpop.f32.mrf.mxu3 }
0x16fc   :  { %v4069_v32 = vpop.f32.mrf.mxu1 }
0x16fd   :  { %5669 = vmatmul.msk.f32.gmra.mxu2 %vm469_vm6, %v4069_v32 }
0x16fe   :  { %v3954_v57 = vpop.f32.mrf.mxu3 }
0x16ff   :  { %v7918_v10 = vadd.f32 %v3954_v57, %v3489_v21 }
0x1704   :  { %v4072_v40 = vpop.f32.mrf.mxu1 }
0x1705   :  { %5670 = vmatmul.msk.f32.gmra.mxu2 %vm469_vm6, %v4072_v40 }
0x1706   :  { %v3957_v27 = vpop.f32.mrf.mxu3 }
0x1707   :  { %v7923_v20 = vadd.f32 %v3957_v27, %v3492_v11 }
0x170c   :  { %v4230_v19 = vpop.f32.mrf.mxu1 }
0x170d   :  { %v4231_v14 = vadd.f32 %v5806_v26, %v4230_v19 }
0x170e   :  { %v4140_v23 = vpop.f32.mrf.mxu3 }
0x170f   :  { %v4141_v33 = vadd.f32 %v5807_v15, %v4140_v23 }
0x1711   :  { %5707 = vmatmul.msk.f32.vlgmr.msrb.gmra.mxu2 %vm469_vm6, %v4141_v33 }
0x1714   :  { %v4233_v25 = vpop.f32.mrf.mxu1 }
0x1715   :  { %v4234_v49 = vadd.f32 %v5806_v26, %v4233_v25 }
0x1716   :  { %v4143_v16 = vpop.f32.mrf.mxu3 }
0x1717   :  { %v4144_v17 = vadd.f32 %v5807_v15, %v4143_v16 }
0x1719   :  { %5708 = vmatmul.msk.f32.gmra.mxu2 %vm469_vm6, %v4144_v17 }
0x171c   :  { %v4236_v8 = vpop.f32.mrf.mxu1 }
0x171d   :  { %v4237_v30 = vadd.f32 %v5806_v26, %v4236_v8 }
0x171e   :  { %v4146_v7 = vpop.f32.mrf.mxu3 }
0x171f   :  { %v4147_v12 = vadd.f32 %v5807_v15, %v4146_v7  ;;  %4347 = vmatpush.msra.mxu2 %v4237_v30 }
0x1721   :  { %5709 = vmatmul.msk.f32.gmra.mxu2 %vm469_vm6, %v4147_v12 }
0x1722   :  { %4348 = vmatpush.msra.mxu2 %v4234_v49 }
0x1724   :  { %4349 = vmatpush.msra.mxu2 %v4231_v14  ;;  %v4239_v55 = vpop.f32.mrf.mxu1 }
0x1725   :  { %v4240_v63 = vadd.f32 %v5806_v26, %v4239_v55 }
0x1726   :  { %v4149_v58 = vpop.f32.mrf.mxu3 }
0x1727   :  { %v4150_v51 = vadd.f32 %v5807_v15, %v4149_v58  ;;  %v5713_v58 = vld [vmem:[%s8365_s12 + $0x38] sm:$0xff] }
0x1728   :  { %4386 = vmatpush.msrb.mxu3 %v5713_v58  ;;  %4536 = vmatpush.msrb.mxu2 %v5713_v58 }
0x1729   :  { %5720 = vmatmul.msk.f32.vlgmr.msra.gmra.mxu0 %vm469_vm6, %v4150_v51 }
0x172c   :  { %v4242_v52 = vpop.f32.mrf.mxu1 }
0x172d   :  { %v4243_v60 = vadd.f32 %v5806_v26, %v4242_v52 }
0x172e   :  { %v4152_v53 = vpop.f32.mrf.mxu3 }
0x172f   :  { %v4153_v54 = vadd.f32 %v5807_v15, %v4152_v53 }
0x1731   :  { %5721 = vmatmul.msk.f32.gmra.mxu0 %vm469_vm6, %v4153_v54 }
0x1734   :  { %v4245_v9 = vpop.f32.mrf.mxu1 }
0x1735   :  { %v4246_v5 = vadd.f32 %v5806_v26, %v4245_v9 }
0x1736   :  { %v4155_v43 = vpop.f32.mrf.mxu3 }
0x1737   :  { %v4156_v61 = vadd.f32 %v5807_v15, %v4155_v43  ;;  %4499 = vmatpush.msra.mxu1 %v4246_v5 }
0x1739   :  { %5722 = vmatmul.msk.f32.gmra.mxu0 %vm469_vm6, %v4156_v61  ;;  %4500 = vmatpush.msra.mxu1 %v4243_v60 }
0x173b   :  { %4501 = vmatpush.msra.mxu1 %v4240_v63 }
0x1778   :  { %v4101_v41 = vpop.f32.mrf.mxu2 }
0x1779   :  { %v7939_v0 = vadd.f32 %v4101_v41, %v3668_v44 }
0x1780   :  { %v4104_v28 = vpop.f32.mrf.mxu2 }
0x1781   :  { %v7943_v6 = vadd.f32 %v4104_v28, %v3671_v31 }
0x1788   :  { %v4107_v38 = vpop.f32.mrf.mxu2 }
0x1789   :  { %v7946_v1 = vadd.f32 %v4107_v38, %v7817_v13 }
0x1794   :  { %v4283_v2 = vpop.f32.mrf.mxu2 }
0x1795   :  { %v4284_v35 = vadd.f32 %v7951_v24, %v4283_v2 }
0x1797   :  { %v4292_v47 = vsel %vm514_vm7, %v4284_v35, -inf }
0x1798   :  { %4293 = vmax.xlane.f32.xlu0 %v4292_v47 }
0x179c   :  { %v4286_v37 = vpop.f32.mrf.mxu2 }
0x179d   :  { %v4287_v18 = vadd.f32 %v7951_v24, %v4286_v37 }
0x179f   :  { %v4295_v45 = vsel %vm514_vm7, %v4287_v18, -inf }
0x17a0   :  { %4296 = vmax.xlane.f32.xlu1 %v4295_v45  ;;  %v7982_v45 = vld [vmem:[%s8366_s13 + $0x1] ss:$0 sm:$0xff] }
0x17a4   :  { %v4289_v48 = vpop.f32.mrf.mxu2 }
0x17a5   :  { %v4290_v13 = vadd.f32 %v7951_v24, %v4289_v48 }
0x17a6   :  { %v4435_v3 = vpop.f32.mrf.mxu0 }
0x17a7   :  { %v4436_v4 = vadd.f32 %v7951_v24, %v4435_v3  ;;  %v4298_v36 = vsel %vm514_vm7, %v4290_v13, -inf }
0x17a8   :  { %4299 = vmax.xlane.f32.xlu2 %v4298_v36 }
0x17a9   :  { %v4444_v32 = vsel %vm514_vm7, %v4436_v4, -inf }
0x17aa   :  { %4445 = vmax.xlane.f32.xlu0 %v4444_v32 }
0x180b   :  { %v4294_v21 = vpop.xlane.xlu0 %4293 }
0x180c   :  { %v4301_v57 = vsub.f32 %v4284_v35, %v4294_v21  ;;  %v3486_v35 = vadd.f32 %v7784_v56, %v7787_v62  ;;  %v4438_v21 = vpop.f32.mrf.mxu0 }
0x180e   :  { %v4304_v40 = vmul.f32 1.442695, %v4301_v57  ;;  %v3960_v47 = vadd.f32 %v7913_v22, %v3486_v35  ;;  %v5735_v35 = vld [vmem:[%s8369_s16 + $0x38] sm:$0xff] }
0x180f   :  { %4761 = vmatpush.msra.mxu3 %v5735_v35 }
0x1810   :  { %6035 = vpow2.f32 %v4304_v40 }
0x1813   :  { %v4297_v11 = vpop.xlane.xlu1 %4296 }
0x1814   :  { %v4302_v27 = vsub.f32 %v4287_v18, %v4297_v11 }
0x1816   :  { %v6036_v15 = vpop.eup %6035  ;;  %v4306_v19 = vmul.f32 1.442695, %v4302_v27 }
0x1817   :  { %v4310_v23 = vsel %vm514_vm7, %v6036_v15, 0.0 }
0x1818   :  { %6037 = vpow2.f32 %v4306_v19  ;;  %4311 = vadd.xlane.f32.xlu1 %v4310_v23  ;;  %v4441_v23 = vpop.f32.mrf.mxu0 }
0x181b   :  { %v4300_v33 = vpop.xlane.xlu2 %4299 }
0x181c   :  { %v4303_v25 = vsub.f32 %v4290_v13, %v4300_v33 }
0x181d   :  { %v4446_v16 = vpop.xlane.xlu0 %4445 }
0x181e   :  { %v6038_v17 = vpop.eup %6037  ;;  %v4308_v26 = vmul.f32 1.442695, %v4303_v25  ;;  %v4453_v8 = vsub.f32 %v4436_v4, %v4446_v16 }
0x181f   :  { %v4313_v30 = vsel %vm514_vm7, %v6038_v17, 0.0 }
0x1820   :  { %6039 = vpow2.f32 %v4308_v26  ;;  %v4456_v7 = vmul.f32 1.442695, %v4453_v8  ;;  %4314 = vadd.xlane.f32.xlu2 %v4313_v30 }
0x1822   :  { %6041 = vpow2.f32 %v4456_v7 }
0x1826   :  { %v6040_v12 = vpop.eup %6039 }
0x1827   :  { %v4316_v49 = vsel %vm514_vm7, %v6040_v12, 0.0 }
0x1828   :  { %v6042_v14 = vpop.eup %6041  ;;  %4317 = vadd.xlane.f32.xlu0 %v4316_v49 }
0x1829   :  { %v4462_v55 = vsel %vm514_vm7, %v6042_v14, 0.0 }
0x182a   :  { %4463 = vadd.xlane.f32.xlu1 %v4462_v55 }
0x188b   :  { %v4312_v51 = vpop.xlane.xlu1 %4311 }
0x188c   :  { %6043 = vrcp.f32 %v4312_v51 }
0x1892   :  { %v6044_v52 = vpop.eup %6043 }
0x1893   :  { %v4322_v53 = vmul.f32 %v6044_v52, %v6036_v15  ;;  %v4315_v54 = vpop.xlane.xlu2 %4314 }
0x1894   :  { %6045 = vrcp.f32 %v4315_v54 }
0x1895   :  { %5710 = vmatmul.msk.f32.vlgmr.msra.gmra.mxu2 %vm514_vm7, %v4322_v53 }
0x189a   :  { %v6046_v9 = vpop.eup %6045 }
0x189b   :  { %v4318_v5 = vpop.xlane.xlu0 %4317  ;;  %v4323_v43 = vmul.f32 %v6046_v9, %v6038_v17 }
0x189c   :  { %6047 = vrcp.f32 %v4318_v5 }
0x189d   :  { %5711 = vmatmul.msk.f32.gmra.mxu2 %vm514_vm7, %v4323_v43  ;;  %v4464_v60 = vpop.xlane.xlu1 %4463 }
0x189e   :  { %6049 = vrcp.f32 %v4464_v60 }
0x18a2   :  { %v6048_v61 = vpop.eup %6047 }
0x18a3   :  { %v4324_v63 = vmul.f32 %v6048_v61, %v6040_v12 }
0x18a4   :  { %v6050_v44 = vpop.eup %6049 }
0x18a5   :  { %v4474_v41 = vmul.f32 %v6050_v44, %v6042_v14  ;;  %5712 = vmatmul.msk.f32.gmra.mxu2 %vm514_vm7, %v4324_v63 }
0x18a7   :  { %5723 = vmatmul.msk.f32.vlgmr.msra.gmra.mxu1 %vm514_vm7, %v4474_v41 }
0x1918   :  { %v4351_v31 = vpop.f32.mrf.mxu2 }
0x1919   :  { %5714 = vmatmul.msk.f32.vlgmr.msrb.gmra.mxu3 %vm469_vm6, %v4351_v31 }
0x1920   :  { %v4354_v28 = vpop.f32.mrf.mxu2 }
0x1921   :  { %5715 = vmatmul.msk.f32.gmra.mxu3 %vm469_vm6, %v4354_v28 }
0x1924   :  { %v4503_v38 = vpop.f32.mrf.mxu1 }
0x1925   :  { %5726 = vmatmul.msk.f32.vlgmr.msrb.gmra.mxu2 %vm469_vm6, %v4503_v38 }
0x1928   :  { %v4357_v2 = vpop.f32.mrf.mxu2 }
0x1929   :  { %5716 = vmatmul.msk.f32.gmra.mxu3 %vm469_vm6, %v4357_v2 }
0x199c   :  { %v4388_v37 = vpop.f32.mrf.mxu3 }
0x199d   :  { %v4397_v18 = vadd.f32 %v4388_v37, %v3960_v47  ;;  %v5734_v47 = vld [vmem:[%s8369_s16 + $0x30] sm:$0xff]  ;;  %v5733_v37 = vld [vmem:[%s8369_s16 + $0x28] sm:$0xff] }
0x199e   :  { %4762 = vmatpush.msra.mxu3 %v5734_v47 }
0x199f   :  { %v4550_v48 = vadd.f32 %v4397_v18, %v7288_v39  ;;  %v5732_v18 = vld [vmem:[%s8369_s16 + $0x20] sm:$0xff] }
0x19a0   :  { %4763 = vmatpush.msra.mxu3 %v5733_v37 }
0x19a1   :  { %v7986_v13 = vadd.f32 %v7982_v45, %v4550_v48 }
0x19a2   :  { %4764 = vmatpush.msra.mxu3 %v5732_v18 }
0x19a3   :  { %v4571_v3 = vsel %vm161_vm1, %v7986_v13, 0.0 }
0x19a4   :  { %4572 = vadd.xlane.f32.xlu2 %v4571_v3  ;;  %v4391_v4 = vpop.f32.mrf.mxu3 }
0x19a5   :  { %v4398_v56 = vadd.f32 %v4391_v4, %v7918_v10 }
0x19a7   :  { %v4551_v62 = vadd.f32 %v4398_v56, %v7298_v59  ;;  %v4439_v59 = vadd.f32 %v7951_v24, %v4438_v21 }
0x19a8   :  { %v4538_v22 = vpop.f32.mrf.mxu2 }
0x19a9   :  { %v7993_v36 = vadd.f32 %v7982_v45, %v4551_v62  ;;  %v4547_v32 = vadd.f32 %v4538_v22, %v7939_v0  ;;  %v4447_v15 = vsel %vm514_vm7, %v4439_v59, -inf }
0x19ab   :  { %v4553_v39 = vadd.f32 %v4547_v32, %v7325_v50  ;;  %v4574_v57 = vsel %vm161_vm1, %v7993_v36, 0.0 }
0x19ac   :  { %4575 = vadd.xlane.f32.xlu0 %v4574_v57  ;;  %v4394_v40 = vpop.f32.mrf.mxu3 }
0x19ad   :  { %v8000_v11 = vadd.f32 %v7982_v45, %v4553_v39  ;;  %v4399_v10 = vadd.f32 %v4394_v40, %v7923_v20  ;;  %v4442_v20 = vadd.f32 %v7951_v24, %v4441_v23 }
0x19af   :  { %v4552_v27 = vadd.f32 %v4399_v10, %v7307_v46  ;;  %v4580_v0 = vsel %vm161_vm1, %v8000_v11, 0.0  ;;  %v4450_v33 = vsel %vm514_vm7, %v4442_v20, -inf }
0x19b0   :  { %4581 = vadd.xlane.f32.xlu2 %v4580_v0 }
0x19b1   :  { %v8008_v50 = vadd.f32 %v7982_v45, %v4552_v27 }
0x19b3   :  { %v4577_v19 = vsel %vm161_vm1, %v8008_v50, 0.0 }
0x19b4   :  { %4448 = vmax.xlane.f32.xlu0 %v4447_v15  ;;  %4578 = vadd.xlane.f32.xlu1 %v4577_v19 }
0x19bc   :  { %4451 = vmax.xlane.f32.xlu1 %v4450_v33 }
0x1a17   :  { %v4573_v46 = vpop.xlane.xlu2 %4572 }
0x1a18   :  { %v4589_v25 = vmul.f32 %v4573_v46, %v6328_v34  ;;  %v8070_v46 = vld [vmem:[%s8367_s14 + $0x1] ss:$0 sm:$0xff]  ;;  %s6117_s14 = smov [#allocation2]  }
0x1a1a   :  { %v8017_v16 = vsub.f32 %v7986_v13, %v4589_v25 }
0x1a1c   :  { %v4601_v17 = vmul.f32 %v8017_v16, %v8017_v16 }
0x1a1e   :  { %v4607_v26 = vsel %vm161_vm1, %v4601_v17, 0.0 }
0x1a1f   :  { %4608 = vadd.xlane.f32.xlu2 %v4607_v26  ;;  %v4576_v8 = vpop.xlane.xlu0 %4575 }
0x1a20   :  { %v4590_v30 = vmul.f32 %v4576_v8, %v6328_v34 }
0x1a22   :  { %v8024_v24 = vsub.f32 %v7993_v36, %v4590_v30  ;;  %v8075_v30 = vld [vmem:[%s8368_s15 + $0x1] ss:$0 sm:$0xff]  ;;  %s5242_s15 = sshll.u32 %s6117_s14, 4  ;;  %s5243_s15 = int_to_ptr.vmem [resolvable:$true] %s5242_s15 }
0x1a23   :  { %v4582_v7 = vpop.xlane.xlu2 %4581 }
0x1a24   :  { %v4592_v12 = vmul.f32 %v4582_v7, %v6328_v34  ;;  %v4602_v49 = vmul.f32 %v8024_v24, %v8024_v24 }
0x1a26   :  { %v8030_v14 = vsub.f32 %v8000_v11, %v4592_v12  ;;  %v4610_v55 = vsel %vm161_vm1, %v4602_v49, 0.0 }
0x1a27   :  { %4611 = vadd.xlane.f32.xlu0 %v4610_v55  ;;  %v4449_v58 = vpop.xlane.xlu0 %4448  ;;  %v4579_v51 = vpop.xlane.xlu1 %4578 }
0x1a28   :  { %v4454_v52 = vsub.f32 %v4439_v59, %v4449_v58  ;;  %v4591_v53 = vmul.f32 %v4579_v51, %v6328_v34  ;;  %v4604_v54 = vmul.f32 %v8030_v14, %v8030_v14 }
0x1a2a   :  { %v4458_v9 = vmul.f32 1.442695, %v4454_v52  ;;  %v8037_v5 = vsub.f32 %v8008_v50, %v4591_v53  ;;  %v4616_v43 = vsel %vm161_vm1, %v4604_v54, 0.0 }
0x1a2b   :  { %4617 = vadd.xlane.f32.xlu2 %v4616_v43 }
0x1a2c   :  { %6051 = vpow2.f32 %v4458_v9  ;;  %v4603_v60 = vmul.f32 %v8037_v5, %v8037_v5 }
0x1a2e   :  { %v4613_v61 = vsel %vm161_vm1, %v4603_v60, 0.0 }
0x1a2f   :  { %4614 = vadd.xlane.f32.xlu1 %v4613_v61  ;;  %v4452_v63 = vpop.xlane.xlu1 %4451 }
0x1a30   :  { %v4455_v44 = vsub.f32 %v4442_v20, %v4452_v63 }
0x1a32   :  { %v8043_v41 = vpop.eup %6051  ;;  %v4460_v31 = vmul.f32 1.442695, %v4455_v44 }
0x1a33   :  { %v4465_v28 = vsel %vm514_vm7, %v8043_v41, 0.0 }
0x1a34   :  { %6053 = vpow2.f32 %v4460_v31  ;;  %4466 = vadd.xlane.f32.xlu0 %v4465_v28 }
0x1a3a   :  { %v8047_v38 = vpop.eup %6053 }
0x1a3b   :  { %v4468_v2 = vsel %vm514_vm7, %v8047_v38, 0.0 }
0x1a3c   :  { %4469 = vadd.xlane.f32.xlu1 %v4468_v2 }
0x1a92   :  { %v4609_v48 = vpop.xlane.xlu2 %4608 }
0x1a93   :  { %v4625_v3 = vmul.f32 %v4609_v48, %v6328_v34 }
0x1a95   :  { %v4631_v4 = vadd.f32 1e-05, %v4625_v3 }
0x1a97   :  { %6055 = vrsqrt.f32 %v4631_v4  ;;  %vm4643_vm8 = vweird.f32 %v4631_v4 }
0x1a9a   :  { %v4612_v56 = vpop.xlane.xlu0 %4611 }
0x1a9b   :  { %v4626_v62 = vmul.f32 %v4612_v56, %v6328_v34 }
0x1a9d   :  { %v6056_v22 = vpop.eup %6055  ;;  %v4632_v32 = vadd.f32 1e-05, %v4626_v62 }
0x1a9e   :  { %v4638_v21 = vmul.f32 %v6056_v22, %v4631_v4  ;;  %v4618_v39 = vpop.xlane.xlu2 %4617  ;;  %vm4644_vm5 = vweird.f32 %v6056_v22 }
0x1a9f   :  { %6057 = vrsqrt.f32 %v4632_v32  ;;  %v4628_v57 = vmul.f32 %v4618_v39, %v6328_v34  ;;  %vm4645_vm9 = vmor %vm4643_vm8, %vm4644_vm5  ;;  %vm4653_vm11 = vweird.f32 %v4632_v32 }
0x1aa0   :  { %v4639_v40 = vmul.f32 %v6056_v22, %v4638_v21 }
0x1aa1   :  { %v4634_v10 = vadd.f32 1e-05, %v4628_v57 }
0x1aa2   :  { %v4640_v59 = vmul.f32 0.5, %v4639_v40  ;;  %v4615_v27 = vpop.xlane.xlu1 %4614 }
0x1aa3   :  { %6059 = vrsqrt.f32 %v4634_v10  ;;  %v4627_v0 = vmul.f32 %v4615_v27, %v6328_v34  ;;  %vm4673_vm2 = vweird.f32 %v4634_v10 }
0x1aa4   :  { %v4641_v15 = vsub.f32 1.5, %v4640_v59 }
0x1aa5   :  { %v6058_v19 = vpop.eup %6057  ;;  %v4633_v23 = vadd.f32 1e-05, %v4627_v0 }
0x1aa6   :  { %v4642_v20 = vmul.f32 %v6056_v22, %v4641_v15  ;;  %v4648_v33 = vmul.f32 %v6058_v19, %v4632_v32  ;;  %vm4654_vm10 = vweird.f32 %v6058_v19 }
0x1aa7   :  { %6061 = vrsqrt.f32 %v4633_v23  ;;  %v4467_v25 = vpop.xlane.xlu0 %4466  ;;  %vm4655_vm12 = vmor %vm4653_vm11, %vm4654_vm10  ;;  %vm4663_vm15 = vweird.f32 %v4633_v23 }
0x1aa8   :  { %v4646_v17 = vsel %vm4645_vm9, %v6056_v22, %v4642_v20  ;;  %v4649_v26 = vmul.f32 %v6058_v19, %v4648_v33  ;;  %6063 = vrcp.f32 %v4467_v25 }
0x1aa9   :  { %v6060_v8 = vpop.eup %6059  ;;  %v4697_v7 = vmul.f32 %v4646_v17, %v8017_v16  ;;  %v5756_v17 = vld [vmem:[%s8371_s18 + $0x78] sm:$0xff] }
0x1aaa   :  { %v4650_v12 = vmul.f32 0.5, %v4649_v26  ;;  %v4668_v49 = vmul.f32 %v6060_v8, %v4634_v10  ;;  %vm4674_vm14 = vweird.f32 %v6060_v8  ;;  %5083 = vmatpush.msrb.mxu0 %v5756_v17 }
0x1aab   :  { %v4706_v55 = vmul.f32 %v8070_v46, %v4697_v7  ;;  %vm4675_vm3 = vmor %vm4673_vm2, %vm4674_vm14 }
0x1aac   :  { %v4651_v58 = vsub.f32 1.5, %v4650_v12  ;;  %v4669_v51 = vmul.f32 %v6060_v8, %v4668_v49  ;;  %v5755_v12 = vld [vmem:[%s8371_s18 + $0x70] sm:$0xff] }
0x1aad   :  { %v6062_v52 = vpop.eup %6061  ;;  %v4715_v53 = vadd.f32 %v8075_v30, %v4706_v55  ;;  %5084 = vmatpush.msrb.mxu0 %v5755_v12 }
0x1aae   :  { %v6064_v54 = vpop.eup %6063  ;;  %v4652_v9 = vmul.f32 %v6058_v19, %v4651_v58  ;;  %v4670_v43 = vmul.f32 0.5, %v4669_v51  ;;  %v4658_v60 = vmul.f32 %v6062_v52, %v4633_v23  ;;  %vm4664_vm13 = vweird.f32 %v6062_v52 }
0x1aaf   :  { %5737 = vmatmul.msk.f32.vlgmr.msra.gmra.mxu3 %vm161_vm1, %v4715_v53  ;;  %v4470_v61 = vpop.xlane.xlu1 %4469  ;;  %v4475_v16 = vmul.f32 %v6064_v54, %v8043_v41  ;;  %vm4665_vm0 = vmor %vm4663_vm15, %vm4664_vm13 }
0x1ab0   :  { %v4656_v63 = vsel %vm4655_vm12, %v6058_v19, %v4652_v9  ;;  %v4659_v44 = vmul.f32 %v6062_v52, %v4658_v60  ;;  %6065 = vrcp.f32 %v4470_v61  ;;  %v4671_v28 = vsub.f32 1.5, %v4670_v43  ;;  %v5753_v61 = vld [vmem:[%s8371_s18 + $0x60] sm:$0xff] }
0x1ab1   :  { %v4698_v31 = vmul.f32 %v4656_v63, %v8024_v24  ;;  %5724 = vmatmul.msk.f32.gmra.mxu1 %vm514_vm7, %v4475_v16 }
0x1ab2   :  { %v4660_v2 = vmul.f32 0.5, %v4659_v44  ;;  %v4672_v48 = vmul.f32 %v6060_v8, %v4671_v28 }
0x1ab3   :  { %v4707_v35 = vmul.f32 %v8070_v46, %v4698_v31 }
0x1ab4   :  { %v4661_v47 = vsub.f32 1.5, %v4660_v2  ;;  %v4676_v56 = vsel %vm4675_vm3, %v6060_v8, %v4672_v48  ;;  %v5752_v2 = vld [vmem:[%s8371_s18 + $0x58] sm:$0xff]  ;;  %v5751_v48 = vld [vmem:[%s8371_s18 + $0x50] sm:$0xff] }
0x1ab5   :  { %v4716_v37 = vadd.f32 %v8075_v30, %v4707_v35  ;;  %v4700_v22 = vmul.f32 %v4676_v56, %v8030_v14  ;;  %v5750_v56 = vld [vmem:[%s8371_s18 + $0x48] sm:$0xff] }
0x1ab6   :  { %v6066_v18 = vpop.eup %6065  ;;  %v4662_v3 = vmul.f32 %v6062_v52, %v4661_v47 }
0x1ab7   :  { %5738 = vmatmul.msk.f32.gmra.mxu3 %vm161_vm1, %v4716_v37  ;;  %v4476_v24 = vmul.f32 %v6066_v18, %v8047_v38  ;;  %v4709_v21 = vmul.f32 %v8070_v46, %v4700_v22 }
0x1ab8   :  { %v4666_v41 = vsel %vm4665_vm0, %v6062_v52, %v4662_v3  ;;  %v5754_v52 = vld [vmem:[%s8371_s18 + $0x68] sm:$0xff] }
0x1ab9   :  { %v4699_v4 = vmul.f32 %v4666_v41, %v8037_v5  ;;  %5725 = vmatmul.msk.f32.gmra.mxu1 %vm514_vm7, %v4476_v24  ;;  %v4718_v38 = vadd.f32 %v8075_v30, %v4709_v21  ;;  %v8101_v5 = vld [vmem:[%s8370_s17 + $0x1] ss:$0 sm:$0xff]  ;;  %5085 = vmatpush.msrb.mxu0 %v5754_v52 }
0x1abb   :  { %v4708_v62 = vmul.f32 %v8070_v46, %v4699_v4  ;;  %5086 = vmatpush.msrb.mxu0 %v5753_v61 }
0x1abd   :  { %v4717_v32 = vadd.f32 %v8075_v30, %v4708_v62  ;;  %5087 = vmatpush.msrb.mxu0 %v5752_v2 }
0x1abf   :  { %5739 = vmatmul.msk.f32.gmra.mxu3 %vm161_vm1, %v4717_v32  ;;  %5088 = vmatpush.msrb.mxu0 %v5751_v48 }
0x1ac1   :  { %5089 = vmatpush.msrb.mxu0 %v5750_v56 }
0x1ac7   :  { %5740 = vmatmul.msk.f32.gmra.mxu3 %vm161_vm1, %v4718_v38 }
0x1b2e   :  { %v4506_v39 = vpop.f32.mrf.mxu1 }
0x1b2f   :  { %5727 = vmatmul.msk.f32.gmra.mxu2 %vm469_vm6, %v4506_v39 }
0x1b32   :  { %v4766_v57 = vpop.f32.mrf.mxu3 }
0x1b33   :  { %v8104_v14 = vadd.f32 %v8101_v5, %v4766_v57  ;;  %v5749_v57 = vld [vmem:[%s8371_s18 + $0x40] sm:$0xff] }
0x1b34   :  { %5090 = vmatpush.msrb.mxu0 %v5749_v57 }
0x1b35   :  { %v8107_v40 = vmul.f32 0.70710677, %v8104_v14 }
0x1b36   :  { %v4509_v10 = vpop.f32.mrf.mxu1 }
0x1b37   :  { %v4796_v59 = vmul.f32 %v8107_v40, %v8107_v40  ;;  %5728 = vmatmul.msk.f32.gmra.mxu2 %vm469_vm6, %v4509_v10 }
0x1b39   :  { %v8112_v27 = vmin.f32 %v4796_v59, 16.0 }
0x1b3a   :  { %v4769_v0 = vpop.f32.mrf.mxu3 }
0x1b3b   :  { %v4798_v15 = vmul.f32 2.1237322e-06, %v8112_v27  ;;  %v4809_v19 = vmul.f32 3.8918573e-05, %v8112_v27  ;;  %v8117_v23 = vadd.f32 %v8101_v5, %v4769_v0 }
0x1b3d   :  { %v4799_v20 = vadd.f32 0.00028619796, %v4798_v15  ;;  %v4810_v33 = vadd.f32 0.001143296, %v4809_v19  ;;  %v8120_v25 = vmul.f32 0.70710677, %v8117_v23 }
0x1b3f   :  { %v4800_v26 = vmul.f32 %v4799_v20, %v8112_v27  ;;  %v4811_v8 = vmul.f32 %v4810_v33, %v8112_v27  ;;  %v4836_v7 = vmul.f32 %v8120_v25, %v8120_v25 }
0x1b41   :  { %v4801_v49 = vadd.f32 0.0036580483, %v4800_v26  ;;  %v4812_v55 = vadd.f32 0.014752088, %v4811_v8  ;;  %v8132_v58 = vmin.f32 %v4836_v7, 16.0 }
0x1b42   :  { %v4772_v51 = vpop.f32.mrf.mxu3 }
0x1b43   :  { %v4813_v53 = vmul.f32 %v4812_v55, %v8112_v27  ;;  %v8139_v54 = vadd.f32 %v8101_v5, %v4772_v51  ;;  %v4802_v9 = vmul.f32 %v4801_v49, %v8112_v27  ;;  %v4838_v43 = vmul.f32 2.1237322e-06, %v8132_v58 }
0x1b44   :  { %v4849_v60 = vmul.f32 3.8918573e-05, %v8132_v58 }
0x1b45   :  { %v4814_v16 = vadd.f32 0.112945676, %v4813_v53  ;;  %v4839_v63 = vadd.f32 0.00028619796, %v4838_v43  ;;  %v8148_v31 = vmul.f32 0.70710677, %v8139_v54 }
0x1b46   :  { %v4850_v44 = vadd.f32 0.001143296, %v4849_v60  ;;  %v4803_v35 = vadd.f32 0.05243302, %v4802_v9 }
0x1b47   :  { %v4815_v28 = vmul.f32 %v4814_v16, %v8112_v27  ;;  %v4840_v47 = vmul.f32 %v4839_v63, %v8132_v58  ;;  %v4876_v18 = vmul.f32 %v8148_v31, %v8148_v31 }
0x1b48   :  { %v4851_v37 = vmul.f32 %v4850_v44, %v8132_v58  ;;  %v4804_v21 = vmul.f32 %v4803_v35, %v8112_v27 }
0x1b49   :  { %v4816_v3 = vadd.f32 0.4994258, %v4815_v28  ;;  %v8161_v41 = vmin.f32 %v4876_v18, 16.0  ;;  %v4841_v22 = vadd.f32 0.0036580483, %v4840_v47 }
0x1b4a   :  { %v4852_v24 = vadd.f32 0.014752088, %v4851_v37  ;;  %v4775_v4 = vpop.f32.mrf.mxu3  ;;  %v4805_v33 = vadd.f32 0.18741608, %v4804_v21 }
0x1b4b   :  { %v4817_v62 = vmul.f32 %v4816_v3, %v8112_v27  ;;  %v8168_v32 = vadd.f32 %v8101_v5, %v4775_v4  ;;  %v4878_v39 = vmul.f32 2.1237322e-06, %v8161_v41  ;;  %v4889_v59 = vmul.f32 3.8918573e-05, %v8161_v41 }
0x1b4c   :  { %v4853_v38 = vmul.f32 %v4852_v24, %v8132_v58  ;;  %v4842_v20 = vmul.f32 %v4841_v22, %v8132_v58  ;;  %v4806_v52 = vmul.f32 %v4805_v33, %v8112_v27 }
0x1b4d   :  { %v4818_v10 = vadd.f32 1.0, %v4817_v62  ;;  %v8178_v0 = vmul.f32 0.70710677, %v8168_v32  ;;  %v4879_v19 = vadd.f32 0.00028619796, %v4878_v39 }
0x1b4e   :  { %v4854_v15 = vadd.f32 0.112945676, %v4853_v38  ;;  %v4890_v8 = vadd.f32 0.001143296, %v4889_v59  ;;  %v4843_v49 = vadd.f32 0.05243302, %v4842_v20 }
0x1b4f   :  { %6067 = vrcp.f32 %v4818_v10  ;;  %v4880_v26 = vmul.f32 %v4879_v19, %v8161_v41  ;;  %v4916_v7 = vmul.f32 %v8178_v0, %v8178_v0  ;;  %v4807_v37 = vadd.f32 1.1283791, %v4806_v52 }
0x1b50   :  { %v4855_v17 = vmul.f32 %v4854_v15, %v8132_v58  ;;  %v4891_v55 = vmul.f32 %v4890_v8, %v8161_v41  ;;  %v4844_v28 = vmul.f32 %v4843_v49, %v8132_v58  ;;  %v4828_v27 = vand.u32 2147483647, %v4818_v10 }
0x1b51   :  { %v8186_v51 = vmin.f32 %v4916_v7, 16.0  ;;  %v4881_v9 = vadd.f32 0.0036580483, %v4880_v26  ;;  %v4830_v48 = vand.u32 2147483648, %v4818_v10  ;;  %vm4824_vm5 = vweird.f32 %v4818_v10 }
0x1b52   :  { %v4856_v12 = vadd.f32 0.4994258, %v4855_v17  ;;  %v4892_v60 = vadd.f32 0.014752088, %v4891_v55  ;;  %v4845_v22 = vadd.f32 0.18741608, %v4844_v28  ;;  %v4808_v57 = vmul.f32 %v4807_v37, %v8107_v40 }
0x1b53   :  { %v4918_v61 = vmul.f32 2.1237322e-06, %v8186_v51  ;;  %v4929_v16 = vmul.f32 3.8918573e-05, %v8186_v51  ;;  %v4882_v3 = vmul.f32 %v4881_v9, %v8161_v41  ;;  %v4831_v59 = vor.u32 1.1754944e-38, %v4830_v48 }
0x1b54   :  { %v4857_v53 = vmul.f32 %v4856_v12, %v8132_v58  ;;  %v4893_v2 = vmul.f32 %v4892_v60, %v8161_v41  ;;  %vm4829_vm9 = vcmp.eq.f32.partialorder %v4828_v27, 8.507059e+37  ;;  %v4846_v7 = vmul.f32 %v4845_v22, %v8132_v58 }
0x1b55   :  { %v6068_v43 = vpop.eup %6067  ;;  %v4919_v35 = vadd.f32 0.00028619796, %v4918_v61  ;;  %v4930_v47 = vadd.f32 0.001143296, %v4929_v16  ;;  %v4883_v15 = vadd.f32 0.05243302, %v4882_v3 }
0x1b56   :  { %v4820_v63 = vmul.f32 %v6068_v43, %v4818_v10  ;;  %v4858_v44 = vadd.f32 1.0, %v4857_v53  ;;  %v4894_v24 = vadd.f32 0.112945676, %v4893_v2  ;;  %vm4825_vm6 = vweird.f32 %v6068_v43 }
0x1b57   :  { %v4920_v56 = vmul.f32 %v4919_v35, %v8186_v51  ;;  %v4931_v62 = vmul.f32 %v4930_v47, %v8186_v51  ;;  %vm4826_vm8 = vmor %vm4824_vm5, %vm4825_vm6  ;;  %v4884_v53 = vmul.f32 %v4883_v15, %v8161_v41  ;;  %v4847_v16 = vadd.f32 1.1283791, %v4846_v7 }
0x1b58   :  { %v4821_v18 = vsub.f32 1.0, %v4820_v63  ;;  %6069 = vrcp.f32 %v4858_v44  ;;  %v4895_v21 = vmul.f32 %v4894_v24, %v8161_v41  ;;  %v4870_v40 = vand.u32 2147483648, %v4858_v44 }
0x1b59   :  { %v4932_v39 = vadd.f32 0.014752088, %v4931_v62  ;;  %v4921_v17 = vadd.f32 0.0036580483, %v4920_v56  ;;  %v4868_v28 = vand.u32 2147483647, %v4858_v44  ;;  %vm4864_vm11 = vweird.f32 %v4858_v44 }
0x1b5a   :  { %v4822_v4 = vmul.f32 %v6068_v43, %v4821_v18  ;;  %v4896_v19 = vadd.f32 0.4994258, %v4895_v21  ;;  %v4784_v58 = vmul.f32 0.5, %v8104_v14  ;;  %v4871_v18 = vor.u32 1.1754944e-38, %v4870_v40 }
0x1b5b   :  { %v4933_v26 = vmul.f32 %v4932_v39, %v8186_v51  ;;  %v4885_v27 = vadd.f32 0.18741608, %v4884_v53  ;;  %v4848_v3 = vmul.f32 %v4847_v16, %v8120_v25  ;;  %vm4869_vm13 = vcmp.eq.f32.partialorder %v4868_v28, 8.507059e+37 }
0x1b5c   :  { %v4823_v38 = vadd.f32 %v6068_v43, %v4822_v4  ;;  %v4897_v10 = vmul.f32 %v4896_v19, %v8161_v41  ;;  %v4786_v16 = vmul.f32 0.5, %v8139_v54 }
0x1b5d   :  { %v4934_v55 = vadd.f32 0.112945676, %v4933_v26 }
0x1b5e   :  { %v6070_v20 = vpop.eup %6069  ;;  %v4827_v33 = vsel %vm4826_vm8, %v6068_v43, %v4823_v38  ;;  %v4898_v60 = vadd.f32 1.0, %v4897_v10  ;;  %v4922_v43 = vmul.f32 %v4921_v17, %v8186_v51 }
0x1b5f   :  { %v4832_v8 = vsel %vm4829_vm9, %v4831_v59, %v4827_v33  ;;  %v4860_v12 = vmul.f32 %v6070_v20, %v4858_v44  ;;  %v4935_v61 = vmul.f32 %v4934_v55, %v8186_v51  ;;  %vm4865_vm10 = vweird.f32 %v6070_v20 }
0x1b60   :  { %v4833_v49 = vmul.f32 %v4832_v8, %v4808_v57  ;;  %6071 = vrcp.f32 %v4898_v60  ;;  %vm4866_vm12 = vmor %vm4864_vm11, %vm4865_vm10  ;;  %v4923_v48 = vadd.f32 0.05243302, %v4922_v43  ;;  %v4886_v44 = vmul.f32 %v4885_v27, %v8161_v41 }
0x1b61   :  { %v4861_v52 = vsub.f32 1.0, %v4860_v12  ;;  %v4936_v47 = vadd.f32 0.4994258, %v4935_v61  ;;  %v4785_v57 = vmul.f32 0.5, %v8117_v23  ;;  %v4910_v19 = vand.u32 2147483648, %v4898_v60 }
0x1b62   :  { %v5743_v9 = vclamps-f32 %v4833_v49, 1.0  ;;  %v4924_v21 = vmul.f32 %v4923_v48, %v8186_v51  ;;  %v4887_v15 = vadd.f32 1.1283791, %v4886_v44  ;;  %v4908_v26 = vand.u32 2147483647, %v4898_v60 }
0x1b63   :  { %v4862_v63 = vmul.f32 %v6070_v20, %v4861_v52  ;;  %v4937_v4 = vmul.f32 %v4936_v47, %v8186_v51  ;;  %vm4904_vm15 = vweird.f32 %v4898_v60  ;;  %v4911_v7 = vor.u32 1.1754944e-38, %v4910_v19 }
0x1b64   :  { %v5036_v2 = vadd.f32 1.0, %v5743_v9  ;;  %v4888_v23 = vmul.f32 %v4887_v15, %v8148_v31  ;;  %vm4909_vm2 = vcmp.eq.f32.partialorder %v4908_v26, 8.507059e+37  ;;  %vm5136_vm9 = vcmask 1040384  }
0x1b65   :  { %v4863_v35 = vadd.f32 %v6070_v20, %v4862_v63  ;;  %v4938_v62 = vadd.f32 1.0, %v4937_v4  ;;  %vm5140_vm10 = vcmask 254976  }
0x1b66   :  { %v5042_v37 = vmul.f32 %v5036_v2, %v4784_v58  ;;  %v6072_v22 = vpop.eup %6071 }
0x1b67   :  { %v4867_v24 = vsel %vm4866_vm12, %v6070_v20, %v4863_v35  ;;  %v4900_v39 = vmul.f32 %v6072_v22, %v4898_v60  ;;  %6073 = vrcp.f32 %v4938_v62  ;;  %v4925_v20 = vadd.f32 0.18741608, %v4924_v21 }
0x1b68   :  { %v4872_v56 = vsel %vm4869_vm13, %v4871_v18, %v4867_v24  ;;  %5757 = vmatmul.msk.f32.vlgmr.msrb.gmra.mxu0 %vm2572_vm4, %v5042_v37  ;;  %vm4905_vm14 = vweird.f32 %v6072_v22  ;;  %v4950_v9 = vand.u32 2147483648, %v4938_v62  ;;  %v4948_v60 = vand.u32 2147483647, %v4938_v62 }
0x1b69   :  { %v4873_v14 = vmul.f32 %v4872_v56, %v4848_v3  ;;  %v4901_v59 = vsub.f32 1.0, %v4900_v39  ;;  %vm4906_vm0 = vmor %vm4904_vm15, %vm4905_vm14  ;;  %v4926_v12 = vmul.f32 %v4925_v20, %v8186_v51  ;;  %vm4944_vm6 = vweird.f32 %v4938_v62 }
0x1b6a   :  { %v4951_v51 = vor.u32 1.1754944e-38, %v4950_v9  ;;  %vm4949_vm8 = vcmp.eq.f32.partialorder %v4948_v60, 8.507059e+37  ;;  %v4787_v18 = vmul.f32 0.5, %v8168_v32 }
0x1b6b   :  { %v5744_v38 = vclamps-f32 %v4873_v14, 1.0  ;;  %v4902_v17 = vmul.f32 %v6072_v22, %v4901_v59  ;;  %v4927_v53 = vadd.f32 1.1283791, %v4926_v12 }
0x1b6d   :  { %v5037_v25 = vadd.f32 1.0, %v5744_v38  ;;  %v4903_v8 = vadd.f32 %v6072_v22, %v4902_v17  ;;  %v6074_v41 = vpop.eup %6073  ;;  %v4928_v58 = vmul.f32 %v4927_v53, %v8178_v0 }
0x1b6e   :  { %v4940_v10 = vmul.f32 %v6074_v41, %v4938_v62  ;;  %vm4945_vm3 = vweird.f32 %v6074_v41 }
0x1b6f   :  { %v5043_v33 = vmul.f32 %v5037_v25, %v4785_v57  ;;  %v4907_v49 = vsel %vm4906_vm0, %v6072_v22, %v4903_v8  ;;  %vm4946_vm5 = vmor %vm4944_vm6, %vm4945_vm3 }
0x1b70   :  { %v4912_v55 = vsel %vm4909_vm2, %v4911_v7, %v4907_v49  ;;  %v4941_v40 = vsub.f32 1.0, %v4940_v10 }
0x1b71   :  { %5758 = vmatmul.msk.f32.gmra.mxu0 %vm2572_vm4, %v5043_v33  ;;  %v4913_v52 = vmul.f32 %v4912_v55, %v4888_v23 }
0x1b72   :  { %v4942_v61 = vmul.f32 %v6074_v41, %v4941_v40 }
0x1b73   :  { %v5745_v43 = vclamps-f32 %v4913_v52, 1.0 }
0x1b74   :  { %v4943_v28 = vadd.f32 %v6074_v41, %v4942_v61 }
0x1b75   :  { %v5038_v63 = vadd.f32 1.0, %v5745_v43 }
0x1b76   :  { %v4947_v2 = vsel %vm4946_vm5, %v6074_v41, %v4943_v28 }
0x1b77   :  { %v5044_v31 = vmul.f32 %v5038_v63, %v4786_v16  ;;  %v4952_v35 = vsel %vm4949_vm8, %v4951_v51, %v4947_v2 }
0x1b78   :  { %v4953_v47 = vmul.f32 %v4952_v35, %v4928_v58 }
0x1b79   :  { %5759 = vmatmul.msk.f32.gmra.mxu0 %vm2572_vm4, %v5044_v31 }
0x1b7a   :  { %v5746_v37 = vclamps-f32 %v4953_v47, 1.0 }
0x1b7c   :  { %v5039_v27 = vadd.f32 1.0, %v5746_v37 }
0x1b7e   :  { %v5045_v48 = vmul.f32 %v5039_v27, %v4787_v18 }
0x1b81   :  { %5760 = vmatmul.msk.f32.gmra.mxu0 %vm2572_vm4, %v5045_v48 }
0x1bb2   :  { %v4541_v54 = vpop.f32.mrf.mxu2 }
0x1bb3   :  { %v4548_v3 = vadd.f32 %v4541_v54, %v7943_v6 }
0x1bb5   :  { %v4554_v24 = vadd.f32 %v4548_v3, %v7335_v29  ;;  %v8237_v29 = vld [vmem:[%s8372_s19 + $0x1] ss:$0 sm:$0xff] }
0x1bb7   :  { %v8223_v0 = vadd.f32 %v7982_v45, %v4554_v24 }
0x1bb9   :  { %v4583_v4 = vsel %vm161_vm1, %v8223_v0, 0.0 }
0x1bba   :  { %4584 = vadd.xlane.f32.xlu2 %v4583_v4  ;;  %v4544_v56 = vpop.f32.mrf.mxu2 }
0x1bbb   :  { %v4549_v14 = vadd.f32 %v4544_v56, %v7946_v1 }
0x1bbd   :  { %v4555_v32 = vadd.f32 %v4549_v14, %v7347_v42 }
0x1bbf   :  { %v8230_v62 = vadd.f32 %v7982_v45, %v4555_v32 }
0x1bc1   :  { %v4586_v6 = vsel %vm161_vm1, %v8230_v62, 0.0 }
0x1bc2   :  { %4587 = vadd.xlane.f32.xlu0 %v4586_v6  ;;  %v5174_v6 = vld [vmem:[%s8375_s22 + $0x18] sm:$0xff] }
0x1bc3   :  { %5194 = vmatpush.msrb.mxu1 %v5174_v6 }
0x1be5   :  { %v5092_v22 = vpop.f32.mrf.mxu0 }
0x1be6   :  { %v5110_v44 = vadd.f32 %v5092_v22, %v7986_v13  ;;  %v5173_v22 = vld [vmem:[%s8375_s22 + $0x10] sm:$0xff] }
0x1be7   :  { %5195 = vmatpush.msrb.mxu1 %v5173_v22 }
0x1be8   :  { %v5121_v21 = vadd.f32 %v8237_v29, %v5110_v44  ;;  %v5172_v44 = vld [vmem:[%s8375_s22 + $0x8] sm:$0xff] }
0x1be9   :  { %5196 = vmatpush.msrb.mxu1 %v5172_v44 }
0x1bea   :  { %5127 = vst.msk [vmem:[%s8379_s26] sm:$0xff] %vm161_vm1, %v5121_v21 }
0x1bee   :  { %v5095_v42 = vpop.f32.mrf.mxu0 }
0x1bef   :  { %v5111_v1 = vadd.f32 %v5095_v42, %v7993_v36 }
0x1bf1   :  { %v5122_v45 = vadd.f32 %v8237_v29, %v5111_v1 }
0x1bf3   :  { %5128 = vst.msk [vmem:[%s8379_s26 + $0x8] sm:$0xff] %vm161_vm1, %v5122_v45 }
0x1bf6   :  { %v5098_v38 = vpop.f32.mrf.mxu0 }
0x1bf7   :  { %v5112_v13 = vadd.f32 %v5098_v38, %v8008_v50 }
0x1bf9   :  { %v5123_v39 = vadd.f32 %v8237_v29, %v5112_v13 }
0x1bfb   :  { %5129 = vst.msk [vmem:[%s8379_s26 + $0x10] sm:$0xff] %vm161_vm1, %v5123_v39 }
0x1bfe   :  { %v5101_v57 = vpop.f32.mrf.mxu0 }
0x1bff   :  { %v5113_v36 = vadd.f32 %v5101_v57, %v8000_v11 }
0x1c01   :  { %v5124_v25 = vadd.f32 %v8237_v29, %v5113_v36  ;;  %v5813_v36 = vld [vmem:[%s8373_s20] ss:$0 sm:$0xff] }
0x1c03   :  { %5130 = vst.msk [vmem:[%s8379_s26 + $0x18] sm:$0xff] %vm161_vm1, %v5124_v25  ;;  %v5134_v59 = vrot.slane %v5124_v25, 7 }
0x1c05   :  { %v5137_v50 = vsel %vm5136_vm9, %v5121_v21, %v5134_v59 }
0x1c06   :  { %v5141_v15 = vsel %vm5140_vm10, %v5137_v50, 0.0 }
0x1c07   :  { %5142 = vadd.xlane.f32.xlu2 %v5141_v15 }
0x1c2d   :  { %v4585_v19 = vpop.xlane.xlu2 %4584 }
0x1c2e   :  { %v4593_v20 = vmul.f32 %v4585_v19, %v6328_v34 }
0x1c30   :  { %v4599_v33 = vsub.f32 %v8223_v0, %v4593_v20 }
0x1c32   :  { %v4605_v11 = vmul.f32 %v4599_v33, %v4599_v33 }
0x1c34   :  { %v4619_v17 = vsel %vm161_vm1, %v4605_v11, 0.0 }
0x1c35   :  { %4620 = vadd.xlane.f32.xlu1 %v4619_v17  ;;  %v4588_v26 = vpop.xlane.xlu0 %4587 }
0x1c36   :  { %v4594_v8 = vmul.f32 %v4588_v26, %v6328_v34 }
0x1c38   :  { %v4600_v41 = vsub.f32 %v8230_v62, %v4594_v8 }
0x1c3a   :  { %v4606_v7 = vmul.f32 %v4600_v41, %v4600_v41 }
0x1c3c   :  { %v4622_v12 = vsel %vm161_vm1, %v4606_v7, 0.0 }
0x1c3d   :  { %4623 = vadd.xlane.f32.xlu0 %v4622_v12 }
0x1c7a   :  { %v5143_v23 = vpop.xlane.xlu2 %5142 }
0x1c7b   :  { %v5144_v49 = vmul.f32 %v5143_v23, %v6328_v34 }
0x1c7d   :  { %v8271_v10 = vsub.f32 %v5137_v50, %v5144_v49 }
0x1c7f   :  { %v5146_v55 = vmul.f32 %v8271_v10, %v8271_v10 }
0x1c81   :  { %v5147_v52 = vsel %vm5140_vm10, %v5146_v55, 0.0 }
0x1c82   :  { %5148 = vadd.xlane.f32.xlu1 %v5147_v52 }
0x1ca8   :  { %v4621_v40 = vpop.xlane.xlu1 %4620 }
0x1ca9   :  { %v4629_v53 = vmul.f32 %v4621_v40, %v6328_v34 }
0x1cab   :  { %v4635_v9 = vadd.f32 1e-05, %v4629_v53 }
0x1cad   :  { %6075 = vrsqrt.f32 %v4635_v9  ;;  %vm4683_vm12 = vweird.f32 %v4635_v9 }
0x1cb0   :  { %v4624_v43 = vpop.xlane.xlu0 %4623 }
0x1cb1   :  { %v4630_v61 = vmul.f32 %v4624_v43, %v6328_v34 }
0x1cb3   :  { %v6076_v60 = vpop.eup %6075  ;;  %v4636_v16 = vadd.f32 1e-05, %v4630_v61 }
0x1cb4   :  { %v4678_v63 = vmul.f32 %v6076_v60, %v4635_v9  ;;  %vm4684_vm11 = vweird.f32 %v6076_v60 }
0x1cb5   :  { %6077 = vrsqrt.f32 %v4636_v16  ;;  %vm4685_vm13 = vmor %vm4683_vm12, %vm4684_vm11  ;;  %vm4693_vm15 = vweird.f32 %v4636_v16 }
0x1cb6   :  { %v4679_v28 = vmul.f32 %v6076_v60, %v4678_v63 }
0x1cb8   :  { %v4680_v51 = vmul.f32 0.5, %v4679_v28 }
0x1cba   :  { %v4681_v31 = vsub.f32 1.5, %v4680_v51 }
0x1cbb   :  { %v6078_v58 = vpop.eup %6077 }
0x1cbc   :  { %v4682_v2 = vmul.f32 %v6076_v60, %v4681_v31  ;;  %v4688_v35 = vmul.f32 %v6078_v58, %v4636_v16  ;;  %vm4694_vm14 = vweird.f32 %v6078_v58 }
0x1cbd   :  { %vm4695_vm0 = vmor %vm4693_vm15, %vm4694_vm14 }
0x1cbe   :  { %v4686_v47 = vsel %vm4685_vm13, %v6076_v60, %v4682_v2  ;;  %v4689_v37 = vmul.f32 %v6078_v58, %v4688_v35 }
0x1cbf   :  { %v4701_v18 = vmul.f32 %v4686_v47, %v4599_v33 }
0x1cc0   :  { %v4690_v27 = vmul.f32 0.5, %v4689_v37 }
0x1cc1   :  { %v4710_v48 = vmul.f32 %v8070_v46, %v4701_v18 }
0x1cc2   :  { %v4691_v54 = vsub.f32 1.5, %v4690_v27 }
0x1cc3   :  { %v4719_v3 = vadd.f32 %v8075_v30, %v4710_v48 }
0x1cc4   :  { %v4692_v24 = vmul.f32 %v6078_v58, %v4691_v54 }
0x1cc5   :  { %5741 = vmatmul.msk.f32.gmra.mxu3 %vm161_vm1, %v4719_v3 }
0x1cc6   :  { %v4696_v4 = vsel %vm4695_vm0, %v6078_v58, %v4692_v24 }
0x1cc7   :  { %v4702_v56 = vmul.f32 %v4696_v4, %v4600_v41 }
0x1cc9   :  { %v4711_v14 = vmul.f32 %v8070_v46, %v4702_v56  ;;  %v5171_v46 = vld [vmem:[%s8375_s22] sm:$0xff] }
0x1cca   :  { %5197 = vmatpush.msrb.mxu1 %v5171_v46 }
0x1ccb   :  { %v4720_v32 = vadd.f32 %v8075_v30, %v4711_v14 }
0x1ccd   :  { %5742 = vmatmul.msk.f32.gmra.mxu3 %vm161_vm1, %v4720_v32 }
0x1cf5   :  { %v5149_v30 = vpop.xlane.xlu1 %5148 }
0x1cf6   :  { %v5150_v21 = vmul.f32 %v5149_v30, %v6328_v34  ;;  %v5814_v34 = vld [vmem:[%s8374_s21] ss:$0 sm:$0xff] }
0x1cf8   :  { %v5151_v42 = vadd.f32 1e-05, %v5150_v21 }
0x1cfa   :  { %6079 = vrsqrt.f32 %v5151_v42  ;;  %vm5158_vm3 = vweird.f32 %v5151_v42 }
0x1d00   :  { %v6080_v1 = vpop.eup %6079 }
0x1d01   :  { %v5153_v45 = vmul.f32 %v6080_v1, %v5151_v42  ;;  %vm5159_vm2 = vweird.f32 %v6080_v1 }
0x1d02   :  { %vm5160_vm6 = vmor %vm5158_vm3, %vm5159_vm2 }
0x1d03   :  { %v5154_v38 = vmul.f32 %v6080_v1, %v5153_v45 }
0x1d05   :  { %v5155_v13 = vmul.f32 0.5, %v5154_v38 }
0x1d07   :  { %v5156_v39 = vsub.f32 1.5, %v5155_v13 }
0x1d09   :  { %v5157_v57 = vmul.f32 %v6080_v1, %v5156_v39 }
0x1d0b   :  { %v5161_v25 = vsel %vm5160_vm6, %v6080_v1, %v5157_v57 }
0x1d0c   :  { %v5162_v59 = vmul.f32 %v5161_v25, %v8271_v10 }
0x1d0e   :  { %v5166_v50 = vmul.f32 %v5813_v36, %v5162_v59 }
0x1d10   :  { %v5170_v15 = vadd.f32 %v5814_v34, %v5166_v50 }
0x1d12   :  { %5764 = vmatmul.msk.f32.vlgmr.msrb.gmra.mxu1 %vm161_vm1, %v5170_v15 }
0x1d48   :  { %v4778_v19 = vpop.f32.mrf.mxu3 }
0x1d49   :  { %v8306_v20 = vadd.f32 %v8101_v5, %v4778_v19 }
0x1d4b   :  { %v4794_v33 = vmul.f32 0.70710677, %v8306_v20 }
0x1d4d   :  { %v4956_v11 = vmul.f32 %v4794_v33, %v4794_v33 }
0x1d4f   :  { %v4957_v17 = vmin.f32 %v4956_v11, 16.0 }
0x1d50   :  { %v4781_v26 = vpop.f32.mrf.mxu3 }
0x1d51   :  { %v4958_v8 = vmul.f32 2.1237322e-06, %v4957_v17  ;;  %v4969_v41 = vmul.f32 3.8918573e-05, %v4957_v17  ;;  %v8310_v7 = vadd.f32 %v8101_v5, %v4781_v26  ;;  %v5204_v26 = vld [vmem:[%s8422_s24 + $0x8] sm:$0xff] }
0x1d53   :  { %v4959_v12 = vadd.f32 0.00028619796, %v4958_v8  ;;  %v4970_v23 = vadd.f32 0.001143296, %v4969_v41  ;;  %v8313_v49 = vmul.f32 0.70710677, %v8310_v7 }
0x1d55   :  { %v4960_v10 = vmul.f32 %v4959_v12, %v4957_v17  ;;  %v4971_v55 = vmul.f32 %v4970_v23, %v4957_v17  ;;  %v4996_v52 = vmul.f32 %v8313_v49, %v8313_v49 }
0x1d57   :  { %v4972_v40 = vadd.f32 0.014752088, %v4971_v55  ;;  %v4961_v53 = vadd.f32 0.0036580483, %v4960_v10  ;;  %v4997_v9 = vmin.f32 %v4996_v52, 16.0  ;;  %v4788_v52 = vmul.f32 0.5, %v8306_v20 }
0x1d59   :  { %v4973_v43 = vmul.f32 %v4972_v40, %v4957_v17  ;;  %v4998_v61 = vmul.f32 2.1237322e-06, %v4997_v9  ;;  %v5009_v60 = vmul.f32 3.8918573e-05, %v4997_v9  ;;  %v4962_v63 = vmul.f32 %v4961_v53, %v4957_v17 }
0x1d5b   :  { %v4974_v16 = vadd.f32 0.112945676, %v4973_v43  ;;  %v4999_v5 = vadd.f32 0.00028619796, %v4998_v61  ;;  %v5010_v28 = vadd.f32 0.001143296, %v5009_v60 }
0x1d5c   :  { %v4963_v35 = vadd.f32 0.05243302, %v4962_v63 }
0x1d5d   :  { %v4975_v51 = vmul.f32 %v4974_v16, %v4957_v17  ;;  %v5000_v31 = vmul.f32 %v4999_v5, %v4997_v9  ;;  %v5011_v58 = vmul.f32 %v5010_v28, %v4997_v9  ;;  %v4789_v28 = vmul.f32 0.5, %v8310_v7 }
0x1d5e   :  { %v4964_v54 = vmul.f32 %v4963_v35, %v4957_v17 }
0x1d5f   :  { %v4976_v2 = vadd.f32 0.4994258, %v4975_v51  ;;  %v5012_v47 = vadd.f32 0.014752088, %v5011_v58  ;;  %v5001_v18 = vadd.f32 0.0036580483, %v5000_v31 }
0x1d60   :  { %v4965_v56 = vadd.f32 0.18741608, %v4964_v54  ;;  %v5815_v31 = vld [vmem:[%s8423_s9] ss:$0 sm:$0xff] }
0x1d61   :  { %v4977_v37 = vmul.f32 %v4976_v2, %v4957_v17  ;;  %v5013_v27 = vmul.f32 %v5012_v47, %v4997_v9  ;;  %v5002_v24 = vmul.f32 %v5001_v18, %v4997_v9 }
0x1d62   :  { %v4966_v44 = vmul.f32 %v4965_v56, %v4957_v17  ;;  %v5205_v17 = vld [vmem:[%s8422_s24 + $0x10] sm:$0xff] }
0x1d63   :  { %v4978_v48 = vadd.f32 1.0, %v4977_v37  ;;  %v5014_v3 = vadd.f32 0.112945676, %v5013_v27  ;;  %v5003_v32 = vadd.f32 0.05243302, %v5002_v24  ;;  %5226 = vmatpush.msra.mxu2 %v5205_v17 }
0x1d64   :  { %v4967_v45 = vadd.f32 1.1283791, %v4966_v44 }
0x1d65   :  { %6081 = vrcp.f32 %v4978_v48  ;;  %v5015_v4 = vmul.f32 %v5014_v3, %v4997_v9  ;;  %v5004_v21 = vmul.f32 %v5003_v32, %v4997_v9  ;;  %v4990_v1 = vand.u32 2147483648, %v4978_v48  ;;  %5227 = vmatpush.msra.mxu2 %v5204_v26 }
0x1d66   :  { %v4988_v13 = vand.u32 2147483647, %v4978_v48  ;;  %vm4984_vm8 = vweird.f32 %v4978_v48  ;;  %v4968_v34 = vmul.f32 %v4967_v45, %v4794_v33  ;;  %v5203_v33 = vld [vmem:[%s8422_s24] sm:$0xff] }
0x1d67   :  { %v5016_v14 = vadd.f32 0.4994258, %v5015_v4  ;;  %v5005_v39 = vadd.f32 0.18741608, %v5004_v21  ;;  %v4991_v36 = vor.u32 1.1754944e-38, %v4990_v1  ;;  %5228 = vmatpush.msra.mxu2 %v5203_v33 }
0x1d68   :  { %vm4989_vm10 = vcmp.eq.f32.partialorder %v4988_v13, 8.507059e+37 }
0x1d69   :  { %v5017_v6 = vmul.f32 %v5016_v14, %v4997_v9  ;;  %v5006_v15 = vmul.f32 %v5005_v39, %v4997_v9 }
0x1d6b   :  { %v6082_v22 = vpop.eup %6081  ;;  %v5018_v30 = vadd.f32 1.0, %v5017_v6  ;;  %v5007_v23 = vadd.f32 1.1283791, %v5006_v15 }
0x1d6c   :  { %v4980_v46 = vmul.f32 %v6082_v22, %v4978_v48  ;;  %vm4985_vm5 = vweird.f32 %v6082_v22 }
0x1d6d   :  { %6083 = vrcp.f32 %v5018_v30  ;;  %vm4986_vm9 = vmor %vm4984_vm8, %vm4985_vm5  ;;  %v5030_v12 = vand.u32 2147483648, %v5018_v30  ;;  %v5028_v55 = vand.u32 2147483647, %v5018_v30  ;;  %vm5024_vm12 = vweird.f32 %v5018_v30 }
0x1d6e   :  { %v4981_v42 = vsub.f32 1.0, %v4980_v46  ;;  %v5008_v61 = vmul.f32 %v5007_v23, %v8313_v49 }
0x1d6f   :  { %v5031_v43 = vor.u32 1.1754944e-38, %v5030_v12  ;;  %vm5029_vm14 = vcmp.eq.f32.partialorder %v5028_v55, 8.507059e+37 }
0x1d70   :  { %v4982_v38 = vmul.f32 %v6082_v22, %v4981_v42 }
0x1d72   :  { %v4983_v57 = vadd.f32 %v6082_v22, %v4982_v38 }
0x1d73   :  { %v6084_v25 = vpop.eup %6083 }
0x1d74   :  { %v4987_v59 = vsel %vm4986_vm9, %v6082_v22, %v4983_v57  ;;  %v5020_v19 = vmul.f32 %v6084_v25, %v5018_v30  ;;  %vm5025_vm11 = vweird.f32 %v6084_v25 }
0x1d75   :  { %v4992_v50 = vsel %vm4989_vm10, %v4991_v36, %v4987_v59  ;;  %vm5026_vm13 = vmor %vm5024_vm12, %vm5025_vm11 }
0x1d76   :  { %v4993_v11 = vmul.f32 %v4992_v50, %v4968_v34  ;;  %v5021_v8 = vsub.f32 1.0, %v5020_v19 }
0x1d78   :  { %v5747_v41 = vclamps-f32 %v4993_v11, 1.0  ;;  %v5022_v10 = vmul.f32 %v6084_v25, %v5021_v8 }
0x1d7a   :  { %v5040_v40 = vadd.f32 1.0, %v5747_v41  ;;  %v5023_v53 = vadd.f32 %v6084_v25, %v5022_v10 }
0x1d7c   :  { %v5046_v9 = vmul.f32 %v5040_v40, %v4788_v52  ;;  %v5027_v60 = vsel %vm5026_vm13, %v6084_v25, %v5023_v53 }
0x1d7d   :  { %v5032_v16 = vsel %vm5029_vm14, %v5031_v43, %v5027_v60 }
0x1d7e   :  { %5761 = vmatmul.msk.f32.gmra.mxu0 %vm2572_vm4, %v5046_v9  ;;  %v5033_v63 = vmul.f32 %v5032_v16, %v5008_v61 }
0x1d80   :  { %v5748_v5 = vclamps-f32 %v5033_v63, 1.0 }
0x1d82   :  { %v5041_v51 = vadd.f32 1.0, %v5748_v5 }
0x1d84   :  { %v5047_v20 = vmul.f32 %v5041_v51, %v4789_v28 }
0x1d86   :  { %5762 = vmatmul.msk.f32.gmra.mxu0 %vm2572_vm4, %v5047_v20 }
0x1d8f   :  { %v5199_v58 = vpop.f32.mrf.mxu1 }
0x1d90   :  { %v5200_v2 = vadd.f32 %v5815_v31, %v5199_v58 }
0x1d92   :  { %6085 = vtanh.f32 %v5200_v2 }
0x1d98   :  { %v6086_v49 = vpop.eup %6085 }
0x1d99   :  { %5765 = vmatmul.msk.f32.vlgmr.msra.gmra.mxu2 %vm514_vm7, %v6086_v49  ;;  %vm5233_vm7 = vcmask 74752  }
0x1dfb   :  { %v5104_v35 = vpop.f32.mrf.mxu0 }
0x1dfc   :  { %v5114_v47 = vadd.f32 %v5104_v35, %v8223_v0  ;;  %v5816_v0 = vld [vmem:[%s8424_s27] ss:$0 sm:$0xff] }
0x1dfe   :  { %v5125_v37 = vadd.f32 %v8237_v29, %v5114_v47 }
0x1e00   :  { %5131 = vst.msk [vmem:[%s8379_s26 + $0x20] sm:$0xff] %vm161_vm1, %v5125_v37 }
0x1e03   :  { %v5107_v7 = vpop.f32.mrf.mxu0 }
0x1e04   :  { %v5115_v18 = vadd.f32 %v5107_v7, %v8230_v62 }
0x1e06   :  { %v5126_v27 = vadd.f32 %v8237_v29, %v5115_v18 }
0x1e08   :  { %5132 = vst.msk [vmem:[%s8379_s26 + $0x28] sm:$0xff] %vm161_vm1, %v5126_v27 }
0x1e1c   :  { %v5230_v48 = vpop.f32.mrf.mxu2 }
0x1e1d   :  { %v5231_v62 = vadd.f32 %v5816_v0, %v5230_v48 }
0x1e1f   :  { %5234 = vst.msk [vmem:[#allocation2] sm:$0x3] %vm5233_vm7, %v5231_v62 }
0x1e20   :  { %5247 = dma.vmem_to_hbm [thread:$0]  %s5243_s15, 32, %s5245_s11, [#allocation3]  }
0x1e21   :  { %6114 = dma.done.wait [#allocation3], 32  }
0x1e22   :  { %6115 = vsyncadd [#allocation3], 4294967264 }
0x1e23   :  { %5254 = vsyncpa [#allocation3], 1 }

</bundles_post_ra>
